<compile_context>
chip_gen: v6e
topology: v6e:2x2x1
jax: 0.10.0
libtpu: 0.0.40
codegen_flags: <defaults>
</compile_context>

<pallas_src>
import functools
import math

import jax
import jax.numpy as jnp
import numpy as np
from jax.experimental import pallas as pl
from jax.experimental.pallas import tpu as pltpu


def _round_up(n, m):
    return ((n + m - 1) // m) * m


def _tpu_vmem_and_kind():
    """Best-effort (vmem_capacity_bytes, device_kind) query with safe fallbacks."""
    vmem = 64 << 20
    kind = ""
    try:
        vmem = int(getattr(pltpu.get_tpu_info(), "vmem_capacity_bytes", vmem))
    except Exception:
        pass
    try:
        kind = jax.devices()[0].device_kind.lower()
    except Exception:
        pass
    return vmem, kind


# ----------------------------------------------------------------------------
# In-kernel helper: one bi-LSTM layer, fwd/bwd chains interleaved
# ----------------------------------------------------------------------------
def _bilstm_layer(gi_ref, w_hh_f, w_hh_b, T, Bt, H, out_f, out_b):
    """Run the forward and backward LSTM chains of one layer, interleaved.

    gi_ref: (T*Bt, 8H) f32 VMEM ref holding x @ W_ih + (b_ih + b_hh),
            time-major rows; columns 0:4H are fwd gates, 4H:8H are bwd gates.
    w_hh_*: (H, 4H) bf16 recurrent weights (values, loaded once).
    Writes bf16 h_t into out_f[t] / out_b[t] (separate refs per direction so
    the two independent chains carry no false dependence and can overlap).
    Gate order i, f, g, o (PyTorch); c and gate math stay f32.
    """

    def step(g, h, c, w_hh):
        g = g + jnp.dot(h, w_hh, preferred_element_type=jnp.float32)
        i = jax.nn.sigmoid(g[:, 0 * H:1 * H])
        f = jax.nn.sigmoid(g[:, 1 * H:2 * H])
        z = jnp.tanh(g[:, 2 * H:3 * H])
        o = jax.nn.sigmoid(g[:, 3 * H:4 * H])
        c = f * c + i * z
        h = (o * jnp.tanh(c)).astype(jnp.bfloat16)
        return h, c

    hf = jnp.zeros((Bt, H), jnp.bfloat16)
    cf = jnp.zeros((Bt, H), jnp.float32)
    hb = jnp.zeros((Bt, H), jnp.bfloat16)
    cb = jnp.zeros((Bt, H), jnp.float32)
    for t in range(T):                       # T is small & static -> unrolled
        tb = T - 1 - t
        hf, cf = step(gi_ref[t * Bt:(t + 1) * Bt, 0:4 * H], hf, cf, w_hh_f)
        hb, cb = step(gi_ref[tb * Bt:(tb + 1) * Bt, 4 * H:8 * H], hb, cb, w_hh_b)
        out_f[t] = hf
        out_b[tb] = hb


# ----------------------------------------------------------------------------
# Pallas kernel: 2-layer bi-LSTM + max over time + Linear (one batch tile)
# ----------------------------------------------------------------------------
def spatial_rnn_kernel(x_ref,
                       w_ih0, b0, w_hh0f, w_hh0b,
                       w_ih1a, w_ih1b, b1, w_hh1f, w_hh1b,
                       w_fca, w_fcb, b_fc,
                       out_ref,
                       gi_buf, l0f, l0b, l1f, l1b):
    T, Bt, Fp = x_ref.shape
    H = w_hh0f.shape[0]

    # (T, Bt, Fp) -> (T*Bt, Fp), time-major rows (leading-dim merge, no relayout)
    x = x_ref[...].reshape(T * Bt, Fp)                        # bf16

    # ---- layer 0: hoisted input projection (both directions + bias fused),
    #      staged into the reused gi scratch ----
    gi_buf[...] = jnp.dot(x, w_ih0[...],
                          preferred_element_type=jnp.float32) + b0[...]
    _bilstm_layer(gi_buf, w_hh0f[...], w_hh0b[...], T, Bt, H, l0f, l0b)

    # ---- layer 1: input is [l0f, l0b] (2H); split weights avoid a lane concat ----
    l0f_v = l0f[...].reshape(T * Bt, H)
    l0b_v = l0b[...].reshape(T * Bt, H)
    gi_buf[...] = (jnp.dot(l0f_v, w_ih1a[...], preferred_element_type=jnp.float32)
                   + jnp.dot(l0b_v, w_ih1b[...], preferred_element_type=jnp.float32)
                   + b1[...])
    _bilstm_layer(gi_buf, w_hh1f[...], w_hh1b[...], T, Bt, H, l1f, l1b)

    # ---- max over time (torch.max(x, dim=1).values), dropout=identity, fc ----
    mf = jnp.max(l1f[...], axis=0)                            # (Bt, H) bf16, exact
    mb = jnp.max(l1b[...], axis=0)
    y = (jnp.dot(mf, w_fca[...], preferred_element_type=jnp.float32)
         + jnp.dot(mb, w_fcb[...], preferred_element_type=jnp.float32)
         + b_fc[...])
    out_ref[...] = y.astype(out_ref.dtype)


# ----------------------------------------------------------------------------
# Parameter construction (PyTorch-shaped init, then packed for the kernel)
# ----------------------------------------------------------------------------
def init_params(key, input_size, hidden_size, num_classes):
    """PyTorch-style uniform init, PyTorch shapes: w_ih (4H,F), w_hh (4H,H)."""
    H = hidden_size
    stdv = 1.0 / math.sqrt(H)

    layers = []
    in_sizes = [input_size, input_size, 2 * H, 2 * H]   # l0 fwd, l0 bwd, l1 fwd, l1 bwd
    for f_in in in_sizes:
        key, k1, k2, k3, k4 = jax.random.split(key, 5)
        w_ih = jax.random.uniform(k1, (4 * H, f_in), jnp.float32, -stdv, stdv)
        w_hh = jax.random.uniform(k2, (4 * H, H), jnp.float32, -stdv, stdv)
        b_ih = jax.random.uniform(k3, (4 * H,), jnp.float32, -stdv, stdv)
        b_hh = jax.random.uniform(k4, (4 * H,), jnp.float32, -stdv, stdv)
        layers.append((w_ih, w_hh, b_ih + b_hh))

    key, k1, k2 = jax.random.split(key, 3)
    fc_stdv = 1.0 / math.sqrt(2 * H)
    w_fc = jax.random.uniform(k1, (num_classes, 2 * H), jnp.float32, -fc_stdv, fc_stdv)
    b_fc = jax.random.uniform(k2, (num_classes,), jnp.float32, -fc_stdv, fc_stdv)
    return layers, (w_fc, b_fc)


def pack_params(layers, fc, *, f_pad, c_pad, weight_dtype=jnp.bfloat16):
    """Transpose for right-multiplication, fuse directions, pad, cast bf16.

    Layer-1 input weights and the fc weights are split per l0/l1 direction so
    the kernel never needs a lane-axis concat.
    """
    (w_ih0f, w_hh0f, b0f), (w_ih0b, w_hh0b, b0b), \
        (w_ih1f, w_hh1f, b1f), (w_ih1b, w_hh1b, b1b) = layers
    w_fc, b_fc = fc
    H = w_hh0f.shape[1]
    C = w_fc.shape[0]
    F = w_ih0f.shape[1]
    assert H % 128 == 0, "hidden_size must be a multiple of 128 (lane alignment)"
    assert f_pad >= F and f_pad % 128 == 0 and c_pad >= C and c_pad % 128 == 0

    # layer 0: (F, 8H), zero-pad F -> f_pad
    w_ih0 = jnp.concatenate([w_ih0f.T, w_ih0b.T], axis=1)
    w_ih0 = jnp.pad(w_ih0, ((0, f_pad - F), (0, 0))).astype(weight_dtype)

    # layer 1: (2H, 8H); rows 0:H are fed by l0-forward h, rows H:2H by l0-backward h
    w_ih1 = jnp.concatenate([w_ih1f.T, w_ih1b.T], axis=1)

    w_fc_t = jnp.pad(w_fc.T, ((0, 0), (0, c_pad - C)))        # (2H, c_pad)

    return dict(
        w_ih0=w_ih0,
        b0=jnp.concatenate([b0f, b0b]).reshape(1, 8 * H),
        w_hh0f=w_hh0f.T.astype(weight_dtype),
        w_hh0b=w_hh0b.T.astype(weight_dtype),
        w_ih1a=w_ih1[:H].astype(weight_dtype),
        w_ih1b=w_ih1[H:].astype(weight_dtype),
        b1=jnp.concatenate([b1f, b1b]).reshape(1, 8 * H),
        w_hh1f=w_hh1f.T.astype(weight_dtype),
        w_hh1b=w_hh1b.T.astype(weight_dtype),
        w_fca=w_fc_t[:H].astype(weight_dtype),
        w_fcb=w_fc_t[H:].astype(weight_dtype),
        b_fc=jnp.pad(b_fc, (0, c_pad - C)).reshape(1, c_pad),
    )


# ----------------------------------------------------------------------------
# Wrapper: data_reshape + batch tiling + pallas_call
# ----------------------------------------------------------------------------
@functools.partial(jax.jit, static_argnames=("window_size", "num_classes",
                                             "seq_type"))
def spatial_rnn_forward(x, params, *, window_size=25, num_classes=60,
                        seq_type="traversal"):
    assert seq_type in ("chain", "traversal")
    assert 100 % window_size == 0
    B = x.shape[0]
    T = 100 // window_size
    F = window_size * 3
    H = params["w_hh0f"].shape[0]
    Fp = params["w_ih0"].shape[0]
    Cp = params["w_fca"].shape[1]

    # data_reshape: (B, 3, 100) -> (B, T, window_size*3), bf16 (matmul operand dtype)
    # TODO(synk): windowing order is assumed; 'chain' == 'traversal' here.
    xr = jnp.transpose(x, (0, 2, 1)).reshape(B, T, F).astype(jnp.bfloat16)

    # --------------------------- generation-aware tiling ---------------------
    vmem_cap, kind = _tpu_vmem_and_kind()
    if vmem_cap <= (80 << 20) and B >= 64:
        B_tile = 64                       # v7x-class: 64 MiB VMEM, 2 TCs -> >=2 blocks
    elif B >= 256 and "v6" in kind:
        B_tile = 256                      # match v6e's 2x256x256 MXU
    elif B >= 128:
        B_tile = 128                      # v5e-class 4x128x128 MXU (and default)
    else:
        B_tile = _round_up(max(B, 16), 16)   # bf16 packs 16 rows per vreg
    B_pad = _round_up(B, B_tile)

    # Pad batch / features, then go time-major so per-timestep rows are
    # contiguous sublane slices.
    xr = jnp.pad(xr, ((0, B_pad - B), (0, 0), (0, Fp - F)))
    xr = jnp.transpose(xr, (1, 0, 2))                         # (T, B_pad, Fp) bf16

    weight_names = ["w_ih0", "b0", "w_hh0f", "w_hh0b",
                    "w_ih1a", "w_ih1b", "b1", "w_hh1f", "w_hh1b",
                    "w_fca", "w_fcb", "b_fc"]
    weight_args = [params[k] for k in weight_names]

    in_specs = [pl.BlockSpec((T, B_tile, Fp), lambda b: (0, b, 0))]
    in_specs += [pl.BlockSpec(memory_space=pltpu.MemorySpace.VMEM)
                 for _ in weight_args]

    # VMEM budget from the real footprint: weights + pipelined i/o blocks +
    # scratch (gi f32, 4 bf16 staging buffers) + the transient gi value, with
    # headroom; floor 32 MiB, cap 3/4 of physical VMEM (generation-aware).
    wbytes = sum(int(np.prod(w.shape)) * w.dtype.itemsize for w in weight_args)
    io_bytes = 2 * (T * B_tile * Fp * 2 + B_tile * Cp * 4)
    scratch_bytes = T * B_tile * 8 * H * 4 + 4 * T * B_tile * H * 2
    temp_bytes = T * B_tile * 8 * H * 4
    vmem_limit = int(min(max(wbytes + io_bytes + scratch_bytes + temp_bytes
                             + (8 << 20), 32 << 20),
                         vmem_cap * 3 // 4))

    n_blocks = B_pad // B_tile
    if vmem_cap <= (80 << 20) and n_blocks >= 2 and n_blocks % 2 == 0:
        dim_semantics = (pltpu.CORE_PARALLEL,)     # split batch blocks across 2 TCs
    else:
        dim_semantics = ("parallel",)

    out = pl.pallas_call(
        spatial_rnn_kernel,
        out_shape=jax.ShapeDtypeStruct((B_pad, Cp), jnp.float32),
        grid=(n_blocks,),
        in_specs=in_specs,
        out_specs=pl.BlockSpec((B_tile, Cp), lambda b: (b, 0)),
        scratch_shapes=[
            pltpu.VMEM((T * B_tile, 8 * H), jnp.float32),      # gi (reused l0/l1)
            pltpu.VMEM((T, B_tile, H), jnp.bfloat16),          # l0 fwd
            pltpu.VMEM((T, B_tile, H), jnp.bfloat16),          # l0 bwd
            pltpu.VMEM((T, B_tile, H), jnp.bfloat16),          # l1 fwd
            pltpu.VMEM((T, B_tile, H), jnp.bfloat16),          # l1 bwd
        ],
        compiler_params=pltpu.CompilerParams(
            dimension_semantics=dim_semantics,
            vmem_limit_bytes=vmem_limit),
    )(xr, *weight_args)

    return out[:B, :num_classes]


# ----------------------------------------------------------------------------
if __name__ == "__main__":
    # Small shapes consistent with the module: window_size=25 -> T=4, F=75.
    # hidden_size=128 keeps the demo fast and lane-aligned (module default 512,
    # also a multiple of 128, works unchanged).
    B = 2
    window_size = 25
    num_classes = 60
    hidden_size = 128

    key = jax.random.PRNGKey(0)
    kx, kp = jax.random.split(key)
    x = jax.random.normal(kx, (B, 3, 100), dtype=jnp.float32)

    layers, fc = init_params(kp, input_size=window_size * 3,
                             hidden_size=hidden_size, num_classes=num_classes)
    params = pack_params(layers, fc,
                         f_pad=_round_up(window_size * 3, 128),
                         c_pad=_round_up(num_classes, 128))

    out = spatial_rnn_forward(x, params, window_size=window_size,
                              num_classes=num_classes, seq_type="traversal")
    jax.block_until_ready(out)
    assert out.shape == (B, num_classes), out.shape
    assert bool(jnp.all(jnp.isfinite(out)))
    print("KERNEL_OK")
</pallas_src>

<mosaic_0001>
module attributes {stable_mosaic.version = 11 : i64} {
  func.func @spatial_rnn_kernel(%arg0: i32, %arg1: memref<4x16x128xbf16, #tpu.memory_space<vmem>>, %arg2: memref<128x1024xbf16, #tpu.memory_space<vmem>>, %arg3: memref<1x1024xf32, #tpu.memory_space<vmem>>, %arg4: memref<128x512xbf16, #tpu.memory_space<vmem>>, %arg5: memref<128x512xbf16, #tpu.memory_space<vmem>>, %arg6: memref<128x1024xbf16, #tpu.memory_space<vmem>>, %arg7: memref<128x1024xbf16, #tpu.memory_space<vmem>>, %arg8: memref<1x1024xf32, #tpu.memory_space<vmem>>, %arg9: memref<128x512xbf16, #tpu.memory_space<vmem>>, %arg10: memref<128x512xbf16, #tpu.memory_space<vmem>>, %arg11: memref<128x128xbf16, #tpu.memory_space<vmem>>, %arg12: memref<128x128xbf16, #tpu.memory_space<vmem>>, %arg13: memref<1x128xf32, #tpu.memory_space<vmem>>, %arg14: memref<16x128xf32, #tpu.memory_space<vmem>>, %arg15: memref<64x1024xf32, #tpu.memory_space<vmem>>, %arg16: memref<4x16x128xbf16, #tpu.memory_space<vmem>>, %arg17: memref<4x16x128xbf16, #tpu.memory_space<vmem>>, %arg18: memref<4x16x128xbf16, #tpu.memory_space<vmem>>, %arg19: memref<4x16x128xbf16, #tpu.memory_space<vmem>>) attributes {dimension_semantics = [#tpu.dimension_semantics<parallel>], iteration_bounds = array<i64: 1>, scalar_prefetch = 0 : i64, scratch_operands = 5 : i64, tpu.core_type = #tpu.core_type<tc>, window_params = [{transform_indices = @transform_0, window_bounds = array<i64: 4, 16, 128>}, {pipeline_mode = #tpu.pipeline_mode<synchronous>, transform_indices = @transform_1, window_bounds = array<i64: 128, 1024>}, {pipeline_mode = #tpu.pipeline_mode<synchronous>, transform_indices = @transform_2, window_bounds = array<i64: 1, 1024>}, {pipeline_mode = #tpu.pipeline_mode<synchronous>, transform_indices = @transform_3, window_bounds = array<i64: 128, 512>}, {pipeline_mode = #tpu.pipeline_mode<synchronous>, transform_indices = @transform_4, window_bounds = array<i64: 128, 512>}, {pipeline_mode = #tpu.pipeline_mode<synchronous>, transform_indices = @transform_5, window_bounds = array<i64: 128, 1024>}, {pipeline_mode = #tpu.pipeline_mode<synchronous>, transform_indices = @transform_6, window_bounds = array<i64: 128, 1024>}, {pipeline_mode = #tpu.pipeline_mode<synchronous>, transform_indices = @transform_7, window_bounds = array<i64: 1, 1024>}, {pipeline_mode = #tpu.pipeline_mode<synchronous>, transform_indices = @transform_8, window_bounds = array<i64: 128, 512>}, {pipeline_mode = #tpu.pipeline_mode<synchronous>, transform_indices = @transform_9, window_bounds = array<i64: 128, 512>}, {pipeline_mode = #tpu.pipeline_mode<synchronous>, transform_indices = @transform_10, window_bounds = array<i64: 128, 128>}, {pipeline_mode = #tpu.pipeline_mode<synchronous>, transform_indices = @transform_11, window_bounds = array<i64: 128, 128>}, {pipeline_mode = #tpu.pipeline_mode<synchronous>, transform_indices = @transform_12, window_bounds = array<i64: 1, 128>}, {transform_indices = @transform_13, window_bounds = array<i64: 16, 128>}]} {
    %c0 = arith.constant 0 : index
    %c0_0 = arith.constant 0 : index
    %c0_1 = arith.constant 0 : index
    %0 = vector.load %arg1[%c0, %c0_0, %c0_1] : memref<4x16x128xbf16, #tpu.memory_space<vmem>>, vector<4x16x128xbf16>
    %1 = vector.shape_cast %0 : vector<4x16x128xbf16> to vector<64x128xbf16>
    %c0_2 = arith.constant 0 : index
    %c0_3 = arith.constant 0 : index
    %2 = vector.load %arg2[%c0_2, %c0_3] : memref<128x1024xbf16, #tpu.memory_space<vmem>>, vector<128x1024xbf16>
    %cst = arith.constant dense<0.000000e+00> : vector<64x1024xf32>
    %3 = tpu.matmul %1, %2, %cst {dimension_numbers = #tpu.dot_dimension_numbers<[1], [0], [0], [1], [0, 0, 1, 1], [], []>} : vector<64x128xbf16>, vector<128x1024xbf16>, vector<64x1024xf32> -> vector<64x1024xf32>
    %c0_4 = arith.constant 0 : index
    %c0_5 = arith.constant 0 : index
    %4 = vector.load %arg3[%c0_4, %c0_5] : memref<1x1024xf32, #tpu.memory_space<vmem>>, vector<1x1024xf32>
    %5 = vector.broadcast %4 : vector<1x1024xf32> to vector<64x1024xf32>
    %6 = arith.addf %3, %5 : vector<64x1024xf32>
    %c0_6 = arith.constant 0 : index
    %c0_7 = arith.constant 0 : index
    %7 = vector.load %arg15[%c0_6, %c0_7] : memref<64x1024xf32, #tpu.memory_space<vmem>>, vector<64x1024xf32>
    tpu.vector_store %arg15[%c0_6, %c0_7], %6 {strides = array<i32>} : memref<64x1024xf32, #tpu.memory_space<vmem>>, vector<64x1024xf32>,
    %c0_8 = arith.constant 0 : index
    %c0_9 = arith.constant 0 : index
    %8 = vector.load %arg4[%c0_8, %c0_9] : memref<128x512xbf16, #tpu.memory_space<vmem>>, vector<128x512xbf16>
    %c0_10 = arith.constant 0 : index
    %c0_11 = arith.constant 0 : index
    %9 = vector.load %arg5[%c0_10, %c0_11] : memref<128x512xbf16, #tpu.memory_space<vmem>>, vector<128x512xbf16>
    %cst_12 = arith.constant 0.000000e+00 : bf16
    %10 = vector.broadcast %cst_12 : bf16 to vector<16x128xbf16>
    %cst_13 = arith.constant 0.000000e+00 : f32
    %11 = vector.broadcast %cst_13 : f32 to vector<16x128xf32>
    %cst_14 = arith.constant 0.000000e+00 : bf16
    %12 = vector.broadcast %cst_14 : bf16 to vector<16x128xbf16>
    %cst_15 = arith.constant 0.000000e+00 : f32
    %13 = vector.broadcast %cst_15 : f32 to vector<16x128xf32>
    %c0_16 = arith.constant 0 : index
    %c0_17 = arith.constant 0 : index
    %14 = vector.load %arg15[%c0_16, %c0_17] : memref<64x1024xf32, #tpu.memory_space<vmem>>, vector<16x512xf32>
    %cst_18 = arith.constant dense<0.000000e+00> : vector<16x512xf32>
    %15 = tpu.matmul %10, %8, %cst_18 {dimension_numbers = #tpu.dot_dimension_numbers<[1], [0], [0], [1], [0, 0, 1, 1], [], []>} : vector<16x128xbf16>, vector<128x512xbf16>, vector<16x512xf32> -> vector<16x512xf32>
    %16 = arith.addf %14, %15 : vector<16x512xf32>
    %17 = vector.extract_strided_slice %16 {offsets = [0, 0], sizes = [16, 128], strides = [1, 1]} : vector<16x512xf32> to vector<16x128xf32>
    %18 = arith.negf %17 : vector<16x128xf32>
    %19 = math.exp %18 : vector<16x128xf32>
    %cst_19 = arith.constant 1.000000e+00 : f32
    %20 = vector.broadcast %cst_19 : f32 to vector<16x128xf32>
    %21 = arith.addf %20, %19 : vector<16x128xf32>
    %22 = arith.divf %20, %21 : vector<16x128xf32>
    %23 = vector.extract_strided_slice %16 {offsets = [0, 128], sizes = [16, 128], strides = [1, 1]} : vector<16x512xf32> to vector<16x128xf32>
    %24 = arith.negf %23 : vector<16x128xf32>
    %25 = math.exp %24 : vector<16x128xf32>
    %cst_20 = arith.constant 1.000000e+00 : f32
    %26 = vector.broadcast %cst_20 : f32 to vector<16x128xf32>
    %27 = arith.addf %26, %25 : vector<16x128xf32>
    %28 = arith.divf %26, %27 : vector<16x128xf32>
    %29 = vector.extract_strided_slice %16 {offsets = [0, 256], sizes = [16, 128], strides = [1, 1]} : vector<16x512xf32> to vector<16x128xf32>
    %30 = math.tanh %29 : vector<16x128xf32>
    %31 = vector.extract_strided_slice %16 {offsets = [0, 384], sizes = [16, 128], strides = [1, 1]} : vector<16x512xf32> to vector<16x128xf32>
    %32 = arith.negf %31 : vector<16x128xf32>
    %33 = math.exp %32 : vector<16x128xf32>
    %cst_21 = arith.constant 1.000000e+00 : f32
    %34 = vector.broadcast %cst_21 : f32 to vector<16x128xf32>
    %35 = arith.addf %34, %33 : vector<16x128xf32>
    %36 = arith.divf %34, %35 : vector<16x128xf32>
    %37 = arith.mulf %28, %11 : vector<16x128xf32>
    %38 = arith.mulf %22, %30 : vector<16x128xf32>
    %39 = arith.addf %37, %38 : vector<16x128xf32>
    %40 = math.tanh %39 : vector<16x128xf32>
    %41 = arith.mulf %36, %40 : vector<16x128xf32>
    %42 = arith.truncf %41 : vector<16x128xf32> to vector<16x128xbf16>
    %c48 = arith.constant 48 : index
    %c512 = arith.constant 512 : index
    %43 = vector.load %arg15[%c48, %c512] : memref<64x1024xf32, #tpu.memory_space<vmem>>, vector<16x512xf32>
    %cst_22 = arith.constant dense<0.000000e+00> : vector<16x512xf32>
    %44 = tpu.matmul %12, %9, %cst_22 {dimension_numbers = #tpu.dot_dimension_numbers<[1], [0], [0], [1], [0, 0, 1, 1], [], []>} : vector<16x128xbf16>, vector<128x512xbf16>, vector<16x512xf32> -> vector<16x512xf32>
    %45 = arith.addf %43, %44 : vector<16x512xf32>
    %46 = vector.extract_strided_slice %45 {offsets = [0, 0], sizes = [16, 128], strides = [1, 1]} : vector<16x512xf32> to vector<16x128xf32>
    %47 = arith.negf %46 : vector<16x128xf32>
    %48 = math.exp %47 : vector<16x128xf32>
    %cst_23 = arith.constant 1.000000e+00 : f32
    %49 = vector.broadcast %cst_23 : f32 to vector<16x128xf32>
    %50 = arith.addf %49, %48 : vector<16x128xf32>
    %51 = arith.divf %49, %50 : vector<16x128xf32>
    %52 = vector.extract_strided_slice %45 {offsets = [0, 128], sizes = [16, 128], strides = [1, 1]} : vector<16x512xf32> to vector<16x128xf32>
    %53 = arith.negf %52 : vector<16x128xf32>
    %54 = math.exp %53 : vector<16x128xf32>
    %cst_24 = arith.constant 1.000000e+00 : f32
    %55 = vector.broadcast %cst_24 : f32 to vector<16x128xf32>
    %56 = arith.addf %55, %54 : vector<16x128xf32>
    %57 = arith.divf %55, %56 : vector<16x128xf32>
    %58 = vector.extract_strided_slice %45 {offsets = [0, 256], sizes = [16, 128], strides = [1, 1]} : vector<16x512xf32> to vector<16x128xf32>
    %59 = math.tanh %58 : vector<16x128xf32>
    %60 = vector.extract_strided_slice %45 {offsets = [0, 384], sizes = [16, 128], strides = [1, 1]} : vector<16x512xf32> to vector<16x128xf32>
    %61 = arith.negf %60 : vector<16x128xf32>
    %62 = math.exp %61 : vector<16x128xf32>
    %cst_25 = arith.constant 1.000000e+00 : f32
    %63 = vector.broadcast %cst_25 : f32 to vector<16x128xf32>
    %64 = arith.addf %63, %62 : vector<16x128xf32>
    %65 = arith.divf %63, %64 : vector<16x128xf32>
    %66 = arith.mulf %57, %13 : vector<16x128xf32>
    %67 = arith.mulf %51, %59 : vector<16x128xf32>
    %68 = arith.addf %66, %67 : vector<16x128xf32>
    %69 = math.tanh %68 : vector<16x128xf32>
    %70 = arith.mulf %65, %69 : vector<16x128xf32>
    %71 = arith.truncf %70 : vector<16x128xf32> to vector<16x128xbf16>
    %c0_26 = arith.constant 0 : index
    %c0_27 = arith.constant 0 : index
    %c0_28 = arith.constant 0 : index
    %72 = vector.load %arg16[%c0_26, %c0_27, %c0_28] : memref<4x16x128xbf16, #tpu.memory_space<vmem>>, vector<1x16x128xbf16>
    %73 = vector.shape_cast %72 : vector<1x16x128xbf16> to vector<16x128xbf16>
    %74 = vector.shape_cast %42 : vector<16x128xbf16> to vector<1x16x128xbf16>
    tpu.vector_store %arg16[%c0_26, %c0_27, %c0_28], %74 {strides = array<i32>} : memref<4x16x128xbf16, #tpu.memory_space<vmem>>, vector<1x16x128xbf16>,
    %c3 = arith.constant 3 : index
    %c0_29 = arith.constant 0 : index
    %c0_30 = arith.constant 0 : index
    %75 = vector.load %arg17[%c3, %c0_29, %c0_30] : memref<4x16x128xbf16, #tpu.memory_space<vmem>>, vector<1x16x128xbf16>
    %76 = vector.shape_cast %75 : vector<1x16x128xbf16> to vector<16x128xbf16>
    %77 = vector.shape_cast %71 : vector<16x128xbf16> to vector<1x16x128xbf16>
    tpu.vector_store %arg17[%c3, %c0_29, %c0_30], %77 {strides = array<i32>} : memref<4x16x128xbf16, #tpu.memory_space<vmem>>, vector<1x16x128xbf16>,
    %c16 = arith.constant 16 : index
    %c0_31 = arith.constant 0 : index
    %78 = vector.load %arg15[%c16, %c0_31] : memref<64x1024xf32, #tpu.memory_space<vmem>>, vector<16x512xf32>
    %cst_32 = arith.constant dense<0.000000e+00> : vector<16x512xf32>
    %79 = tpu.matmul %42, %8, %cst_32 {dimension_numbers = #tpu.dot_dimension_numbers<[1], [0], [0], [1], [0, 0, 1, 1], [], []>} : vector<16x128xbf16>, vector<128x512xbf16>, vector<16x512xf32> -> vector<16x512xf32>
    %80 = arith.addf %78, %79 : vector<16x512xf32>
    %81 = vector.extract_strided_slice %80 {offsets = [0, 0], sizes = [16, 128], strides = [1, 1]} : vector<16x512xf32> to vector<16x128xf32>
    %82 = arith.negf %81 : vector<16x128xf32>
    %83 = math.exp %82 : vector<16x128xf32>
    %cst_33 = arith.constant 1.000000e+00 : f32
    %84 = vector.broadcast %cst_33 : f32 to vector<16x128xf32>
    %85 = arith.addf %84, %83 : vector<16x128xf32>
    %86 = arith.divf %84, %85 : vector<16x128xf32>
    %87 = vector.extract_strided_slice %80 {offsets = [0, 128], sizes = [16, 128], strides = [1, 1]} : vector<16x512xf32> to vector<16x128xf32>
    %88 = arith.negf %87 : vector<16x128xf32>
    %89 = math.exp %88 : vector<16x128xf32>
    %cst_34 = arith.constant 1.000000e+00 : f32
    %90 = vector.broadcast %cst_34 : f32 to vector<16x128xf32>
    %91 = arith.addf %90, %89 : vector<16x128xf32>
    %92 = arith.divf %90, %91 : vector<16x128xf32>
    %93 = vector.extract_strided_slice %80 {offsets = [0, 256], sizes = [16, 128], strides = [1, 1]} : vector<16x512xf32> to vector<16x128xf32>
    %94 = math.tanh %93 : vector<16x128xf32>
    %95 = vector.extract_strided_slice %80 {offsets = [0, 384], sizes = [16, 128], strides = [1, 1]} : vector<16x512xf32> to vector<16x128xf32>
    %96 = arith.negf %95 : vector<16x128xf32>
    %97 = math.exp %96 : vector<16x128xf32>
    %cst_35 = arith.constant 1.000000e+00 : f32
    %98 = vector.broadcast %cst_35 : f32 to vector<16x128xf32>
    %99 = arith.addf %98, %97 : vector<16x128xf32>
    %100 = arith.divf %98, %99 : vector<16x128xf32>
    %101 = arith.mulf %92, %39 : vector<16x128xf32>
    %102 = arith.mulf %86, %94 : vector<16x128xf32>
    %103 = arith.addf %101, %102 : vector<16x128xf32>
    %104 = math.tanh %103 : vector<16x128xf32>
    %105 = arith.mulf %100, %104 : vector<16x128xf32>
    %106 = arith.truncf %105 : vector<16x128xf32> to vector<16x128xbf16>
    %c32 = arith.constant 32 : index
    %c512_36 = arith.constant 512 : index
    %107 = vector.load %arg15[%c32, %c512_36] : memref<64x1024xf32, #tpu.memory_space<vmem>>, vector<16x512xf32>
    %cst_37 = arith.constant dense<0.000000e+00> : vector<16x512xf32>
    %108 = tpu.matmul %71, %9, %cst_37 {dimension_numbers = #tpu.dot_dimension_numbers<[1], [0], [0], [1], [0, 0, 1, 1], [], []>} : vector<16x128xbf16>, vector<128x512xbf16>, vector<16x512xf32> -> vector<16x512xf32>
    %109 = arith.addf %107, %108 : vector<16x512xf32>
    %110 = vector.extract_strided_slice %109 {offsets = [0, 0], sizes = [16, 128], strides = [1, 1]} : vector<16x512xf32> to vector<16x128xf32>
    %111 = arith.negf %110 : vector<16x128xf32>
    %112 = math.exp %111 : vector<16x128xf32>
    %cst_38 = arith.constant 1.000000e+00 : f32
    %113 = vector.broadcast %cst_38 : f32 to vector<16x128xf32>
    %114 = arith.addf %113, %112 : vector<16x128xf32>
    %115 = arith.divf %113, %114 : vector<16x128xf32>
    %116 = vector.extract_strided_slice %109 {offsets = [0, 128], sizes = [16, 128], strides = [1, 1]} : vector<16x512xf32> to vector<16x128xf32>
    %117 = arith.negf %116 : vector<16x128xf32>
    %118 = math.exp %117 : vector<16x128xf32>
    %cst_39 = arith.constant 1.000000e+00 : f32
    %119 = vector.broadcast %cst_39 : f32 to vector<16x128xf32>
    %120 = arith.addf %119, %118 : vector<16x128xf32>
    %121 = arith.divf %119, %120 : vector<16x128xf32>
    %122 = vector.extract_strided_slice %109 {offsets = [0, 256], sizes = [16, 128], strides = [1, 1]} : vector<16x512xf32> to vector<16x128xf32>
    %123 = math.tanh %122 : vector<16x128xf32>
    %124 = vector.extract_strided_slice %109 {offsets = [0, 384], sizes = [16, 128], strides = [1, 1]} : vector<16x512xf32> to vector<16x128xf32>
    %125 = arith.negf %124 : vector<16x128xf32>
    %126 = math.exp %125 : vector<16x128xf32>
    %cst_40 = arith.constant 1.000000e+00 : f32
    %127 = vector.broadcast %cst_40 : f32 to vector<16x128xf32>
    %128 = arith.addf %127, %126 : vector<16x128xf32>
    %129 = arith.divf %127, %128 : vector<16x128xf32>
    %130 = arith.mulf %121, %68 : vector<16x128xf32>
    %131 = arith.mulf %115, %123 : vector<16x128xf32>
    %132 = arith.addf %130, %131 : vector<16x128xf32>
    %133 = math.tanh %132 : vector<16x128xf32>
    %134 = arith.mulf %129, %133 : vector<16x128xf32>
    %135 = arith.truncf %134 : vector<16x128xf32> to vector<16x128xbf16>
    %c1 = arith.constant 1 : index
    %c0_41 = arith.constant 0 : index
    %c0_42 = arith.constant 0 : index
    %136 = vector.load %arg16[%c1, %c0_41, %c0_42] : memref<4x16x128xbf16, #tpu.memory_space<vmem>>, vector<1x16x128xbf16>
    %137 = vector.shape_cast %136 : vector<1x16x128xbf16> to vector<16x128xbf16>
    %138 = vector.shape_cast %106 : vector<16x128xbf16> to vector<1x16x128xbf16>
    tpu.vector_store %arg16[%c1, %c0_41, %c0_42], %138 {strides = array<i32>} : memref<4x16x128xbf16, #tpu.memory_space<vmem>>, vector<1x16x128xbf16>,
    %c2 = arith.constant 2 : index
    %c0_43 = arith.constant 0 : index
    %c0_44 = arith.constant 0 : index
    %139 = vector.load %arg17[%c2, %c0_43, %c0_44] : memref<4x16x128xbf16, #tpu.memory_space<vmem>>, vector<1x16x128xbf16>
    %140 = vector.shape_cast %139 : vector<1x16x128xbf16> to vector<16x128xbf16>
    %141 = vector.shape_cast %135 : vector<16x128xbf16> to vector<1x16x128xbf16>
    tpu.vector_store %arg17[%c2, %c0_43, %c0_44], %141 {strides = array<i32>} : memref<4x16x128xbf16, #tpu.memory_space<vmem>>, vector<1x16x128xbf16>,
    %c32_45 = arith.constant 32 : index
    %c0_46 = arith.constant 0 : index
    %142 = vector.load %arg15[%c32_45, %c0_46] : memref<64x1024xf32, #tpu.memory_space<vmem>>, vector<16x512xf32>
    %cst_47 = arith.constant dense<0.000000e+00> : vector<16x512xf32>
    %143 = tpu.matmul %106, %8, %cst_47 {dimension_numbers = #tpu.dot_dimension_numbers<[1], [0], [0], [1], [0, 0, 1, 1], [], []>} : vector<16x128xbf16>, vector<128x512xbf16>, vector<16x512xf32> -> vector<16x512xf32>
    %144 = arith.addf %142, %143 : vector<16x512xf32>
    %145 = vector.extract_strided_slice %144 {offsets = [0, 0], sizes = [16, 128], strides = [1, 1]} : vector<16x512xf32> to vector<16x128xf32>
    %146 = arith.negf %145 : vector<16x128xf32>
    %147 = math.exp %146 : vector<16x128xf32>
    %cst_48 = arith.constant 1.000000e+00 : f32
    %148 = vector.broadcast %cst_48 : f32 to vector<16x128xf32>
    %149 = arith.addf %148, %147 : vector<16x128xf32>
    %150 = arith.divf %148, %149 : vector<16x128xf32>
    %151 = vector.extract_strided_slice %144 {offsets = [0, 128], sizes = [16, 128], strides = [1, 1]} : vector<16x512xf32> to vector<16x128xf32>
    %152 = arith.negf %151 : vector<16x128xf32>
    %153 = math.exp %152 : vector<16x128xf32>
    %cst_49 = arith.constant 1.000000e+00 : f32
    %154 = vector.broadcast %cst_49 : f32 to vector<16x128xf32>
    %155 = arith.addf %154, %153 : vector<16x128xf32>
    %156 = arith.divf %154, %155 : vector<16x128xf32>
    %157 = vector.extract_strided_slice %144 {offsets = [0, 256], sizes = [16, 128], strides = [1, 1]} : vector<16x512xf32> to vector<16x128xf32>
    %158 = math.tanh %157 : vector<16x128xf32>
    %159 = vector.extract_strided_slice %144 {offsets = [0, 384], sizes = [16, 128], strides = [1, 1]} : vector<16x512xf32> to vector<16x128xf32>
    %160 = arith.negf %159 : vector<16x128xf32>
    %161 = math.exp %160 : vector<16x128xf32>
    %cst_50 = arith.constant 1.000000e+00 : f32
    %162 = vector.broadcast %cst_50 : f32 to vector<16x128xf32>
    %163 = arith.addf %162, %161 : vector<16x128xf32>
    %164 = arith.divf %162, %163 : vector<16x128xf32>
    %165 = arith.mulf %156, %103 : vector<16x128xf32>
    %166 = arith.mulf %150, %158 : vector<16x128xf32>
    %167 = arith.addf %165, %166 : vector<16x128xf32>
    %168 = math.tanh %167 : vector<16x128xf32>
    %169 = arith.mulf %164, %168 : vector<16x128xf32>
    %170 = arith.truncf %169 : vector<16x128xf32> to vector<16x128xbf16>
    %c16_51 = arith.constant 16 : index
    %c512_52 = arith.constant 512 : index
    %171 = vector.load %arg15[%c16_51, %c512_52] : memref<64x1024xf32, #tpu.memory_space<vmem>>, vector<16x512xf32>
    %cst_53 = arith.constant dense<0.000000e+00> : vector<16x512xf32>
    %172 = tpu.matmul %135, %9, %cst_53 {dimension_numbers = #tpu.dot_dimension_numbers<[1], [0], [0], [1], [0, 0, 1, 1], [], []>} : vector<16x128xbf16>, vector<128x512xbf16>, vector<16x512xf32> -> vector<16x512xf32>
    %173 = arith.addf %171, %172 : vector<16x512xf32>
    %174 = vector.extract_strided_slice %173 {offsets = [0, 0], sizes = [16, 128], strides = [1, 1]} : vector<16x512xf32> to vector<16x128xf32>
    %175 = arith.negf %174 : vector<16x128xf32>
    %176 = math.exp %175 : vector<16x128xf32>
    %cst_54 = arith.constant 1.000000e+00 : f32
    %177 = vector.broadcast %cst_54 : f32 to vector<16x128xf32>
    %178 = arith.addf %177, %176 : vector<16x128xf32>
    %179 = arith.divf %177, %178 : vector<16x128xf32>
    %180 = vector.extract_strided_slice %173 {offsets = [0, 128], sizes = [16, 128], strides = [1, 1]} : vector<16x512xf32> to vector<16x128xf32>
    %181 = arith.negf %180 : vector<16x128xf32>
    %182 = math.exp %181 : vector<16x128xf32>
    %cst_55 = arith.constant 1.000000e+00 : f32
    %183 = vector.broadcast %cst_55 : f32 to vector<16x128xf32>
    %184 = arith.addf %183, %182 : vector<16x128xf32>
    %185 = arith.divf %183, %184 : vector<16x128xf32>
    %186 = vector.extract_strided_slice %173 {offsets = [0, 256], sizes = [16, 128], strides = [1, 1]} : vector<16x512xf32> to vector<16x128xf32>
    %187 = math.tanh %186 : vector<16x128xf32>
    %188 = vector.extract_strided_slice %173 {offsets = [0, 384], sizes = [16, 128], strides = [1, 1]} : vector<16x512xf32> to vector<16x128xf32>
    %189 = arith.negf %188 : vector<16x128xf32>
    %190 = math.exp %189 : vector<16x128xf32>
    %cst_56 = arith.constant 1.000000e+00 : f32
    %191 = vector.broadcast %cst_56 : f32 to vector<16x128xf32>
    %192 = arith.addf %191, %190 : vector<16x128xf32>
    %193 = arith.divf %191, %192 : vector<16x128xf32>
    %194 = arith.mulf %185, %132 : vector<16x128xf32>
    %195 = arith.mulf %179, %187 : vector<16x128xf32>
    %196 = arith.addf %194, %195 : vector<16x128xf32>
    %197 = math.tanh %196 : vector<16x128xf32>
    %198 = arith.mulf %193, %197 : vector<16x128xf32>
    %199 = arith.truncf %198 : vector<16x128xf32> to vector<16x128xbf16>
    %c2_57 = arith.constant 2 : index
    %c0_58 = arith.constant 0 : index
    %c0_59 = arith.constant 0 : index
    %200 = vector.load %arg16[%c2_57, %c0_58, %c0_59] : memref<4x16x128xbf16, #tpu.memory_space<vmem>>, vector<1x16x128xbf16>
    %201 = vector.shape_cast %200 : vector<1x16x128xbf16> to vector<16x128xbf16>
    %202 = vector.shape_cast %170 : vector<16x128xbf16> to vector<1x16x128xbf16>
    tpu.vector_store %arg16[%c2_57, %c0_58, %c0_59], %202 {strides = array<i32>} : memref<4x16x128xbf16, #tpu.memory_space<vmem>>, vector<1x16x128xbf16>,
    %c1_60 = arith.constant 1 : index
    %c0_61 = arith.constant 0 : index
    %c0_62 = arith.constant 0 : index
    %203 = vector.load %arg17[%c1_60, %c0_61, %c0_62] : memref<4x16x128xbf16, #tpu.memory_space<vmem>>, vector<1x16x128xbf16>
    %204 = vector.shape_cast %203 : vector<1x16x128xbf16> to vector<16x128xbf16>
    %205 = vector.shape_cast %199 : vector<16x128xbf16> to vector<1x16x128xbf16>
    tpu.vector_store %arg17[%c1_60, %c0_61, %c0_62], %205 {strides = array<i32>} : memref<4x16x128xbf16, #tpu.memory_space<vmem>>, vector<1x16x128xbf16>,
    %c48_63 = arith.constant 48 : index
    %c0_64 = arith.constant 0 : index
    %206 = vector.load %arg15[%c48_63, %c0_64] : memref<64x1024xf32, #tpu.memory_space<vmem>>, vector<16x512xf32>
    %cst_65 = arith.constant dense<0.000000e+00> : vector<16x512xf32>
    %207 = tpu.matmul %170, %8, %cst_65 {dimension_numbers = #tpu.dot_dimension_numbers<[1], [0], [0], [1], [0, 0, 1, 1], [], []>} : vector<16x128xbf16>, vector<128x512xbf16>, vector<16x512xf32> -> vector<16x512xf32>
    %208 = arith.addf %206, %207 : vector<16x512xf32>
    %209 = vector.extract_strided_slice %208 {offsets = [0, 0], sizes = [16, 128], strides = [1, 1]} : vector<16x512xf32> to vector<16x128xf32>
    %210 = arith.negf %209 : vector<16x128xf32>
    %211 = math.exp %210 : vector<16x128xf32>
    %cst_66 = arith.constant 1.000000e+00 : f32
    %212 = vector.broadcast %cst_66 : f32 to vector<16x128xf32>
    %213 = arith.addf %212, %211 : vector<16x128xf32>
    %214 = arith.divf %212, %213 : vector<16x128xf32>
    %215 = vector.extract_strided_slice %208 {offsets = [0, 128], sizes = [16, 128], strides = [1, 1]} : vector<16x512xf32> to vector<16x128xf32>
    %216 = arith.negf %215 : vector<16x128xf32>
    %217 = math.exp %216 : vector<16x128xf32>
    %cst_67 = arith.constant 1.000000e+00 : f32
    %218 = vector.broadcast %cst_67 : f32 to vector<16x128xf32>
    %219 = arith.addf %218, %217 : vector<16x128xf32>
    %220 = arith.divf %218, %219 : vector<16x128xf32>
    %221 = vector.extract_strided_slice %208 {offsets = [0, 256], sizes = [16, 128], strides = [1, 1]} : vector<16x512xf32> to vector<16x128xf32>
    %222 = math.tanh %221 : vector<16x128xf32>
    %223 = vector.extract_strided_slice %208 {offsets = [0, 384], sizes = [16, 128], strides = [1, 1]} : vector<16x512xf32> to vector<16x128xf32>
    %224 = arith.negf %223 : vector<16x128xf32>
    %225 = math.exp %224 : vector<16x128xf32>
    %cst_68 = arith.constant 1.000000e+00 : f32
    %226 = vector.broadcast %cst_68 : f32 to vector<16x128xf32>
    %227 = arith.addf %226, %225 : vector<16x128xf32>
    %228 = arith.divf %226, %227 : vector<16x128xf32>
    %229 = arith.mulf %220, %167 : vector<16x128xf32>
    %230 = arith.mulf %214, %222 : vector<16x128xf32>
    %231 = arith.addf %229, %230 : vector<16x128xf32>
    %232 = math.tanh %231 : vector<16x128xf32>
    %233 = arith.mulf %228, %232 : vector<16x128xf32>
    %234 = arith.truncf %233 : vector<16x128xf32> to vector<16x128xbf16>
    %c0_69 = arith.constant 0 : index
    %c512_70 = arith.constant 512 : index
    %235 = vector.load %arg15[%c0_69, %c512_70] : memref<64x1024xf32, #tpu.memory_space<vmem>>, vector<16x512xf32>
    %cst_71 = arith.constant dense<0.000000e+00> : vector<16x512xf32>
    %236 = tpu.matmul %199, %9, %cst_71 {dimension_numbers = #tpu.dot_dimension_numbers<[1], [0], [0], [1], [0, 0, 1, 1], [], []>} : vector<16x128xbf16>, vector<128x512xbf16>, vector<16x512xf32> -> vector<16x512xf32>
    %237 = arith.addf %235, %236 : vector<16x512xf32>
    %238 = vector.extract_strided_slice %237 {offsets = [0, 0], sizes = [16, 128], strides = [1, 1]} : vector<16x512xf32> to vector<16x128xf32>
    %239 = arith.negf %238 : vector<16x128xf32>
    %240 = math.exp %239 : vector<16x128xf32>
    %cst_72 = arith.constant 1.000000e+00 : f32
    %241 = vector.broadcast %cst_72 : f32 to vector<16x128xf32>
    %242 = arith.addf %241, %240 : vector<16x128xf32>
    %243 = arith.divf %241, %242 : vector<16x128xf32>
    %244 = vector.extract_strided_slice %237 {offsets = [0, 128], sizes = [16, 128], strides = [1, 1]} : vector<16x512xf32> to vector<16x128xf32>
    %245 = arith.negf %244 : vector<16x128xf32>
    %246 = math.exp %245 : vector<16x128xf32>
    %cst_73 = arith.constant 1.000000e+00 : f32
    %247 = vector.broadcast %cst_73 : f32 to vector<16x128xf32>
    %248 = arith.addf %247, %246 : vector<16x128xf32>
    %249 = arith.divf %247, %248 : vector<16x128xf32>
    %250 = vector.extract_strided_slice %237 {offsets = [0, 256], sizes = [16, 128], strides = [1, 1]} : vector<16x512xf32> to vector<16x128xf32>
    %251 = math.tanh %250 : vector<16x128xf32>
    %252 = vector.extract_strided_slice %237 {offsets = [0, 384], sizes = [16, 128], strides = [1, 1]} : vector<16x512xf32> to vector<16x128xf32>
    %253 = arith.negf %252 : vector<16x128xf32>
    %254 = math.exp %253 : vector<16x128xf32>
    %cst_74 = arith.constant 1.000000e+00 : f32
    %255 = vector.broadcast %cst_74 : f32 to vector<16x128xf32>
    %256 = arith.addf %255, %254 : vector<16x128xf32>
    %257 = arith.divf %255, %256 : vector<16x128xf32>
    %258 = arith.mulf %249, %196 : vector<16x128xf32>
    %259 = arith.mulf %243, %251 : vector<16x128xf32>
    %260 = arith.addf %258, %259 : vector<16x128xf32>
    %261 = math.tanh %260 : vector<16x128xf32>
    %262 = arith.mulf %257, %261 : vector<16x128xf32>
    %263 = arith.truncf %262 : vector<16x128xf32> to vector<16x128xbf16>
    %c3_75 = arith.constant 3 : index
    %c0_76 = arith.constant 0 : index
    %c0_77 = arith.constant 0 : index
    %264 = vector.load %arg16[%c3_75, %c0_76, %c0_77] : memref<4x16x128xbf16, #tpu.memory_space<vmem>>, vector<1x16x128xbf16>
    %265 = vector.shape_cast %264 : vector<1x16x128xbf16> to vector<16x128xbf16>
    %266 = vector.shape_cast %234 : vector<16x128xbf16> to vector<1x16x128xbf16>
    tpu.vector_store %arg16[%c3_75, %c0_76, %c0_77], %266 {strides = array<i32>} : memref<4x16x128xbf16, #tpu.memory_space<vmem>>, vector<1x16x128xbf16>,
    %c0_78 = arith.constant 0 : index
    %c0_79 = arith.constant 0 : index
    %c0_80 = arith.constant 0 : index
    %267 = vector.load %arg17[%c0_78, %c0_79, %c0_80] : memref<4x16x128xbf16, #tpu.memory_space<vmem>>, vector<1x16x128xbf16>
    %268 = vector.shape_cast %267 : vector<1x16x128xbf16> to vector<16x128xbf16>
    %269 = vector.shape_cast %263 : vector<16x128xbf16> to vector<1x16x128xbf16>
    tpu.vector_store %arg17[%c0_78, %c0_79, %c0_80], %269 {strides = array<i32>} : memref<4x16x128xbf16, #tpu.memory_space<vmem>>, vector<1x16x128xbf16>,
    %c0_81 = arith.constant 0 : index
    %c0_82 = arith.constant 0 : index
    %c0_83 = arith.constant 0 : index
    %270 = vector.load %arg16[%c0_81, %c0_82, %c0_83] : memref<4x16x128xbf16, #tpu.memory_space<vmem>>, vector<4x16x128xbf16>
    %271 = vector.shape_cast %270 : vector<4x16x128xbf16> to vector<64x128xbf16>
    %c0_84 = arith.constant 0 : index
    %c0_85 = arith.constant 0 : index
    %c0_86 = arith.constant 0 : index
    %272 = vector.load %arg17[%c0_84, %c0_85, %c0_86] : memref<4x16x128xbf16, #tpu.memory_space<vmem>>, vector<4x16x128xbf16>
    %273 = vector.shape_cast %272 : vector<4x16x128xbf16> to vector<64x128xbf16>
    %c0_87 = arith.constant 0 : index
    %c0_88 = arith.constant 0 : index
    %274 = vector.load %arg6[%c0_87, %c0_88] : memref<128x1024xbf16, #tpu.memory_space<vmem>>, vector<128x1024xbf16>
    %cst_89 = arith.constant dense<0.000000e+00> : vector<64x1024xf32>
    %275 = tpu.matmul %271, %274, %cst_89 {dimension_numbers = #tpu.dot_dimension_numbers<[1], [0], [0], [1], [0, 0, 1, 1], [], []>} : vector<64x128xbf16>, vector<128x1024xbf16>, vector<64x1024xf32> -> vector<64x1024xf32>
    %c0_90 = arith.constant 0 : index
    %c0_91 = arith.constant 0 : index
    %276 = vector.load %arg7[%c0_90, %c0_91] : memref<128x1024xbf16, #tpu.memory_space<vmem>>, vector<128x1024xbf16>
    %cst_92 = arith.constant dense<0.000000e+00> : vector<64x1024xf32>
    %277 = tpu.matmul %273, %276, %cst_92 {dimension_numbers = #tpu.dot_dimension_numbers<[1], [0], [0], [1], [0, 0, 1, 1], [], []>} : vector<64x128xbf16>, vector<128x1024xbf16>, vector<64x1024xf32> -> vector<64x1024xf32>
    %278 = arith.addf %275, %277 : vector<64x1024xf32>
    %c0_93 = arith.constant 0 : index
    %c0_94 = arith.constant 0 : index
    %279 = vector.load %arg8[%c0_93, %c0_94] : memref<1x1024xf32, #tpu.memory_space<vmem>>, vector<1x1024xf32>
    %280 = vector.broadcast %279 : vector<1x1024xf32> to vector<64x1024xf32>
    %281 = arith.addf %278, %280 : vector<64x1024xf32>
    %c0_95 = arith.constant 0 : index
    %c0_96 = arith.constant 0 : index
    %282 = vector.load %arg15[%c0_95, %c0_96] : memref<64x1024xf32, #tpu.memory_space<vmem>>, vector<64x1024xf32>
    tpu.vector_store %arg15[%c0_95, %c0_96], %281 {strides = array<i32>} : memref<64x1024xf32, #tpu.memory_space<vmem>>, vector<64x1024xf32>,
    %c0_97 = arith.constant 0 : index
    %c0_98 = arith.constant 0 : index
    %283 = vector.load %arg9[%c0_97, %c0_98] : memref<128x512xbf16, #tpu.memory_space<vmem>>, vector<128x512xbf16>
    %c0_99 = arith.constant 0 : index
    %c0_100 = arith.constant 0 : index
    %284 = vector.load %arg10[%c0_99, %c0_100] : memref<128x512xbf16, #tpu.memory_space<vmem>>, vector<128x512xbf16>
    %cst_101 = arith.constant 0.000000e+00 : bf16
    %285 = vector.broadcast %cst_101 : bf16 to vector<16x128xbf16>
    %cst_102 = arith.constant 0.000000e+00 : f32
    %286 = vector.broadcast %cst_102 : f32 to vector<16x128xf32>
    %cst_103 = arith.constant 0.000000e+00 : bf16
    %287 = vector.broadcast %cst_103 : bf16 to vector<16x128xbf16>
    %cst_104 = arith.constant 0.000000e+00 : f32
    %288 = vector.broadcast %cst_104 : f32 to vector<16x128xf32>
    %c0_105 = arith.constant 0 : index
    %c0_106 = arith.constant 0 : index
    %289 = vector.load %arg15[%c0_105, %c0_106] : memref<64x1024xf32, #tpu.memory_space<vmem>>, vector<16x512xf32>
    %cst_107 = arith.constant dense<0.000000e+00> : vector<16x512xf32>
    %290 = tpu.matmul %285, %283, %cst_107 {dimension_numbers = #tpu.dot_dimension_numbers<[1], [0], [0], [1], [0, 0, 1, 1], [], []>} : vector<16x128xbf16>, vector<128x512xbf16>, vector<16x512xf32> -> vector<16x512xf32>
    %291 = arith.addf %289, %290 : vector<16x512xf32>
    %292 = vector.extract_strided_slice %291 {offsets = [0, 0], sizes = [16, 128], strides = [1, 1]} : vector<16x512xf32> to vector<16x128xf32>
    %293 = arith.negf %292 : vector<16x128xf32>
    %294 = math.exp %293 : vector<16x128xf32>
    %cst_108 = arith.constant 1.000000e+00 : f32
    %295 = vector.broadcast %cst_108 : f32 to vector<16x128xf32>
    %296 = arith.addf %295, %294 : vector<16x128xf32>
    %297 = arith.divf %295, %296 : vector<16x128xf32>
    %298 = vector.extract_strided_slice %291 {offsets = [0, 128], sizes = [16, 128], strides = [1, 1]} : vector<16x512xf32> to vector<16x128xf32>
    %299 = arith.negf %298 : vector<16x128xf32>
    %300 = math.exp %299 : vector<16x128xf32>
    %cst_109 = arith.constant 1.000000e+00 : f32
    %301 = vector.broadcast %cst_109 : f32 to vector<16x128xf32>
    %302 = arith.addf %301, %300 : vector<16x128xf32>
    %303 = arith.divf %301, %302 : vector<16x128xf32>
    %304 = vector.extract_strided_slice %291 {offsets = [0, 256], sizes = [16, 128], strides = [1, 1]} : vector<16x512xf32> to vector<16x128xf32>
    %305 = math.tanh %304 : vector<16x128xf32>
    %306 = vector.extract_strided_slice %291 {offsets = [0, 384], sizes = [16, 128], strides = [1, 1]} : vector<16x512xf32> to vector<16x128xf32>
    %307 = arith.negf %306 : vector<16x128xf32>
    %308 = math.exp %307 : vector<16x128xf32>
    %cst_110 = arith.constant 1.000000e+00 : f32
    %309 = vector.broadcast %cst_110 : f32 to vector<16x128xf32>
    %310 = arith.addf %309, %308 : vector<16x128xf32>
    %311 = arith.divf %309, %310 : vector<16x128xf32>
    %312 = arith.mulf %303, %286 : vector<16x128xf32>
    %313 = arith.mulf %297, %305 : vector<16x128xf32>
    %314 = arith.addf %312, %313 : vector<16x128xf32>
    %315 = math.tanh %314 : vector<16x128xf32>
    %316 = arith.mulf %311, %315 : vector<16x128xf32>
    %317 = arith.truncf %316 : vector<16x128xf32> to vector<16x128xbf16>
    %c48_111 = arith.constant 48 : index
    %c512_112 = arith.constant 512 : index
    %318 = vector.load %arg15[%c48_111, %c512_112] : memref<64x1024xf32, #tpu.memory_space<vmem>>, vector<16x512xf32>
    %cst_113 = arith.constant dense<0.000000e+00> : vector<16x512xf32>
    %319 = tpu.matmul %287, %284, %cst_113 {dimension_numbers = #tpu.dot_dimension_numbers<[1], [0], [0], [1], [0, 0, 1, 1], [], []>} : vector<16x128xbf16>, vector<128x512xbf16>, vector<16x512xf32> -> vector<16x512xf32>
    %320 = arith.addf %318, %319 : vector<16x512xf32>
    %321 = vector.extract_strided_slice %320 {offsets = [0, 0], sizes = [16, 128], strides = [1, 1]} : vector<16x512xf32> to vector<16x128xf32>
    %322 = arith.negf %321 : vector<16x128xf32>
    %323 = math.exp %322 : vector<16x128xf32>
    %cst_114 = arith.constant 1.000000e+00 : f32
    %324 = vector.broadcast %cst_114 : f32 to vector<16x128xf32>
    %325 = arith.addf %324, %323 : vector<16x128xf32>
    %326 = arith.divf %324, %325 : vector<16x128xf32>
    %327 = vector.extract_strided_slice %320 {offsets = [0, 128], sizes = [16, 128], strides = [1, 1]} : vector<16x512xf32> to vector<16x128xf32>
    %328 = arith.negf %327 : vector<16x128xf32>
    %329 = math.exp %328 : vector<16x128xf32>
    %cst_115 = arith.constant 1.000000e+00 : f32
    %330 = vector.broadcast %cst_115 : f32 to vector<16x128xf32>
    %331 = arith.addf %330, %329 : vector<16x128xf32>
    %332 = arith.divf %330, %331 : vector<16x128xf32>
    %333 = vector.extract_strided_slice %320 {offsets = [0, 256], sizes = [16, 128], strides = [1, 1]} : vector<16x512xf32> to vector<16x128xf32>
    %334 = math.tanh %333 : vector<16x128xf32>
    %335 = vector.extract_strided_slice %320 {offsets = [0, 384], sizes = [16, 128], strides = [1, 1]} : vector<16x512xf32> to vector<16x128xf32>
    %336 = arith.negf %335 : vector<16x128xf32>
    %337 = math.exp %336 : vector<16x128xf32>
    %cst_116 = arith.constant 1.000000e+00 : f32
    %338 = vector.broadcast %cst_116 : f32 to vector<16x128xf32>
    %339 = arith.addf %338, %337 : vector<16x128xf32>
    %340 = arith.divf %338, %339 : vector<16x128xf32>
    %341 = arith.mulf %332, %288 : vector<16x128xf32>
    %342 = arith.mulf %326, %334 : vector<16x128xf32>
    %343 = arith.addf %341, %342 : vector<16x128xf32>
    %344 = math.tanh %343 : vector<16x128xf32>
    %345 = arith.mulf %340, %344 : vector<16x128xf32>
    %346 = arith.truncf %345 : vector<16x128xf32> to vector<16x128xbf16>
    %c0_117 = arith.constant 0 : index
    %c0_118 = arith.constant 0 : index
    %c0_119 = arith.constant 0 : index
    %347 = vector.load %arg18[%c0_117, %c0_118, %c0_119] : memref<4x16x128xbf16, #tpu.memory_space<vmem>>, vector<1x16x128xbf16>
    %348 = vector.shape_cast %347 : vector<1x16x128xbf16> to vector<16x128xbf16>
    %349 = vector.shape_cast %317 : vector<16x128xbf16> to vector<1x16x128xbf16>
    tpu.vector_store %arg18[%c0_117, %c0_118, %c0_119], %349 {strides = array<i32>} : memref<4x16x128xbf16, #tpu.memory_space<vmem>>, vector<1x16x128xbf16>,
    %c3_120 = arith.constant 3 : index
    %c0_121 = arith.constant 0 : index
    %c0_122 = arith.constant 0 : index
    %350 = vector.load %arg19[%c3_120, %c0_121, %c0_122] : memref<4x16x128xbf16, #tpu.memory_space<vmem>>, vector<1x16x128xbf16>
    %351 = vector.shape_cast %350 : vector<1x16x128xbf16> to vector<16x128xbf16>
    %352 = vector.shape_cast %346 : vector<16x128xbf16> to vector<1x16x128xbf16>
    tpu.vector_store %arg19[%c3_120, %c0_121, %c0_122], %352 {strides = array<i32>} : memref<4x16x128xbf16, #tpu.memory_space<vmem>>, vector<1x16x128xbf16>,
    %c16_123 = arith.constant 16 : index
    %c0_124 = arith.constant 0 : index
    %353 = vector.load %arg15[%c16_123, %c0_124] : memref<64x1024xf32, #tpu.memory_space<vmem>>, vector<16x512xf32>
    %cst_125 = arith.constant dense<0.000000e+00> : vector<16x512xf32>
    %354 = tpu.matmul %317, %283, %cst_125 {dimension_numbers = #tpu.dot_dimension_numbers<[1], [0], [0], [1], [0, 0, 1, 1], [], []>} : vector<16x128xbf16>, vector<128x512xbf16>, vector<16x512xf32> -> vector<16x512xf32>
    %355 = arith.addf %353, %354 : vector<16x512xf32>
    %356 = vector.extract_strided_slice %355 {offsets = [0, 0], sizes = [16, 128], strides = [1, 1]} : vector<16x512xf32> to vector<16x128xf32>
    %357 = arith.negf %356 : vector<16x128xf32>
    %358 = math.exp %357 : vector<16x128xf32>
    %cst_126 = arith.constant 1.000000e+00 : f32
    %359 = vector.broadcast %cst_126 : f32 to vector<16x128xf32>
    %360 = arith.addf %359, %358 : vector<16x128xf32>
    %361 = arith.divf %359, %360 : vector<16x128xf32>
    %362 = vector.extract_strided_slice %355 {offsets = [0, 128], sizes = [16, 128], strides = [1, 1]} : vector<16x512xf32> to vector<16x128xf32>
    %363 = arith.negf %362 : vector<16x128xf32>
    %364 = math.exp %363 : vector<16x128xf32>
    %cst_127 = arith.constant 1.000000e+00 : f32
    %365 = vector.broadcast %cst_127 : f32 to vector<16x128xf32>
    %366 = arith.addf %365, %364 : vector<16x128xf32>
    %367 = arith.divf %365, %366 : vector<16x128xf32>
    %368 = vector.extract_strided_slice %355 {offsets = [0, 256], sizes = [16, 128], strides = [1, 1]} : vector<16x512xf32> to vector<16x128xf32>
    %369 = math.tanh %368 : vector<16x128xf32>
    %370 = vector.extract_strided_slice %355 {offsets = [0, 384], sizes = [16, 128], strides = [1, 1]} : vector<16x512xf32> to vector<16x128xf32>
    %371 = arith.negf %370 : vector<16x128xf32>
    %372 = math.exp %371 : vector<16x128xf32>
    %cst_128 = arith.constant 1.000000e+00 : f32
    %373 = vector.broadcast %cst_128 : f32 to vector<16x128xf32>
    %374 = arith.addf %373, %372 : vector<16x128xf32>
    %375 = arith.divf %373, %374 : vector<16x128xf32>
    %376 = arith.mulf %367, %314 : vector<16x128xf32>
    %377 = arith.mulf %361, %369 : vector<16x128xf32>
    %378 = arith.addf %376, %377 : vector<16x128xf32>
    %379 = math.tanh %378 : vector<16x128xf32>
    %380 = arith.mulf %375, %379 : vector<16x128xf32>
    %381 = arith.truncf %380 : vector<16x128xf32> to vector<16x128xbf16>
    %c32_129 = arith.constant 32 : index
    %c512_130 = arith.constant 512 : index
    %382 = vector.load %arg15[%c32_129, %c512_130] : memref<64x1024xf32, #tpu.memory_space<vmem>>, vector<16x512xf32>
    %cst_131 = arith.constant dense<0.000000e+00> : vector<16x512xf32>
    %383 = tpu.matmul %346, %284, %cst_131 {dimension_numbers = #tpu.dot_dimension_numbers<[1], [0], [0], [1], [0, 0, 1, 1], [], []>} : vector<16x128xbf16>, vector<128x512xbf16>, vector<16x512xf32> -> vector<16x512xf32>
    %384 = arith.addf %382, %383 : vector<16x512xf32>
    %385 = vector.extract_strided_slice %384 {offsets = [0, 0], sizes = [16, 128], strides = [1, 1]} : vector<16x512xf32> to vector<16x128xf32>
    %386 = arith.negf %385 : vector<16x128xf32>
    %387 = math.exp %386 : vector<16x128xf32>
    %cst_132 = arith.constant 1.000000e+00 : f32
    %388 = vector.broadcast %cst_132 : f32 to vector<16x128xf32>
    %389 = arith.addf %388, %387 : vector<16x128xf32>
    %390 = arith.divf %388, %389 : vector<16x128xf32>
    %391 = vector.extract_strided_slice %384 {offsets = [0, 128], sizes = [16, 128], strides = [1, 1]} : vector<16x512xf32> to vector<16x128xf32>
    %392 = arith.negf %391 : vector<16x128xf32>
    %393 = math.exp %392 : vector<16x128xf32>
    %cst_133 = arith.constant 1.000000e+00 : f32
    %394 = vector.broadcast %cst_133 : f32 to vector<16x128xf32>
    %395 = arith.addf %394, %393 : vector<16x128xf32>
    %396 = arith.divf %394, %395 : vector<16x128xf32>
    %397 = vector.extract_strided_slice %384 {offsets = [0, 256], sizes = [16, 128], strides = [1, 1]} : vector<16x512xf32> to vector<16x128xf32>
    %398 = math.tanh %397 : vector<16x128xf32>
    %399 = vector.extract_strided_slice %384 {offsets = [0, 384], sizes = [16, 128], strides = [1, 1]} : vector<16x512xf32> to vector<16x128xf32>
    %400 = arith.negf %399 : vector<16x128xf32>
    %401 = math.exp %400 : vector<16x128xf32>
    %cst_134 = arith.constant 1.000000e+00 : f32
    %402 = vector.broadcast %cst_134 : f32 to vector<16x128xf32>
    %403 = arith.addf %402, %401 : vector<16x128xf32>
    %404 = arith.divf %402, %403 : vector<16x128xf32>
    %405 = arith.mulf %396, %343 : vector<16x128xf32>
    %406 = arith.mulf %390, %398 : vector<16x128xf32>
    %407 = arith.addf %405, %406 : vector<16x128xf32>
    %408 = math.tanh %407 : vector<16x128xf32>
    %409 = arith.mulf %404, %408 : vector<16x128xf32>
    %410 = arith.truncf %409 : vector<16x128xf32> to vector<16x128xbf16>
    %c1_135 = arith.constant 1 : index
    %c0_136 = arith.constant 0 : index
    %c0_137 = arith.constant 0 : index
    %411 = vector.load %arg18[%c1_135, %c0_136, %c0_137] : memref<4x16x128xbf16, #tpu.memory_space<vmem>>, vector<1x16x128xbf16>
    %412 = vector.shape_cast %411 : vector<1x16x128xbf16> to vector<16x128xbf16>
    %413 = vector.shape_cast %381 : vector<16x128xbf16> to vector<1x16x128xbf16>
    tpu.vector_store %arg18[%c1_135, %c0_136, %c0_137], %413 {strides = array<i32>} : memref<4x16x128xbf16, #tpu.memory_space<vmem>>, vector<1x16x128xbf16>,
    %c2_138 = arith.constant 2 : index
    %c0_139 = arith.constant 0 : index
    %c0_140 = arith.constant 0 : index
    %414 = vector.load %arg19[%c2_138, %c0_139, %c0_140] : memref<4x16x128xbf16, #tpu.memory_space<vmem>>, vector<1x16x128xbf16>
    %415 = vector.shape_cast %414 : vector<1x16x128xbf16> to vector<16x128xbf16>
    %416 = vector.shape_cast %410 : vector<16x128xbf16> to vector<1x16x128xbf16>
    tpu.vector_store %arg19[%c2_138, %c0_139, %c0_140], %416 {strides = array<i32>} : memref<4x16x128xbf16, #tpu.memory_space<vmem>>, vector<1x16x128xbf16>,
    %c32_141 = arith.constant 32 : index
    %c0_142 = arith.constant 0 : index
    %417 = vector.load %arg15[%c32_141, %c0_142] : memref<64x1024xf32, #tpu.memory_space<vmem>>, vector<16x512xf32>
    %cst_143 = arith.constant dense<0.000000e+00> : vector<16x512xf32>
    %418 = tpu.matmul %381, %283, %cst_143 {dimension_numbers = #tpu.dot_dimension_numbers<[1], [0], [0], [1], [0, 0, 1, 1], [], []>} : vector<16x128xbf16>, vector<128x512xbf16>, vector<16x512xf32> -> vector<16x512xf32>
    %419 = arith.addf %417, %418 : vector<16x512xf32>
    %420 = vector.extract_strided_slice %419 {offsets = [0, 0], sizes = [16, 128], strides = [1, 1]} : vector<16x512xf32> to vector<16x128xf32>
    %421 = arith.negf %420 : vector<16x128xf32>
    %422 = math.exp %421 : vector<16x128xf32>
    %cst_144 = arith.constant 1.000000e+00 : f32
    %423 = vector.broadcast %cst_144 : f32 to vector<16x128xf32>
    %424 = arith.addf %423, %422 : vector<16x128xf32>
    %425 = arith.divf %423, %424 : vector<16x128xf32>
    %426 = vector.extract_strided_slice %419 {offsets = [0, 128], sizes = [16, 128], strides = [1, 1]} : vector<16x512xf32> to vector<16x128xf32>
    %427 = arith.negf %426 : vector<16x128xf32>
    %428 = math.exp %427 : vector<16x128xf32>
    %cst_145 = arith.constant 1.000000e+00 : f32
    %429 = vector.broadcast %cst_145 : f32 to vector<16x128xf32>
    %430 = arith.addf %429, %428 : vector<16x128xf32>
    %431 = arith.divf %429, %430 : vector<16x128xf32>
    %432 = vector.extract_strided_slice %419 {offsets = [0, 256], sizes = [16, 128], strides = [1, 1]} : vector<16x512xf32> to vector<16x128xf32>
    %433 = math.tanh %432 : vector<16x128xf32>
    %434 = vector.extract_strided_slice %419 {offsets = [0, 384], sizes = [16, 128], strides = [1, 1]} : vector<16x512xf32> to vector<16x128xf32>
    %435 = arith.negf %434 : vector<16x128xf32>
    %436 = math.exp %435 : vector<16x128xf32>
    %cst_146 = arith.constant 1.000000e+00 : f32
    %437 = vector.broadcast %cst_146 : f32 to vector<16x128xf32>
    %438 = arith.addf %437, %436 : vector<16x128xf32>
    %439 = arith.divf %437, %438 : vector<16x128xf32>
    %440 = arith.mulf %431, %378 : vector<16x128xf32>
    %441 = arith.mulf %425, %433 : vector<16x128xf32>
    %442 = arith.addf %440, %441 : vector<16x128xf32>
    %443 = math.tanh %442 : vector<16x128xf32>
    %444 = arith.mulf %439, %443 : vector<16x128xf32>
    %445 = arith.truncf %444 : vector<16x128xf32> to vector<16x128xbf16>
    %c16_147 = arith.constant 16 : index
    %c512_148 = arith.constant 512 : index
    %446 = vector.load %arg15[%c16_147, %c512_148] : memref<64x1024xf32, #tpu.memory_space<vmem>>, vector<16x512xf32>
    %cst_149 = arith.constant dense<0.000000e+00> : vector<16x512xf32>
    %447 = tpu.matmul %410, %284, %cst_149 {dimension_numbers = #tpu.dot_dimension_numbers<[1], [0], [0], [1], [0, 0, 1, 1], [], []>} : vector<16x128xbf16>, vector<128x512xbf16>, vector<16x512xf32> -> vector<16x512xf32>
    %448 = arith.addf %446, %447 : vector<16x512xf32>
    %449 = vector.extract_strided_slice %448 {offsets = [0, 0], sizes = [16, 128], strides = [1, 1]} : vector<16x512xf32> to vector<16x128xf32>
    %450 = arith.negf %449 : vector<16x128xf32>
    %451 = math.exp %450 : vector<16x128xf32>
    %cst_150 = arith.constant 1.000000e+00 : f32
    %452 = vector.broadcast %cst_150 : f32 to vector<16x128xf32>
    %453 = arith.addf %452, %451 : vector<16x128xf32>
    %454 = arith.divf %452, %453 : vector<16x128xf32>
    %455 = vector.extract_strided_slice %448 {offsets = [0, 128], sizes = [16, 128], strides = [1, 1]} : vector<16x512xf32> to vector<16x128xf32>
    %456 = arith.negf %455 : vector<16x128xf32>
    %457 = math.exp %456 : vector<16x128xf32>
    %cst_151 = arith.constant 1.000000e+00 : f32
    %458 = vector.broadcast %cst_151 : f32 to vector<16x128xf32>
    %459 = arith.addf %458, %457 : vector<16x128xf32>
    %460 = arith.divf %458, %459 : vector<16x128xf32>
    %461 = vector.extract_strided_slice %448 {offsets = [0, 256], sizes = [16, 128], strides = [1, 1]} : vector<16x512xf32> to vector<16x128xf32>
    %462 = math.tanh %461 : vector<16x128xf32>
    %463 = vector.extract_strided_slice %448 {offsets = [0, 384], sizes = [16, 128], strides = [1, 1]} : vector<16x512xf32> to vector<16x128xf32>
    %464 = arith.negf %463 : vector<16x128xf32>
    %465 = math.exp %464 : vector<16x128xf32>
    %cst_152 = arith.constant 1.000000e+00 : f32
    %466 = vector.broadcast %cst_152 : f32 to vector<16x128xf32>
    %467 = arith.addf %466, %465 : vector<16x128xf32>
    %468 = arith.divf %466, %467 : vector<16x128xf32>
    %469 = arith.mulf %460, %407 : vector<16x128xf32>
    %470 = arith.mulf %454, %462 : vector<16x128xf32>
    %471 = arith.addf %469, %470 : vector<16x128xf32>
    %472 = math.tanh %471 : vector<16x128xf32>
    %473 = arith.mulf %468, %472 : vector<16x128xf32>
    %474 = arith.truncf %473 : vector<16x128xf32> to vector<16x128xbf16>
    %c2_153 = arith.constant 2 : index
    %c0_154 = arith.constant 0 : index
    %c0_155 = arith.constant 0 : index
    %475 = vector.load %arg18[%c2_153, %c0_154, %c0_155] : memref<4x16x128xbf16, #tpu.memory_space<vmem>>, vector<1x16x128xbf16>
    %476 = vector.shape_cast %475 : vector<1x16x128xbf16> to vector<16x128xbf16>
    %477 = vector.shape_cast %445 : vector<16x128xbf16> to vector<1x16x128xbf16>
    tpu.vector_store %arg18[%c2_153, %c0_154, %c0_155], %477 {strides = array<i32>} : memref<4x16x128xbf16, #tpu.memory_space<vmem>>, vector<1x16x128xbf16>,
    %c1_156 = arith.constant 1 : index
    %c0_157 = arith.constant 0 : index
    %c0_158 = arith.constant 0 : index
    %478 = vector.load %arg19[%c1_156, %c0_157, %c0_158] : memref<4x16x128xbf16, #tpu.memory_space<vmem>>, vector<1x16x128xbf16>
    %479 = vector.shape_cast %478 : vector<1x16x128xbf16> to vector<16x128xbf16>
    %480 = vector.shape_cast %474 : vector<16x128xbf16> to vector<1x16x128xbf16>
    tpu.vector_store %arg19[%c1_156, %c0_157, %c0_158], %480 {strides = array<i32>} : memref<4x16x128xbf16, #tpu.memory_space<vmem>>, vector<1x16x128xbf16>,
    %c48_159 = arith.constant 48 : index
    %c0_160 = arith.constant 0 : index
    %481 = vector.load %arg15[%c48_159, %c0_160] : memref<64x1024xf32, #tpu.memory_space<vmem>>, vector<16x512xf32>
    %cst_161 = arith.constant dense<0.000000e+00> : vector<16x512xf32>
    %482 = tpu.matmul %445, %283, %cst_161 {dimension_numbers = #tpu.dot_dimension_numbers<[1], [0], [0], [1], [0, 0, 1, 1], [], []>} : vector<16x128xbf16>, vector<128x512xbf16>, vector<16x512xf32> -> vector<16x512xf32>
    %483 = arith.addf %481, %482 : vector<16x512xf32>
    %484 = vector.extract_strided_slice %483 {offsets = [0, 0], sizes = [16, 128], strides = [1, 1]} : vector<16x512xf32> to vector<16x128xf32>
    %485 = arith.negf %484 : vector<16x128xf32>
    %486 = math.exp %485 : vector<16x128xf32>
    %cst_162 = arith.constant 1.000000e+00 : f32
    %487 = vector.broadcast %cst_162 : f32 to vector<16x128xf32>
    %488 = arith.addf %487, %486 : vector<16x128xf32>
    %489 = arith.divf %487, %488 : vector<16x128xf32>
    %490 = vector.extract_strided_slice %483 {offsets = [0, 128], sizes = [16, 128], strides = [1, 1]} : vector<16x512xf32> to vector<16x128xf32>
    %491 = arith.negf %490 : vector<16x128xf32>
    %492 = math.exp %491 : vector<16x128xf32>
    %cst_163 = arith.constant 1.000000e+00 : f32
    %493 = vector.broadcast %cst_163 : f32 to vector<16x128xf32>
    %494 = arith.addf %493, %492 : vector<16x128xf32>
    %495 = arith.divf %493, %494 : vector<16x128xf32>
    %496 = vector.extract_strided_slice %483 {offsets = [0, 256], sizes = [16, 128], strides = [1, 1]} : vector<16x512xf32> to vector<16x128xf32>
    %497 = math.tanh %496 : vector<16x128xf32>
    %498 = vector.extract_strided_slice %483 {offsets = [0, 384], sizes = [16, 128], strides = [1, 1]} : vector<16x512xf32> to vector<16x128xf32>
    %499 = arith.negf %498 : vector<16x128xf32>
    %500 = math.exp %499 : vector<16x128xf32>
    %cst_164 = arith.constant 1.000000e+00 : f32
    %501 = vector.broadcast %cst_164 : f32 to vector<16x128xf32>
    %502 = arith.addf %501, %500 : vector<16x128xf32>
    %503 = arith.divf %501, %502 : vector<16x128xf32>
    %504 = arith.mulf %495, %442 : vector<16x128xf32>
    %505 = arith.mulf %489, %497 : vector<16x128xf32>
    %506 = arith.addf %504, %505 : vector<16x128xf32>
    %507 = math.tanh %506 : vector<16x128xf32>
    %508 = arith.mulf %503, %507 : vector<16x128xf32>
    %509 = arith.truncf %508 : vector<16x128xf32> to vector<16x128xbf16>
    %c0_165 = arith.constant 0 : index
    %c512_166 = arith.constant 512 : index
    %510 = vector.load %arg15[%c0_165, %c512_166] : memref<64x1024xf32, #tpu.memory_space<vmem>>, vector<16x512xf32>
    %cst_167 = arith.constant dense<0.000000e+00> : vector<16x512xf32>
    %511 = tpu.matmul %474, %284, %cst_167 {dimension_numbers = #tpu.dot_dimension_numbers<[1], [0], [0], [1], [0, 0, 1, 1], [], []>} : vector<16x128xbf16>, vector<128x512xbf16>, vector<16x512xf32> -> vector<16x512xf32>
    %512 = arith.addf %510, %511 : vector<16x512xf32>
    %513 = vector.extract_strided_slice %512 {offsets = [0, 0], sizes = [16, 128], strides = [1, 1]} : vector<16x512xf32> to vector<16x128xf32>
    %514 = arith.negf %513 : vector<16x128xf32>
    %515 = math.exp %514 : vector<16x128xf32>
    %cst_168 = arith.constant 1.000000e+00 : f32
    %516 = vector.broadcast %cst_168 : f32 to vector<16x128xf32>
    %517 = arith.addf %516, %515 : vector<16x128xf32>
    %518 = arith.divf %516, %517 : vector<16x128xf32>
    %519 = vector.extract_strided_slice %512 {offsets = [0, 128], sizes = [16, 128], strides = [1, 1]} : vector<16x512xf32> to vector<16x128xf32>
    %520 = arith.negf %519 : vector<16x128xf32>
    %521 = math.exp %520 : vector<16x128xf32>
    %cst_169 = arith.constant 1.000000e+00 : f32
    %522 = vector.broadcast %cst_169 : f32 to vector<16x128xf32>
    %523 = arith.addf %522, %521 : vector<16x128xf32>
    %524 = arith.divf %522, %523 : vector<16x128xf32>
    %525 = vector.extract_strided_slice %512 {offsets = [0, 256], sizes = [16, 128], strides = [1, 1]} : vector<16x512xf32> to vector<16x128xf32>
    %526 = math.tanh %525 : vector<16x128xf32>
    %527 = vector.extract_strided_slice %512 {offsets = [0, 384], sizes = [16, 128], strides = [1, 1]} : vector<16x512xf32> to vector<16x128xf32>
    %528 = arith.negf %527 : vector<16x128xf32>
    %529 = math.exp %528 : vector<16x128xf32>
    %cst_170 = arith.constant 1.000000e+00 : f32
    %530 = vector.broadcast %cst_170 : f32 to vector<16x128xf32>
    %531 = arith.addf %530, %529 : vector<16x128xf32>
    %532 = arith.divf %530, %531 : vector<16x128xf32>
    %533 = arith.mulf %524, %471 : vector<16x128xf32>
    %534 = arith.mulf %518, %526 : vector<16x128xf32>
    %535 = arith.addf %533, %534 : vector<16x128xf32>
    %536 = math.tanh %535 : vector<16x128xf32>
    %537 = arith.mulf %532, %536 : vector<16x128xf32>
    %538 = arith.truncf %537 : vector<16x128xf32> to vector<16x128xbf16>
    %c3_171 = arith.constant 3 : index
    %c0_172 = arith.constant 0 : index
    %c0_173 = arith.constant 0 : index
    %539 = vector.load %arg18[%c3_171, %c0_172, %c0_173] : memref<4x16x128xbf16, #tpu.memory_space<vmem>>, vector<1x16x128xbf16>
    %540 = vector.shape_cast %539 : vector<1x16x128xbf16> to vector<16x128xbf16>
    %541 = vector.shape_cast %509 : vector<16x128xbf16> to vector<1x16x128xbf16>
    tpu.vector_store %arg18[%c3_171, %c0_172, %c0_173], %541 {strides = array<i32>} : memref<4x16x128xbf16, #tpu.memory_space<vmem>>, vector<1x16x128xbf16>,
    %c0_174 = arith.constant 0 : index
    %c0_175 = arith.constant 0 : index
    %c0_176 = arith.constant 0 : index
    %542 = vector.load %arg19[%c0_174, %c0_175, %c0_176] : memref<4x16x128xbf16, #tpu.memory_space<vmem>>, vector<1x16x128xbf16>
    %543 = vector.shape_cast %542 : vector<1x16x128xbf16> to vector<16x128xbf16>
    %544 = vector.shape_cast %538 : vector<16x128xbf16> to vector<1x16x128xbf16>
    tpu.vector_store %arg19[%c0_174, %c0_175, %c0_176], %544 {strides = array<i32>} : memref<4x16x128xbf16, #tpu.memory_space<vmem>>, vector<1x16x128xbf16>,
    %c0_177 = arith.constant 0 : index
    %c0_178 = arith.constant 0 : index
    %c0_179 = arith.constant 0 : index
    %545 = vector.load %arg18[%c0_177, %c0_178, %c0_179] : memref<4x16x128xbf16, #tpu.memory_space<vmem>>, vector<4x16x128xbf16>
    %cst_180 = arith.constant dense<0xFF80> : vector<16x128xbf16>
    %546 = vector.multi_reduction <maximumf>, %545, %cst_180 [0] : vector<4x16x128xbf16> to vector<16x128xbf16>
    %c0_181 = arith.constant 0 : index
    %c0_182 = arith.constant 0 : index
    %c0_183 = arith.constant 0 : index
    %547 = vector.load %arg19[%c0_181, %c0_182, %c0_183] : memref<4x16x128xbf16, #tpu.memory_space<vmem>>, vector<4x16x128xbf16>
    %cst_184 = arith.constant dense<0xFF80> : vector<16x128xbf16>
    %548 = vector.multi_reduction <maximumf>, %547, %cst_184 [0] : vector<4x16x128xbf16> to vector<16x128xbf16>
    %c0_185 = arith.constant 0 : index
    %c0_186 = arith.constant 0 : index
    %549 = vector.load %arg11[%c0_185, %c0_186] : memref<128x128xbf16, #tpu.memory_space<vmem>>, vector<128x128xbf16>
    %cst_187 = arith.constant dense<0.000000e+00> : vector<16x128xf32>
    %550 = tpu.matmul %546, %549, %cst_187 {dimension_numbers = #tpu.dot_dimension_numbers<[1], [0], [0], [1], [0, 0, 1, 1], [], []>} : vector<16x128xbf16>, vector<128x128xbf16>, vector<16x128xf32> -> vector<16x128xf32>
    %c0_188 = arith.constant 0 : index
    %c0_189 = arith.constant 0 : index
    %551 = vector.load %arg12[%c0_188, %c0_189] : memref<128x128xbf16, #tpu.memory_space<vmem>>, vector<128x128xbf16>
    %cst_190 = arith.constant dense<0.000000e+00> : vector<16x128xf32>
    %552 = tpu.matmul %548, %551, %cst_190 {dimension_numbers = #tpu.dot_dimension_numbers<[1], [0], [0], [1], [0, 0, 1, 1], [], []>} : vector<16x128xbf16>, vector<128x128xbf16>, vector<16x128xf32> -> vector<16x128xf32>
    %553 = arith.addf %550, %552 : vector<16x128xf32>
    %c0_191 = arith.constant 0 : index
    %c0_192 = arith.constant 0 : index
    %554 = vector.load %arg13[%c0_191, %c0_192] : memref<1x128xf32, #tpu.memory_space<vmem>>, vector<1x128xf32>
    %555 = vector.broadcast %554 : vector<1x128xf32> to vector<16x128xf32>
    %556 = arith.addf %553, %555 : vector<16x128xf32>
    %c0_193 = arith.constant 0 : index
    %c0_194 = arith.constant 0 : index
    %557 = vector.load %arg14[%c0_193, %c0_194] : memref<16x128xf32, #tpu.memory_space<vmem>>, vector<16x128xf32>
    tpu.vector_store %arg14[%c0_193, %c0_194], %556 {strides = array<i32>} : memref<16x128xf32, #tpu.memory_space<vmem>>, vector<16x128xf32>,
    return
  }
  func.func @transform_0(%arg0: i32) -> (i32, i32, i32) {
    %c0_i32 = arith.constant 0 : i32
    %c0_i32_0 = arith.constant 0 : i32
    %c0_i32_1 = arith.constant 0 : i32
    return %c0_i32, %arg0, %c0_i32_0 : i32, i32, i32
  }
  func.func @transform_1(%arg0: i32) -> (i32, i32) {
    %c0_i32 = arith.constant 0 : i32
    %c0_i32_0 = arith.constant 0 : i32
    %c0_i32_1 = arith.constant 0 : i32
    return %c0_i32, %c0_i32_0 : i32, i32
  }
  func.func @transform_2(%arg0: i32) -> (i32, i32) {
    %c0_i32 = arith.constant 0 : i32
    %c0_i32_0 = arith.constant 0 : i32
    %c0_i32_1 = arith.constant 0 : i32
    return %c0_i32, %c0_i32_0 : i32, i32
  }
  func.func @transform_3(%arg0: i32) -> (i32, i32) {
    %c0_i32 = arith.constant 0 : i32
    %c0_i32_0 = arith.constant 0 : i32
    %c0_i32_1 = arith.constant 0 : i32
    return %c0_i32, %c0_i32_0 : i32, i32
  }
  func.func @transform_4(%arg0: i32) -> (i32, i32) {
    %c0_i32 = arith.constant 0 : i32
    %c0_i32_0 = arith.constant 0 : i32
    %c0_i32_1 = arith.constant 0 : i32
    return %c0_i32, %c0_i32_0 : i32, i32
  }
  func.func @transform_5(%arg0: i32) -> (i32, i32) {
    %c0_i32 = arith.constant 0 : i32
    %c0_i32_0 = arith.constant 0 : i32
    %c0_i32_1 = arith.constant 0 : i32
    return %c0_i32, %c0_i32_0 : i32, i32
  }
  func.func @transform_6(%arg0: i32) -> (i32, i32) {
    %c0_i32 = arith.constant 0 : i32
    %c0_i32_0 = arith.constant 0 : i32
    %c0_i32_1 = arith.constant 0 : i32
    return %c0_i32, %c0_i32_0 : i32, i32
  }
  func.func @transform_7(%arg0: i32) -> (i32, i32) {
    %c0_i32 = arith.constant 0 : i32
    %c0_i32_0 = arith.constant 0 : i32
    %c0_i32_1 = arith.constant 0 : i32
    return %c0_i32, %c0_i32_0 : i32, i32
  }
  func.func @transform_8(%arg0: i32) -> (i32, i32) {
    %c0_i32 = arith.constant 0 : i32
    %c0_i32_0 = arith.constant 0 : i32
    %c0_i32_1 = arith.constant 0 : i32
    return %c0_i32, %c0_i32_0 : i32, i32
  }
  func.func @transform_9(%arg0: i32) -> (i32, i32) {
    %c0_i32 = arith.constant 0 : i32
    %c0_i32_0 = arith.constant 0 : i32
    %c0_i32_1 = arith.constant 0 : i32
    return %c0_i32, %c0_i32_0 : i32, i32
  }
  func.func @transform_10(%arg0: i32) -> (i32, i32) {
    %c0_i32 = arith.constant 0 : i32
    %c0_i32_0 = arith.constant 0 : i32
    %c0_i32_1 = arith.constant 0 : i32
    return %c0_i32, %c0_i32_0 : i32, i32
  }
  func.func @transform_11(%arg0: i32) -> (i32, i32) {
    %c0_i32 = arith.constant 0 : i32
    %c0_i32_0 = arith.constant 0 : i32
    %c0_i32_1 = arith.constant 0 : i32
    return %c0_i32, %c0_i32_0 : i32, i32
  }
  func.func @transform_12(%arg0: i32) -> (i32, i32) {
    %c0_i32 = arith.constant 0 : i32
    %c0_i32_0 = arith.constant 0 : i32
    %c0_i32_1 = arith.constant 0 : i32
    return %c0_i32, %c0_i32_0 : i32, i32
  }
  func.func @transform_13(%arg0: i32) -> (i32, i32) {
    %c0_i32 = arith.constant 0 : i32
    %c0_i32_0 = arith.constant 0 : i32
    return %arg0, %c0_i32 : i32, i32
  }
}

</mosaic_0001>

<bundles_post_ra>
// kernel: spatial_rnn_forward.1
= control target key start
LH: loop header
LB: loop body
LE: loop exit
PB: predicated region body
PF: predicated region fallthrough
CT: control target
= control target key end

     0   :  { %18 = vsyncpa [#allocation8], 0  ;;  %s10332_s0 = inlined_call_operand.vmem [shape: bf16[4,16,128], index: 0, kind: input, shape index: {}]   ;;  %s10333_s1 = inlined_call_operand.hbm [shape: bf16[128,1024], index: 1, kind: input, shape index: {}]   ;;  %s10334_s2 = inlined_call_operand.vmem [shape: f32[1,1024], index: 2, kind: input, shape index: {}]   ;;  %s10335_s3 = inlined_call_operand.vmem [shape: bf16[128,512], index: 3, kind: input, shape index: {}]   ;;  %s10336_s4 = inlined_call_operand.hbm [shape: bf16[128,512], index: 4, kind: input, shape index: {}]   ;;  %s10337_s5 = inlined_call_operand.hbm [shape: bf16[128,1024], index: 5, kind: input, shape index: {}]   ;;  %s10338_s6 = inlined_call_operand.hbm [shape: bf16[128,1024], index: 6, kind: input, shape index: {}]   ;;  %s10339_s7 = inlined_call_operand.vmem [shape: f32[1,1024], index: 7, kind: input, shape index: {}]   ;;  %s10340_s8 = inlined_call_operand.hbm [shape: bf16[128,512], index: 8, kind: input, shape index: {}]   ;;  %s10341_s9 = inlined_call_operand.hbm [shape: bf16[128,512], index: 9, kind: input, shape index: {}]   ;;  %s10342_s10 = inlined_call_operand.hbm [shape: bf16[128,128], index: 10, kind: input, shape index: {}]   ;;  %s10343_s11 = inlined_call_operand.hbm [shape: bf16[128,128], index: 11, kind: input, shape index: {}]   ;;  %s10344_s12 = inlined_call_operand.vmem [shape: f32[1,128], index: 12, kind: input, shape index: {}]   ;;  %s10345_s13 = inlined_call_operand.vmem [shape: f32[16,128], index: 13, kind: output, shape index: {}]  }
   0x1   :  { %19 = vsyncpa [#allocation10], 0 }
   0x2   :  { %20 = vsyncpa [#allocation13], 0 }
   0x3   :  { %21 = vsyncpa [#allocation16], 0 }
   0x4   :  { %22 = vsyncpa [#allocation19], 0  ;;  %s7911_s25 = smov [#allocation9]  }
   0x5   :  { %s46_s26 = sshll.u32 %s7911_s25, 4  ;;  %s47_s26 = int_to_ptr.vmem [resolvable:$true] %s46_s26 }
   0x6   :  { %s7749_s27 = scalar_lea.vmem %s47_s26, 4096  ;;  %p7754_p1 = scmp.lt.s32.totalorder %s47_s26, %s47_s26 }
   0x7   :  { %p7750_p0 = scmp.ne.s32.totalorder %s47_s26, %s7749_s27  ;;  %p7755_p2 = scmp.lt.s32.totalorder %s7749_s27, %s7749_s27 }
   0x9   :  { %p7756_p3 = por %p7755_p2, %p7754_p1 }
   0xb   :  { %p7757_p4 = pnand %p7756_p3, %p7750_p0 }
   0xd   :  { %7760 = shalt.err (!%p7757_p4)
}
   0xe   :  { %s7912_s28 = smov 256   ;;  %s7913_s29 = smov 16  }
   0xf   :  { %52 = dma.hbm_to_vmem [thread:$0]  %s10336_s4, 4096, %s47_s26, [#allocation10], %s7912_s28, %s7912_s28, %s7913_s29  }
  0x10   :  { %s7914_s15 = smov [#allocation12]   ;;  %s7915_s17 = smov [#allocation15]  }
  0x11   :  { %s70_s16 = sshll.u32 %s7914_s15, 4  ;;  %s96_s18 = sshll.u32 %s7915_s17, 4  ;;  %s71_s16 = int_to_ptr.vmem [resolvable:$true] %s70_s16  ;;  %s97_s18 = int_to_ptr.vmem [resolvable:$true] %s96_s18 }
  0x12   :  { %s7769_s19 = scalar_lea.vmem %s71_s16, 8192  ;;  %p7774_p6 = scmp.lt.s32.totalorder %s71_s16, %s71_s16 }
  0x13   :  { %p7770_p5 = scmp.ne.s32.totalorder %s71_s16, %s7769_s19  ;;  %p7775_p7 = scmp.lt.s32.totalorder %s7769_s19, %s7769_s19 }
  0x15   :  { %p7776_p8 = por %p7775_p7, %p7774_p6 }
  0x17   :  { %p7777_p9 = pnand %p7776_p8, %p7770_p5 }
  0x19   :  { %7780 = shalt.err (!%p7777_p9)
}
  0x1a   :  { %s7916_s20 = smov 512   ;;  %s7917_s21 = smov 32  }
  0x1b   :  { %76 = dma.hbm_to_vmem [thread:$0]  %s10338_s6, 8192, %s71_s16, [#allocation13], %s7916_s20, %s7916_s20, %s7917_s21  }
  0x1c   :  { %s7789_s4 = scalar_lea.vmem %s97_s18, 4096  ;;  %p7794_p11 = scmp.lt.s32.totalorder %s97_s18, %s97_s18 }
  0x1d   :  { %p7790_p10 = scmp.ne.s32.totalorder %s97_s18, %s7789_s4  ;;  %p7795_p12 = scmp.lt.s32.totalorder %s7789_s4, %s7789_s4 }
  0x1f   :  { %p7796_p13 = por %p7795_p12, %p7794_p11 }
  0x21   :  { %p7797_p0 = pnand %p7796_p13, %p7790_p10 }
  0x23   :  { %7800 = shalt.err (!%p7797_p0)
}
  0x24   :  { %102 = dma.hbm_to_vmem [thread:$0]  %s10341_s9, 4096, %s97_s18, [#allocation16], %s7912_s28, %s7912_s28, %s7913_s29  }
  0x25   :  { %s7918_s26 = smov [#allocation7]   ;;  %s7919_s30 = smov [#allocation11]  }
  0x26   :  { %s30_s27 = sshll.u32 %s7918_s26, 4  ;;  %s58_s6 = sshll.u32 %s7919_s30, 4  ;;  %s31_s27 = int_to_ptr.vmem [resolvable:$true] %s30_s27  ;;  %s59_s6 = int_to_ptr.vmem [resolvable:$true] %s58_s6 }
  0x27   :  { %s7809_s14 = scalar_lea.vmem %s31_s27, 8192  ;;  %p7814_p2 = scmp.lt.s32.totalorder %s31_s27, %s31_s27 }
  0x28   :  { %p7810_p1 = scmp.ne.s32.totalorder %s31_s27, %s7809_s14  ;;  %p7815_p3 = scmp.lt.s32.totalorder %s7809_s14, %s7809_s14 }
  0x2a   :  { %p7816_p4 = por %p7815_p3, %p7814_p2 }
  0x2c   :  { %p7817_p5 = pnand %p7816_p4, %p7810_p1 }
  0x2e   :  { %7820 = shalt.err (!%p7817_p5)
}
  0x2f   :  { %36 = dma.hbm_to_vmem [thread:$0]  %s10333_s1, 8192, %s31_s27, [#allocation8], %s7916_s20, %s7916_s20, %s7917_s21  }
  0x30   :  { %s7829_s9 = scalar_lea.vmem %s59_s6, 8192  ;;  %p7834_p7 = scmp.lt.s32.totalorder %s59_s6, %s59_s6 }
  0x31   :  { %p7830_p6 = scmp.ne.s32.totalorder %s59_s6, %s7829_s9  ;;  %p7835_p8 = scmp.lt.s32.totalorder %s7829_s9, %s7829_s9 }
  0x33   :  { %p7836_p9 = por %p7835_p8, %p7834_p7 }
  0x35   :  { %p7837_p10 = pnand %p7836_p9, %p7830_p6 }
  0x37   :  { %7840 = shalt.err (!%p7837_p10)
}
  0x38   :  { %64 = dma.hbm_to_vmem [thread:$0]  %s10337_s5, 8192, %s59_s6, [#allocation10], %s7916_s20, %s7916_s20, %s7917_s21  }
  0x39   :  { %s7920_s19 = smov [#allocation14]   ;;  %s7921_s23 = smov [#allocation17]  }
  0x3a   :  { %s84_s22 = sshll.u32 %s7920_s19, 4  ;;  %s108_s1 = sshll.u32 %s7921_s23, 4  ;;  %s85_s22 = int_to_ptr.vmem [resolvable:$true] %s84_s22  ;;  %s109_s1 = int_to_ptr.vmem [resolvable:$true] %s108_s1 }
  0x3b   :  { %s7849_s4 = scalar_lea.vmem %s85_s22, 4096  ;;  %p7854_p12 = scmp.lt.s32.totalorder %s85_s22, %s85_s22 }
  0x3c   :  { %p7850_p11 = scmp.ne.s32.totalorder %s85_s22, %s7849_s4  ;;  %p7855_p13 = scmp.lt.s32.totalorder %s7849_s4, %s7849_s4 }
  0x3e   :  { %p7856_p0 = por %p7855_p13, %p7854_p12 }
  0x40   :  { %p7857_p1 = pnand %p7856_p0, %p7850_p11 }
  0x42   :  { %7860 = shalt.err (!%p7857_p1)
}
  0x43   :  { %90 = dma.hbm_to_vmem [thread:$0]  %s10340_s8, 4096, %s85_s22, [#allocation13], %s7912_s28, %s7912_s28, %s7913_s29  }
  0x44   :  { %s7869_s5 = scalar_lea.vmem %s109_s1, 1024  ;;  %p7874_p3 = scmp.lt.s32.totalorder %s109_s1, %s109_s1 }
  0x45   :  { %p7870_p2 = scmp.ne.s32.totalorder %s109_s1, %s7869_s5  ;;  %p7875_p4 = scmp.lt.s32.totalorder %s7869_s5, %s7869_s5 }
  0x47   :  { %p7876_p5 = por %p7875_p4, %p7874_p3 }
  0x49   :  { %p7877_p6 = pnand %p7876_p5, %p7870_p2 }
  0x4b   :  { %7880 = shalt.err (!%p7877_p6)
}
  0x4c   :  { %s7922_s20 = smov 64   ;;  %s7923_s21 = smov 4  }
  0x4d   :  { %114 = dma.hbm_to_vmem [thread:$0]  %s10342_s10, 1024, %s109_s1, [#allocation16], %s7922_s20, %s7922_s20, %s7923_s21  }
  0x4e   :  { %s7924_s30 = smov [#allocation18]  }
  0x4f   :  { %s120_s6 = sshll.u32 %s7924_s30, 4  ;;  %s121_s6 = int_to_ptr.vmem [resolvable:$true] %s120_s6 }
  0x50   :  { %s7889_s14 = scalar_lea.vmem %s121_s6, 1024  ;;  %p7894_p8 = scmp.lt.s32.totalorder %s121_s6, %s121_s6 }
  0x51   :  { %p7890_p7 = scmp.ne.s32.totalorder %s121_s6, %s7889_s14  ;;  %p7895_p9 = scmp.lt.s32.totalorder %s7889_s14, %s7889_s14 }
  0x53   :  { %p7896_p10 = por %p7895_p9, %p7894_p8 }
  0x55   :  { %p7897_p11 = pnand %p7896_p10, %p7890_p7 }
  0x57   :  { %7900 = shalt.err (!%p7897_p11)
}
  0x58   :  { %126 = dma.hbm_to_vmem [thread:$0]  %s10343_s11, 1024, %s121_s6, [#allocation19], %s7922_s20, %s7922_s20, %s7923_s21  }
  0x59   :  { %7901 = dma.done.wait [#allocation8], 8192  }
  0x5a   :  { %7902 = vsyncadd [#allocation8], 4294959104 }
  0x5b   :  { %7903 = dma.done.wait [#allocation10], 12288  }
  0x5c   :  { %7904 = vsyncadd [#allocation10], 4294955008 }
  0x5d   :  { %7905 = dma.done.wait [#allocation13], 12288  }
  0x5e   :  { %7906 = vsyncadd [#allocation13], 4294955008 }
  0x5f   :  { %7907 = dma.done.wait [#allocation16], 5120  }
  0x60   :  { %7908 = vsyncadd [#allocation16], 4294962176 }
  0x61   :  { %7909 = dma.done.wait [#allocation19], 1024  }
  0x62   :  { %7910 = vsyncadd [#allocation19], 4294966272  ;;  %v10346_v0 = vmov 0   ;;  %v219_v1 = vld [vmem:[#allocation7 + $0x1c0] sm:$0xff]  ;;  %v220_v3 = vld [vmem:[#allocation7 + $0x1c8] sm:$0xff]  ;;  %vm7927_vm0 = vmmov 0  }
  0x63   :  { %645 = vmatprep.mubr.bf16.mxu0 %v10346_v0  ;;  %718 = vmatprep.mubr.bf16.mxu1 %v10346_v0  ;;  %v223_v2 = vld [vmem:[#allocation7 + $0x1e0] sm:$0xff]  ;;  %v224_v5 = vld [vmem:[#allocation7 + $0x1e8] sm:$0xff]  ;;  %v221_v62 = vld [vmem:[#allocation7 + $0x1d0] sm:$0xff]  ;;  %vm5903_vm1 = vcmask 1043456  }
  0x64   :  { %v6276_v4 = vcombine.high %v219_v1, %v223_v2  ;;  %v6275_v6 = vcombine.low %v219_v1, %v223_v2  ;;  %v211_v7 = vld [vmem:[#allocation7 + $0x180] sm:$0xff]  ;;  %v6278_v9 = vcombine.high %v220_v3, %v224_v5  ;;  %v6277_v10 = vcombine.low %v220_v3, %v224_v5  ;;  %v212_v12 = vld [vmem:[#allocation7 + $0x188] sm:$0xff]  ;;  %v225_v1 = vld [vmem:[#allocation7 + $0x1f0] sm:$0xff] }
  0x65   :  { %v215_v8 = vld [vmem:[#allocation7 + $0x1a0] sm:$0xff]  ;;  %v216_v13 = vld [vmem:[#allocation7 + $0x1a8] sm:$0xff]  ;;  %v222_v2 = vld [vmem:[#allocation7 + $0x1d8] sm:$0xff] }
  0x66   :  { %v6268_v11 = vcombine.high %v211_v7, %v215_v8  ;;  %v203_v14 = vld [vmem:[#allocation7 + $0x140] sm:$0xff]  ;;  %613 = vmatprep.subr.bf16.mxu0 %v6276_v4  ;;  %v6270_v15 = vcombine.high %v212_v12, %v216_v13  ;;  %v204_v17 = vld [vmem:[#allocation7 + $0x148] sm:$0xff]  ;;  %686 = vmatprep.subr.bf16.mxu1 %v6278_v9  ;;  %v6267_v19 = vcombine.low %v211_v7, %v215_v8  ;;  %v226_v3 = vld [vmem:[#allocation7 + $0x1f8] sm:$0xff] }
  0x67   :  { %v207_v16 = vld [vmem:[#allocation7 + $0x160] sm:$0xff]  ;;  %v208_v18 = vld [vmem:[#allocation7 + $0x168] sm:$0xff]  ;;  %614 = vmatpush1.bf16.msra.mxu0 %v6275_v6  ;;  %687 = vmatpush1.bf16.msra.mxu1 %v6277_v10  ;;  %v6269_v20 = vcombine.low %v212_v12, %v216_v13  ;;  %v6280_v7 = vcombine.high %v221_v62, %v225_v1  ;;  %v213_v8 = vld [vmem:[#allocation7 + $0x190] sm:$0xff]  ;;  %v6282_v9 = vcombine.high %v222_v2, %v226_v3 }
  0x68   :  { %615 = vmatprep.subr.bf16.mxu0 %v6268_v11  ;;  %v6260_v21 = vcombine.high %v203_v14, %v207_v16  ;;  %688 = vmatprep.subr.bf16.mxu1 %v6270_v15  ;;  %v6262_v22 = vcombine.high %v204_v17, %v208_v18  ;;  %v195_v23 = vld [vmem:[#allocation7 + $0x100] sm:$0xff]  ;;  %v196_v25 = vld [vmem:[#allocation7 + $0x108] sm:$0xff]  ;;  %v6259_v27 = vcombine.low %v203_v14, %v207_v16  ;;  %v217_v10 = vld [vmem:[#allocation7 + $0x1b0] sm:$0xff] }
  0x69   :  { %v199_v24 = vld [vmem:[#allocation7 + $0x120] sm:$0xff]  ;;  %v200_v26 = vld [vmem:[#allocation7 + $0x128] sm:$0xff]  ;;  %v6261_v28 = vcombine.low %v204_v17, %v208_v18  ;;  %v214_v11 = vld [vmem:[#allocation7 + $0x198] sm:$0xff]  ;;  %v6279_v13 = vcombine.low %v221_v62, %v225_v1  ;;  %v6281_v14 = vcombine.low %v222_v2, %v226_v3  ;;  %v6272_v15 = vcombine.high %v213_v8, %v217_v10 }
  0x6a   :  { %v6252_v29 = vcombine.high %v195_v23, %v199_v24  ;;  %v6254_v30 = vcombine.high %v196_v25, %v200_v26  ;;  %v187_v31 = vld [vmem:[#allocation7 + $0xc0] sm:$0xff]  ;;  %v188_v33 = vld [vmem:[#allocation7 + $0xc8] sm:$0xff]  ;;  %v6251_v35 = vcombine.low %v195_v23, %v199_v24  ;;  %v6253_v36 = vcombine.low %v196_v25, %v200_v26  ;;  %v218_v12 = vld [vmem:[#allocation7 + $0x1b8] sm:$0xff] }
  0x6b   :  { %616 = vmatpush1.bf16.msra.mxu0 %v6267_v19  ;;  %689 = vmatpush1.bf16.msra.mxu1 %v6269_v20  ;;  %v191_v32 = vld [vmem:[#allocation7 + $0xe0] sm:$0xff]  ;;  %v192_v34 = vld [vmem:[#allocation7 + $0xe8] sm:$0xff]  ;;  %v205_v16 = vld [vmem:[#allocation7 + $0x150] sm:$0xff]  ;;  %v6274_v17 = vcombine.high %v214_v11, %v218_v12 }
  0x6c   :  { %617 = vmatprep.subr.bf16.mxu0 %v6260_v21  ;;  %690 = vmatprep.subr.bf16.mxu1 %v6262_v22  ;;  %v6244_v37 = vcombine.high %v187_v31, %v191_v32  ;;  %v179_v38 = vld [vmem:[#allocation7 + $0x80] sm:$0xff]  ;;  %v6246_v39 = vcombine.high %v188_v33, %v192_v34  ;;  %v180_v41 = vld [vmem:[#allocation7 + $0x88] sm:$0xff]  ;;  %v6243_v43 = vcombine.low %v187_v31, %v191_v32  ;;  %v209_v18 = vld [vmem:[#allocation7 + $0x170] sm:$0xff] }
  0x6d   :  { %v183_v40 = vld [vmem:[#allocation7 + $0xa0] sm:$0xff]  ;;  %v184_v42 = vld [vmem:[#allocation7 + $0xa8] sm:$0xff]  ;;  %v6245_v44 = vcombine.low %v188_v33, %v192_v34  ;;  %v206_v19 = vld [vmem:[#allocation7 + $0x158] sm:$0xff]  ;;  %v6271_v21 = vcombine.low %v213_v8, %v217_v10  ;;  %v6273_v22 = vcombine.low %v214_v11, %v218_v12  ;;  %v6264_v24 = vcombine.high %v205_v16, %v209_v18 }
  0x6e   :  { %v6236_v45 = vcombine.high %v179_v38, %v183_v40  ;;  %v171_v46 = vld [vmem:[#allocation7 + $0x40] sm:$0xff]  ;;  %v6238_v47 = vcombine.high %v180_v41, %v184_v42  ;;  %v172_v49 = vld [vmem:[#allocation7 + $0x48] sm:$0xff]  ;;  %v6235_v51 = vcombine.low %v179_v38, %v183_v40  ;;  %v6237_v52 = vcombine.low %v180_v41, %v184_v42  ;;  %v210_v20 = vld [vmem:[#allocation7 + $0x178] sm:$0xff] }
  0x6f   :  { %618 = vmatpush1.bf16.msra.mxu0 %v6259_v27  ;;  %691 = vmatpush1.bf16.msra.mxu1 %v6261_v28  ;;  %v175_v48 = vld [vmem:[#allocation7 + $0x60] sm:$0xff]  ;;  %v176_v50 = vld [vmem:[#allocation7 + $0x68] sm:$0xff]  ;;  %v197_v25 = vld [vmem:[#allocation7 + $0x110] sm:$0xff]  ;;  %v6266_v26 = vcombine.high %v206_v19, %v210_v20  ;;  %v6265_v31 = vcombine.low %v206_v19, %v210_v20 }
  0x70   :  { %619 = vmatprep.subr.bf16.mxu0 %v6252_v29  ;;  %692 = vmatprep.subr.bf16.mxu1 %v6254_v30  ;;  %v6228_v53 = vcombine.high %v171_v46, %v175_v48  ;;  %v6230_v54 = vcombine.high %v172_v49, %v176_v50  ;;  %v163_v55 = vld [vmem:[#allocation7] sm:$0xff]  ;;  %v164_v57 = vld [vmem:[#allocation7 + $0x8] sm:$0xff]  ;;  %v6227_v59 = vcombine.low %v171_v46, %v175_v48  ;;  %v201_v27 = vld [vmem:[#allocation7 + $0x130] sm:$0xff] }
  0x71   :  { %v167_v56 = vld [vmem:[#allocation7 + $0x20] sm:$0xff]  ;;  %v168_v58 = vld [vmem:[#allocation7 + $0x28] sm:$0xff]  ;;  %v6229_v60 = vcombine.low %v172_v49, %v176_v50  ;;  %v198_v28 = vld [vmem:[#allocation7 + $0x118] sm:$0xff]  ;;  %v6263_v30 = vcombine.low %v205_v16, %v209_v18  ;;  %v6256_v32 = vcombine.high %v197_v25, %v201_v27  ;;  %v6255_v38 = vcombine.low %v197_v25, %v201_v27 }
  0x72   :  { %v6220_v61 = vcombine.high %v163_v55, %v167_v56  ;;  %v6222_v63 = vcombine.high %v164_v57, %v168_v58  ;;  %v6219_v4 = vcombine.low %v163_v55, %v167_v56  ;;  %v6221_v5 = vcombine.low %v164_v57, %v168_v58  ;;  %v8045_v6 = vld [vmem:[%s10332_s0] sm:$0xff]   ;;  %v8052_v23 = vld [vmem:[%s10332_s0 + $0x8] sm:$0xff]   ;;  %v202_v29 = vld [vmem:[#allocation7 + $0x138] sm:$0xff] }
  0x73   :  { %620 = vmatpush1.bf16.msra.mxu0 %v6251_v35  ;;  %693 = vmatpush1.bf16.msra.mxu1 %v6253_v36  ;;  %v189_v33 = vld [vmem:[#allocation7 + $0xd0] sm:$0xff]  ;;  %v6258_v34 = vcombine.high %v198_v28, %v202_v29  ;;  %v190_v36 = vld [vmem:[#allocation7 + $0xd8] sm:$0xff] }
  0x74   :  { %621 = vmatprep.subr.bf16.mxu0 %v6244_v37  ;;  %694 = vmatprep.subr.bf16.mxu1 %v6246_v39  ;;  %v193_v35 = vld [vmem:[#allocation7 + $0xf0] sm:$0xff]  ;;  %v194_v37 = vld [vmem:[#allocation7 + $0xf8] sm:$0xff]  ;;  %v6257_v39 = vcombine.low %v198_v28, %v202_v29 }
  0x75   :  { %v8061_v40 = vld [vmem:[%s10332_s0 + $0x10] sm:$0xff]   ;;  %v6248_v41 = vcombine.high %v189_v33, %v193_v35  ;;  %v186_v46 = vld [vmem:[#allocation7 + $0xb8] sm:$0xff]  ;;  %v6249_v48 = vcombine.low %v190_v36, %v194_v37 }
  0x76   :  { %v181_v42 = vld [vmem:[#allocation7 + $0x90] sm:$0xff]  ;;  %v8070_v57 = vld [vmem:[%s10332_s0 + $0x18] sm:$0xff]  }
  0x77   :  { %622 = vmatpush1.bf16.msra.mxu0 %v6243_v43  ;;  %695 = vmatpush1.bf16.msra.mxu1 %v6245_v44  ;;  %v6250_v43 = vcombine.high %v190_v36, %v194_v37  ;;  %v185_v44 = vld [vmem:[#allocation7 + $0xb0] sm:$0xff]  ;;  %v166_v62 = vld [vmem:[#allocation7 + $0x18] sm:$0xff] }
  0x78   :  { %623 = vmatprep.subr.bf16.mxu0 %v6236_v45  ;;  %696 = vmatprep.subr.bf16.mxu1 %v6238_v47  ;;  %v182_v45 = vld [vmem:[#allocation7 + $0x98] sm:$0xff]  ;;  %v6247_v47 = vcombine.low %v189_v33, %v193_v35  ;;  %v6240_v49 = vcombine.high %v181_v42, %v185_v44  ;;  %v173_v50 = vld [vmem:[#allocation7 + $0x50] sm:$0xff]  ;;  %v6239_v55 = vcombine.low %v181_v42, %v185_v44 }
  0x79   :  { %v6241_v56 = vcombine.low %v182_v45, %v186_v46  ;;  %v8079_v8 = vld [vmem:[%s10335_s3 + $0xe4] ss:$16 sps:$4 sm:$0xff]   ;;  %v8091_v10 = vld [vmem:[%s10335_s3 + $0xe0] ss:$16 sps:$4 sm:$0xff]   ;;  %v8096_v11 = vld [vmem:[%s10335_s3 + $0xe8] ss:$16 sps:$4 sm:$0xff]  }
  0x7a   :  { %v8102_v12 = vld [vmem:[%s10335_s3 + $0xc4] ss:$16 sps:$4 sm:$0xff]   ;;  %v8140_v18 = vld [vmem:[%s10335_s3 + $0xa0] ss:$16 sps:$4 sm:$0xff]   ;;  %v8157_v20 = vld [vmem:[%s10335_s3 + $0x8c] ss:$16 sps:$4 sm:$0xff]  }
  0x7b   :  { %624 = vmatpush1.bf16.msra.mxu0 %v6235_v51  ;;  %697 = vmatpush1.bf16.msra.mxu1 %v6237_v52  ;;  %v6242_v51 = vcombine.high %v182_v45, %v186_v46  ;;  %v177_v52 = vld [vmem:[#allocation7 + $0x70] sm:$0xff]  ;;  %v8183_v25 = vld [vmem:[%s10335_s3 + $0x6c] ss:$16 sps:$4 sm:$0xff]   ;;  %v8290_v42 = vld [vmem:[#allocation9 + $0xe8] ss:$16 sps:$4 sm:$0xff]  }
  0x7c   :  { %625 = vmatprep.subr.bf16.mxu0 %v6228_v53  ;;  %698 = vmatprep.subr.bf16.mxu1 %v6230_v54  ;;  %v174_v53 = vld [vmem:[#allocation7 + $0x58] sm:$0xff]  ;;  %v6232_v58 = vcombine.high %v173_v50, %v177_v52  ;;  %v6231_v1 = vcombine.low %v173_v50, %v177_v52  ;;  %v8124_v16 = vld [vmem:[%s10335_s3 + $0xa4] ss:$16 sps:$4 sm:$0xff]   ;;  %v8217_v29 = vld [vmem:[%s10335_s3 + $0x40] ss:$16 sps:$4 sm:$0xff]  }
  0x7d   :  { %v178_v54 = vld [vmem:[#allocation7 + $0x78] sm:$0xff]  ;;  %v8151_v19 = vld [vmem:[%s10335_s3 + $0x84] ss:$16 sps:$4 sm:$0xff]   ;;  %v8244_v33 = vld [vmem:[%s10335_s3 + $0x20] ss:$16 sps:$4 sm:$0xff]  }
  0x7e   :  { %v6233_v2 = vcombine.low %v174_v53, %v178_v54  ;;  %v8203_v27 = vld [vmem:[%s10335_s3 + $0x44] ss:$16 sps:$4 sm:$0xff]   ;;  %v8209_v28 = vld [vmem:[%s10335_s3 + $0x4c] ss:$16 sps:$4 sm:$0xff]   ;;  %v8269_v37 = vld [vmem:[%s10335_s3] ss:$16 sps:$4 sm:$0xff]  }
  0x7f   :  { %626 = vmatpush1.bf16.msra.mxu0 %v6227_v59  ;;  %699 = vmatpush1.bf16.msra.mxu1 %v6229_v60  ;;  %v165_v59 = vld [vmem:[#allocation7 + $0x10] sm:$0xff]  ;;  %v6234_v60 = vcombine.high %v174_v53, %v178_v54  ;;  %v8261_v36 = vld [vmem:[%s10335_s3 + $0xc] ss:$16 sps:$4 sm:$0xff]   ;;  %10422 = vst [vmem:[#allocation28_spill] sm:$0xff] %v8269_v37  ;;  %v8307_v46 = vld [vmem:[#allocation9 + $0xc8] ss:$16 sps:$4 sm:$0xff]  }
  0x80   :  { %627 = vmatprep.subr.bf16.mxu0 %v6220_v61  ;;  %700 = vmatprep.subr.bf16.mxu1 %v6222_v63  ;;  %v169_v61 = vld [vmem:[#allocation7 + $0x30] sm:$0xff]  ;;  %v170_v63 = vld [vmem:[#allocation7 + $0x38] sm:$0xff]  ;;  %10421 = vst [vmem:[#allocation27_spill] sm:$0xff] %v8261_v36 }
  0x81   :  { %v6224_v3 = vcombine.high %v165_v59, %v169_v61  ;;  %v8255_v35 = vld [vmem:[%s10335_s3 + $0x4] ss:$16 sps:$4 sm:$0xff]   ;;  %v8295_v44 = vld [vmem:[#allocation9 + $0xcc] ss:$16 sps:$4 sm:$0xff]   ;;  %v8303_v45 = vld [vmem:[#allocation9 + $0xc0] ss:$16 sps:$4 sm:$0xff]  }
  0x82   :  { %10420 = vst [vmem:[#allocation26_spill] sm:$0xff] %v8255_v35  ;;  %v8321_v50 = vld [vmem:[#allocation9 + $0xa8] ss:$16 sps:$4 sm:$0xff]   ;;  %v8326_v52 = vld [vmem:[#allocation9 + $0x8c] ss:$16 sps:$4 sm:$0xff]  }
  0x83   :  { %628 = vmatpush1.bf16.msra.mxu0 %v6219_v4  ;;  %701 = vmatpush1.bf16.msra.mxu1 %v6221_v5  ;;  %v6226_v4 = vcombine.high %v166_v62, %v170_v63  ;;  %v6223_v5 = vcombine.low %v165_v59, %v169_v61  ;;  %v8329_v53 = vld [vmem:[#allocation9 + $0x80] ss:$16 sps:$4 sm:$0xff]   ;;  %v8333_v54 = vld [vmem:[#allocation9 + $0x88] ss:$16 sps:$4 sm:$0xff]   ;;  %v8347_v59 = vld [vmem:[#allocation9 + $0x44] ss:$16 sps:$4 sm:$0xff]  }
  0x84   :  { %759 = vmatprep.subr.bf16.mxu0 %v6280_v7  ;;  %832 = vmatprep.subr.bf16.mxu1 %v6282_v9  ;;  %v6225_v7 = vcombine.low %v166_v62, %v170_v63  ;;  %v8085_v9 = vld [vmem:[%s10335_s3 + $0xec] ss:$16 sps:$4 sm:$0xff]   ;;  %v8353_v61 = vld [vmem:[#allocation9 + $0x40] ss:$16 sps:$4 sm:$0xff]   ;;  %v8357_v62 = vld [vmem:[#allocation9 + $0x48] ss:$16 sps:$4 sm:$0xff]  }
  0x85   :  { %v8359_v63 = vld [vmem:[#allocation9 + $0x24] ss:$16 sps:$4 sm:$0xff]  }
  0x86   :  { %646 = vmatmul.mubr.bf16.vlgmr.msra.gmra.mxu0 %v8045_v6  ;;  %719 = vmatmul.mubr.bf16.vlgmr.msra.gmra.mxu1 %v8045_v6 }
  0x87   :  { %760 = vmatpush1.bf16.msra.mxu0 %v6279_v13  ;;  %833 = vmatpush1.bf16.msra.mxu1 %v6281_v14  ;;  %v8108_v13 = vld [vmem:[%s10335_s3 + $0xcc] ss:$16 sps:$4 sm:$0xff]   ;;  %v8114_v14 = vld [vmem:[%s10335_s3 + $0xc0] ss:$16 sps:$4 sm:$0xff]  }
  0x88   :  { %761 = vmatprep.subr.bf16.mxu0 %v6272_v15  ;;  %834 = vmatprep.subr.bf16.mxu1 %v6274_v17  ;;  %v8119_v15 = vld [vmem:[%s10335_s3 + $0xc8] ss:$16 sps:$4 sm:$0xff]   ;;  %v8131_v17 = vld [vmem:[%s10335_s3 + $0xac] ss:$16 sps:$4 sm:$0xff]  }
  0x89   :  { %655 = vmatprep.mubr.bf16.mxu0 %v10346_v0  ;;  %728 = vmatprep.mubr.bf16.mxu1 %v10346_v0 }
  0x8b   :  { %762 = vmatpush1.bf16.msra.mxu0 %v6271_v21  ;;  %835 = vmatpush1.bf16.msra.mxu1 %v6273_v22  ;;  %v8165_v21 = vld [vmem:[%s10335_s3 + $0x80] ss:$16 sps:$4 sm:$0xff]   ;;  %v8171_v22 = vld [vmem:[%s10335_s3 + $0x88] ss:$16 sps:$4 sm:$0xff]  }
  0x8c   :  { %763 = vmatprep.subr.bf16.mxu0 %v6264_v24  ;;  %836 = vmatprep.subr.bf16.mxu1 %v6266_v26  ;;  %v8176_v24 = vld [vmem:[%s10335_s3 + $0x64] ss:$16 sps:$4 sm:$0xff]   ;;  %v8192_v26 = vld [vmem:[%s10335_s3 + $0x60] ss:$16 sps:$4 sm:$0xff]  }
  0x8e   :  { %656 = vmatmul.mubr.bf16.gmra.mxu0 %v8052_v23  ;;  %729 = vmatmul.mubr.bf16.gmra.mxu1 %v8052_v23 }
  0x8f   :  { %764 = vmatpush1.bf16.msra.mxu0 %v6263_v30  ;;  %837 = vmatpush1.bf16.msra.mxu1 %v6265_v31  ;;  %v8223_v30 = vld [vmem:[%s10335_s3 + $0x48] ss:$16 sps:$4 sm:$0xff]   ;;  %v8228_v31 = vld [vmem:[%s10335_s3 + $0x24] ss:$16 sps:$4 sm:$0xff]  }
  0x90   :  { %765 = vmatprep.subr.bf16.mxu0 %v6256_v32  ;;  %838 = vmatprep.subr.bf16.mxu1 %v6258_v34  ;;  %v8235_v32 = vld [vmem:[%s10335_s3 + $0x2c] ss:$16 sps:$4 sm:$0xff]   ;;  %v8250_v34 = vld [vmem:[%s10335_s3 + $0x28] ss:$16 sps:$4 sm:$0xff]  }
  0x91   :  { %665 = vmatprep.mubr.bf16.mxu0 %v10346_v0  ;;  %738 = vmatprep.mubr.bf16.mxu1 %v10346_v0  ;;  %10419 = vst [vmem:[#allocation25_spill] sm:$0xff] %v8250_v34 }
  0x93   :  { %766 = vmatpush1.bf16.msra.mxu0 %v6255_v38  ;;  %839 = vmatpush1.bf16.msra.mxu1 %v6257_v39  ;;  %v8275_v38 = vld [vmem:[%s10335_s3 + $0x8] ss:$16 sps:$4 sm:$0xff]   ;;  %v8277_v39 = vld [vmem:[#allocation9 + $0xe4] ss:$16 sps:$4 sm:$0xff]  }
  0x94   :  { %767 = vmatprep.subr.bf16.mxu0 %v6248_v41  ;;  %840 = vmatprep.subr.bf16.mxu1 %v6250_v43  ;;  %10423 = vst [vmem:[#allocation29_spill] sm:$0xff] %v8275_v38  ;;  %10424 = vst [vmem:[#allocation30_spill] sm:$0xff] %v8277_v39  ;;  %v8287_v41 = vld [vmem:[#allocation9 + $0xe0] ss:$16 sps:$4 sm:$0xff]   ;;  %v8292_v43 = vld [vmem:[#allocation9 + $0xc4] ss:$16 sps:$4 sm:$0xff]  }
  0x96   :  { %666 = vmatmul.mubr.bf16.gmra.mxu0 %v8061_v40  ;;  %739 = vmatmul.mubr.bf16.gmra.mxu1 %v8061_v40 }
  0x97   :  { %768 = vmatpush1.bf16.msra.mxu0 %v6247_v47  ;;  %841 = vmatpush1.bf16.msra.mxu1 %v6249_v48  ;;  %v8309_v47 = vld [vmem:[#allocation9 + $0xa4] ss:$16 sps:$4 sm:$0xff]   ;;  %v8312_v48 = vld [vmem:[#allocation9 + $0xac] ss:$16 sps:$4 sm:$0xff]  }
  0x98   :  { %769 = vmatprep.subr.bf16.mxu0 %v6240_v49  ;;  %842 = vmatprep.subr.bf16.mxu1 %v6242_v51  ;;  %v8317_v49 = vld [vmem:[#allocation9 + $0xa0] ss:$16 sps:$4 sm:$0xff]   ;;  %v8323_v51 = vld [vmem:[#allocation9 + $0x84] ss:$16 sps:$4 sm:$0xff]  }
  0x99   :  { %675 = vmatprep.mubr.bf16.mxu0 %v10346_v0  ;;  %748 = vmatprep.mubr.bf16.mxu1 %v10346_v0 }
  0x9b   :  { %770 = vmatpush1.bf16.msra.mxu0 %v6239_v55  ;;  %843 = vmatpush1.bf16.msra.mxu1 %v6241_v56  ;;  %v8335_v55 = vld [vmem:[#allocation9 + $0x64] ss:$16 sps:$4 sm:$0xff]   ;;  %v8338_v56 = vld [vmem:[#allocation9 + $0x6c] ss:$16 sps:$4 sm:$0xff]  }
  0x9c   :  { %771 = vmatprep.subr.bf16.mxu0 %v6232_v58  ;;  %844 = vmatprep.subr.bf16.mxu1 %v6234_v60  ;;  %v8345_v58 = vld [vmem:[#allocation9 + $0x68] ss:$16 sps:$4 sm:$0xff]   ;;  %v8350_v60 = vld [vmem:[#allocation9 + $0x4c] ss:$16 sps:$4 sm:$0xff]  }
  0x9e   :  { %676 = vmatmul.mubr.bf16.gmra.mxu0 %v8070_v57  ;;  %749 = vmatmul.mubr.bf16.gmra.mxu1 %v8070_v57 }
  0x9f   :  { %772 = vmatpush1.bf16.msra.mxu0 %v6231_v1  ;;  %845 = vmatpush1.bf16.msra.mxu1 %v6233_v2  ;;  %v8362_v1 = vld [vmem:[#allocation9 + $0x2c] ss:$16 sps:$4 sm:$0xff]   ;;  %v8365_v2 = vld [vmem:[#allocation9 + $0x20] ss:$16 sps:$4 sm:$0xff]  }
  0xa0   :  { %773 = vmatprep.subr.bf16.mxu0 %v6224_v3  ;;  %846 = vmatprep.subr.bf16.mxu1 %v6226_v4  ;;  %10426 = vst [vmem:[#allocation32_spill] sm:$0xff] %v8362_v1  ;;  %v8369_v3 = vld [vmem:[#allocation9 + $0x28] ss:$16 sps:$4 sm:$0xff]   ;;  %v8371_v4 = vld [vmem:[#allocation9 + $0x4] ss:$16 sps:$4 sm:$0xff]  }
  0xa1   :  { %791 = vmatprep.mubr.bf16.mxu0 %v10346_v0  ;;  %864 = vmatprep.mubr.bf16.mxu1 %v10346_v0  ;;  %10427 = vst [vmem:[#allocation33_spill] sm:$0xff] %v8369_v3  ;;  %10428 = vst [vmem:[#allocation34_spill] sm:$0xff] %v8371_v4 }
  0xa3   :  { %774 = vmatpush1.bf16.msra.mxu0 %v6223_v5  ;;  %847 = vmatpush1.bf16.msra.mxu1 %v6225_v7  ;;  %v8374_v5 = vld [vmem:[#allocation9 + $0xc] ss:$16 sps:$4 sm:$0xff]   ;;  %v8377_v7 = vld [vmem:[#allocation9] ss:$16 sps:$4 sm:$0xff]  }
  0xa4   :  { %1201 = vmatprep.subr.bf16.mxu0 %v8079_v8  ;;  %1244 = vmatprep.subr.bf16.mxu1 %v8085_v9  ;;  %10429 = vst [vmem:[#allocation35_spill] sm:$0xff] %v8374_v5  ;;  %10430 = vst [vmem:[#allocation36_spill] sm:$0xff] %v8377_v7 }
  0xa6   :  { %792 = vmatmul.mubr.bf16.vlgmr.msra.gmra.mxu0 %v8045_v6  ;;  %865 = vmatmul.mubr.bf16.vlgmr.msra.gmra.mxu1 %v8045_v6  ;;  %v8146_v6 = vld [vmem:[%s10335_s3 + $0xa8] ss:$16 sps:$4 sm:$0xff]  }
  0xa7   :  { %1202 = vmatpush1.bf16.msra.mxu0 %v8091_v10  ;;  %1245 = vmatpush1.bf16.msra.mxu1 %v8096_v11 }
  0xa8   :  { %1203 = vmatprep.subr.bf16.mxu0 %v8102_v12  ;;  %1246 = vmatprep.subr.bf16.mxu1 %v8108_v13 }
  0xa9   :  { %801 = vmatprep.mubr.bf16.mxu0 %v10346_v0  ;;  %874 = vmatprep.mubr.bf16.mxu1 %v10346_v0 }
  0xab   :  { %1204 = vmatpush1.bf16.msra.mxu0 %v8114_v14  ;;  %1247 = vmatpush1.bf16.msra.mxu1 %v8119_v15 }
  0xac   :  { %1205 = vmatprep.subr.bf16.mxu0 %v8124_v16  ;;  %1248 = vmatprep.subr.bf16.mxu1 %v8131_v17 }
  0xae   :  { %802 = vmatmul.mubr.bf16.gmra.mxu0 %v8052_v23  ;;  %875 = vmatmul.mubr.bf16.gmra.mxu1 %v8052_v23  ;;  %v8198_v23 = vld [vmem:[%s10335_s3 + $0x68] ss:$16 sps:$4 sm:$0xff]  }
  0xaf   :  { %1206 = vmatpush1.bf16.msra.mxu0 %v8140_v18  ;;  %1249 = vmatpush1.bf16.msra.mxu1 %v8146_v6 }
  0xb0   :  { %1207 = vmatprep.subr.bf16.mxu0 %v8151_v19  ;;  %1250 = vmatprep.subr.bf16.mxu1 %v8157_v20 }
  0xb1   :  { %811 = vmatprep.mubr.bf16.mxu0 %v10346_v0  ;;  %884 = vmatprep.mubr.bf16.mxu1 %v10346_v0 }
  0xb3   :  { %1208 = vmatpush1.bf16.msra.mxu0 %v8165_v21  ;;  %1251 = vmatpush1.bf16.msra.mxu1 %v8171_v22 }
  0xb4   :  { %1209 = vmatprep.subr.bf16.mxu0 %v8176_v24  ;;  %1252 = vmatprep.subr.bf16.mxu1 %v8183_v25 }
  0xb6   :  { %812 = vmatmul.mubr.bf16.gmra.mxu0 %v8061_v40  ;;  %885 = vmatmul.mubr.bf16.gmra.mxu1 %v8061_v40  ;;  %v8281_v40 = vld [vmem:[#allocation9 + $0xec] ss:$16 sps:$4 sm:$0xff]  }
  0xb7   :  { %1210 = vmatpush1.bf16.msra.mxu0 %v8192_v26  ;;  %1253 = vmatpush1.bf16.msra.mxu1 %v8198_v23  ;;  %10425 = vst [vmem:[#allocation31_spill] sm:$0xff] %v8281_v40 }
  0xb8   :  { %1211 = vmatprep.subr.bf16.mxu0 %v8203_v27  ;;  %1254 = vmatprep.subr.bf16.mxu1 %v8209_v28 }
  0xb9   :  { %821 = vmatprep.mubr.bf16.mxu0 %v10346_v0  ;;  %894 = vmatprep.mubr.bf16.mxu1 %v10346_v0 }
  0xbb   :  { %1212 = vmatpush1.bf16.msra.mxu0 %v8217_v29  ;;  %1255 = vmatpush1.bf16.msra.mxu1 %v8223_v30 }
  0xbc   :  { %1213 = vmatprep.subr.bf16.mxu0 %v8228_v31  ;;  %1256 = vmatprep.subr.bf16.mxu1 %v8235_v32 }
  0xbe   :  { %822 = vmatmul.mubr.bf16.gmra.mxu0 %v8070_v57  ;;  %895 = vmatmul.mubr.bf16.gmra.mxu1 %v8070_v57  ;;  %v8341_v57 = vld [vmem:[#allocation9 + $0x60] ss:$16 sps:$4 sm:$0xff]  }
  0xbf   :  { %1214 = vmatpush1.bf16.msra.mxu0 %v8244_v33  ;;  %1257 = vmatpush1.bf16.msra.mxu1 %v8250_v34 }
  0xc0   :  { %1215 = vmatprep.subr.bf16.mxu0 %v8255_v35  ;;  %1258 = vmatprep.subr.bf16.mxu1 %v8261_v36 }
  0xc1   :  { %1233 = vmatprep.mubr.bf16.mxu0 %v10346_v0  ;;  %1276 = vmatprep.mubr.bf16.mxu1 %v10346_v0 }
  0xc3   :  { %1216 = vmatpush1.bf16.msra.mxu0 %v8269_v37  ;;  %1259 = vmatpush1.bf16.msra.mxu1 %v8275_v38 }
  0xc4   :  { %1512 = vmatprep.subr.bf16.mxu0 %v8277_v39  ;;  %1555 = vmatprep.subr.bf16.mxu1 %v8281_v40 }
  0xc6   :  { %1234 = vmatmul.mubr.bf16.vlgmr.msra.gmra.mxu0 %v10346_v0  ;;  %1277 = vmatmul.mubr.bf16.vlgmr.msra.gmra.mxu1 %v10346_v0 }
  0xc7   :  { %1513 = vmatpush1.bf16.msra.mxu0 %v8287_v41  ;;  %1556 = vmatpush1.bf16.msra.mxu1 %v8290_v42 }
  0xc8   :  { %1514 = vmatprep.subr.bf16.mxu0 %v8292_v43  ;;  %1557 = vmatprep.subr.bf16.mxu1 %v8295_v44 }
  0xc9   :  { %1544 = vmatprep.mubr.bf16.mxu0 %v10346_v0  ;;  %1587 = vmatprep.mubr.bf16.mxu1 %v10346_v0  ;;  %v8381_v0 = vld [vmem:[#allocation9 + $0x8] ss:$16 sps:$4 sm:$0xff]  }
  0xca   :  { %10431 = vst [vmem:[#allocation37_spill] sm:$0xff] %v8381_v0 }
  0xcb   :  { %1515 = vmatpush1.bf16.msra.mxu0 %v8303_v45  ;;  %1558 = vmatpush1.bf16.msra.mxu1 %v8307_v46 }
  0xcc   :  { %1516 = vmatprep.subr.bf16.mxu0 %v8309_v47  ;;  %1559 = vmatprep.subr.bf16.mxu1 %v8312_v48 }
  0xcf   :  { %1517 = vmatpush1.bf16.msra.mxu0 %v8317_v49  ;;  %1560 = vmatpush1.bf16.msra.mxu1 %v8321_v50 }
  0xd0   :  { %1518 = vmatprep.subr.bf16.mxu0 %v8323_v51  ;;  %1561 = vmatprep.subr.bf16.mxu1 %v8326_v52 }
  0xd3   :  { %1519 = vmatpush1.bf16.msra.mxu0 %v8329_v53  ;;  %1562 = vmatpush1.bf16.msra.mxu1 %v8333_v54 }
  0xd4   :  { %1520 = vmatprep.subr.bf16.mxu0 %v8335_v55  ;;  %1563 = vmatprep.subr.bf16.mxu1 %v8338_v56 }
  0xd7   :  { %1521 = vmatpush1.bf16.msra.mxu0 %v8341_v57  ;;  %1564 = vmatpush1.bf16.msra.mxu1 %v8345_v58 }
  0xd8   :  { %1522 = vmatprep.subr.bf16.mxu0 %v8347_v59  ;;  %1565 = vmatprep.subr.bf16.mxu1 %v8350_v60 }
  0xdb   :  { %1523 = vmatpush1.bf16.msra.mxu0 %v8353_v61  ;;  %1566 = vmatpush1.bf16.msra.mxu1 %v8357_v62 }
  0xdc   :  { %1524 = vmatprep.subr.bf16.mxu0 %v8359_v63  ;;  %1567 = vmatprep.subr.bf16.mxu1 %v8362_v1  ;;  %v10432_v1 = vmov 0  }
  0xdf   :  { %1525 = vmatpush1.bf16.msra.mxu0 %v8365_v2  ;;  %1568 = vmatpush1.bf16.msra.mxu1 %v8369_v3 }
  0xe0   :  { %1526 = vmatprep.subr.bf16.mxu0 %v8371_v4  ;;  %1569 = vmatprep.subr.bf16.mxu1 %v8374_v5 }
  0xe3   :  { %1527 = vmatpush1.bf16.msra.mxu0 %v8377_v7  ;;  %1570 = vmatpush1.bf16.msra.mxu1 %v8381_v0 }
  0xe4   :  { %1682 = vmatprep.subr.bf16.mxu0 %v8079_v8  ;;  %1725 = vmatprep.subr.bf16.mxu1 %v8085_v9  ;;  %v229_v8 = vlaneseq }
  0xe6   :  { %1545 = vmatmul.mubr.bf16.vlgmr.msra.gmra.mxu0 %v10432_v1  ;;  %1588 = vmatmul.mubr.bf16.vlgmr.msra.gmra.mxu1 %v10432_v1  ;;  %v8424_v9 = vshrl.u32 %v229_v8, 7 }
  0xe7   :  { %1683 = vmatpush1.bf16.msra.mxu0 %v8091_v10  ;;  %1726 = vmatpush1.bf16.msra.mxu1 %v8096_v11 }
  0xe8   :  { %1684 = vmatprep.subr.bf16.mxu0 %v8102_v12  ;;  %1727 = vmatprep.subr.bf16.mxu1 %v8108_v13  ;;  %10433 = vst [vmem:[#allocation38_spill] sm:$0xff] %v8424_v9  ;;  %v10352_v13 = vsub.s32 0, %v8424_v9 }
  0xe9   :  { %1714 = vmatprep.mubr.bf16.mxu0 %v10432_v1  ;;  %1757 = vmatprep.mubr.bf16.mxu1 %v10432_v1 }
  0xeb   :  { %1685 = vmatpush1.bf16.msra.mxu0 %v8114_v14  ;;  %1728 = vmatpush1.bf16.msra.mxu1 %v8119_v15  ;;  %v227_v15 = vld [vmem:[%s10334_s2] sm:$0xff] }
  0xec   :  { %1686 = vmatprep.subr.bf16.mxu0 %v8124_v16  ;;  %1729 = vmatprep.subr.bf16.mxu1 %v8131_v17  ;;  %v10350_v16 = vsub.s32 2, %v8424_v9 }
  0xef   :  { %1687 = vmatpush1.bf16.msra.mxu0 %v8140_v18  ;;  %1730 = vmatpush1.bf16.msra.mxu1 %v8146_v6  ;;  %v10349_v18 = vsub.s32 1, %v8424_v9 }
  0xf0   :  { %1688 = vmatprep.subr.bf16.mxu0 %v8151_v19  ;;  %1731 = vmatprep.subr.bf16.mxu1 %v8157_v20  ;;  %v10351_v19 = vsub.s32 3, %v8424_v9 }
  0xf3   :  { %1689 = vmatpush1.bf16.msra.mxu0 %v8165_v21  ;;  %1732 = vmatpush1.bf16.msra.mxu1 %v8171_v22  ;;  %v8449_v21 = vrot.slane %v227_v15, %v10352_v13 }
  0xf4   :  { %1690 = vmatprep.subr.bf16.mxu0 %v8176_v24  ;;  %1733 = vmatprep.subr.bf16.mxu1 %v8183_v25  ;;  %v8455_v24 = vrot.slane %v227_v15, %v10350_v16 }
  0xf7   :  { %1691 = vmatpush1.bf16.msra.mxu0 %v8192_v26  ;;  %1734 = vmatpush1.bf16.msra.mxu1 %v8198_v23  ;;  %v8459_v26 = vrot.slane %v227_v15, %v10349_v18 }
  0xf8   :  { %1692 = vmatprep.subr.bf16.mxu0 %v8203_v27  ;;  %1735 = vmatprep.subr.bf16.mxu1 %v8209_v28  ;;  %v8466_v28 = vrot.slane %v227_v15, %v10351_v19 }
  0xfb   :  { %1693 = vmatpush1.bf16.msra.mxu0 %v8217_v29  ;;  %1736 = vmatpush1.bf16.msra.mxu1 %v8223_v30 }
  0xfc   :  { %1694 = vmatprep.subr.bf16.mxu0 %v8228_v31  ;;  %1737 = vmatprep.subr.bf16.mxu1 %v8235_v32 }
  0xff   :  { %1695 = vmatpush1.bf16.msra.mxu0 %v8244_v33  ;;  %1738 = vmatpush1.bf16.msra.mxu1 %v8250_v34 }
 0x100   :  { %1696 = vmatprep.subr.bf16.mxu0 %v8255_v35  ;;  %1739 = vmatprep.subr.bf16.mxu1 %v8261_v36 }
 0x103   :  { %1697 = vmatpush1.bf16.msra.mxu0 %v8269_v37  ;;  %1740 = vmatpush1.bf16.msra.mxu1 %v8275_v38 }
 0x104   :  { %1833 = vmatprep.subr.bf16.mxu0 %v8277_v39  ;;  %1876 = vmatprep.subr.bf16.mxu1 %v8281_v40 }
 0x146   :  { %v8426_v10 = vpop.f32.mrf.mxu0  ;;  %v8428_v11 = vpop.f32.mrf.mxu1 }
 0x148   :  { %v8430_v12 = vpop.f32.mrf.mxu0  ;;  %v8433_v14 = vpop.f32.mrf.mxu1 }
 0x14a   :  { %v8439_v17 = vpop.f32.mrf.mxu0  ;;  %v8442_v6 = vpop.f32.mrf.mxu1 }
 0x14b   :  { %v652_v37 = vadd.f32 %v8439_v17, %v8449_v21 }
 0x14c   :  { %v8445_v20 = vpop.f32.mrf.mxu0  ;;  %v8451_v22 = vpop.f32.mrf.mxu1 }
 0x14d   :  { %v654_v7 = vadd.f32 %v8445_v20, %v8459_v26 }
 0x14e   :  { %v657_v25 = vpop.f32.mrf.mxu0  ;;  %v730_v27 = vpop.f32.mrf.mxu1 }
 0x14f   :  { %v8462_v23 = vadd.f32 %v657_v25, %v8449_v21  ;;  %v8469_v29 = vadd.f32 %v730_v27, %v8455_v24 }
 0x150   :  { %v659_v30 = vpop.f32.mrf.mxu0  ;;  %v732_v32 = vpop.f32.mrf.mxu1 }
 0x151   :  { %10434 = vst [vmem:[#allocation39_spill] sm:$0xff] %v8462_v23  ;;  %10435 = vst [vmem:[#allocation40_spill] sm:$0xff] %v8469_v29  ;;  %v8472_v31 = vadd.f32 %v659_v30, %v8459_v26  ;;  %v8475_v33 = vadd.f32 %v732_v32, %v8466_v28 }
 0x152   :  { %v661_v8 = vpop.f32.mrf.mxu0  ;;  %v734_v18 = vpop.f32.mrf.mxu1 }
 0x153   :  { %10436 = vst [vmem:[#allocation41_spill] sm:$0xff] %v8472_v31  ;;  %10437 = vst [vmem:[#allocation42_spill] sm:$0xff] %v8475_v33  ;;  %v8478_v25 = vadd.f32 %v661_v8, %v8449_v21  ;;  %v8481_v16 = vadd.f32 %v734_v18, %v8455_v24 }
 0x154   :  { %v8483_v19 = vpop.f32.mrf.mxu0  ;;  %v8485_v27 = vpop.f32.mrf.mxu1 }
 0x155   :  { %10438 = vst [vmem:[#allocation43_spill] sm:$0xff] %v8478_v25  ;;  %10439 = vst [vmem:[#allocation44_spill] sm:$0xff] %v8481_v16 }
 0x156   :  { %10440 = vst [vmem:[#allocation45_spill] sm:$0xff] %v8483_v19  ;;  %10441 = vst [vmem:[#allocation46_spill] sm:$0xff] %v8485_v27  ;;  %v667_v13 = vpop.f32.mrf.mxu0  ;;  %v740_v29 = vpop.f32.mrf.mxu1 }
 0x157   :  { %v8488_v30 = vadd.f32 %v667_v13, %v8449_v21  ;;  %v8491_v32 = vadd.f32 %v740_v29, %v8455_v24 }
 0x158   :  { %v669_v33 = vpop.f32.mrf.mxu0  ;;  %v742_v25 = vpop.f32.mrf.mxu1 }
 0x159   :  { %10442 = vst [vmem:[#allocation47_spill] sm:$0xff] %v8488_v30  ;;  %10443 = vst [vmem:[#allocation48_spill] sm:$0xff] %v8491_v32  ;;  %v8494_v8 = vadd.f32 %v669_v33, %v8459_v26  ;;  %v8497_v18 = vadd.f32 %v742_v25, %v8466_v28 }
 0x15a   :  { %v671_v16 = vpop.f32.mrf.mxu0  ;;  %v744_v27 = vpop.f32.mrf.mxu1 }
 0x15b   :  { %10444 = vst [vmem:[#allocation49_spill] sm:$0xff] %v8494_v8  ;;  %10445 = vst [vmem:[#allocation50_spill] sm:$0xff] %v8497_v18  ;;  %v8500_v19 = vadd.f32 %v671_v16, %v8449_v21  ;;  %v8503_v13 = vadd.f32 %v744_v27, %v8455_v24 }
 0x15c   :  { %v8505_v30 = vpop.f32.mrf.mxu0  ;;  %v8507_v29 = vpop.f32.mrf.mxu1 }
 0x15d   :  { %10446 = vst [vmem:[#allocation51_spill] sm:$0xff] %v8500_v19  ;;  %10447 = vst [vmem:[#allocation52_spill] sm:$0xff] %v8503_v13 }
 0x15e   :  { %10448 = vst [vmem:[#allocation53_spill] sm:$0xff] %v8505_v30  ;;  %10449 = vst [vmem:[#allocation54_spill] sm:$0xff] %v8507_v29  ;;  %v677_v32 = vpop.f32.mrf.mxu0  ;;  %v750_v8 = vpop.f32.mrf.mxu1  ;;  %v10458_v30 = vsub.s32 6, %v8424_v9 }
 0x15f   :  { %v8510_v33 = vadd.f32 %v677_v32, %v8449_v21  ;;  %v8514_v18 = vadd.f32 %v750_v8, %v8455_v24 }
 0x160   :  { %v679_v16 = vpop.f32.mrf.mxu0  ;;  %v752_v13 = vpop.f32.mrf.mxu1 }
 0x161   :  { %10450 = vst [vmem:[#allocation55_spill] sm:$0xff] %v8510_v33  ;;  %10451 = vst [vmem:[#allocation56_spill] sm:$0xff] %v8514_v18  ;;  %v8518_v27 = vadd.f32 %v679_v16, %v8459_v26  ;;  %v8522_v29 = vadd.f32 %v752_v13, %v8466_v28  ;;  %v10455_v18 = vsub.s32 4, %v8424_v9  ;;  %v8539_v13 = vrot.slane %v227_v15, %v10458_v30 }
 0x162   :  { %v681_v32 = vpop.f32.mrf.mxu0  ;;  %v754_v8 = vpop.f32.mrf.mxu1  ;;  %v10460_v33 = vsub.s32 5, %v8424_v9 }
 0x163   :  { %10452 = vst [vmem:[#allocation57_spill] sm:$0xff] %v8518_v27  ;;  %10453 = vst [vmem:[#allocation58_spill] sm:$0xff] %v8522_v29  ;;  %v8526_v25 = vadd.f32 %v681_v32, %v8449_v21  ;;  %v8530_v31 = vrot.slane %v227_v15, %v10455_v18  ;;  %v8533_v16 = vadd.f32 %v754_v8, %v8455_v24  ;;  %v10461_v27 = vsub.s32 7, %v8424_v9 }
 0x164   :  { %v8535_v19 = vpop.f32.mrf.mxu0  ;;  %v8541_v29 = vpop.f32.mrf.mxu1  ;;  %v8545_v32 = vrot.slane %v227_v15, %v10460_v33 }
 0x165   :  { %10454 = vst [vmem:[#allocation59_spill] sm:$0xff] %v8526_v25  ;;  %10456 = vst [vmem:[#allocation60_spill] sm:$0xff] %v8533_v16  ;;  %v8549_v18 = vrot.slane %v227_v15, %v10461_v27 }
 0x166   :  { %10457 = vst [vmem:[#allocation61_spill] sm:$0xff] %v8535_v19  ;;  %10459 = vst [vmem:[#allocation62_spill] sm:$0xff] %v8541_v29  ;;  %v793_v25 = vpop.f32.mrf.mxu0  ;;  %v866_v16 = vpop.f32.mrf.mxu1 }
 0x167   :  { %v8552_v8 = vadd.f32 %v793_v25, %v8530_v31  ;;  %v8555_v19 = vadd.f32 %v866_v16, %v8539_v13 }
 0x168   :  { %v795_v30 = vpop.f32.mrf.mxu0  ;;  %v868_v29 = vpop.f32.mrf.mxu1 }
 0x169   :  { %10462 = vst [vmem:[#allocation63_spill] sm:$0xff] %v8552_v8  ;;  %10463 = vst [vmem:[#allocation64_spill] sm:$0xff] %v8555_v19  ;;  %v8558_v23 = vadd.f32 %v795_v30, %v8545_v32  ;;  %v8561_v33 = vadd.f32 %v868_v29, %v8549_v18 }
 0x16a   :  { %v797_v40 = vpop.f32.mrf.mxu0  ;;  %v870_v15 = vpop.f32.mrf.mxu1 }
 0x16b   :  { %10464 = vst [vmem:[#allocation65_spill] sm:$0xff] %v8558_v23  ;;  %10465 = vst [vmem:[#allocation66_spill] sm:$0xff] %v8561_v33  ;;  %v8564_v9 = vadd.f32 %v797_v40, %v8530_v31  ;;  %v8567_v25 = vadd.f32 %v870_v15, %v8539_v13 }
 0x16c   :  { %v8569_v27 = vpop.f32.mrf.mxu0  ;;  %v8571_v16 = vpop.f32.mrf.mxu1 }
 0x16d   :  { %10466 = vst [vmem:[#allocation67_spill] sm:$0xff] %v8564_v9  ;;  %10467 = vst [vmem:[#allocation68_spill] sm:$0xff] %v8567_v25 }
 0x16e   :  { %10468 = vst [vmem:[#allocation69_spill] sm:$0xff] %v8569_v27  ;;  %10469 = vst [vmem:[#allocation70_spill] sm:$0xff] %v8571_v16  ;;  %v803_v19 = vpop.f32.mrf.mxu0  ;;  %v876_v23 = vpop.f32.mrf.mxu1 }
 0x16f   :  { %v8574_v30 = vadd.f32 %v803_v19, %v8530_v31  ;;  %v8577_v29 = vadd.f32 %v876_v23, %v8539_v13 }
 0x170   :  { %v805_v33 = vpop.f32.mrf.mxu0  ;;  %v878_v9 = vpop.f32.mrf.mxu1 }
 0x171   :  { %10470 = vst [vmem:[#allocation71_spill] sm:$0xff] %v8574_v30  ;;  %10471 = vst [vmem:[#allocation72_spill] sm:$0xff] %v8577_v29  ;;  %v8580_v40 = vadd.f32 %v805_v33, %v8545_v32  ;;  %v8583_v15 = vadd.f32 %v878_v9, %v8549_v18 }
 0x172   :  { %v807_v25 = vpop.f32.mrf.mxu0  ;;  %v880_v16 = vpop.f32.mrf.mxu1 }
 0x173   :  { %10472 = vst [vmem:[#allocation73_spill] sm:$0xff] %v8580_v40  ;;  %10473 = vst [vmem:[#allocation74_spill] sm:$0xff] %v8583_v15  ;;  %v8586_v27 = vadd.f32 %v807_v25, %v8530_v31  ;;  %v8589_v19 = vadd.f32 %v880_v16, %v8539_v13 }
 0x174   :  { %v8591_v8 = vpop.f32.mrf.mxu0  ;;  %v8593_v23 = vpop.f32.mrf.mxu1 }
 0x175   :  { %10474 = vst [vmem:[#allocation75_spill] sm:$0xff] %v8586_v27  ;;  %10475 = vst [vmem:[#allocation76_spill] sm:$0xff] %v8589_v19 }
 0x176   :  { %10476 = vst [vmem:[#allocation77_spill] sm:$0xff] %v8591_v8  ;;  %10477 = vst [vmem:[#allocation78_spill] sm:$0xff] %v8593_v23  ;;  %v813_v29 = vpop.f32.mrf.mxu0  ;;  %v886_v40 = vpop.f32.mrf.mxu1 }
 0x177   :  { %v8596_v33 = vadd.f32 %v813_v29, %v8530_v31  ;;  %v8599_v9 = vadd.f32 %v886_v40, %v8539_v13 }
 0x178   :  { %v815_v15 = vpop.f32.mrf.mxu0  ;;  %v888_v27 = vpop.f32.mrf.mxu1 }
 0x179   :  { %10478 = vst [vmem:[#allocation79_spill] sm:$0xff] %v8596_v33  ;;  %10479 = vst [vmem:[#allocation80_spill] sm:$0xff] %v8599_v9  ;;  %v8602_v25 = vadd.f32 %v815_v15, %v8545_v32  ;;  %v8605_v16 = vadd.f32 %v888_v27, %v8549_v18 }
 0x17a   :  { %v817_v19 = vpop.f32.mrf.mxu0  ;;  %v890_v23 = vpop.f32.mrf.mxu1 }
 0x17b   :  { %10480 = vst [vmem:[#allocation81_spill] sm:$0xff] %v8602_v25  ;;  %10481 = vst [vmem:[#allocation82_spill] sm:$0xff] %v8605_v16  ;;  %v8608_v8 = vadd.f32 %v817_v19, %v8530_v31  ;;  %v8611_v29 = vadd.f32 %v890_v23, %v8539_v13  ;;  %v648_v23 = vadd.f32 %v8426_v10, %v8449_v21 }
 0x17c   :  { %v8613_v30 = vpop.f32.mrf.mxu0  ;;  %v8615_v40 = vpop.f32.mrf.mxu1 }
 0x17d   :  { %10482 = vst [vmem:[#allocation83_spill] sm:$0xff] %v8608_v8  ;;  %10483 = vst [vmem:[#allocation84_spill] sm:$0xff] %v8611_v29 }
 0x17e   :  { %10484 = vst [vmem:[#allocation85_spill] sm:$0xff] %v8613_v30  ;;  %10485 = vst [vmem:[#allocation86_spill] sm:$0xff] %v8615_v40  ;;  %v823_v9 = vpop.f32.mrf.mxu0  ;;  %v8617_v33 = vpop.f32.mrf.mxu1  ;;  %v650_v40 = vadd.f32 %v8430_v12, %v8459_v26 }
 0x180   :  { %v825_v15 = vpop.f32.mrf.mxu0  ;;  %v8619_v25 = vpop.f32.mrf.mxu1 }
 0x182   :  { %v8621_v27 = vpop.f32.mrf.mxu0  ;;  %v8623_v16 = vpop.f32.mrf.mxu1 }
 0x184   :  { %v8625_v19 = vpop.f32.mrf.mxu0  ;;  %v8629_v29 = vpop.f32.mrf.mxu1 }
 0x186   :  { %v1235_v8 = vpop.f32.mrf.mxu0  ;;  %v1278_v39 = vpop.f32.mrf.mxu1 }
 0x187   :  { %v1287_v30 = vadd.f32 %v1235_v8, %v648_v23  ;;  %v723_v23 = vadd.f32 %v8433_v14, %v8466_v28 }
 0x188   :  { %v1237_v38 = vpop.f32.mrf.mxu0  ;;  %v1280_v34 = vpop.f32.mrf.mxu1 }
 0x189   :  { %v6315_v36 = vmul.f32 -1.442695, %v1287_v30  ;;  %v1288_v35 = vadd.f32 %v1237_v38, %v650_v40  ;;  %v727_v38 = vadd.f32 %v8451_v22, %v8466_v28  ;;  %v1290_v30 = vadd.f32 %v1280_v34, %v723_v23 }
 0x18a   :  { %v1239_v0 = vpop.f32.mrf.mxu0  ;;  %v1282_v4 = vpop.f32.mrf.mxu1 }
 0x18b   :  { %7101 = vpow2.f32 %v6315_v36  ;;  %v6317_v10 = vmul.f32 -1.442695, %v1288_v35  ;;  %v1291_v5 = vadd.f32 %v1239_v0, %v652_v37  ;;  %v721_v35 = vadd.f32 %v8428_v11, %v8455_v24 }
 0x18c   :  { %v1241_v3 = vpop.f32.mrf.mxu0  ;;  %v1284_v21 = vpop.f32.mrf.mxu1  ;;  %v6319_v37 = vmul.f32 -1.442695, %v1290_v30 }
 0x18d   :  { %7103 = vpow2.f32 %v6317_v10  ;;  %v6316_v12 = vmul.f32 -1.442695, %v1291_v5  ;;  %v1292_v8 = vadd.f32 %v1241_v3, %v654_v7  ;;  %v1294_v0 = vadd.f32 %v1284_v21, %v727_v38 }
 0x18e   :  { %v1289_v36 = vadd.f32 %v1278_v39, %v721_v35  ;;  %v725_v3 = vadd.f32 %v8442_v6, %v8455_v24  ;;  %v828_v35 = vadd.f32 %v8621_v27, %v8530_v31 }
 0x18f   :  { %7105 = vpow2.f32 %v6316_v12  ;;  %v6318_v17 = vmul.f32 -1.442695, %v1292_v8  ;;  %v6320_v20 = vmul.f32 -1.442695, %v1294_v0  ;;  %v824_v8 = vadd.f32 %v823_v9, %v8530_v31 }
 0x190   :  { %v1293_v40 = vadd.f32 %v1282_v4, %v725_v3 }
 0x191   :  { %7107 = vpow2.f32 %v6318_v17  ;;  %v826_v17 = vadd.f32 %v825_v15, %v8545_v32 }
 0x192   :  { %7109 = vtanh.f32 %v1289_v36 }
 0x193   :  { %7111 = vpow2.f32 %v6319_v37 }
 0x194   :  { %7113 = vpow2.f32 %v6320_v20 }
 0x198   :  { %v7102_v5 = vpop.eup %7101 }
 0x199   :  { %v1301_v7 = vadd.f32 1.0, %v7102_v5 }
 0x19a   :  { %v7104_v14 = vpop.eup %7103 }
 0x19b   :  { %7115 = vrcp.f32 %v1301_v7  ;;  %v1313_v34 = vadd.f32 1.0, %v7104_v14 }
 0x19c   :  { %v7106_v22 = vpop.eup %7105 }
 0x19d   :  { %7117 = vrcp.f32 %v1313_v34  ;;  %v1302_v10 = vadd.f32 1.0, %v7106_v22  ;;  %v830_v22 = vadd.f32 %v8625_v19, %v8545_v32 }
 0x19e   :  { %v7108_v11 = vpop.eup %7107  ;;  %7119 = vtanh.f32 %v1293_v40 }
 0x19f   :  { %7121 = vrcp.f32 %v1302_v10  ;;  %v1314_v39 = vadd.f32 1.0, %v7108_v11  ;;  %v7110_v12 = vpop.eup %7109 }
 0x1a0   :  { %v7112_v6 = vpop.eup %7111 }
 0x1a1   :  { %7123 = vrcp.f32 %v1314_v39  ;;  %v7114_v23 = vpop.eup %7113  ;;  %v1327_v5 = vadd.f32 1.0, %v7112_v6 }
 0x1a2   :  { %v1328_v3 = vadd.f32 1.0, %v7114_v23 }
 0x1a6   :  { %v1546_v24 = vpop.f32.mrf.mxu0  ;;  %v1589_v38 = vpop.f32.mrf.mxu1 }
 0x1a7   :  { %v1598_v4 = vadd.f32 %v1546_v24, %v824_v8 }
 0x1a8   :  { %v7116_v21 = vpop.eup %7115  ;;  %v1548_v30 = vpop.f32.mrf.mxu0 }
 0x1a9   :  { %v1335_v0 = vmul.f32 %v7116_v21, %v7110_v12  ;;  %v6353_v36 = vmul.f32 -1.442695, %v1598_v4  ;;  %v1599_v37 = vadd.f32 %v1548_v30, %v826_v17  ;;  %v1591_v10 = vpop.f32.mrf.mxu1  ;;  %v899_v17 = vadd.f32 %v8619_v25, %v8549_v18 }
 0x1aa   :  { %v7118_v20 = vpop.eup %7117  ;;  %v1550_v7 = vpop.f32.mrf.mxu0  ;;  %v903_v30 = vadd.f32 %v8629_v29, %v8549_v18 }
 0x1ab   :  { %v7120_v9 = vpop.eup %7119  ;;  %v1333_v14 = vmul.f32 0.0, %v7118_v20  ;;  %7125 = vpow2.f32 %v6353_v36  ;;  %v6355_v40 = vmul.f32 -1.442695, %v1599_v37  ;;  %v1602_v34 = vadd.f32 %v1550_v7, %v828_v35  ;;  %v1593_v24 = vpop.f32.mrf.mxu1 }
 0x1ac   :  { %v7122_v15 = vpop.eup %7121  ;;  %v1552_v11 = vpop.f32.mrf.mxu0  ;;  %v1601_v4 = vadd.f32 %v1591_v10, %v899_v17  ;;  %v897_v37 = vadd.f32 %v8617_v33, %v8539_v13  ;;  %v901_v7 = vadd.f32 %v8623_v16, %v8539_v13 }
 0x1ad   :  { %v8651_v39 = vadd.f32 %v1335_v0, %v1333_v14  ;;  %v1336_v31 = vmul.f32 %v7122_v15, %v7120_v9  ;;  %7127 = vpow2.f32 %v6355_v40  ;;  %v6354_v27 = vmul.f32 -1.442695, %v1602_v34  ;;  %v1595_v21 = vpop.f32.mrf.mxu1 }
 0x1ae   :  { %v7124_v12 = vpop.eup %7123  ;;  %7129 = vrcp.f32 %v1327_v5  ;;  %v1603_v8 = vadd.f32 %v1552_v11, %v830_v22  ;;  %v6357_v35 = vmul.f32 -1.442695, %v1601_v4  ;;  %v1605_v0 = vadd.f32 %v1595_v21, %v903_v30  ;;  %v8724_v4 = vld [vmem:[%s10335_s3 + $0xe8] ss:$16 sps:$4 sm:$0xff]   ;;  %v8730_v21 = vld [vmem:[%s10335_s3 + $0xc4] ss:$16 sps:$4 sm:$0xff]  }
 0x1af   :  { %v1334_v6 = vmul.f32 0.0, %v7124_v12  ;;  %7131 = vrcp.f32 %v1328_v3  ;;  %v1600_v5 = vadd.f32 %v1589_v38, %v897_v37  ;;  %v1604_v29 = vadd.f32 %v1593_v24, %v901_v7  ;;  %v8736_v30 = vld [vmem:[%s10335_s3 + $0xcc] ss:$16 sps:$4 sm:$0xff]   ;;  %v8792_v7 = vld [vmem:[%s10335_s3 + $0x80] ss:$16 sps:$4 sm:$0xff]  }
 0x1b0   :  { %7133 = vpow2.f32 %v6354_v27  ;;  %v6356_v23 = vmul.f32 -1.442695, %v1603_v8  ;;  %v6358_v14 = vmul.f32 -1.442695, %v1605_v0  ;;  %v8750_v0 = vld [vmem:[%s10335_s3 + $0xc8] ss:$16 sps:$4 sm:$0xff]  }
 0x1b1   :  { %7135 = vtanh.f32 %v8651_v39  ;;  %v8656_v19 = vadd.f32 %v1336_v31, %v1334_v6  ;;  %v8762_v37 = vld [vmem:[%s10335_s3 + $0xac] ss:$16 sps:$4 sm:$0xff]  }
 0x1b2   :  { %7137 = vpow2.f32 %v6356_v23 }
 0x1b3   :  { %7139 = vtanh.f32 %v8656_v19 }
 0x1b4   :  { %7141 = vpow2.f32 %v6357_v35  ;;  %v8744_v35 = vld [vmem:[%s10335_s3 + $0xc0] ss:$16 sps:$4 sm:$0xff]  }
 0x1b8   :  { %v7126_v36 = vpop.eup %7125 }
 0x1b9   :  { %v1612_v20 = vadd.f32 1.0, %v7126_v36  ;;  %v8756_v36 = vld [vmem:[%s10335_s3 + $0xa4] ss:$16 sps:$4 sm:$0xff]  }
 0x1ba   :  { %v7128_v25 = vpop.eup %7127 }
 0x1bb   :  { %v7130_v3 = vpop.eup %7129  ;;  %v1624_v9 = vadd.f32 1.0, %v7128_v25  ;;  %7143 = vrcp.f32 %v1612_v20  ;;  %v8768_v20 = vld [vmem:[%s10335_s3 + $0xa0] ss:$16 sps:$4 sm:$0xff]   ;;  %v8774_v25 = vld [vmem:[%s10335_s3 + $0xa8] ss:$16 sps:$4 sm:$0xff]  }
 0x1bc   :  { %v7132_v40 = vpop.eup %7131 }
 0x1bd   :  { %v7134_v34 = vpop.eup %7133  ;;  %7145 = vrcp.f32 %v1624_v9  ;;  %v8798_v9 = vld [vmem:[%s10335_s3 + $0x88] ss:$16 sps:$4 sm:$0xff]  }
 0x1be   :  { %v7136_v15 = vpop.eup %7135  ;;  %7147 = vtanh.f32 %v1600_v5  ;;  %v1613_v22 = vadd.f32 1.0, %v7134_v34  ;;  %v8780_v5 = vld [vmem:[%s10335_s3 + $0x84] ss:$16 sps:$4 sm:$0xff]   ;;  %v8816_v34 = vld [vmem:[%s10335_s3 + $0x60] ss:$16 sps:$4 sm:$0xff]  }
 0x1bf   :  { %v7138_v10 = vpop.eup %7137  ;;  %7149 = vpow2.f32 %v6358_v14  ;;  %v1341_v11 = vmul.f32 %v7136_v15, %v7130_v3  ;;  %v8786_v3 = vld [vmem:[%s10335_s3 + $0x8c] ss:$16 sps:$4 sm:$0xff]   ;;  %v8804_v14 = vld [vmem:[%s10335_s3 + $0x64] ss:$16 sps:$4 sm:$0xff]  }
 0x1c0   :  { %v7140_v33 = vpop.eup %7139  ;;  %7151 = vrcp.f32 %v1613_v22  ;;  %v1625_v38 = vadd.f32 1.0, %v7138_v10  ;;  %v8828_v15 = vld [vmem:[%s10335_s3 + $0x44] ss:$16 sps:$4 sm:$0xff]   ;;  %v8834_v22 = vld [vmem:[%s10335_s3 + $0x4c] ss:$16 sps:$4 sm:$0xff]  }
 0x1c1   :  { %7153 = vtanh.f32 %v1604_v29  ;;  %v1342_v31 = vmul.f32 %v7140_v33, %v7132_v40  ;;  %v7142_v16 = vpop.eup %7141  ;;  %v8810_v40 = vld [vmem:[%s10335_s3 + $0x6c] ss:$16 sps:$4 sm:$0xff]   ;;  %v8822_v29 = vld [vmem:[%s10335_s3 + $0x68] ss:$16 sps:$4 sm:$0xff]   ;;  %v8840_v10 = vld [vmem:[%s10335_s3 + $0x40] ss:$16 sps:$4 sm:$0xff]  }
 0x1c2   :  { %7155 = vrcp.f32 %v1625_v38  ;;  %v8846_v33 = vld [vmem:[%s10335_s3 + $0x48] ss:$16 sps:$4 sm:$0xff]   ;;  %v8852_v38 = vld [vmem:[%s10335_s3 + $0x24] ss:$16 sps:$4 sm:$0xff]  }
 0x1c3   :  { %v1343_v13 = vpack.c.bf16 %v1342_v31, %v1341_v11  ;;  %v8858_v11 = vld [vmem:[%s10335_s3 + $0x2c] ss:$16 sps:$4 sm:$0xff]   ;;  %v8864_v31 = vld [vmem:[%s10335_s3 + $0x20] ss:$16 sps:$4 sm:$0xff]  }
 0x1c5   :  { %6730 = vst [vmem:[#allocation3] sm:$0xff] %v1343_v13   ;;  %1715 = vmatmul.mubr.bf16.vlgmr.msra.gmra.mxu0 %v1343_v13  ;;  %1758 = vmatmul.mubr.bf16.vlgmr.msra.gmra.mxu1 %v1343_v13  ;;  %v10492_v13 = vld [vmem:[#allocation25_spill] sm:$0xff] }
 0x1c6   :  { %1834 = vmatpush1.bf16.msra.mxu0 %v8287_v41  ;;  %1877 = vmatpush1.bf16.msra.mxu1 %v8290_v42 }
 0x1c7   :  { %1835 = vmatprep.subr.bf16.mxu0 %v8292_v43  ;;  %1878 = vmatprep.subr.bf16.mxu1 %v8295_v44  ;;  %v1638_v44 = vadd.f32 1.0, %v7142_v16  ;;  %v10493_v16 = vld [vmem:[#allocation26_spill] sm:$0xff] }
 0x1c8   :  { %1865 = vmatprep.mubr.bf16.mxu0 %v10432_v1  ;;  %1908 = vmatprep.mubr.bf16.mxu1 %v10432_v1  ;;  %v7144_v27 = vpop.eup %7143 }
 0x1c9   :  { %7157 = vrcp.f32 %v1638_v44 }
 0x1ca   :  { %v7146_v12 = vpop.eup %7145  ;;  %1836 = vmatpush1.bf16.msra.mxu0 %v8303_v45  ;;  %1879 = vmatpush1.bf16.msra.mxu1 %v8307_v46 }
 0x1cb   :  { %v7148_v8 = vpop.eup %7147  ;;  %v1644_v6 = vmul.f32 0.0, %v7146_v12  ;;  %1837 = vmatprep.subr.bf16.mxu0 %v8309_v47  ;;  %1880 = vmatprep.subr.bf16.mxu1 %v8312_v48  ;;  %v10495_v12 = vld [vmem:[#allocation28_spill] sm:$0xff] }
 0x1cc   :  { %v7150_v41 = vpop.eup %7149  ;;  %v1646_v42 = vmul.f32 %v7148_v8, %v7144_v27  ;;  %v10494_v27 = vld [vmem:[#allocation27_spill] sm:$0xff]  ;;  %v10496_v8 = vld [vmem:[#allocation29_spill] sm:$0xff] }
 0x1cd   :  { %v7152_v43 = vpop.eup %7151  ;;  %v1639_v17 = vadd.f32 1.0, %v7150_v41  ;;  %v10498_v41 = vld [vmem:[#allocation31_spill] sm:$0xff] }
 0x1ce   :  { %v7154_v24 = vpop.eup %7153  ;;  %v8675_v23 = vadd.f32 %v1646_v42, %v1644_v6  ;;  %1838 = vmatpush1.bf16.msra.mxu0 %v8317_v49  ;;  %1881 = vmatpush1.bf16.msra.mxu1 %v8321_v50  ;;  %v10486_v49 = vld [vmem:[#allocation32_spill] sm:$0xff]  ;;  %v10497_v6 = vld [vmem:[#allocation30_spill] sm:$0xff] }
 0x1cf   :  { %v7156_v45 = vpop.eup %7155  ;;  %1839 = vmatprep.subr.bf16.mxu0 %v8323_v51  ;;  %1882 = vmatprep.subr.bf16.mxu1 %v8326_v52  ;;  %v1647_v47 = vmul.f32 %v7154_v24, %v7152_v43  ;;  %v10487_v51 = vld [vmem:[#allocation33_spill] sm:$0xff]  ;;  %v10499_v43 = vld [vmem:[#allocation39_spill] sm:$0xff] }
 0x1d0   :  { %v1645_v46 = vmul.f32 0.0, %v7156_v45  ;;  %7159 = vtanh.f32 %v8675_v23 }
 0x1d1   :  { %7161 = vrcp.f32 %v1639_v17 }
 0x1d2   :  { %v8682_v48 = vadd.f32 %v1647_v47, %v1645_v46  ;;  %1840 = vmatpush1.bf16.msra.mxu0 %v8329_v53  ;;  %1883 = vmatpush1.bf16.msra.mxu1 %v8333_v54  ;;  %v10488_v53 = vld [vmem:[#allocation34_spill] sm:$0xff]  ;;  %v10489_v54 = vld [vmem:[#allocation35_spill] sm:$0xff]  ;;  %v10500_v46 = vld [vmem:[#allocation41_spill] sm:$0xff] }
 0x1d3   :  { %1841 = vmatprep.subr.bf16.mxu0 %v8335_v55  ;;  %1884 = vmatprep.subr.bf16.mxu1 %v8338_v56 }
 0x1d4   :  { %7163 = vtanh.f32 %v8682_v48 }
 0x1d6   :  { %1842 = vmatpush1.bf16.msra.mxu0 %v8341_v57  ;;  %1885 = vmatpush1.bf16.msra.mxu1 %v8345_v58  ;;  %v7158_v50 = vpop.eup %7157  ;;  %v10490_v57 = vld [vmem:[#allocation36_spill] sm:$0xff]  ;;  %v10491_v58 = vld [vmem:[#allocation37_spill] sm:$0xff] }
 0x1d7   :  { %1843 = vmatprep.subr.bf16.mxu0 %v8347_v59  ;;  %1886 = vmatprep.subr.bf16.mxu1 %v8350_v60 }
 0x1da   :  { %1844 = vmatpush1.bf16.msra.mxu0 %v8353_v61  ;;  %1887 = vmatpush1.bf16.msra.mxu1 %v8357_v62  ;;  %v8706_v61 = vld [vmem:[%s10335_s3 + $0xe4] ss:$16 sps:$4 sm:$0xff]   ;;  %v8712_v62 = vld [vmem:[%s10335_s3 + $0xec] ss:$16 sps:$4 sm:$0xff]  }
 0x1db   :  { %1845 = vmatprep.subr.bf16.mxu0 %v8359_v63  ;;  %1888 = vmatprep.subr.bf16.mxu1 %v10486_v49 }
 0x1dd   :  { %v7160_v52 = vpop.eup %7159 }
 0x1de   :  { %1846 = vmatpush1.bf16.msra.mxu0 %v8365_v2  ;;  %1889 = vmatpush1.bf16.msra.mxu1 %v10487_v51  ;;  %v7162_v55 = vpop.eup %7161  ;;  %v1652_v59 = vmul.f32 %v7160_v52, %v7158_v50  ;;  %v8718_v2 = vld [vmem:[%s10335_s3 + $0xe0] ss:$16 sps:$4 sm:$0xff]  }
 0x1df   :  { %1847 = vmatprep.subr.bf16.mxu0 %v10488_v53  ;;  %1890 = vmatprep.subr.bf16.mxu1 %v10489_v54  ;;  %v10501_v50 = vld [vmem:[#allocation45_spill] sm:$0xff]  ;;  %v10502_v54 = vld [vmem:[#allocation43_spill] sm:$0xff] }
 0x1e0   :  { %v664_v51 = vadd.f32 %v10501_v50, %v8459_v26 }
 0x1e1   :  { %v7164_v56 = vpop.eup %7163 }
 0x1e2   :  { %1848 = vmatpush1.bf16.msra.mxu0 %v10490_v57  ;;  %1891 = vmatpush1.bf16.msra.mxu1 %v10491_v58  ;;  %v1653_v60 = vmul.f32 %v7164_v56, %v7162_v55 }
 0x1e3   :  { %2004 = vmatprep.subr.bf16.mxu0 %v8706_v61  ;;  %2047 = vmatprep.subr.bf16.mxu1 %v8712_v62 }
 0x1e4   :  { %v1654_v63 = vpack.c.bf16 %v1653_v60, %v1652_v59 }
 0x1e6   :  { %6735 = vst [vmem:[#allocation4 + $0x18] sm:$0xff] %v1654_v63   ;;  %1866 = vmatmul.mubr.bf16.vlgmr.msra.gmra.mxu0 %v1654_v63  ;;  %1909 = vmatmul.mubr.bf16.vlgmr.msra.gmra.mxu1 %v1654_v63  ;;  %v10503_v63 = vld [vmem:[#allocation42_spill] sm:$0xff] }
 0x1e7   :  { %2005 = vmatpush1.bf16.msra.mxu0 %v8718_v2  ;;  %2048 = vmatpush1.bf16.msra.mxu1 %v8724_v4 }
 0x1e8   :  { %2006 = vmatprep.subr.bf16.mxu0 %v8730_v21  ;;  %2049 = vmatprep.subr.bf16.mxu1 %v8736_v30 }
 0x1e9   :  { %2036 = vmatprep.mubr.bf16.mxu0 %v10432_v1  ;;  %2079 = vmatprep.mubr.bf16.mxu1 %v10432_v1 }
 0x1eb   :  { %2007 = vmatpush1.bf16.msra.mxu0 %v8744_v35  ;;  %2050 = vmatpush1.bf16.msra.mxu1 %v8750_v0 }
 0x1ec   :  { %2008 = vmatprep.subr.bf16.mxu0 %v8756_v36  ;;  %2051 = vmatprep.subr.bf16.mxu1 %v8762_v37 }
 0x1ef   :  { %2009 = vmatpush1.bf16.msra.mxu0 %v8768_v20  ;;  %2052 = vmatpush1.bf16.msra.mxu1 %v8774_v25 }
 0x1f0   :  { %2010 = vmatprep.subr.bf16.mxu0 %v8780_v5  ;;  %2053 = vmatprep.subr.bf16.mxu1 %v8786_v3 }
 0x1f3   :  { %2011 = vmatpush1.bf16.msra.mxu0 %v8792_v7  ;;  %2054 = vmatpush1.bf16.msra.mxu1 %v8798_v9 }
 0x1f4   :  { %2012 = vmatprep.subr.bf16.mxu0 %v8804_v14  ;;  %2055 = vmatprep.subr.bf16.mxu1 %v8810_v40 }
 0x1f7   :  { %2013 = vmatpush1.bf16.msra.mxu0 %v8816_v34  ;;  %2056 = vmatpush1.bf16.msra.mxu1 %v8822_v29 }
 0x1f8   :  { %2014 = vmatprep.subr.bf16.mxu0 %v8828_v15  ;;  %2057 = vmatprep.subr.bf16.mxu1 %v8834_v22 }
 0x1fb   :  { %2015 = vmatpush1.bf16.msra.mxu0 %v8840_v10  ;;  %2058 = vmatpush1.bf16.msra.mxu1 %v8846_v33 }
 0x1fc   :  { %2016 = vmatprep.subr.bf16.mxu0 %v8852_v38  ;;  %2059 = vmatprep.subr.bf16.mxu1 %v8858_v11 }
 0x1ff   :  { %2017 = vmatpush1.bf16.msra.mxu0 %v8864_v31  ;;  %2060 = vmatpush1.bf16.msra.mxu1 %v10492_v13 }
 0x200   :  { %2018 = vmatprep.subr.bf16.mxu0 %v10493_v16  ;;  %2061 = vmatprep.subr.bf16.mxu1 %v10494_v27  ;;  %v10504_v27 = vld [vmem:[#allocation46_spill] sm:$0xff] }
 0x203   :  { %2019 = vmatpush1.bf16.msra.mxu0 %v10495_v12  ;;  %2062 = vmatpush1.bf16.msra.mxu1 %v10496_v8  ;;  %v737_v12 = vadd.f32 %v10504_v27, %v8466_v28  ;;  %v10505_v8 = vld [vmem:[#allocation40_spill] sm:$0xff] }
 0x204   :  { %2155 = vmatprep.subr.bf16.mxu0 %v10497_v6  ;;  %2198 = vmatprep.subr.bf16.mxu1 %v10498_v41 }
 0x285   :  { %v1716_v42 = vpop.f32.mrf.mxu0  ;;  %v1759_v24 = vpop.f32.mrf.mxu1 }
 0x286   :  { %v1768_v44 = vadd.f32 %v1716_v42, %v10499_v43  ;;  %v1770_v6 = vadd.f32 %v1759_v24, %v10505_v8 }
 0x287   :  { %v1718_v45 = vpop.f32.mrf.mxu0  ;;  %v1761_v53 = vpop.f32.mrf.mxu1 }
 0x288   :  { %v6363_v17 = vmul.f32 -1.442695, %v1768_v44  ;;  %v1769_v47 = vadd.f32 %v1718_v45, %v10500_v46  ;;  %v1771_v13 = vadd.f32 %v1761_v53, %v10503_v63  ;;  %v10506_v44 = vld [vmem:[#allocation44_spill] sm:$0xff] }
 0x289   :  { %v1720_v49 = vpop.f32.mrf.mxu0  ;;  %v1763_v59 = vpop.f32.mrf.mxu1 }
 0x28a   :  { %7165 = vpow2.f32 %v6363_v17  ;;  %v6365_v52 = vmul.f32 -1.442695, %v1769_v47  ;;  %v1772_v55 = vadd.f32 %v1720_v49, %v10502_v54  ;;  %v6367_v41 = vmul.f32 -1.442695, %v1771_v13 }
 0x28b   :  { %v1722_v56 = vpop.f32.mrf.mxu0  ;;  %v1765_v16 = vpop.f32.mrf.mxu1  ;;  %v1774_v45 = vadd.f32 %v1763_v59, %v10506_v44  ;;  %v10509_v44 = vld [vmem:[#allocation85_spill] sm:$0xff] }
 0x28c   :  { %7167 = vpow2.f32 %v6365_v52  ;;  %v6364_v57 = vmul.f32 -1.442695, %v1772_v55  ;;  %v1773_v58 = vadd.f32 %v1722_v56, %v664_v51  ;;  %v1775_v42 = vadd.f32 %v1765_v16, %v737_v12  ;;  %v10508_v12 = vld [vmem:[#allocation81_spill] sm:$0xff] }
 0x28e   :  { %7169 = vpow2.f32 %v6364_v57  ;;  %v6366_v60 = vmul.f32 -1.442695, %v1773_v58  ;;  %v6368_v47 = vmul.f32 -1.442695, %v1775_v42  ;;  %v10507_v57 = vld [vmem:[#allocation79_spill] sm:$0xff] }
 0x290   :  { %7171 = vpow2.f32 %v6366_v60 }
 0x291   :  { %7173 = vtanh.f32 %v1770_v6 }
 0x292   :  { %7175 = vpow2.f32 %v6367_v41 }
 0x297   :  { %v7166_v43 = vpop.eup %7165 }
 0x298   :  { %v1782_v17 = vadd.f32 1.0, %v7166_v43 }
 0x299   :  { %v7168_v46 = vpop.eup %7167 }
 0x29a   :  { %7177 = vrcp.f32 %v1782_v17  ;;  %v1794_v49 = vadd.f32 1.0, %v7168_v46 }
 0x29b   :  { %v7170_v50 = vpop.eup %7169  ;;  %7179 = vtanh.f32 %v1774_v45  ;;  %v820_v45 = vadd.f32 %v10509_v44, %v8545_v32 }
 0x29c   :  { %7181 = vrcp.f32 %v1794_v49  ;;  %v1783_v51 = vadd.f32 1.0, %v7170_v50 }
 0x29d   :  { %v7172_v52 = vpop.eup %7171  ;;  %7183 = vpow2.f32 %v6368_v47  ;;  %v10510_v47 = vld [vmem:[#allocation83_spill] sm:$0xff] }
 0x29e   :  { %7185 = vrcp.f32 %v1783_v51  ;;  %v1795_v24 = vadd.f32 1.0, %v7172_v52  ;;  %v7174_v53 = vpop.eup %7173 }
 0x29f   :  { %v7176_v54 = vpop.eup %7175 }
 0x2a0   :  { %7187 = vrcp.f32 %v1795_v24  ;;  %v1808_v51 = vadd.f32 1.0, %v7176_v54 }
 0x2a6   :  { %v1867_v55 = vpop.f32.mrf.mxu0  ;;  %v1910_v59 = vpop.f32.mrf.mxu1 }
 0x2a7   :  { %v7178_v56 = vpop.eup %7177  ;;  %v1919_v58 = vadd.f32 %v1867_v55, %v10507_v57 }
 0x2a8   :  { %v7180_v60 = vpop.eup %7179  ;;  %v1816_v63 = vmul.f32 %v7178_v56, %v7174_v53  ;;  %v1869_v13 = vpop.f32.mrf.mxu0 }
 0x2a9   :  { %v7182_v16 = vpop.eup %7181  ;;  %v6369_v27 = vmul.f32 -1.442695, %v1919_v58  ;;  %v1920_v8 = vadd.f32 %v1869_v13, %v10508_v12  ;;  %v1912_v46 = vpop.f32.mrf.mxu1 }
 0x2aa   :  { %v7184_v6 = vpop.eup %7183  ;;  %v1814_v41 = vmul.f32 %v7182_v16, %v8651_v39  ;;  %v1871_v42 = vpop.f32.mrf.mxu0 }
 0x2ab   :  { %v7186_v43 = vpop.eup %7185  ;;  %7189 = vpow2.f32 %v6369_v27  ;;  %v6371_v17 = vmul.f32 -1.442695, %v1920_v8  ;;  %v1923_v49 = vadd.f32 %v1871_v42, %v10510_v47  ;;  %v1809_v57 = vadd.f32 1.0, %v7184_v6  ;;  %v1914_v58 = vpop.f32.mrf.mxu1 }
 0x2ac   :  { %v8890_v50 = vadd.f32 %v1816_v63, %v1814_v41  ;;  %v1817_v52 = vmul.f32 %v7186_v43, %v7180_v60  ;;  %v1873_v24 = vpop.f32.mrf.mxu0  ;;  %v10511_v63 = vld [vmem:[#allocation82_spill] sm:$0xff]  ;;  %v10514_v43 = vld [vmem:[#allocation84_spill] sm:$0xff] }
 0x2ad   :  { %v7188_v53 = vpop.eup %7187  ;;  %7191 = vpow2.f32 %v6371_v17  ;;  %v6370_v55 = vmul.f32 -1.442695, %v1923_v49  ;;  %v1924_v56 = vadd.f32 %v1873_v24, %v820_v45  ;;  %v1922_v27 = vadd.f32 %v1912_v46, %v10511_v63  ;;  %v1916_v54 = vpop.f32.mrf.mxu1  ;;  %v10512_v60 = vld [vmem:[#allocation86_spill] sm:$0xff] }
 0x2ae   :  { %v1815_v39 = vmul.f32 %v7188_v53, %v8656_v19  ;;  %v893_v12 = vadd.f32 %v10512_v60, %v8549_v18  ;;  %v10513_v19 = vld [vmem:[#allocation80_spill] sm:$0xff]  ;;  %v1925_v44 = vadd.f32 %v1914_v58, %v10514_v43 }
 0x2af   :  { %7193 = vpow2.f32 %v6370_v55  ;;  %v6372_v13 = vmul.f32 -1.442695, %v1924_v56  ;;  %v1921_v8 = vadd.f32 %v1910_v59, %v10513_v19  ;;  %v6373_v6 = vmul.f32 -1.442695, %v1922_v27  ;;  %v8902_v27 = vld [vmem:[#allocation9 + $0xe0] ss:$16 sps:$4 sm:$0xff]  }
 0x2b0   :  { %7195 = vrcp.f32 %v1808_v51  ;;  %v8893_v16 = vadd.f32 %v1817_v52, %v1815_v39  ;;  %v1926_v41 = vadd.f32 %v1916_v54, %v893_v12  ;;  %v8905_v54 = vld [vmem:[#allocation9 + $0xe8] ss:$16 sps:$4 sm:$0xff]   ;;  %v8908_v12 = vld [vmem:[#allocation9 + $0xc4] ss:$16 sps:$4 sm:$0xff]   ;;  %v8911_v19 = vld [vmem:[#allocation9 + $0xcc] ss:$16 sps:$4 sm:$0xff]  }
 0x2b1   :  { %7197 = vpow2.f32 %v6372_v13 }
 0x2b2   :  { %7199 = vrcp.f32 %v1809_v57  ;;  %v6374_v46 = vmul.f32 -1.442695, %v1926_v41 }
 0x2b3   :  { %7201 = vtanh.f32 %v8890_v50 }
 0x2b4   :  { %7203 = vtanh.f32 %v8893_v16 }
 0x2b5   :  { %7205 = vtanh.f32 %v1921_v8 }
 0x2b6   :  { %7207 = vpow2.f32 %v6373_v6 }
 0x2b8   :  { %v7190_v42 = vpop.eup %7189 }
 0x2b9   :  { %v1933_v45 = vadd.f32 1.0, %v7190_v42 }
 0x2ba   :  { %v7192_v17 = vpop.eup %7191 }
 0x2bb   :  { %7209 = vrcp.f32 %v1933_v45  ;;  %v1945_v47 = vadd.f32 1.0, %v7192_v17  ;;  %v8920_v45 = vld [vmem:[#allocation9 + $0xc8] ss:$16 sps:$4 sm:$0xff]  }
 0x2bc   :  { %v7194_v49 = vpop.eup %7193  ;;  %7211 = vtanh.f32 %v1925_v44  ;;  %v8917_v44 = vld [vmem:[#allocation9 + $0xc0] ss:$16 sps:$4 sm:$0xff]  }
 0x2bd   :  { %v7196_v51 = vpop.eup %7195  ;;  %7213 = vrcp.f32 %v1945_v47  ;;  %v1934_v52 = vadd.f32 1.0, %v7194_v49  ;;  %v8923_v47 = vld [vmem:[#allocation9 + $0xa4] ss:$16 sps:$4 sm:$0xff]   ;;  %v8926_v49 = vld [vmem:[#allocation9 + $0xac] ss:$16 sps:$4 sm:$0xff]  }
 0x2be   :  { %v7198_v24 = vpop.eup %7197  ;;  %7215 = vpow2.f32 %v6374_v46 }
 0x2bf   :  { %v7200_v59 = vpop.eup %7199  ;;  %7217 = vrcp.f32 %v1934_v52  ;;  %v1946_v53 = vadd.f32 1.0, %v7198_v24 }
 0x2c0   :  { %v7202_v55 = vpop.eup %7201 }
 0x2c1   :  { %v7204_v56 = vpop.eup %7203  ;;  %7219 = vrcp.f32 %v1946_v53  ;;  %v1822_v39 = vmul.f32 %v7202_v55, %v7196_v51  ;;  %v8932_v53 = vld [vmem:[#allocation9 + $0xa0] ss:$16 sps:$4 sm:$0xff]   ;;  %v8935_v55 = vld [vmem:[#allocation9 + $0xa8] ss:$16 sps:$4 sm:$0xff]  }
 0x2c2   :  { %v1823_v57 = vmul.f32 %v7204_v56, %v7200_v59  ;;  %v7206_v13 = vpop.eup %7205  ;;  %v8938_v56 = vld [vmem:[#allocation9 + $0x84] ss:$16 sps:$4 sm:$0xff]  }
 0x2c3   :  { %v7208_v63 = vpop.eup %7207 }
 0x2c4   :  { %v1824_v58 = vpack.c.bf16 %v1823_v57, %v1822_v39  ;;  %v1959_v46 = vadd.f32 1.0, %v7208_v63  ;;  %v8941_v39 = vld [vmem:[#allocation9 + $0x8c] ss:$16 sps:$4 sm:$0xff]  }
 0x2c5   :  { %v8957_v63 = vld [vmem:[#allocation9 + $0x6c] ss:$16 sps:$4 sm:$0xff]  }
 0x2c6   :  { %6740 = vst [vmem:[#allocation3 + $0x8] sm:$0xff] %v1824_v58   ;;  %2037 = vmatmul.mubr.bf16.vlgmr.msra.gmra.mxu0 %v1824_v58  ;;  %2080 = vmatmul.mubr.bf16.vlgmr.msra.gmra.mxu1 %v1824_v58  ;;  %7221 = vrcp.f32 %v1959_v46  ;;  %v8950_v58 = vld [vmem:[#allocation9 + $0x88] ss:$16 sps:$4 sm:$0xff]   ;;  %v8981_v46 = vld [vmem:[#allocation9 + $0x2c] ss:$16 sps:$4 sm:$0xff]  }
 0x2c7   :  { %2156 = vmatpush1.bf16.msra.mxu0 %v8902_v27  ;;  %2199 = vmatpush1.bf16.msra.mxu1 %v8905_v54  ;;  %10521 = vst [vmem:[#allocation25_spill] sm:$0xff] %v8981_v46 }
 0x2c8   :  { %v7210_v60 = vpop.eup %7209  ;;  %2157 = vmatprep.subr.bf16.mxu0 %v8908_v12  ;;  %2200 = vmatprep.subr.bf16.mxu1 %v8911_v19 }
 0x2c9   :  { %v7212_v8 = vpop.eup %7211  ;;  %v1967_v6 = vmul.f32 %v7210_v60, %v7206_v13  ;;  %2187 = vmatprep.mubr.bf16.mxu0 %v10432_v1  ;;  %2230 = vmatprep.mubr.bf16.mxu1 %v10432_v1  ;;  %v8954_v13 = vld [vmem:[#allocation9 + $0x64] ss:$16 sps:$4 sm:$0xff]   ;;  %v8960_v60 = vld [vmem:[#allocation9 + $0x60] ss:$16 sps:$4 sm:$0xff]  }
 0x2ca   :  { %v7214_v41 = vpop.eup %7213 }
 0x2cb   :  { %v7216_v42 = vpop.eup %7215  ;;  %v1965_v43 = vmul.f32 %v7214_v41, %v8675_v23  ;;  %2158 = vmatpush1.bf16.msra.mxu0 %v8917_v44  ;;  %2201 = vmatpush1.bf16.msra.mxu1 %v8920_v45  ;;  %v8969_v41 = vld [vmem:[#allocation9 + $0x4c] ss:$16 sps:$4 sm:$0xff]  }
 0x2cc   :  { %v7218_v17 = vpop.eup %7217  ;;  %2159 = vmatprep.subr.bf16.mxu0 %v8923_v47  ;;  %2202 = vmatprep.subr.bf16.mxu1 %v8926_v49  ;;  %v1960_v24 = vadd.f32 1.0, %v7216_v42  ;;  %10517 = vst [vmem:[#allocation34_spill] sm:$0xff] %v8969_v41  ;;  %v8972_v42 = vld [vmem:[#allocation9 + $0x40] ss:$16 sps:$4 sm:$0xff]  }
 0x2cd   :  { %v8929_v51 = vadd.f32 %v1967_v6, %v1965_v43  ;;  %v1968_v23 = vmul.f32 %v7218_v17, %v7212_v8  ;;  %v8963_v8 = vld [vmem:[#allocation9 + $0x68] ss:$16 sps:$4 sm:$0xff]   ;;  %v8966_v6 = vld [vmem:[#allocation9 + $0x44] ss:$16 sps:$4 sm:$0xff]   ;;  %10518 = vst [vmem:[#allocation35_spill] sm:$0xff] %v8972_v42 }
 0x2ce   :  { %v7220_v52 = vpop.eup %7219  ;;  %10515 = vst [vmem:[#allocation32_spill] sm:$0xff] %v8963_v8  ;;  %10516 = vst [vmem:[#allocation33_spill] sm:$0xff] %v8966_v6  ;;  %v8975_v43 = vld [vmem:[#allocation9 + $0x48] ss:$16 sps:$4 sm:$0xff]   ;;  %v8978_v17 = vld [vmem:[#allocation9 + $0x24] ss:$16 sps:$4 sm:$0xff]  }
 0x2cf   :  { %v1966_v59 = vmul.f32 %v7220_v52, %v8682_v48  ;;  %2160 = vmatpush1.bf16.msra.mxu0 %v8932_v53  ;;  %2203 = vmatpush1.bf16.msra.mxu1 %v8935_v55  ;;  %7223 = vtanh.f32 %v8929_v51  ;;  %v8947_v48 = vld [vmem:[#allocation9 + $0x80] ss:$16 sps:$4 sm:$0xff]   ;;  %10519 = vst [vmem:[#allocation36_spill] sm:$0xff] %v8975_v43  ;;  %10520 = vst [vmem:[#allocation37_spill] sm:$0xff] %v8978_v17 }
 0x2d0   :  { %2161 = vmatprep.subr.bf16.mxu0 %v8938_v56  ;;  %2204 = vmatprep.subr.bf16.mxu1 %v8941_v39  ;;  %7225 = vrcp.f32 %v1960_v24 }
 0x2d1   :  { %v8944_v57 = vadd.f32 %v1968_v23, %v1966_v59  ;;  %v8984_v59 = vld [vmem:[#allocation9 + $0x20] ss:$16 sps:$4 sm:$0xff]  }
 0x2d2   :  { %10522 = vst [vmem:[#allocation26_spill] sm:$0xff] %v8984_v59 }
 0x2d3   :  { %2162 = vmatpush1.bf16.msra.mxu0 %v8947_v48  ;;  %2205 = vmatpush1.bf16.msra.mxu1 %v8950_v58  ;;  %7227 = vtanh.f32 %v8944_v57  ;;  %v7222_v23 = vpop.eup %7221 }
 0x2d4   :  { %2163 = vmatprep.subr.bf16.mxu0 %v8954_v13  ;;  %2206 = vmatprep.subr.bf16.mxu1 %v8957_v63 }
 0x2d7   :  { %2164 = vmatpush1.bf16.msra.mxu0 %v8960_v60  ;;  %2207 = vmatpush1.bf16.msra.mxu1 %v8963_v8  ;;  %v8996_v8 = vld [vmem:[#allocation9] ss:$16 sps:$4 sm:$0xff]  }
 0x2d8   :  { %2165 = vmatprep.subr.bf16.mxu0 %v8966_v6  ;;  %2208 = vmatprep.subr.bf16.mxu1 %v8969_v41  ;;  %v8990_v41 = vld [vmem:[#allocation9 + $0x4] ss:$16 sps:$4 sm:$0xff]  }
 0x2db   :  { %2166 = vmatpush1.bf16.msra.mxu0 %v8972_v42  ;;  %2209 = vmatpush1.bf16.msra.mxu1 %v8975_v43  ;;  %v8987_v42 = vld [vmem:[#allocation9 + $0x28] ss:$16 sps:$4 sm:$0xff]  }
 0x2dc   :  { %2167 = vmatprep.subr.bf16.mxu0 %v8978_v17  ;;  %2210 = vmatprep.subr.bf16.mxu1 %v8981_v46  ;;  %v7224_v52 = vpop.eup %7223  ;;  %10523 = vst [vmem:[#allocation27_spill] sm:$0xff] %v8987_v42  ;;  %v8993_v17 = vld [vmem:[#allocation9 + $0xc] ss:$16 sps:$4 sm:$0xff]  }
 0x2dd   :  { %v7226_v24 = vpop.eup %7225  ;;  %v1973_v46 = vmul.f32 %v7224_v52, %v7222_v23  ;;  %v10530_v52 = vld [vmem:[#allocation48_spill] sm:$0xff] }
 0x2df   :  { %2168 = vmatpush1.bf16.msra.mxu0 %v8984_v59  ;;  %2211 = vmatpush1.bf16.msra.mxu1 %v8987_v42  ;;  %v8999_v59 = vld [vmem:[#allocation9 + $0x8] ss:$16 sps:$4 sm:$0xff]  }
 0x2e0   :  { %v7228_v43 = vpop.eup %7227  ;;  %2169 = vmatprep.subr.bf16.mxu0 %v8990_v41  ;;  %2212 = vmatprep.subr.bf16.mxu1 %v8993_v17 }
 0x2e1   :  { %v1974_v6 = vmul.f32 %v7228_v43, %v7226_v24 }
 0x2e3   :  { %2170 = vmatpush1.bf16.msra.mxu0 %v8996_v8  ;;  %2213 = vmatpush1.bf16.msra.mxu1 %v8999_v59  ;;  %v1975_v42 = vpack.c.bf16 %v1974_v6, %v1973_v46  ;;  %v10528_v6 = vld [vmem:[#allocation50_spill] sm:$0xff] }
 0x2e4   :  { %2326 = vmatprep.subr.bf16.mxu0 %v8706_v61  ;;  %2369 = vmatprep.subr.bf16.mxu1 %v8712_v62  ;;  %v7670_v61 = vld [vmem:[%s10335_s3 + $0x28] ss:$16 sps:$4 sm:$0xff]   ;;  %v7671_v62 = vld [vmem:[%s10335_s3 + $0x4] ss:$16 sps:$4 sm:$0xff]  }
 0x2e5   :  { %6745 = vst [vmem:[#allocation4 + $0x10] sm:$0xff] %v1975_v42   ;;  %v10529_v46 = vld [vmem:[#allocation54_spill] sm:$0xff] }
 0x2e6   :  { %2188 = vmatmul.mubr.bf16.vlgmr.msra.gmra.mxu0 %v1975_v42  ;;  %2231 = vmatmul.mubr.bf16.vlgmr.msra.gmra.mxu1 %v1975_v42  ;;  %v747_v23 = vadd.f32 %v10529_v46, %v8466_v28 }
 0x2e7   :  { %2327 = vmatpush1.bf16.msra.mxu0 %v8718_v2  ;;  %2370 = vmatpush1.bf16.msra.mxu1 %v8724_v4  ;;  %v7672_v2 = vld [vmem:[%s10335_s3 + $0xc] ss:$16 sps:$4 sm:$0xff]   ;;  %v7673_v4 = vld [vmem:[%s10335_s3] ss:$16 sps:$4 sm:$0xff]  }
 0x2e8   :  { %2328 = vmatprep.subr.bf16.mxu0 %v8730_v21  ;;  %2371 = vmatprep.subr.bf16.mxu1 %v8736_v30  ;;  %v7674_v21 = vld [vmem:[%s10335_s3 + $0x8] ss:$16 sps:$4 sm:$0xff]   ;;  %v7675_v30 = vld [vmem:[#allocation9 + $0xe4] ss:$16 sps:$4 sm:$0xff]  }
 0x2e9   :  { %2358 = vmatprep.mubr.bf16.mxu0 %v10432_v1  ;;  %2401 = vmatprep.mubr.bf16.mxu1 %v10432_v1 }
 0x2eb   :  { %2329 = vmatpush1.bf16.msra.mxu0 %v8744_v35  ;;  %2372 = vmatpush1.bf16.msra.mxu1 %v8750_v0  ;;  %v7676_v35 = vld [vmem:[#allocation9 + $0xec] ss:$16 sps:$4 sm:$0xff]  }
 0x2ec   :  { %2330 = vmatprep.subr.bf16.mxu0 %v8756_v36  ;;  %2373 = vmatprep.subr.bf16.mxu1 %v8762_v37  ;;  %v10524_v36 = vld [vmem:[#allocation47_spill] sm:$0xff] }
 0x2ef   :  { %2331 = vmatpush1.bf16.msra.mxu0 %v8768_v20  ;;  %2374 = vmatpush1.bf16.msra.mxu1 %v8774_v25 }
 0x2f0   :  { %2332 = vmatprep.subr.bf16.mxu0 %v8780_v5  ;;  %2375 = vmatprep.subr.bf16.mxu1 %v8786_v3  ;;  %v10525_v3 = vld [vmem:[#allocation49_spill] sm:$0xff] }
 0x2f3   :  { %2333 = vmatpush1.bf16.msra.mxu0 %v8792_v7  ;;  %2376 = vmatpush1.bf16.msra.mxu1 %v8798_v9 }
 0x2f4   :  { %2334 = vmatprep.subr.bf16.mxu0 %v8804_v14  ;;  %2377 = vmatprep.subr.bf16.mxu1 %v8810_v40  ;;  %v10526_v14 = vld [vmem:[#allocation53_spill] sm:$0xff] }
 0x2f5   :  { %v674_v40 = vadd.f32 %v10526_v14, %v8459_v26  ;;  %v10532_v14 = vld [vmem:[#allocation71_spill] sm:$0xff] }
 0x2f7   :  { %2335 = vmatpush1.bf16.msra.mxu0 %v8816_v34  ;;  %2378 = vmatpush1.bf16.msra.mxu1 %v8822_v29 }
 0x2f8   :  { %2336 = vmatprep.subr.bf16.mxu0 %v8828_v15  ;;  %2379 = vmatprep.subr.bf16.mxu1 %v8834_v22  ;;  %v10527_v15 = vld [vmem:[#allocation51_spill] sm:$0xff] }
 0x2fb   :  { %2337 = vmatpush1.bf16.msra.mxu0 %v8840_v10  ;;  %2380 = vmatpush1.bf16.msra.mxu1 %v8846_v33 }
 0x2fc   :  { %2338 = vmatprep.subr.bf16.mxu0 %v8852_v38  ;;  %2381 = vmatprep.subr.bf16.mxu1 %v8858_v11 }
 0x2ff   :  { %2339 = vmatpush1.bf16.msra.mxu0 %v8864_v31  ;;  %2382 = vmatpush1.bf16.msra.mxu1 %v7670_v61 }
 0x300   :  { %2340 = vmatprep.subr.bf16.mxu0 %v7671_v62  ;;  %2383 = vmatprep.subr.bf16.mxu1 %v7672_v2 }
 0x303   :  { %2341 = vmatpush1.bf16.msra.mxu0 %v7673_v4  ;;  %2384 = vmatpush1.bf16.msra.mxu1 %v7674_v21  ;;  %v10531_v4 = vld [vmem:[#allocation52_spill] sm:$0xff] }
 0x304   :  { %2477 = vmatprep.subr.bf16.mxu0 %v7675_v30  ;;  %2520 = vmatprep.subr.bf16.mxu1 %v7676_v35 }
 0x386   :  { %v2038_v0 = vpop.f32.mrf.mxu0  ;;  %v2081_v20 = vpop.f32.mrf.mxu1 }
 0x387   :  { %v2090_v37 = vadd.f32 %v2038_v0, %v10524_v36  ;;  %v2092_v24 = vadd.f32 %v2081_v20, %v10530_v52  ;;  %v10534_v52 = vld [vmem:[#allocation75_spill] sm:$0xff] }
 0x388   :  { %v2040_v25 = vpop.f32.mrf.mxu0  ;;  %v2083_v29 = vpop.f32.mrf.mxu1 }
 0x389   :  { %v6379_v5 = vmul.f32 -1.442695, %v2090_v37  ;;  %v2091_v7 = vadd.f32 %v2040_v25, %v10525_v3  ;;  %v2093_v42 = vadd.f32 %v2083_v29, %v10528_v6 }
 0x38a   :  { %v2042_v9 = vpop.f32.mrf.mxu0  ;;  %v2085_v11 = vpop.f32.mrf.mxu1 }
 0x38b   :  { %7229 = vpow2.f32 %v6379_v5  ;;  %v6381_v34 = vmul.f32 -1.442695, %v2091_v7  ;;  %v2094_v22 = vadd.f32 %v2042_v9, %v10527_v15  ;;  %v6383_v61 = vmul.f32 -1.442695, %v2093_v42 }
 0x38c   :  { %v2044_v10 = vpop.f32.mrf.mxu0  ;;  %v2087_v43 = vpop.f32.mrf.mxu1  ;;  %v2096_v21 = vadd.f32 %v2085_v11, %v10531_v4 }
 0x38d   :  { %7231 = vpow2.f32 %v6381_v34  ;;  %v6380_v33 = vmul.f32 -1.442695, %v2094_v22  ;;  %v2095_v38 = vadd.f32 %v2044_v10, %v674_v40  ;;  %v2097_v62 = vadd.f32 %v2087_v43, %v747_v23 }
 0x38f   :  { %7233 = vpow2.f32 %v6380_v33  ;;  %v6382_v31 = vmul.f32 -1.442695, %v2095_v38  ;;  %v6384_v0 = vmul.f32 -1.442695, %v2097_v62  ;;  %v10533_v38 = vld [vmem:[#allocation73_spill] sm:$0xff] }
 0x390   :  { %v10535_v62 = vld [vmem:[#allocation77_spill] sm:$0xff] }
 0x391   :  { %7235 = vpow2.f32 %v6382_v31 }
 0x392   :  { %7237 = vtanh.f32 %v2092_v24 }
 0x393   :  { %7239 = vpow2.f32 %v6383_v61 }
 0x398   :  { %v7230_v2 = vpop.eup %7229 }
 0x399   :  { %v2104_v30 = vadd.f32 1.0, %v7230_v2  ;;  %v810_v2 = vadd.f32 %v10535_v62, %v8545_v32 }
 0x39a   :  { %v7232_v35 = vpop.eup %7231 }
 0x39b   :  { %7241 = vrcp.f32 %v2104_v30  ;;  %v2116_v36 = vadd.f32 1.0, %v7232_v35 }
 0x39c   :  { %v7234_v37 = vpop.eup %7233  ;;  %7243 = vtanh.f32 %v2096_v21 }
 0x39d   :  { %7245 = vrcp.f32 %v2116_v36  ;;  %v2105_v25 = vadd.f32 1.0, %v7234_v37 }
 0x39e   :  { %v7236_v5 = vpop.eup %7235  ;;  %7247 = vpow2.f32 %v6384_v0 }
 0x39f   :  { %7249 = vrcp.f32 %v2105_v25  ;;  %v2117_v20 = vadd.f32 1.0, %v7236_v5  ;;  %v7238_v3 = vpop.eup %7237 }
 0x3a0   :  { %v7240_v9 = vpop.eup %7239 }
 0x3a1   :  { %7251 = vrcp.f32 %v2117_v20  ;;  %v2130_v4 = vadd.f32 1.0, %v7240_v9 }
 0x3a6   :  { %v2189_v7 = vpop.f32.mrf.mxu0  ;;  %v2232_v34 = vpop.f32.mrf.mxu1 }
 0x3a7   :  { %v2241_v40 = vadd.f32 %v2189_v7, %v10532_v14  ;;  %v10536_v7 = vld [vmem:[#allocation74_spill] sm:$0xff] }
 0x3a8   :  { %v7242_v29 = vpop.eup %7241  ;;  %v2191_v15 = vpop.f32.mrf.mxu0 }
 0x3a9   :  { %v7244_v22 = vpop.eup %7243  ;;  %v2138_v10 = vmul.f32 %v7242_v29, %v7238_v3  ;;  %v6385_v33 = vmul.f32 -1.442695, %v2241_v40  ;;  %v2242_v11 = vadd.f32 %v2191_v15, %v10533_v38  ;;  %v2234_v23 = vpop.f32.mrf.mxu1  ;;  %v10537_v40 = vld [vmem:[#allocation78_spill] sm:$0xff]  ;;  %v10539_v38 = vld [vmem:[#allocation76_spill] sm:$0xff] }
 0x3aa   :  { %v7246_v31 = vpop.eup %7245  ;;  %v2193_v6 = vpop.f32.mrf.mxu0  ;;  %v2244_v9 = vadd.f32 %v2234_v23, %v10536_v7  ;;  %v883_v29 = vadd.f32 %v10537_v40, %v8549_v18 }
 0x3ab   :  { %v7248_v42 = vpop.eup %7247  ;;  %v2136_v43 = vmul.f32 %v7246_v31, %v8890_v50  ;;  %7253 = vpow2.f32 %v6385_v33  ;;  %v6387_v46 = vmul.f32 -1.442695, %v2242_v11  ;;  %v2245_v24 = vadd.f32 %v2193_v6, %v10534_v52  ;;  %v2236_v5 = vpop.f32.mrf.mxu1 }
 0x3ac   :  { %v7250_v61 = vpop.eup %7249  ;;  %v2195_v21 = vpop.f32.mrf.mxu0  ;;  %v2131_v25 = vadd.f32 1.0, %v7248_v42  ;;  %v2247_v11 = vadd.f32 %v2236_v5, %v10539_v38 }
 0x3ad   :  { %v9062_v30 = vadd.f32 %v2138_v10, %v2136_v43  ;;  %v2139_v35 = vmul.f32 %v7250_v61, %v7244_v22  ;;  %7255 = vpow2.f32 %v6387_v46  ;;  %v6386_v0 = vmul.f32 -1.442695, %v2245_v24  ;;  %v2238_v14 = vpop.f32.mrf.mxu1 }
 0x3ae   :  { %v7252_v36 = vpop.eup %7251  ;;  %v2246_v37 = vadd.f32 %v2195_v21, %v810_v2  ;;  %v6389_v22 = vmul.f32 -1.442695, %v2244_v9  ;;  %v2248_v10 = vadd.f32 %v2238_v14, %v883_v29 }
 0x3af   :  { %v2137_v50 = vmul.f32 %v7252_v36, %v8893_v16  ;;  %7257 = vpow2.f32 %v6386_v0  ;;  %v10538_v16 = vld [vmem:[#allocation72_spill] sm:$0xff] }
 0x3b0   :  { %7259 = vrcp.f32 %v2130_v4  ;;  %v6388_v20 = vmul.f32 -1.442695, %v2246_v37  ;;  %v2243_v15 = vadd.f32 %v2232_v34, %v10538_v16  ;;  %v6390_v42 = vmul.f32 -1.442695, %v2248_v10 }
 0x3b1   :  { %v9065_v3 = vadd.f32 %v2139_v35, %v2137_v50  ;;  %7261 = vtanh.f32 %v9062_v30 }
 0x3b2   :  { %7263 = vpow2.f32 %v6388_v20 }
 0x3b3   :  { %7265 = vrcp.f32 %v2131_v25 }
 0x3b4   :  { %7267 = vtanh.f32 %v9065_v3 }
 0x3b5   :  { %7269 = vtanh.f32 %v2243_v15  ;;  %v2775_v15 = vld [vmem:[#allocation12 + $0x1c0] sm:$0xff] }
 0x3b6   :  { %7271 = vpow2.f32 %v6389_v22  ;;  %v2779_v22 = vld [vmem:[#allocation12 + $0x1e0] sm:$0xff] }
 0x3b7   :  { %v6472_v10 = vcombine.high %v2775_v15, %v2779_v22 }
 0x3b8   :  { %v7254_v33 = vpop.eup %7253 }
 0x3b9   :  { %v2255_v31 = vadd.f32 1.0, %v7254_v33  ;;  %v6471_v33 = vcombine.low %v2775_v15, %v2779_v22  ;;  %v2723_v15 = vld [vmem:[#allocation12 + $0x20] sm:$0xff] }
 0x3ba   :  { %v7256_v6 = vpop.eup %7255 }
 0x3bb   :  { %7273 = vrcp.f32 %v2255_v31  ;;  %v2267_v43 = vadd.f32 1.0, %v7256_v6  ;;  %v2768_v31 = vld [vmem:[#allocation12 + $0x188] sm:$0xff] }
 0x3bc   :  { %v7258_v46 = vpop.eup %7257  ;;  %7275 = vtanh.f32 %v2247_v11 }
 0x3bd   :  { %v7260_v23 = vpop.eup %7259  ;;  %7277 = vrcp.f32 %v2267_v43  ;;  %v2256_v52 = vadd.f32 1.0, %v7258_v46 }
 0x3be   :  { %v7262_v24 = vpop.eup %7261  ;;  %7279 = vpow2.f32 %v6390_v42  ;;  %v2772_v42 = vld [vmem:[#allocation12 + $0x1a8] sm:$0xff] }
 0x3bf   :  { %v7264_v34 = vpop.eup %7263  ;;  %7281 = vrcp.f32 %v2256_v52  ;;  %v2144_v4 = vmul.f32 %v7262_v24, %v7260_v23  ;;  %v6465_v46 = vcombine.low %v2768_v31, %v2772_v42  ;;  %v6466_v23 = vcombine.high %v2768_v31, %v2772_v42  ;;  %v2759_v52 = vld [vmem:[#allocation12 + $0x140] sm:$0xff]  ;;  %v9122_v31 = vld [vmem:[#allocation12 + $0x1f8] sm:$0xff] }
 0x3c0   :  { %v7266_v61 = vpop.eup %7265  ;;  %v2268_v62 = vadd.f32 1.0, %v7264_v34  ;;  %v2763_v24 = vld [vmem:[#allocation12 + $0x160] sm:$0xff]  ;;  %v2760_v34 = vld [vmem:[#allocation12 + $0x148] sm:$0xff] }
 0x3c1   :  { %v7268_v2 = vpop.eup %7267 }
 0x3c2   :  { %7283 = vrcp.f32 %v2268_v62  ;;  %v2145_v21 = vmul.f32 %v7268_v2, %v7266_v61  ;;  %v7270_v0 = vpop.eup %7269  ;;  %v6456_v61 = vcombine.high %v2759_v52, %v2763_v24  ;;  %v2764_v62 = vld [vmem:[#allocation12 + $0x168] sm:$0xff]  ;;  %v6455_v2 = vcombine.low %v2759_v52, %v2763_v24 }
 0x3c3   :  { %v7272_v36 = vpop.eup %7271 }
 0x3c4   :  { %v2146_v35 = vpack.c.bf16 %v2145_v21, %v2144_v4  ;;  %v6457_v4 = vcombine.low %v2760_v34, %v2764_v62  ;;  %v6458_v21 = vcombine.high %v2760_v34, %v2764_v62 }
 0x3c6   :  { %6750 = vst [vmem:[#allocation3 + $0x10] sm:$0xff] %v2146_v35   ;;  %2359 = vmatmul.mubr.bf16.vlgmr.msra.gmra.mxu0 %v2146_v35  ;;  %2402 = vmatmul.mubr.bf16.vlgmr.msra.gmra.mxu1 %v2146_v35  ;;  %v2751_v35 = vld [vmem:[#allocation12 + $0x100] sm:$0xff] }
 0x3c7   :  { %2478 = vmatpush1.bf16.msra.mxu0 %v8902_v27  ;;  %2521 = vmatpush1.bf16.msra.mxu1 %v8905_v54 }
 0x3c8   :  { %v7274_v37 = vpop.eup %7273  ;;  %2479 = vmatprep.subr.bf16.mxu0 %v8908_v12  ;;  %2522 = vmatprep.subr.bf16.mxu1 %v8911_v19  ;;  %v2281_v12 = vadd.f32 1.0, %v7272_v36  ;;  %v2752_v36 = vld [vmem:[#allocation12 + $0x108] sm:$0xff] }
 0x3c9   :  { %v7276_v50 = vpop.eup %7275  ;;  %v2289_v25 = vmul.f32 %v7274_v37, %v7270_v0  ;;  %2509 = vmatprep.mubr.bf16.mxu0 %v10432_v1  ;;  %2552 = vmatprep.mubr.bf16.mxu1 %v10432_v1  ;;  %v2755_v0 = vld [vmem:[#allocation12 + $0x120] sm:$0xff] }
 0x3ca   :  { %v7278_v5 = vpop.eup %7277  ;;  %7285 = vrcp.f32 %v2281_v12  ;;  %v6448_v37 = vcombine.high %v2751_v35, %v2755_v0  ;;  %v2744_v12 = vld [vmem:[#allocation12 + $0xc8] sm:$0xff] }
 0x3cb   :  { %v7280_v20 = vpop.eup %7279  ;;  %v2287_v7 = vmul.f32 %v7278_v5, %v8929_v51  ;;  %2480 = vmatpush1.bf16.msra.mxu0 %v8917_v44  ;;  %2523 = vmatpush1.bf16.msra.mxu1 %v8920_v45  ;;  %v10540_v45 = vld [vmem:[#allocation32_spill] sm:$0xff] }
 0x3cc   :  { %v7282_v27 = vpop.eup %7281  ;;  %2481 = vmatprep.subr.bf16.mxu0 %v8923_v47  ;;  %2524 = vmatprep.subr.bf16.mxu1 %v8926_v49  ;;  %v2282_v14 = vadd.f32 1.0, %v7280_v20  ;;  %v10541_v47 = vld [vmem:[#allocation33_spill] sm:$0xff]  ;;  %v10542_v49 = vld [vmem:[#allocation34_spill] sm:$0xff] }
 0x3cd   :  { %v9085_v54 = vadd.f32 %v2289_v25, %v2287_v7  ;;  %v2290_v19 = vmul.f32 %v7282_v27, %v7276_v50  ;;  %v2756_v50 = vld [vmem:[#allocation12 + $0x128] sm:$0xff]  ;;  %v6447_v25 = vcombine.low %v2751_v35, %v2755_v0  ;;  %v2743_v7 = vld [vmem:[#allocation12 + $0xc0] sm:$0xff] }
 0x3ce   :  { %v6449_v5 = vcombine.low %v2752_v36, %v2756_v50  ;;  %v6450_v20 = vcombine.high %v2752_v36, %v2756_v50  ;;  %v2747_v27 = vld [vmem:[#allocation12 + $0xe0] sm:$0xff] }
 0x3cf   :  { %v7284_v9 = vpop.eup %7283  ;;  %2482 = vmatpush1.bf16.msra.mxu0 %v8932_v53  ;;  %2525 = vmatpush1.bf16.msra.mxu1 %v8935_v55  ;;  %7287 = vtanh.f32 %v9085_v54  ;;  %v10543_v53 = vld [vmem:[#allocation35_spill] sm:$0xff]  ;;  %v10544_v55 = vld [vmem:[#allocation36_spill] sm:$0xff] }
 0x3d0   :  { %v2288_v51 = vmul.f32 %v7284_v9, %v8944_v57  ;;  %2483 = vmatprep.subr.bf16.mxu0 %v8938_v56  ;;  %2526 = vmatprep.subr.bf16.mxu1 %v8941_v39  ;;  %7289 = vrcp.f32 %v2282_v14  ;;  %v10545_v56 = vld [vmem:[#allocation37_spill] sm:$0xff]  ;;  %v2748_v9 = vld [vmem:[#allocation12 + $0xe8] sm:$0xff]  ;;  %v6439_v14 = vcombine.low %v2743_v7, %v2747_v27 }
 0x3d1   :  { %v10546_v39 = vld [vmem:[#allocation25_spill] sm:$0xff] }
 0x3d2   :  { %v9092_v44 = vadd.f32 %v2290_v19, %v2288_v51  ;;  %v6440_v19 = vcombine.high %v2743_v7, %v2747_v27  ;;  %v6441_v51 = vcombine.low %v2744_v12, %v2748_v9 }
 0x3d3   :  { %2484 = vmatpush1.bf16.msra.mxu0 %v8947_v48  ;;  %2527 = vmatpush1.bf16.msra.mxu1 %v8950_v58  ;;  %v10547_v58 = vld [vmem:[#allocation26_spill] sm:$0xff] }
 0x3d4   :  { %2485 = vmatprep.subr.bf16.mxu0 %v8954_v13  ;;  %2528 = vmatprep.subr.bf16.mxu1 %v8957_v63  ;;  %7291 = vtanh.f32 %v9092_v44  ;;  %v10548_v13 = vld [vmem:[#allocation27_spill] sm:$0xff] }
 0x3d7   :  { %2486 = vmatpush1.bf16.msra.mxu0 %v8960_v60  ;;  %2529 = vmatpush1.bf16.msra.mxu1 %v10540_v45  ;;  %v7286_v57 = vpop.eup %7285  ;;  %v6442_v45 = vcombine.high %v2744_v12, %v2748_v9 }
 0x3d8   :  { %2487 = vmatprep.subr.bf16.mxu0 %v10541_v47  ;;  %2530 = vmatprep.subr.bf16.mxu1 %v10542_v49  ;;  %v2735_v47 = vld [vmem:[#allocation12 + $0x80] sm:$0xff] }
 0x3d9   :  { %v2739_v49 = vld [vmem:[#allocation12 + $0xa0] sm:$0xff] }
 0x3db   :  { %2488 = vmatpush1.bf16.msra.mxu0 %v10543_v53  ;;  %2531 = vmatpush1.bf16.msra.mxu1 %v10544_v55  ;;  %v2736_v53 = vld [vmem:[#allocation12 + $0x88] sm:$0xff]  ;;  %v6432_v55 = vcombine.high %v2735_v47, %v2739_v49 }
 0x3dc   :  { %2489 = vmatprep.subr.bf16.mxu0 %v10545_v56  ;;  %2532 = vmatprep.subr.bf16.mxu1 %v10546_v39  ;;  %v7288_v48 = vpop.eup %7287  ;;  %v2740_v56 = vld [vmem:[#allocation12 + $0xa8] sm:$0xff]  ;;  %v6431_v39 = vcombine.low %v2735_v47, %v2739_v49 }
 0x3dd   :  { %v7290_v63 = vpop.eup %7289  ;;  %v2295_v40 = vmul.f32 %v7288_v48, %v7286_v57  ;;  %v6433_v57 = vcombine.low %v2736_v53, %v2740_v56  ;;  %v6434_v48 = vcombine.high %v2736_v53, %v2740_v56  ;;  %v10554_v47 = vld [vmem:[#allocation58_spill] sm:$0xff] }
 0x3df   :  { %2490 = vmatpush1.bf16.msra.mxu0 %v10547_v58  ;;  %2533 = vmatpush1.bf16.msra.mxu1 %v10548_v13  ;;  %v2727_v58 = vld [vmem:[#allocation12 + $0x40] sm:$0xff] }
 0x3e0   :  { %2491 = vmatprep.subr.bf16.mxu0 %v8990_v41  ;;  %2534 = vmatprep.subr.bf16.mxu1 %v8993_v17  ;;  %v2776_v41 = vld [vmem:[#allocation12 + $0x1c8] sm:$0xff]  ;;  %v2731_v13 = vld [vmem:[#allocation12 + $0x60] sm:$0xff] }
 0x3e1   :  { %v7292_v60 = vpop.eup %7291  ;;  %v2780_v17 = vld [vmem:[#allocation12 + $0x1e8] sm:$0xff] }
 0x3e2   :  { %v2296_v29 = vmul.f32 %v7292_v60, %v7290_v63  ;;  %v6473_v38 = vcombine.low %v2776_v41, %v2780_v17  ;;  %v6474_v11 = vcombine.high %v2776_v41, %v2780_v17  ;;  %v2728_v63 = vld [vmem:[#allocation12 + $0x48] sm:$0xff]  ;;  %v6423_v60 = vcombine.low %v2727_v58, %v2731_v13 }
 0x3e3   :  { %2492 = vmatpush1.bf16.msra.mxu0 %v8996_v8  ;;  %2535 = vmatpush1.bf16.msra.mxu1 %v8999_v59  ;;  %v2767_v8 = vld [vmem:[#allocation12 + $0x180] sm:$0xff]  ;;  %v2720_v17 = vld [vmem:[#allocation12 + $0x8] sm:$0xff] }
 0x3e4   :  { %v2297_v16 = vpack.c.bf16 %v2296_v29, %v2295_v40  ;;  %3127 = vmatprep.subr.bf16.mxu0 %v6472_v10  ;;  %3200 = vmatprep.subr.bf16.mxu1 %v6474_v11  ;;  %v2771_v59 = vld [vmem:[#allocation12 + $0x1a0] sm:$0xff]  ;;  %v6424_v40 = vcombine.high %v2727_v58, %v2731_v13  ;;  %v2732_v29 = vld [vmem:[#allocation12 + $0x68] sm:$0xff]  ;;  %v10556_v13 = vld [vmem:[#allocation60_spill] sm:$0xff] }
 0x3e5   :  { %v6464_v6 = vcombine.high %v2767_v8, %v2771_v59  ;;  %v6463_v43 = vcombine.low %v2767_v8, %v2771_v59  ;;  %v6425_v22 = vcombine.low %v2728_v63, %v2732_v29  ;;  %v6426_v41 = vcombine.high %v2728_v63, %v2732_v29  ;;  %v9118_v8 = vld [vmem:[#allocation12 + $0x1f0] sm:$0xff]  ;;  %v9120_v59 = vld [vmem:[#allocation12 + $0x1d8] sm:$0xff] }
 0x3e6   :  { %6755 = vst [vmem:[#allocation4 + $0x8] sm:$0xff] %v2297_v16   ;;  %2510 = vmatmul.mubr.bf16.vlgmr.msra.gmra.mxu0 %v2297_v16  ;;  %2553 = vmatmul.mubr.bf16.vlgmr.msra.gmra.mxu1 %v2297_v16  ;;  %v2719_v16 = vld [vmem:[#allocation12] sm:$0xff]  ;;  %v6478_v52 = vcombine.high %v9120_v59, %v9122_v31 }
 0x3e7   :  { %3159 = vmatprep.mubr.bf16.mxu0 %v10432_v1  ;;  %3232 = vmatprep.mubr.bf16.mxu1 %v10432_v1  ;;  %v6416_v10 = vcombine.high %v2719_v16, %v2723_v15 }
 0x3e8   :  { %3128 = vmatpush1.bf16.msra.mxu0 %v6471_v33  ;;  %3201 = vmatpush1.bf16.msra.mxu1 %v6473_v38  ;;  %v2724_v33 = vld [vmem:[#allocation12 + $0x28] sm:$0xff]  ;;  %v9116_v38 = vld [vmem:[#allocation12 + $0x1d0] sm:$0xff] }
 0x3e9   :  { %3129 = vmatprep.subr.bf16.mxu0 %v6464_v6  ;;  %3202 = vmatprep.subr.bf16.mxu1 %v6466_v23  ;;  %v6418_v11 = vcombine.high %v2720_v17, %v2724_v33  ;;  %v6415_v6 = vcombine.low %v2719_v16, %v2723_v15  ;;  %v6475_v42 = vcombine.low %v9116_v38, %v9118_v8 }
 0x3ea   :  { %v6476_v23 = vcombine.high %v9116_v38, %v9118_v8 }
 0x3ec   :  { %3130 = vmatpush1.bf16.msra.mxu0 %v6463_v43  ;;  %3203 = vmatpush1.bf16.msra.mxu1 %v6465_v46  ;;  %v6477_v43 = vcombine.low %v9120_v59, %v9122_v31  ;;  %v6417_v46 = vcombine.low %v2720_v17, %v2724_v33 }
 0x3ed   :  { %3131 = vmatprep.subr.bf16.mxu0 %v6456_v61  ;;  %3204 = vmatprep.subr.bf16.mxu1 %v6458_v21  ;;  %v10549_v61 = vld [vmem:[#allocation55_spill] sm:$0xff]  ;;  %v10550_v21 = vld [vmem:[#allocation57_spill] sm:$0xff]  ;;  %v9168_v59 = vld [vmem:[#allocation4 + $0x8] sm:$0xff]  }
 0x3f0   :  { %3132 = vmatpush1.bf16.msra.mxu0 %v6455_v2  ;;  %3205 = vmatpush1.bf16.msra.mxu1 %v6457_v4 }
 0x3f1   :  { %3133 = vmatprep.subr.bf16.mxu0 %v6448_v37  ;;  %3206 = vmatprep.subr.bf16.mxu1 %v6450_v20  ;;  %v10551_v37 = vld [vmem:[#allocation61_spill] sm:$0xff] }
 0x3f2   :  { %v684_v50 = vadd.f32 %v10551_v37, %v8459_v26  ;;  %v10555_v26 = vld [vmem:[#allocation56_spill] sm:$0xff] }
 0x3f4   :  { %3134 = vmatpush1.bf16.msra.mxu0 %v6447_v25  ;;  %3207 = vmatpush1.bf16.msra.mxu1 %v6449_v5  ;;  %v10552_v5 = vld [vmem:[#allocation59_spill] sm:$0xff] }
 0x3f5   :  { %3135 = vmatprep.subr.bf16.mxu0 %v6440_v19  ;;  %3208 = vmatprep.subr.bf16.mxu1 %v6442_v45 }
 0x3f8   :  { %3136 = vmatpush1.bf16.msra.mxu0 %v6439_v14  ;;  %3209 = vmatpush1.bf16.msra.mxu1 %v6441_v51  ;;  %v10553_v51 = vld [vmem:[#allocation62_spill] sm:$0xff] }
 0x3f9   :  { %3137 = vmatprep.subr.bf16.mxu0 %v6432_v55  ;;  %3210 = vmatprep.subr.bf16.mxu1 %v6434_v48  ;;  %v757_v45 = vadd.f32 %v10553_v51, %v8466_v28 }
 0x3fc   :  { %3138 = vmatpush1.bf16.msra.mxu0 %v6431_v39  ;;  %3211 = vmatpush1.bf16.msra.mxu1 %v6433_v57 }
 0x3fd   :  { %3139 = vmatprep.subr.bf16.mxu0 %v6424_v40  ;;  %3212 = vmatprep.subr.bf16.mxu1 %v6426_v41 }
 0x400   :  { %3140 = vmatpush1.bf16.msra.mxu0 %v6423_v60  ;;  %3213 = vmatpush1.bf16.msra.mxu1 %v6425_v22 }
 0x401   :  { %3141 = vmatprep.subr.bf16.mxu0 %v6416_v10  ;;  %3214 = vmatprep.subr.bf16.mxu1 %v6418_v11  ;;  %v10557_v10 = vld [vmem:[#allocation63_spill] sm:$0xff] }
 0x404   :  { %3142 = vmatpush1.bf16.msra.mxu0 %v6415_v6  ;;  %3215 = vmatpush1.bf16.msra.mxu1 %v6417_v46 }
 0x405   :  { %3273 = vmatprep.subr.bf16.mxu0 %v6476_v23  ;;  %3346 = vmatprep.subr.bf16.mxu1 %v6478_v52 }
 0x486   :  { %v2360_v24 = vpop.f32.mrf.mxu0  ;;  %v2403_v34 = vpop.f32.mrf.mxu1 }
 0x487   :  { %v2412_v62 = vadd.f32 %v2360_v24, %v10549_v61  ;;  %v2414_v55 = vadd.f32 %v2403_v34, %v10555_v26  ;;  %v10558_v24 = vld [vmem:[#allocation65_spill] sm:$0xff]  ;;  %v10562_v26 = vld [vmem:[#allocation70_spill] sm:$0xff] }
 0x488   :  { %v2362_v2 = vpop.f32.mrf.mxu0  ;;  %v2405_v0 = vpop.f32.mrf.mxu1 }
 0x489   :  { %v6395_v4 = vmul.f32 -1.442695, %v2412_v62  ;;  %v2413_v35 = vadd.f32 %v2362_v2, %v10550_v21  ;;  %v2415_v49 = vadd.f32 %v2405_v0, %v10554_v47  ;;  %v10559_v0 = vld [vmem:[#allocation67_spill] sm:$0xff] }
 0x48a   :  { %v2364_v36 = vpop.f32.mrf.mxu0  ;;  %v2407_v12 = vpop.f32.mrf.mxu1 }
 0x48b   :  { %7293 = vpow2.f32 %v6395_v4  ;;  %v6397_v25 = vmul.f32 -1.442695, %v2413_v35  ;;  %v2416_v20 = vadd.f32 %v2364_v36, %v10552_v5  ;;  %v6399_v56 = vmul.f32 -1.442695, %v2415_v49  ;;  %v10561_v49 = vld [vmem:[#allocation66_spill] sm:$0xff] }
 0x48c   :  { %v2366_v7 = vpop.f32.mrf.mxu0  ;;  %v2409_v14 = vpop.f32.mrf.mxu1  ;;  %v2418_v63 = vadd.f32 %v2407_v12, %v10556_v13 }
 0x48d   :  { %7295 = vpow2.f32 %v6397_v25  ;;  %v6396_v27 = vmul.f32 -1.442695, %v2416_v20  ;;  %v2417_v19 = vadd.f32 %v2366_v7, %v684_v50  ;;  %v2419_v53 = vadd.f32 %v2409_v14, %v757_v45  ;;  %v10560_v50 = vld [vmem:[#allocation69_spill] sm:$0xff] }
 0x48e   :  { %v800_v25 = vadd.f32 %v10560_v50, %v8545_v32 }
 0x48f   :  { %7297 = vpow2.f32 %v6396_v27  ;;  %v6398_v9 = vmul.f32 -1.442695, %v2417_v19  ;;  %v6400_v57 = vmul.f32 -1.442695, %v2419_v53 }
 0x491   :  { %7299 = vpow2.f32 %v6398_v9 }
 0x492   :  { %7301 = vtanh.f32 %v2414_v55  ;;  %v873_v55 = vadd.f32 %v10562_v26, %v8549_v18  ;;  %v2766_v26 = vld [vmem:[#allocation12 + $0x178] sm:$0xff] }
 0x493   :  { %7303 = vpow2.f32 %v6399_v56  ;;  %v10563_v56 = vld [vmem:[#allocation64_spill] sm:$0xff] }
 0x498   :  { %v7294_v39 = vpop.eup %7293 }
 0x499   :  { %v2426_v48 = vadd.f32 1.0, %v7294_v39 }
 0x49a   :  { %v7296_v58 = vpop.eup %7295 }
 0x49b   :  { %7305 = vrcp.f32 %v2426_v48  ;;  %v2438_v60 = vadd.f32 1.0, %v7296_v58 }
 0x49c   :  { %v7298_v40 = vpop.eup %7297  ;;  %7307 = vpow2.f32 %v6400_v57 }
 0x49d   :  { %7309 = vrcp.f32 %v2438_v60  ;;  %v2427_v28 = vadd.f32 1.0, %v7298_v40 }
 0x49e   :  { %v7300_v29 = vpop.eup %7299  ;;  %7311 = vtanh.f32 %v2418_v63  ;;  %v10564_v63 = vld [vmem:[#allocation68_spill] sm:$0xff] }
 0x49f   :  { %7313 = vrcp.f32 %v2427_v28  ;;  %v2439_v16 = vadd.f32 1.0, %v7300_v29  ;;  %v7302_v15 = vpop.eup %7301 }
 0x4a0   :  { %v7304_v41 = vpop.eup %7303 }
 0x4a1   :  { %7315 = vrcp.f32 %v2439_v16  ;;  %v2452_v62 = vadd.f32 1.0, %v7304_v41 }
 0x4a6   :  { %v2511_v22 = vpop.f32.mrf.mxu0  ;;  %v2554_v11 = vpop.f32.mrf.mxu1 }
 0x4a7   :  { %v2563_v17 = vadd.f32 %v2511_v22, %v10557_v10  ;;  %v2565_v39 = vadd.f32 %v2554_v11, %v10563_v56 }
 0x4a8   :  { %v7306_v33 = vpop.eup %7305  ;;  %v2513_v6 = vpop.f32.mrf.mxu0 }
 0x4a9   :  { %v7308_v46 = vpop.eup %7307  ;;  %v2460_v23 = vmul.f32 %v7306_v33, %v7302_v15  ;;  %v6401_v52 = vmul.f32 -1.442695, %v2563_v17  ;;  %v2564_v34 = vadd.f32 %v2513_v6, %v10558_v24  ;;  %v2556_v20 = vpop.f32.mrf.mxu1 }
 0x4aa   :  { %v7310_v61 = vpop.eup %7309  ;;  %v2515_v2 = vpop.f32.mrf.mxu0  ;;  %v2453_v5 = vadd.f32 1.0, %v7308_v46  ;;  %v2566_v32 = vadd.f32 %v2556_v20, %v10561_v49 }
 0x4ab   :  { %v7312_v4 = vpop.eup %7311  ;;  %v2458_v21 = vmul.f32 %v7310_v61, %v9062_v30  ;;  %7317 = vpow2.f32 %v6401_v52  ;;  %v6403_v35 = vmul.f32 -1.442695, %v2564_v34  ;;  %v2567_v36 = vadd.f32 %v2515_v2, %v10559_v0  ;;  %v2558_v51 = vpop.f32.mrf.mxu1 }
 0x4ac   :  { %v7314_v37 = vpop.eup %7313  ;;  %v2517_v7 = vpop.f32.mrf.mxu0  ;;  %v6405_v57 = vmul.f32 -1.442695, %v2566_v32  ;;  %v2569_v60 = vadd.f32 %v2558_v51, %v10564_v63  ;;  %v2774_v51 = vld [vmem:[#allocation12 + $0x1b8] sm:$0xff]  ;;  %v2765_v32 = vld [vmem:[#allocation12 + $0x170] sm:$0xff] }
 0x4ad   :  { %v2462_v27 = vadd.f32 %v2460_v23, %v2458_v21  ;;  %v2461_v12 = vmul.f32 %v7314_v37, %v7312_v4  ;;  %7319 = vpow2.f32 %v6403_v35  ;;  %v6402_v19 = vmul.f32 -1.442695, %v2567_v36  ;;  %v2560_v53 = vpop.f32.mrf.mxu1  ;;  %v2749_v63 = vld [vmem:[#allocation12 + $0xf0] sm:$0xff] }
 0x4ae   :  { %v7316_v9 = vpop.eup %7315  ;;  %7321 = vrcp.f32 %v2452_v62  ;;  %v2568_v14 = vadd.f32 %v2517_v7, %v800_v25  ;;  %v2570_v48 = vadd.f32 %v2560_v53, %v873_v55  ;;  %v2762_v53 = vld [vmem:[#allocation12 + $0x158] sm:$0xff] }
 0x4af   :  { %7323 = vtanh.f32 %v2462_v27  ;;  %v2459_v30 = vmul.f32 %v7316_v9, %v9065_v3  ;;  %v2769_v9 = vld [vmem:[#allocation12 + $0x190] sm:$0xff]  ;;  %v6461_v8 = vcombine.low %v2762_v53, %v2766_v26 }
 0x4b0   :  { %7325 = vpow2.f32 %v6402_v19  ;;  %v6404_v45 = vmul.f32 -1.442695, %v2568_v14  ;;  %v6406_v29 = vmul.f32 -1.442695, %v2570_v48  ;;  %v2773_v14 = vld [vmem:[#allocation12 + $0x1b0] sm:$0xff] }
 0x4b1   :  { %v2463_v47 = vadd.f32 %v2461_v12, %v2459_v30  ;;  %7327 = vrcp.f32 %v2453_v5  ;;  %v2770_v30 = vld [vmem:[#allocation12 + $0x198] sm:$0xff]  ;;  %v6468_v49 = vcombine.high %v2769_v9, %v2773_v14  ;;  %v6467_v55 = vcombine.low %v2769_v9, %v2773_v14  ;;  %v2753_v48 = vld [vmem:[#allocation12 + $0x110] sm:$0xff] }
 0x4b2   :  { %7329 = vpow2.f32 %v6404_v45  ;;  %v2761_v45 = vld [vmem:[#allocation12 + $0x150] sm:$0xff]  ;;  %v6469_v56 = vcombine.low %v2770_v30, %v2774_v51 }
 0x4b3   :  { %7331 = vtanh.f32 %v2463_v47  ;;  %v6459_v38 = vcombine.low %v2761_v45, %v2765_v32 }
 0x4b4   :  { %7333 = vtanh.f32 %v2565_v39  ;;  %v6460_v39 = vcombine.high %v2761_v45, %v2765_v32  ;;  %v2707_v45 = vld [vmem:[#allocation11 + $0x1a0] sm:$0xff] }
 0x4b5   :  { %7335 = vpow2.f32 %v6405_v57  ;;  %v6462_v57 = vcombine.high %v2762_v53, %v2766_v26 }
 0x4b8   :  { %v7318_v58 = vpop.eup %7317 }
 0x4b9   :  { %v2577_v13 = vadd.f32 1.0, %v7318_v58  ;;  %v2757_v58 = vld [vmem:[#allocation12 + $0x130] sm:$0xff] }
 0x4ba   :  { %v7320_v3 = vpop.eup %7319  ;;  %v6452_v31 = vcombine.high %v2753_v48, %v2757_v58 }
 0x4bb   :  { %v7322_v40 = vpop.eup %7321  ;;  %7337 = vrcp.f32 %v2577_v13  ;;  %v2589_v28 = vadd.f32 1.0, %v7320_v3  ;;  %v2754_v13 = vld [vmem:[#allocation12 + $0x118] sm:$0xff] }
 0x4bc   :  { %v7324_v16 = vpop.eup %7323  ;;  %v2758_v3 = vld [vmem:[#allocation12 + $0x138] sm:$0xff] }
 0x4bd   :  { %v7326_v15 = vpop.eup %7325  ;;  %v2466_v22 = vmul.f32 %v7324_v16, %v7322_v40  ;;  %7339 = vrcp.f32 %v2589_v28  ;;  %v2750_v40 = vld [vmem:[#allocation12 + $0xf8] sm:$0xff]  ;;  %v6451_v28 = vcombine.low %v2753_v48, %v2757_v58  ;;  %v2700_v48 = vld [vmem:[#allocation11 + $0x168] sm:$0xff] }
 0x4be   :  { %v7328_v18 = vpop.eup %7327  ;;  %v2578_v41 = vadd.f32 1.0, %v7326_v15  ;;  %7341 = vtanh.f32 %v2569_v60  ;;  %v2746_v60 = vld [vmem:[#allocation12 + $0xd8] sm:$0xff] }
 0x4bf   :  { %v7330_v10 = vpop.eup %7329  ;;  %7343 = vpow2.f32 %v6406_v29  ;;  %v6453_v29 = vcombine.low %v2754_v13, %v2758_v3  ;;  %v6446_v15 = vcombine.high %v2746_v60, %v2750_v40 }
 0x4c0   :  { %v7332_v17 = vpop.eup %7331  ;;  %7345 = vrcp.f32 %v2578_v41  ;;  %v2590_v33 = vadd.f32 1.0, %v7330_v10  ;;  %v2738_v41 = vld [vmem:[#allocation12 + $0x98] sm:$0xff] }
 0x4c1   :  { %v2467_v11 = vmul.f32 %v7332_v17, %v7328_v18  ;;  %v7334_v46 = vpop.eup %7333  ;;  %v2741_v18 = vld [vmem:[#allocation12 + $0xb0] sm:$0xff]  ;;  %v2742_v10 = vld [vmem:[#allocation12 + $0xb8] sm:$0xff] }
 0x4c2   :  { %7347 = vrcp.f32 %v2590_v33  ;;  %v7336_v23 = vpop.eup %7335  ;;  %v6445_v33 = vcombine.low %v2746_v60, %v2750_v40 }
 0x4c3   :  { %v6759_v6 = vpack.c.bf16 %v2467_v11, %v2466_v22  ;;  %v2603_v61 = vadd.f32 1.0, %v7336_v23  ;;  %v2737_v22 = vld [vmem:[#allocation12 + $0x90] sm:$0xff] }
 0x4c4   :  { %v9174_v11 = vld [vmem:[#allocation4 + $0x10] sm:$0xff]  }
 0x4c5   :  { %6760 = vst [vmem:[#allocation3 + $0x18] sm:$0xff] %v6759_v6   ;;  %7349 = vrcp.f32 %v2603_v61  ;;  %v6436_v6 = vcombine.high %v2737_v22, %v2741_v18  ;;  %v2729_v23 = vld [vmem:[#allocation12 + $0x50] sm:$0xff]  ;;  %v6435_v61 = vcombine.low %v2737_v22, %v2741_v18 }
 0x4c8   :  { %v7338_v52 = vpop.eup %7337 }
 0x4c9   :  { %v2611_v24 = vmul.f32 %v7338_v52, %v7334_v46  ;;  %v6438_v46 = vcombine.high %v2738_v41, %v2742_v10  ;;  %v2733_v52 = vld [vmem:[#allocation12 + $0x70] sm:$0xff] }
 0x4ca   :  { %v7340_v34 = vpop.eup %7339 }
 0x4cb   :  { %v7342_v62 = vpop.eup %7341  ;;  %v2609_v2 = vmul.f32 %v7340_v34, %v9085_v54  ;;  %v2734_v34 = vld [vmem:[#allocation12 + $0x78] sm:$0xff] }
 0x4cc   :  { %v7344_v4 = vpop.eup %7343 }
 0x4cd   :  { %v7346_v21 = vpop.eup %7345  ;;  %v2613_v35 = vadd.f32 %v2611_v24, %v2609_v2  ;;  %v2604_v37 = vadd.f32 1.0, %v7344_v4  ;;  %v2730_v24 = vld [vmem:[#allocation12 + $0x58] sm:$0xff]  ;;  %v6428_v2 = vcombine.high %v2729_v23, %v2733_v52 }
 0x4ce   :  { %v2612_v0 = vmul.f32 %v7346_v21, %v7342_v62  ;;  %v6437_v62 = vcombine.low %v2738_v41, %v2742_v10  ;;  %v6430_v4 = vcombine.high %v2730_v24, %v2734_v34  ;;  %v2721_v21 = vld [vmem:[#allocation12 + $0x10] sm:$0xff] }
 0x4cf   :  { %v7348_v36 = vpop.eup %7347  ;;  %7351 = vtanh.f32 %v2613_v35  ;;  %v2725_v35 = vld [vmem:[#allocation12 + $0x30] sm:$0xff] }
 0x4d0   :  { %v2610_v50 = vmul.f32 %v7348_v36, %v9092_v44  ;;  %7353 = vrcp.f32 %v2604_v37  ;;  %v6470_v44 = vcombine.high %v2770_v30, %v2774_v51  ;;  %v2726_v36 = vld [vmem:[#allocation12 + $0x38] sm:$0xff]  ;;  %v6427_v37 = vcombine.low %v2729_v23, %v2733_v52  ;;  %v2703_v51 = vld [vmem:[#allocation11 + $0x180] sm:$0xff] }
 0x4d1   :  { %v6532_v26 = vcombine.high %v2703_v51, %v2707_v45  ;;  %v6531_v58 = vcombine.low %v2703_v51, %v2707_v45 }
 0x4d2   :  { %v2614_v25 = vadd.f32 %v2612_v0, %v2610_v50  ;;  %v7350_v5 = vpop.eup %7349  ;;  %v2722_v0 = vld [vmem:[#allocation12 + $0x18] sm:$0xff]  ;;  %v6429_v50 = vcombine.low %v2730_v24, %v2734_v34  ;;  %v2663_v34 = vld [vmem:[#allocation11 + $0x40] sm:$0xff] }
 0x4d3   :  { %v6421_v9 = vcombine.low %v2722_v0, %v2726_v36 }
 0x4d4   :  { %7355 = vtanh.f32 %v2614_v25  ;;  %v9180_v25 = vld [vmem:[#allocation4 + $0x18] sm:$0xff]  }
 0x4dc   :  { %v7352_v20 = vpop.eup %7351 }
 0x4dd   :  { %v2617_v7 = vmul.f32 %v7352_v20, %v7350_v5  ;;  %v7354_v27 = vpop.eup %7353  ;;  %v6420_v5 = vcombine.high %v2721_v21, %v2725_v35  ;;  %v6422_v20 = vcombine.high %v2722_v0, %v2726_v36  ;;  %v2655_v36 = vld [vmem:[#allocation11] sm:$0xff] }
 0x4e1   :  { %v7356_v12 = vpop.eup %7355 }
 0x4e2   :  { %v2618_v19 = vmul.f32 %v7356_v12, %v7354_v27  ;;  %v2715_v27 = vld [vmem:[#allocation11 + $0x1e0] sm:$0xff]  ;;  %v2712_v12 = vld [vmem:[#allocation11 + $0x1c8] sm:$0xff] }
 0x4e4   :  { %v6764_v54 = vpack.c.bf16 %v2618_v19, %v2617_v7  ;;  %v2711_v7 = vld [vmem:[#allocation11 + $0x1c0] sm:$0xff]  ;;  %v2716_v19 = vld [vmem:[#allocation11 + $0x1e8] sm:$0xff] }
 0x4e5   :  { %v6540_v14 = vcombine.high %v2711_v7, %v2715_v27  ;;  %v6542_v30 = vcombine.high %v2712_v12, %v2716_v19  ;;  %v6539_v32 = vcombine.low %v2711_v7, %v2715_v27  ;;  %v6541_v53 = vcombine.low %v2712_v12, %v2716_v19  ;;  %v2713_v12 = vld [vmem:[#allocation11 + $0x1d0] sm:$0xff] }
 0x4e6   :  { %6765 = vst [vmem:[#allocation4] sm:$0xff] %v6764_v54   ;;  %v6419_v54 = vcombine.low %v2721_v21, %v2725_v35  ;;  %v2717_v19 = vld [vmem:[#allocation11 + $0x1f0] sm:$0xff] }
 0x4e7   :  { %v6544_v51 = vcombine.high %v2713_v12, %v2717_v19 }
 0x4ed   :  { %v9156_v47 = vld [vmem:[#allocation4] sm:$0xff]  }
 0x4ee   :  { %3160 = vmatmul.mubr.bf16.vlgmr.msra.gmra.mxu0 %v9156_v47  ;;  %3233 = vmatmul.mubr.bf16.vlgmr.msra.gmra.mxu1 %v9156_v47 }
 0x4ef   :  { %3274 = vmatpush1.bf16.msra.mxu0 %v6475_v42  ;;  %3347 = vmatpush1.bf16.msra.mxu1 %v6477_v43  ;;  %v6454_v42 = vcombine.high %v2754_v13, %v2758_v3  ;;  %v2745_v43 = vld [vmem:[#allocation12 + $0xd0] sm:$0xff] }
 0x4f0   :  { %3275 = vmatprep.subr.bf16.mxu0 %v6468_v49  ;;  %3348 = vmatprep.subr.bf16.mxu1 %v6470_v44  ;;  %v6444_v16 = vcombine.high %v2745_v43, %v2749_v63  ;;  %v6443_v17 = vcombine.low %v2745_v43, %v2749_v63  ;;  %v2704_v49 = vld [vmem:[#allocation11 + $0x188] sm:$0xff] }
 0x4f1   :  { %3169 = vmatprep.mubr.bf16.mxu0 %v10432_v1  ;;  %3242 = vmatprep.mubr.bf16.mxu1 %v10432_v1  ;;  %v2708_v44 = vld [vmem:[#allocation11 + $0x1a8] sm:$0xff] }
 0x4f2   :  { %v6533_v13 = vcombine.low %v2704_v49, %v2708_v44  ;;  %v2692_v43 = vld [vmem:[#allocation11 + $0x128] sm:$0xff] }
 0x4f3   :  { %3276 = vmatpush1.bf16.msra.mxu0 %v6467_v55  ;;  %3349 = vmatpush1.bf16.msra.mxu1 %v6469_v56  ;;  %v6534_v55 = vcombine.high %v2704_v49, %v2708_v44  ;;  %v2695_v56 = vld [vmem:[#allocation11 + $0x140] sm:$0xff]  ;;  %v2705_v49 = vld [vmem:[#allocation11 + $0x190] sm:$0xff] }
 0x4f4   :  { %3277 = vmatprep.subr.bf16.mxu0 %v6460_v39  ;;  %3350 = vmatprep.subr.bf16.mxu1 %v6462_v57  ;;  %v2699_v39 = vld [vmem:[#allocation11 + $0x160] sm:$0xff]  ;;  %v2696_v57 = vld [vmem:[#allocation11 + $0x148] sm:$0xff]  ;;  %v2709_v44 = vld [vmem:[#allocation11 + $0x1b0] sm:$0xff] }
 0x4f5   :  { %v6524_v3 = vcombine.high %v2695_v56, %v2699_v39  ;;  %v6523_v63 = vcombine.low %v2695_v56, %v2699_v39  ;;  %v6536_v56 = vcombine.high %v2705_v49, %v2709_v44 }
 0x4f6   :  { %3170 = vmatmul.mubr.bf16.gmra.mxu0 %v9168_v59  ;;  %3243 = vmatmul.mubr.bf16.gmra.mxu1 %v9168_v59 }
 0x4f7   :  { %3278 = vmatpush1.bf16.msra.mxu0 %v6459_v38  ;;  %3351 = vmatpush1.bf16.msra.mxu1 %v6461_v8  ;;  %v6526_v38 = vcombine.high %v2696_v57, %v2700_v48  ;;  %v2687_v8 = vld [vmem:[#allocation11 + $0x100] sm:$0xff] }
 0x4f8   :  { %3279 = vmatprep.subr.bf16.mxu0 %v6452_v31  ;;  %3352 = vmatprep.subr.bf16.mxu1 %v6454_v42  ;;  %v2691_v31 = vld [vmem:[#allocation11 + $0x120] sm:$0xff]  ;;  %v2688_v42 = vld [vmem:[#allocation11 + $0x108] sm:$0xff] }
 0x4f9   :  { %3179 = vmatprep.mubr.bf16.mxu0 %v10432_v1  ;;  %3252 = vmatprep.mubr.bf16.mxu1 %v10432_v1  ;;  %v6516_v60 = vcombine.high %v2687_v8, %v2691_v31  ;;  %v6518_v40 = vcombine.high %v2688_v42, %v2692_v43  ;;  %v6515_v22 = vcombine.low %v2687_v8, %v2691_v31 }
 0x4fa   :  { %v6517_v18 = vcombine.low %v2688_v42, %v2692_v43  ;;  %v2689_v42 = vld [vmem:[#allocation11 + $0x110] sm:$0xff] }
 0x4fb   :  { %3280 = vmatpush1.bf16.msra.mxu0 %v6451_v28  ;;  %3353 = vmatpush1.bf16.msra.mxu1 %v6453_v29  ;;  %v2679_v28 = vld [vmem:[#allocation11 + $0xc0] sm:$0xff]  ;;  %v2693_v43 = vld [vmem:[#allocation11 + $0x130] sm:$0xff] }
 0x4fc   :  { %3281 = vmatprep.subr.bf16.mxu0 %v6444_v16  ;;  %3354 = vmatprep.subr.bf16.mxu1 %v6446_v15  ;;  %v2683_v29 = vld [vmem:[#allocation11 + $0xe0] sm:$0xff]  ;;  %v2680_v16 = vld [vmem:[#allocation11 + $0xc8] sm:$0xff] }
 0x4fd   :  { %v2684_v15 = vld [vmem:[#allocation11 + $0xe8] sm:$0xff]  ;;  %v6508_v41 = vcombine.high %v2679_v28, %v2683_v29  ;;  %v6507_v23 = vcombine.low %v2679_v28, %v2683_v29  ;;  %v6520_v29 = vcombine.high %v2689_v42, %v2693_v43 }
 0x4fe   :  { %3180 = vmatmul.mubr.bf16.gmra.mxu0 %v9174_v11  ;;  %3253 = vmatmul.mubr.bf16.gmra.mxu1 %v9174_v11  ;;  %v6510_v10 = vcombine.high %v2680_v16, %v2684_v15  ;;  %v9208_v28 = vld [vmem:[#allocation3 + $0x8] sm:$0xff]  }
 0x4ff   :  { %3282 = vmatpush1.bf16.msra.mxu0 %v6443_v17  ;;  %3355 = vmatpush1.bf16.msra.mxu1 %v6445_v33  ;;  %v2671_v17 = vld [vmem:[#allocation11 + $0x80] sm:$0xff] }
 0x500   :  { %3283 = vmatprep.subr.bf16.mxu0 %v6436_v6  ;;  %3356 = vmatprep.subr.bf16.mxu1 %v6438_v46  ;;  %v2675_v33 = vld [vmem:[#allocation11 + $0xa0] sm:$0xff]  ;;  %v2672_v6 = vld [vmem:[#allocation11 + $0x88] sm:$0xff] }
 0x501   :  { %3189 = vmatprep.mubr.bf16.mxu0 %v10432_v1  ;;  %3262 = vmatprep.mubr.bf16.mxu1 %v10432_v1  ;;  %v2676_v46 = vld [vmem:[#allocation11 + $0xa8] sm:$0xff]  ;;  %v6500_v52 = vcombine.high %v2671_v17, %v2675_v33 }
 0x502   :  { %v6502_v24 = vcombine.high %v2672_v6, %v2676_v46  ;;  %v6501_v21 = vcombine.low %v2672_v6, %v2676_v46  ;;  %v2673_v46 = vld [vmem:[#allocation11 + $0x90] sm:$0xff] }
 0x503   :  { %3284 = vmatpush1.bf16.msra.mxu0 %v6435_v61  ;;  %3357 = vmatpush1.bf16.msra.mxu1 %v6437_v62  ;;  %v2667_v61 = vld [vmem:[#allocation11 + $0x60] sm:$0xff]  ;;  %v2664_v62 = vld [vmem:[#allocation11 + $0x48] sm:$0xff] }
 0x504   :  { %3285 = vmatprep.subr.bf16.mxu0 %v6428_v2  ;;  %3358 = vmatprep.subr.bf16.mxu1 %v6430_v4  ;;  %v2668_v2 = vld [vmem:[#allocation11 + $0x68] sm:$0xff]  ;;  %v6499_v4 = vcombine.low %v2671_v17, %v2675_v33  ;;  %v6492_v35 = vcombine.high %v2663_v34, %v2667_v61 }
 0x505   :  { %v6494_v0 = vcombine.high %v2664_v62, %v2668_v2 }
 0x506   :  { %3190 = vmatmul.mubr.bf16.gmra.mxu0 %v9180_v25  ;;  %3263 = vmatmul.mubr.bf16.gmra.mxu1 %v9180_v25 }
 0x507   :  { %3286 = vmatpush1.bf16.msra.mxu0 %v6427_v37  ;;  %3359 = vmatpush1.bf16.msra.mxu1 %v6429_v50  ;;  %v2659_v37 = vld [vmem:[#allocation11 + $0x20] sm:$0xff]  ;;  %v2656_v50 = vld [vmem:[#allocation11 + $0x8] sm:$0xff] }
 0x508   :  { %3287 = vmatprep.subr.bf16.mxu0 %v6420_v5  ;;  %3360 = vmatprep.subr.bf16.mxu1 %v6422_v20  ;;  %v2660_v5 = vld [vmem:[#allocation11 + $0x28] sm:$0xff]  ;;  %v6491_v20 = vcombine.low %v2663_v34, %v2667_v61  ;;  %v6484_v7 = vcombine.high %v2655_v36, %v2659_v37  ;;  %v9214_v61 = vld [vmem:[#allocation3 + $0x10] sm:$0xff]  }
 0x509   :  { %3305 = vmatprep.mubr.bf16.mxu0 %v10432_v1  ;;  %3378 = vmatprep.mubr.bf16.mxu1 %v10432_v1  ;;  %v6486_v27 = vcombine.high %v2656_v50, %v2660_v5 }
 0x50b   :  { %3288 = vmatpush1.bf16.msra.mxu0 %v6419_v54  ;;  %3361 = vmatpush1.bf16.msra.mxu1 %v6421_v9  ;;  %v2714_v54 = vld [vmem:[#allocation11 + $0x1d8] sm:$0xff] }
 0x50c   :  { %3763 = vmatprep.subr.bf16.mxu0 %v6540_v14  ;;  %3836 = vmatprep.subr.bf16.mxu1 %v6542_v30  ;;  %v2718_v9 = vld [vmem:[#allocation11 + $0x1f8] sm:$0xff]  ;;  %v6483_v14 = vcombine.low %v2655_v36, %v2659_v37  ;;  %v6485_v30 = vcombine.low %v2656_v50, %v2660_v5 }
 0x50d   :  { %v6546_v45 = vcombine.high %v2714_v54, %v2718_v9 }
 0x50e   :  { %3306 = vmatmul.mubr.bf16.vlgmr.msra.gmra.mxu0 %v9156_v47  ;;  %3379 = vmatmul.mubr.bf16.vlgmr.msra.gmra.mxu1 %v9156_v47  ;;  %v6525_v47 = vcombine.low %v2696_v57, %v2700_v48  ;;  %v2697_v57 = vld [vmem:[#allocation11 + $0x150] sm:$0xff] }
 0x50f   :  { %3764 = vmatpush1.bf16.msra.mxu0 %v6539_v32  ;;  %3837 = vmatpush1.bf16.msra.mxu1 %v6541_v53  ;;  %v2706_v32 = vld [vmem:[#allocation11 + $0x198] sm:$0xff]  ;;  %v2701_v48 = vld [vmem:[#allocation11 + $0x170] sm:$0xff] }
 0x510   :  { %3765 = vmatprep.subr.bf16.mxu0 %v6532_v26  ;;  %3838 = vmatprep.subr.bf16.mxu1 %v6534_v55  ;;  %v2710_v53 = vld [vmem:[#allocation11 + $0x1b8] sm:$0xff]  ;;  %v6543_v26 = vcombine.low %v2713_v12, %v2717_v19  ;;  %v9202_v55 = vld [vmem:[#allocation3] sm:$0xff]   ;;  %v6528_v8 = vcombine.high %v2697_v57, %v2701_v48 }
 0x511   :  { %3315 = vmatprep.mubr.bf16.mxu0 %v10432_v1  ;;  %3388 = vmatprep.mubr.bf16.mxu1 %v10432_v1  ;;  %v6538_v39 = vcombine.high %v2706_v32, %v2710_v53 }
 0x513   :  { %3766 = vmatpush1.bf16.msra.mxu0 %v6531_v58  ;;  %3839 = vmatpush1.bf16.msra.mxu1 %v6533_v13  ;;  %v2698_v58 = vld [vmem:[#allocation11 + $0x158] sm:$0xff] }
 0x514   :  { %3767 = vmatprep.subr.bf16.mxu0 %v6524_v3  ;;  %3840 = vmatprep.subr.bf16.mxu1 %v6526_v38  ;;  %v2702_v13 = vld [vmem:[#allocation11 + $0x178] sm:$0xff]  ;;  %v6535_v3 = vcombine.low %v2705_v49, %v2709_v44  ;;  %v6537_v38 = vcombine.low %v2706_v32, %v2710_v53  ;;  %v9230_v44 = vld [vmem:[#allocation14 + $0xe0] ss:$16 sps:$4 sm:$0xff]   ;;  %v9236_v53 = vld [vmem:[#allocation14 + $0xc4] ss:$16 sps:$4 sm:$0xff]  }
 0x515   :  { %v6530_v31 = vcombine.high %v2698_v58, %v2702_v13  ;;  %v9226_v49 = vld [vmem:[#allocation14 + $0xec] ss:$16 sps:$4 sm:$0xff]   ;;  %v9232_v32 = vld [vmem:[#allocation14 + $0xe8] ss:$16 sps:$4 sm:$0xff]  }
 0x516   :  { %3316 = vmatmul.mubr.bf16.gmra.mxu0 %v9168_v59  ;;  %3389 = vmatmul.mubr.bf16.gmra.mxu1 %v9168_v59  ;;  %v6509_v59 = vcombine.low %v2680_v16, %v2684_v15  ;;  %v2681_v15 = vld [vmem:[#allocation11 + $0xd0] sm:$0xff] }
 0x517   :  { %3768 = vmatpush1.bf16.msra.mxu0 %v6523_v63  ;;  %3841 = vmatpush1.bf16.msra.mxu1 %v6525_v47  ;;  %v2690_v63 = vld [vmem:[#allocation11 + $0x118] sm:$0xff] }
 0x518   :  { %3769 = vmatprep.subr.bf16.mxu0 %v6516_v60  ;;  %3842 = vmatprep.subr.bf16.mxu1 %v6518_v40  ;;  %v2694_v47 = vld [vmem:[#allocation11 + $0x138] sm:$0xff]  ;;  %v6527_v60 = vcombine.low %v2697_v57, %v2701_v48  ;;  %v6529_v40 = vcombine.low %v2698_v58, %v2702_v13  ;;  %v9264_v58 = vld [vmem:[#allocation14 + $0x84] ss:$16 sps:$4 sm:$0xff]  }
 0x519   :  { %3325 = vmatprep.mubr.bf16.mxu0 %v10432_v1  ;;  %3398 = vmatprep.mubr.bf16.mxu1 %v10432_v1  ;;  %v6522_v16 = vcombine.high %v2690_v63, %v2694_v47  ;;  %v6521_v17 = vcombine.low %v2690_v63, %v2694_v47  ;;  %v9252_v57 = vld [vmem:[#allocation14 + $0xac] ss:$16 sps:$4 sm:$0xff]   ;;  %v9260_v48 = vld [vmem:[#allocation14 + $0xa8] ss:$16 sps:$4 sm:$0xff]   ;;  %v9292_v63 = vld [vmem:[#allocation14 + $0x44] ss:$16 sps:$4 sm:$0xff]  }
 0x51a   :  { %v9266_v13 = vld [vmem:[#allocation14 + $0x8c] ss:$16 sps:$4 sm:$0xff]  }
 0x51b   :  { %3770 = vmatpush1.bf16.msra.mxu0 %v6515_v22  ;;  %3843 = vmatpush1.bf16.msra.mxu1 %v6517_v18  ;;  %v2685_v22 = vld [vmem:[#allocation11 + $0xf0] sm:$0xff]  ;;  %v2682_v18 = vld [vmem:[#allocation11 + $0xd8] sm:$0xff] }
 0x51c   :  { %3771 = vmatprep.subr.bf16.mxu0 %v6508_v41  ;;  %3844 = vmatprep.subr.bf16.mxu1 %v6510_v10  ;;  %v2686_v41 = vld [vmem:[#allocation11 + $0xf8] sm:$0xff]  ;;  %v6519_v10 = vcombine.low %v2689_v42, %v2693_v43  ;;  %v6512_v33 = vcombine.high %v2681_v15, %v2685_v22  ;;  %v9286_v42 = vld [vmem:[#allocation14 + $0x60] ss:$16 sps:$4 sm:$0xff]  }
 0x51d   :  { %v6514_v6 = vcombine.high %v2682_v18, %v2686_v41  ;;  %v6513_v34 = vcombine.low %v2682_v18, %v2686_v41  ;;  %v9288_v43 = vld [vmem:[#allocation14 + $0x68] ss:$16 sps:$4 sm:$0xff]   ;;  %v9294_v47 = vld [vmem:[#allocation14 + $0x4c] ss:$16 sps:$4 sm:$0xff]   ;;  %v9328_v41 = vld [vmem:[#allocation14] ss:$16 sps:$4 sm:$0xff]  }
 0x51e   :  { %3326 = vmatmul.mubr.bf16.gmra.mxu0 %v9174_v11  ;;  %3399 = vmatmul.mubr.bf16.gmra.mxu1 %v9174_v11  ;;  %v6493_v11 = vcombine.low %v2664_v62, %v2668_v2  ;;  %v9322_v18 = vld [vmem:[#allocation14 + $0xc] ss:$16 sps:$4 sm:$0xff]  }
 0x51f   :  { %3772 = vmatpush1.bf16.msra.mxu0 %v6507_v23  ;;  %3845 = vmatpush1.bf16.msra.mxu1 %v6509_v59  ;;  %v2677_v23 = vld [vmem:[#allocation11 + $0xb0] sm:$0xff]  ;;  %v2674_v59 = vld [vmem:[#allocation11 + $0x98] sm:$0xff] }
 0x520   :  { %3773 = vmatprep.subr.bf16.mxu0 %v6500_v52  ;;  %3846 = vmatprep.subr.bf16.mxu1 %v6502_v24  ;;  %v2678_v52 = vld [vmem:[#allocation11 + $0xb8] sm:$0xff]  ;;  %v6511_v24 = vcombine.low %v2681_v15, %v2685_v22  ;;  %v6504_v62 = vcombine.high %v2673_v46, %v2677_v23  ;;  %v6503_v36 = vcombine.low %v2673_v46, %v2677_v23  ;;  %v9320_v22 = vld [vmem:[#allocation14 + $0x4] ss:$16 sps:$4 sm:$0xff]  }
 0x521   :  { %3335 = vmatprep.mubr.bf16.mxu0 %v10432_v1  ;;  %3408 = vmatprep.mubr.bf16.mxu1 %v10432_v1  ;;  %v6506_v2 = vcombine.high %v2674_v59, %v2678_v52  ;;  %v6505_v37 = vcombine.low %v2674_v59, %v2678_v52  ;;  %v9316_v15 = vld [vmem:[#allocation14 + $0x28] ss:$16 sps:$4 sm:$0xff]   ;;  %v9348_v23 = vld [vmem:[#allocation15 + $0xc4] ss:$16 sps:$4 sm:$0xff]   ;;  %v9350_v59 = vld [vmem:[#allocation15 + $0xcc] ss:$16 sps:$4 sm:$0xff]  }
 0x522   :  { %v9344_v46 = vld [vmem:[#allocation15 + $0xe8] ss:$16 sps:$4 sm:$0xff]   ;;  %10567 = vst [vmem:[#allocation30_spill] sm:$0xff] %v9348_v23  ;;  %10568 = vst [vmem:[#allocation31_spill] sm:$0xff] %v9350_v59  ;;  %v9356_v52 = vld [vmem:[#allocation15 + $0xc0] ss:$16 sps:$4 sm:$0xff]  }
 0x523   :  { %3774 = vmatpush1.bf16.msra.mxu0 %v6499_v4  ;;  %3847 = vmatpush1.bf16.msra.mxu1 %v6501_v21  ;;  %v2665_v4 = vld [vmem:[#allocation11 + $0x50] sm:$0xff]  ;;  %10566 = vst [vmem:[#allocation29_spill] sm:$0xff] %v9344_v46  ;;  %10569 = vst [vmem:[#allocation39_spill] sm:$0xff] %v9356_v52 }
 0x524   :  { %3775 = vmatprep.subr.bf16.mxu0 %v6492_v35  ;;  %3848 = vmatprep.subr.bf16.mxu1 %v6494_v0  ;;  %v2669_v21 = vld [vmem:[#allocation11 + $0x70] sm:$0xff]  ;;  %v2666_v35 = vld [vmem:[#allocation11 + $0x58] sm:$0xff] }
 0x525   :  { %v2670_v0 = vld [vmem:[#allocation11 + $0x78] sm:$0xff]  ;;  %v6496_v50 = vcombine.high %v2665_v4, %v2669_v21  ;;  %v6495_v12 = vcombine.low %v2665_v4, %v2669_v21  ;;  %v9376_v4 = vld [vmem:[#allocation15 + $0x84] ss:$16 sps:$4 sm:$0xff]  }
 0x526   :  { %3336 = vmatmul.mubr.bf16.gmra.mxu0 %v9180_v25  ;;  %3409 = vmatmul.mubr.bf16.gmra.mxu1 %v9180_v25  ;;  %v6545_v25 = vcombine.low %v2714_v54, %v2718_v9  ;;  %v6498_v5 = vcombine.high %v2666_v35, %v2670_v0  ;;  %v6497_v19 = vcombine.low %v2666_v35, %v2670_v0  ;;  %v9220_v54 = vld [vmem:[#allocation3 + $0x18] sm:$0xff]   ;;  %v9382_v35 = vld [vmem:[#allocation15 + $0x80] ss:$16 sps:$4 sm:$0xff]  }
 0x527   :  { %3776 = vmatpush1.bf16.msra.mxu0 %v6491_v20  ;;  %3849 = vmatpush1.bf16.msra.mxu1 %v6493_v11  ;;  %v2657_v20 = vld [vmem:[#allocation11 + $0x10] sm:$0xff]  ;;  %10575 = vst [vmem:[#allocation40_spill] sm:$0xff] %v9376_v4  ;;  %v9378_v21 = vld [vmem:[#allocation15 + $0x8c] ss:$16 sps:$4 sm:$0xff]   ;;  %10577 = vst [vmem:[#allocation79_spill] sm:$0xff] %v9382_v35 }
 0x528   :  { %3777 = vmatprep.subr.bf16.mxu0 %v6484_v7  ;;  %3850 = vmatprep.subr.bf16.mxu1 %v6486_v27  ;;  %v2661_v11 = vld [vmem:[#allocation11 + $0x30] sm:$0xff]  ;;  %v2658_v7 = vld [vmem:[#allocation11 + $0x18] sm:$0xff]  ;;  %10576 = vst [vmem:[#allocation44_spill] sm:$0xff] %v9378_v21 }
 0x529   :  { %3795 = vmatprep.mubr.bf16.mxu0 %v10432_v1  ;;  %3868 = vmatprep.mubr.bf16.mxu1 %v10432_v1  ;;  %v2662_v27 = vld [vmem:[#allocation11 + $0x38] sm:$0xff]  ;;  %v6488_v9 = vcombine.high %v2657_v20, %v2661_v11 }
 0x52a   :  { %v9384_v0 = vld [vmem:[#allocation15 + $0x88] ss:$16 sps:$4 sm:$0xff]  }
 0x52b   :  { %3778 = vmatpush1.bf16.msra.mxu0 %v6483_v14  ;;  %3851 = vmatpush1.bf16.msra.mxu1 %v6485_v30  ;;  %v6490_v14 = vcombine.high %v2658_v7, %v2662_v27  ;;  %v6487_v30 = vcombine.low %v2657_v20, %v2661_v11  ;;  %10578 = vst [vmem:[#allocation81_spill] sm:$0xff] %v9384_v0  ;;  %v9400_v20 = vld [vmem:[#allocation15 + $0x44] ss:$16 sps:$4 sm:$0xff]   ;;  %v9402_v11 = vld [vmem:[#allocation15 + $0x4c] ss:$16 sps:$4 sm:$0xff]  }
 0x52c   :  { %3909 = vmatprep.subr.bf16.mxu0 %v6544_v51  ;;  %3982 = vmatprep.subr.bf16.mxu1 %v6546_v45  ;;  %v6489_v51 = vcombine.low %v2658_v7, %v2662_v27  ;;  %v9224_v45 = vld [vmem:[#allocation14 + $0xe4] ss:$16 sps:$4 sm:$0xff]   ;;  %10583 = vst [vmem:[#allocation80_spill] sm:$0xff] %v9400_v20  ;;  %10584 = vst [vmem:[#allocation84_spill] sm:$0xff] %v9402_v11  ;;  %v9406_v7 = vld [vmem:[#allocation15 + $0x40] ss:$16 sps:$4 sm:$0xff]  }
 0x52d   :  { %10585 = vst [vmem:[#allocation47_spill] sm:$0xff] %v9406_v7  ;;  %v9408_v27 = vld [vmem:[#allocation15 + $0x48] ss:$16 sps:$4 sm:$0xff]  }
 0x52e   :  { %3796 = vmatmul.mubr.bf16.vlgmr.msra.gmra.mxu0 %v9202_v55  ;;  %3869 = vmatmul.mubr.bf16.vlgmr.msra.gmra.mxu1 %v9202_v55  ;;  %10586 = vst [vmem:[#allocation49_spill] sm:$0xff] %v9408_v27 }
 0x52f   :  { %3910 = vmatpush1.bf16.msra.mxu0 %v6543_v26  ;;  %3983 = vmatpush1.bf16.msra.mxu1 %v6545_v25  ;;  %v9238_v26 = vld [vmem:[#allocation14 + $0xcc] ss:$16 sps:$4 sm:$0xff]   ;;  %v9244_v25 = vld [vmem:[#allocation14 + $0xc0] ss:$16 sps:$4 sm:$0xff]  }
 0x530   :  { %3911 = vmatprep.subr.bf16.mxu0 %v6536_v56  ;;  %3984 = vmatprep.subr.bf16.mxu1 %v6538_v39  ;;  %v9246_v56 = vld [vmem:[#allocation14 + $0xc8] ss:$16 sps:$4 sm:$0xff]   ;;  %v9250_v39 = vld [vmem:[#allocation14 + $0xa4] ss:$16 sps:$4 sm:$0xff]  }
 0x531   :  { %3805 = vmatprep.mubr.bf16.mxu0 %v10432_v1  ;;  %3878 = vmatprep.mubr.bf16.mxu1 %v10432_v1 }
 0x533   :  { %3912 = vmatpush1.bf16.msra.mxu0 %v6535_v3  ;;  %3985 = vmatpush1.bf16.msra.mxu1 %v6537_v38  ;;  %v9272_v3 = vld [vmem:[#allocation14 + $0x80] ss:$16 sps:$4 sm:$0xff]   ;;  %v9274_v38 = vld [vmem:[#allocation14 + $0x88] ss:$16 sps:$4 sm:$0xff]  }
 0x534   :  { %3913 = vmatprep.subr.bf16.mxu0 %v6528_v8  ;;  %3986 = vmatprep.subr.bf16.mxu1 %v6530_v31  ;;  %v9278_v8 = vld [vmem:[#allocation14 + $0x64] ss:$16 sps:$4 sm:$0xff]   ;;  %v9280_v31 = vld [vmem:[#allocation14 + $0x6c] ss:$16 sps:$4 sm:$0xff]  }
 0x536   :  { %3806 = vmatmul.mubr.bf16.gmra.mxu0 %v9208_v28  ;;  %3879 = vmatmul.mubr.bf16.gmra.mxu1 %v9208_v28 }
 0x537   :  { %3914 = vmatpush1.bf16.msra.mxu0 %v6527_v60  ;;  %3987 = vmatpush1.bf16.msra.mxu1 %v6529_v40  ;;  %v9300_v60 = vld [vmem:[#allocation14 + $0x40] ss:$16 sps:$4 sm:$0xff]   ;;  %v9302_v40 = vld [vmem:[#allocation14 + $0x48] ss:$16 sps:$4 sm:$0xff]  }
 0x538   :  { %3915 = vmatprep.subr.bf16.mxu0 %v6520_v29  ;;  %3988 = vmatprep.subr.bf16.mxu1 %v6522_v16  ;;  %v9308_v29 = vld [vmem:[#allocation14 + $0x2c] ss:$16 sps:$4 sm:$0xff]   ;;  %v9314_v16 = vld [vmem:[#allocation14 + $0x20] ss:$16 sps:$4 sm:$0xff]  }
 0x539   :  { %3815 = vmatprep.mubr.bf16.mxu0 %v10432_v1  ;;  %3888 = vmatprep.mubr.bf16.mxu1 %v10432_v1 }
 0x53b   :  { %3916 = vmatpush1.bf16.msra.mxu0 %v6519_v10  ;;  %3989 = vmatpush1.bf16.msra.mxu1 %v6521_v17  ;;  %v9330_v10 = vld [vmem:[#allocation14 + $0x8] ss:$16 sps:$4 sm:$0xff]   ;;  %v9334_v17 = vld [vmem:[#allocation15 + $0xe4] ss:$16 sps:$4 sm:$0xff]  }
 0x53c   :  { %3917 = vmatprep.subr.bf16.mxu0 %v6512_v33  ;;  %3990 = vmatprep.subr.bf16.mxu1 %v6514_v6  ;;  %v9336_v33 = vld [vmem:[#allocation15 + $0xec] ss:$16 sps:$4 sm:$0xff]   ;;  %v9342_v6 = vld [vmem:[#allocation15 + $0xe0] ss:$16 sps:$4 sm:$0xff]  }
 0x53d   :  { %10565 = vst [vmem:[#allocation28_spill] sm:$0xff] %v9342_v6 }
 0x53e   :  { %3816 = vmatmul.mubr.bf16.gmra.mxu0 %v9214_v61  ;;  %3889 = vmatmul.mubr.bf16.gmra.mxu1 %v9214_v61 }
 0x53f   :  { %3918 = vmatpush1.bf16.msra.mxu0 %v6511_v24  ;;  %3991 = vmatpush1.bf16.msra.mxu1 %v6513_v34  ;;  %v9358_v24 = vld [vmem:[#allocation15 + $0xc8] ss:$16 sps:$4 sm:$0xff]   ;;  %v9362_v34 = vld [vmem:[#allocation15 + $0xa4] ss:$16 sps:$4 sm:$0xff]  }
 0x540   :  { %3919 = vmatprep.subr.bf16.mxu0 %v6504_v62  ;;  %3992 = vmatprep.subr.bf16.mxu1 %v6506_v2  ;;  %10570 = vst [vmem:[#allocation41_spill] sm:$0xff] %v9358_v24  ;;  %10571 = vst [vmem:[#allocation45_spill] sm:$0xff] %v9362_v34  ;;  %v9370_v62 = vld [vmem:[#allocation15 + $0xa0] ss:$16 sps:$4 sm:$0xff]   ;;  %v9372_v2 = vld [vmem:[#allocation15 + $0xa8] ss:$16 sps:$4 sm:$0xff]  }
 0x541   :  { %3825 = vmatprep.mubr.bf16.mxu0 %v10432_v1  ;;  %3898 = vmatprep.mubr.bf16.mxu1 %v10432_v1  ;;  %10573 = vst [vmem:[#allocation42_spill] sm:$0xff] %v9370_v62  ;;  %10574 = vst [vmem:[#allocation46_spill] sm:$0xff] %v9372_v2 }
 0x543   :  { %3920 = vmatpush1.bf16.msra.mxu0 %v6503_v36  ;;  %3993 = vmatpush1.bf16.msra.mxu1 %v6505_v37  ;;  %v9388_v36 = vld [vmem:[#allocation15 + $0x64] ss:$16 sps:$4 sm:$0xff]   ;;  %v9390_v37 = vld [vmem:[#allocation15 + $0x6c] ss:$16 sps:$4 sm:$0xff]  }
 0x544   :  { %3921 = vmatprep.subr.bf16.mxu0 %v6496_v50  ;;  %3994 = vmatprep.subr.bf16.mxu1 %v6498_v5  ;;  %10579 = vst [vmem:[#allocation85_spill] sm:$0xff] %v9388_v36  ;;  %10580 = vst [vmem:[#allocation83_spill] sm:$0xff] %v9390_v37  ;;  %v9394_v50 = vld [vmem:[#allocation15 + $0x60] ss:$16 sps:$4 sm:$0xff]   ;;  %v9396_v5 = vld [vmem:[#allocation15 + $0x68] ss:$16 sps:$4 sm:$0xff]  }
 0x545   :  { %10581 = vst [vmem:[#allocation82_spill] sm:$0xff] %v9394_v50  ;;  %10582 = vst [vmem:[#allocation86_spill] sm:$0xff] %v9396_v5 }
 0x546   :  { %3826 = vmatmul.mubr.bf16.gmra.mxu0 %v9220_v54  ;;  %3899 = vmatmul.mubr.bf16.gmra.mxu1 %v9220_v54 }
 0x547   :  { %3922 = vmatpush1.bf16.msra.mxu0 %v6495_v12  ;;  %3995 = vmatpush1.bf16.msra.mxu1 %v6497_v19  ;;  %v9412_v12 = vld [vmem:[#allocation15 + $0x24] ss:$16 sps:$4 sm:$0xff]   ;;  %v9414_v19 = vld [vmem:[#allocation15 + $0x2c] ss:$16 sps:$4 sm:$0xff]  }
 0x548   :  { %3923 = vmatprep.subr.bf16.mxu0 %v6488_v9  ;;  %3996 = vmatprep.subr.bf16.mxu1 %v6490_v14  ;;  %10587 = vst [vmem:[#allocation53_spill] sm:$0xff] %v9412_v12  ;;  %10588 = vst [vmem:[#allocation51_spill] sm:$0xff] %v9414_v19  ;;  %v9420_v9 = vld [vmem:[#allocation15 + $0x28] ss:$16 sps:$4 sm:$0xff]   ;;  %v9424_v14 = vld [vmem:[#allocation15 + $0x4] ss:$16 sps:$4 sm:$0xff]  }
 0x549   :  { %3941 = vmatprep.mubr.bf16.mxu0 %v10432_v1  ;;  %4014 = vmatprep.mubr.bf16.mxu1 %v10432_v1  ;;  %10590 = vst [vmem:[#allocation54_spill] sm:$0xff] %v9420_v9  ;;  %10591 = vst [vmem:[#allocation48_spill] sm:$0xff] %v9424_v14 }
 0x54b   :  { %3924 = vmatpush1.bf16.msra.mxu0 %v6487_v30  ;;  %3997 = vmatpush1.bf16.msra.mxu1 %v6489_v51  ;;  %v9426_v30 = vld [vmem:[#allocation15 + $0xc] ss:$16 sps:$4 sm:$0xff]   ;;  %v9430_v51 = vld [vmem:[#allocation15] ss:$16 sps:$4 sm:$0xff]  }
 0x54c   :  { %4457 = vmatprep.subr.bf16.mxu0 %v9224_v45  ;;  %4500 = vmatprep.subr.bf16.mxu1 %v9226_v49  ;;  %10592 = vst [vmem:[#allocation52_spill] sm:$0xff] %v9426_v30  ;;  %10593 = vst [vmem:[#allocation71_spill] sm:$0xff] %v9430_v51 }
 0x54e   :  { %3942 = vmatmul.mubr.bf16.vlgmr.msra.gmra.mxu0 %v9202_v55  ;;  %4015 = vmatmul.mubr.bf16.vlgmr.msra.gmra.mxu1 %v9202_v55  ;;  %v9258_v55 = vld [vmem:[#allocation14 + $0xa0] ss:$16 sps:$4 sm:$0xff]  }
 0x54f   :  { %4458 = vmatpush1.bf16.msra.mxu0 %v9230_v44  ;;  %4501 = vmatpush1.bf16.msra.mxu1 %v9232_v32 }
 0x550   :  { %4459 = vmatprep.subr.bf16.mxu0 %v9236_v53  ;;  %4502 = vmatprep.subr.bf16.mxu1 %v9238_v26 }
 0x551   :  { %3951 = vmatprep.mubr.bf16.mxu0 %v10432_v1  ;;  %4024 = vmatprep.mubr.bf16.mxu1 %v10432_v1 }
 0x553   :  { %4460 = vmatpush1.bf16.msra.mxu0 %v9244_v25  ;;  %4503 = vmatpush1.bf16.msra.mxu1 %v9246_v56 }
 0x554   :  { %4461 = vmatprep.subr.bf16.mxu0 %v9250_v39  ;;  %4504 = vmatprep.subr.bf16.mxu1 %v9252_v57 }
 0x556   :  { %3952 = vmatmul.mubr.bf16.gmra.mxu0 %v9208_v28  ;;  %4025 = vmatmul.mubr.bf16.gmra.mxu1 %v9208_v28  ;;  %v9306_v28 = vld [vmem:[#allocation14 + $0x24] ss:$16 sps:$4 sm:$0xff]  }
 0x557   :  { %4462 = vmatpush1.bf16.msra.mxu0 %v9258_v55  ;;  %4505 = vmatpush1.bf16.msra.mxu1 %v9260_v48 }
 0x558   :  { %4463 = vmatprep.subr.bf16.mxu0 %v9264_v58  ;;  %4506 = vmatprep.subr.bf16.mxu1 %v9266_v13 }
 0x559   :  { %3961 = vmatprep.mubr.bf16.mxu0 %v10432_v1  ;;  %4034 = vmatprep.mubr.bf16.mxu1 %v10432_v1 }
 0x55b   :  { %4464 = vmatpush1.bf16.msra.mxu0 %v9272_v3  ;;  %4507 = vmatpush1.bf16.msra.mxu1 %v9274_v38 }
 0x55c   :  { %4465 = vmatprep.subr.bf16.mxu0 %v9278_v8  ;;  %4508 = vmatprep.subr.bf16.mxu1 %v9280_v31 }
 0x55e   :  { %3962 = vmatmul.mubr.bf16.gmra.mxu0 %v9214_v61  ;;  %4035 = vmatmul.mubr.bf16.gmra.mxu1 %v9214_v61  ;;  %v9364_v61 = vld [vmem:[#allocation15 + $0xac] ss:$16 sps:$4 sm:$0xff]  }
 0x55f   :  { %4466 = vmatpush1.bf16.msra.mxu0 %v9286_v42  ;;  %4509 = vmatpush1.bf16.msra.mxu1 %v9288_v43  ;;  %10572 = vst [vmem:[#allocation43_spill] sm:$0xff] %v9364_v61 }
 0x560   :  { %4467 = vmatprep.subr.bf16.mxu0 %v9292_v63  ;;  %4510 = vmatprep.subr.bf16.mxu1 %v9294_v47 }
 0x561   :  { %3971 = vmatprep.mubr.bf16.mxu0 %v10432_v1  ;;  %4044 = vmatprep.mubr.bf16.mxu1 %v10432_v1 }
 0x563   :  { %4468 = vmatpush1.bf16.msra.mxu0 %v9300_v60  ;;  %4511 = vmatpush1.bf16.msra.mxu1 %v9302_v40 }
 0x564   :  { %4469 = vmatprep.subr.bf16.mxu0 %v9306_v28  ;;  %4512 = vmatprep.subr.bf16.mxu1 %v9308_v29 }
 0x566   :  { %3972 = vmatmul.mubr.bf16.gmra.mxu0 %v9220_v54  ;;  %4045 = vmatmul.mubr.bf16.gmra.mxu1 %v9220_v54  ;;  %v9418_v54 = vld [vmem:[#allocation15 + $0x20] ss:$16 sps:$4 sm:$0xff]  }
 0x567   :  { %4470 = vmatpush1.bf16.msra.mxu0 %v9314_v16  ;;  %4513 = vmatpush1.bf16.msra.mxu1 %v9316_v15  ;;  %10589 = vst [vmem:[#allocation50_spill] sm:$0xff] %v9418_v54 }
 0x568   :  { %4471 = vmatprep.subr.bf16.mxu0 %v9320_v22  ;;  %4514 = vmatprep.subr.bf16.mxu1 %v9322_v18 }
 0x569   :  { %4489 = vmatprep.mubr.bf16.mxu0 %v10432_v1  ;;  %4532 = vmatprep.mubr.bf16.mxu1 %v10432_v1 }
 0x56b   :  { %4472 = vmatpush1.bf16.msra.mxu0 %v9328_v41  ;;  %4515 = vmatpush1.bf16.msra.mxu1 %v9330_v10 }
 0x56c   :  { %4768 = vmatprep.subr.bf16.mxu0 %v9334_v17  ;;  %4811 = vmatprep.subr.bf16.mxu1 %v9336_v33 }
 0x56e   :  { %4490 = vmatmul.mubr.bf16.vlgmr.msra.gmra.mxu0 %v10432_v1  ;;  %4533 = vmatmul.mubr.bf16.vlgmr.msra.gmra.mxu1 %v10432_v1 }
 0x56f   :  { %4769 = vmatpush1.bf16.msra.mxu0 %v9342_v6  ;;  %4812 = vmatpush1.bf16.msra.mxu1 %v9344_v46 }
 0x570   :  { %4770 = vmatprep.subr.bf16.mxu0 %v9348_v23  ;;  %4813 = vmatprep.subr.bf16.mxu1 %v9350_v59 }
 0x571   :  { %4800 = vmatprep.mubr.bf16.mxu0 %v10432_v1  ;;  %4843 = vmatprep.mubr.bf16.mxu1 %v10432_v1 }
 0x573   :  { %4771 = vmatpush1.bf16.msra.mxu0 %v9356_v52  ;;  %4814 = vmatpush1.bf16.msra.mxu1 %v9358_v24 }
 0x574   :  { %4772 = vmatprep.subr.bf16.mxu0 %v9362_v34  ;;  %4815 = vmatprep.subr.bf16.mxu1 %v9364_v61 }
 0x577   :  { %4773 = vmatpush1.bf16.msra.mxu0 %v9370_v62  ;;  %4816 = vmatpush1.bf16.msra.mxu1 %v9372_v2 }
 0x578   :  { %4774 = vmatprep.subr.bf16.mxu0 %v9376_v4  ;;  %4817 = vmatprep.subr.bf16.mxu1 %v9378_v21 }
 0x57b   :  { %4775 = vmatpush1.bf16.msra.mxu0 %v9382_v35  ;;  %4818 = vmatpush1.bf16.msra.mxu1 %v9384_v0 }
 0x57c   :  { %4776 = vmatprep.subr.bf16.mxu0 %v9388_v36  ;;  %4819 = vmatprep.subr.bf16.mxu1 %v9390_v37 }
 0x57f   :  { %4777 = vmatpush1.bf16.msra.mxu0 %v9394_v50  ;;  %4820 = vmatpush1.bf16.msra.mxu1 %v9396_v5 }
 0x580   :  { %4778 = vmatprep.subr.bf16.mxu0 %v9400_v20  ;;  %4821 = vmatprep.subr.bf16.mxu1 %v9402_v11 }
 0x583   :  { %4779 = vmatpush1.bf16.msra.mxu0 %v9406_v7  ;;  %4822 = vmatpush1.bf16.msra.mxu1 %v9408_v27  ;;  %v9432_v7 = vld [vmem:[#allocation15 + $0x8] ss:$16 sps:$4 sm:$0xff]  }
 0x584   :  { %4780 = vmatprep.subr.bf16.mxu0 %v9412_v12  ;;  %4823 = vmatprep.subr.bf16.mxu1 %v9414_v19  ;;  %10594 = vst [vmem:[#allocation73_spill] sm:$0xff] %v9432_v7 }
 0x587   :  { %4781 = vmatpush1.bf16.msra.mxu0 %v9418_v54  ;;  %4824 = vmatpush1.bf16.msra.mxu1 %v9420_v9 }
 0x588   :  { %4782 = vmatprep.subr.bf16.mxu0 %v9424_v14  ;;  %4825 = vmatprep.subr.bf16.mxu1 %v9426_v30 }
 0x58b   :  { %4783 = vmatpush1.bf16.msra.mxu0 %v9430_v51  ;;  %4826 = vmatpush1.bf16.msra.mxu1 %v9432_v7 }
 0x58c   :  { %4938 = vmatprep.subr.bf16.mxu0 %v9224_v45  ;;  %4981 = vmatprep.subr.bf16.mxu1 %v9226_v49 }
 0x58e   :  { %4801 = vmatmul.mubr.bf16.vlgmr.msra.gmra.mxu0 %v10432_v1  ;;  %4844 = vmatmul.mubr.bf16.vlgmr.msra.gmra.mxu1 %v10432_v1 }
 0x58f   :  { %4939 = vmatpush1.bf16.msra.mxu0 %v9230_v44  ;;  %4982 = vmatpush1.bf16.msra.mxu1 %v9232_v32 }
 0x590   :  { %4940 = vmatprep.subr.bf16.mxu0 %v9236_v53  ;;  %4983 = vmatprep.subr.bf16.mxu1 %v9238_v26 }
 0x591   :  { %4970 = vmatprep.mubr.bf16.mxu0 %v10432_v1  ;;  %5013 = vmatprep.mubr.bf16.mxu1 %v10432_v1 }
 0x593   :  { %4941 = vmatpush1.bf16.msra.mxu0 %v9244_v25  ;;  %4984 = vmatpush1.bf16.msra.mxu1 %v9246_v56 }
 0x594   :  { %4942 = vmatprep.subr.bf16.mxu0 %v9250_v39  ;;  %4985 = vmatprep.subr.bf16.mxu1 %v9252_v57 }
 0x597   :  { %4943 = vmatpush1.bf16.msra.mxu0 %v9258_v55  ;;  %4986 = vmatpush1.bf16.msra.mxu1 %v9260_v48 }
 0x598   :  { %4944 = vmatprep.subr.bf16.mxu0 %v9264_v58  ;;  %4987 = vmatprep.subr.bf16.mxu1 %v9266_v13 }
 0x59b   :  { %4945 = vmatpush1.bf16.msra.mxu0 %v9272_v3  ;;  %4988 = vmatpush1.bf16.msra.mxu1 %v9274_v38 }
 0x59c   :  { %4946 = vmatprep.subr.bf16.mxu0 %v9278_v8  ;;  %4989 = vmatprep.subr.bf16.mxu1 %v9280_v31 }
 0x59f   :  { %4947 = vmatpush1.bf16.msra.mxu0 %v9286_v42  ;;  %4990 = vmatpush1.bf16.msra.mxu1 %v9288_v43 }
 0x5a0   :  { %4948 = vmatprep.subr.bf16.mxu0 %v9292_v63  ;;  %4991 = vmatprep.subr.bf16.mxu1 %v9294_v47 }
 0x5a3   :  { %4949 = vmatpush1.bf16.msra.mxu0 %v9300_v60  ;;  %4992 = vmatpush1.bf16.msra.mxu1 %v9302_v40 }
 0x5a4   :  { %4950 = vmatprep.subr.bf16.mxu0 %v9306_v28  ;;  %4993 = vmatprep.subr.bf16.mxu1 %v9308_v29 }
 0x5a7   :  { %4951 = vmatpush1.bf16.msra.mxu0 %v9314_v16  ;;  %4994 = vmatpush1.bf16.msra.mxu1 %v9316_v15 }
 0x5a8   :  { %4952 = vmatprep.subr.bf16.mxu0 %v9320_v22  ;;  %4995 = vmatprep.subr.bf16.mxu1 %v9322_v18 }
 0x5ab   :  { %4953 = vmatpush1.bf16.msra.mxu0 %v9328_v41  ;;  %4996 = vmatpush1.bf16.msra.mxu1 %v9330_v10 }
 0x5ac   :  { %5089 = vmatprep.subr.bf16.mxu0 %v9334_v17  ;;  %5132 = vmatprep.subr.bf16.mxu1 %v9336_v33 }
 0x5ae   :  { %v9476_v45 = vpop.f32.mrf.mxu0  ;;  %v9478_v49 = vpop.f32.mrf.mxu1 }
 0x5b0   :  { %v9480_v44 = vpop.f32.mrf.mxu0  ;;  %v9482_v32 = vpop.f32.mrf.mxu1 }
 0x5b2   :  { %v9484_v53 = vpop.f32.mrf.mxu0  ;;  %v9486_v26 = vpop.f32.mrf.mxu1 }
 0x5b3   :  { %10595 = vst [vmem:[#allocation75_spill] sm:$0xff] %v9484_v53  ;;  %10596 = vst [vmem:[#allocation77_spill] sm:$0xff] %v9486_v26 }
 0x5b4   :  { %v9488_v25 = vpop.f32.mrf.mxu0  ;;  %v9490_v56 = vpop.f32.mrf.mxu1 }
 0x5b5   :  { %10597 = vst [vmem:[#allocation74_spill] sm:$0xff] %v9488_v25  ;;  %10598 = vst [vmem:[#allocation78_spill] sm:$0xff] %v9490_v56 }
 0x5b6   :  { %v9492_v39 = vpop.f32.mrf.mxu0  ;;  %v9494_v57 = vpop.f32.mrf.mxu1 }
 0x5b8   :  { %v9496_v55 = vpop.f32.mrf.mxu0  ;;  %v9498_v48 = vpop.f32.mrf.mxu1 }
 0x5ba   :  { %v9500_v58 = vpop.f32.mrf.mxu0  ;;  %v9502_v13 = vpop.f32.mrf.mxu1 }
 0x5bc   :  { %v9504_v3 = vpop.f32.mrf.mxu0  ;;  %v9506_v38 = vpop.f32.mrf.mxu1 }
 0x5be   :  { %v9508_v8 = vpop.f32.mrf.mxu0  ;;  %v9510_v31 = vpop.f32.mrf.mxu1 }
 0x5c0   :  { %v9512_v42 = vpop.f32.mrf.mxu0  ;;  %v9514_v43 = vpop.f32.mrf.mxu1 }
 0x5c2   :  { %v9516_v63 = vpop.f32.mrf.mxu0  ;;  %v9518_v47 = vpop.f32.mrf.mxu1 }
 0x5c4   :  { %v9520_v60 = vpop.f32.mrf.mxu0  ;;  %v9522_v40 = vpop.f32.mrf.mxu1 }
 0x5c6   :  { %v9524_v28 = vpop.f32.mrf.mxu0  ;;  %v9526_v29 = vpop.f32.mrf.mxu1 }
 0x5c8   :  { %v9528_v16 = vpop.f32.mrf.mxu0  ;;  %v9530_v15 = vpop.f32.mrf.mxu1 }
 0x5ca   :  { %v9532_v22 = vpop.f32.mrf.mxu0  ;;  %v9534_v18 = vpop.f32.mrf.mxu1 }
 0x5cc   :  { %v9536_v41 = vpop.f32.mrf.mxu0  ;;  %v9538_v10 = vpop.f32.mrf.mxu1 }
 0x5ce   :  { %v9540_v17 = vpop.f32.mrf.mxu0  ;;  %v9542_v33 = vpop.f32.mrf.mxu1 }
 0x5d0   :  { %v9544_v7 = vpop.f32.mrf.mxu0  ;;  %v9546_v51 = vpop.f32.mrf.mxu1 }
 0x5d2   :  { %v9548_v30 = vpop.f32.mrf.mxu0  ;;  %v9550_v14 = vpop.f32.mrf.mxu1 }
 0x5d4   :  { %v9552_v9 = vpop.f32.mrf.mxu0  ;;  %v9554_v54 = vpop.f32.mrf.mxu1 }
 0x5d6   :  { %v9556_v19 = vpop.f32.mrf.mxu0  ;;  %v9558_v12 = vpop.f32.mrf.mxu1 }
 0x5d8   :  { %v9560_v27 = vpop.f32.mrf.mxu0  ;;  %v9562_v11 = vpop.f32.mrf.mxu1 }
 0x5da   :  { %v9564_v20 = vpop.f32.mrf.mxu0  ;;  %v9566_v5 = vpop.f32.mrf.mxu1 }
 0x5dc   :  { %v9568_v50 = vpop.f32.mrf.mxu0  ;;  %v9570_v37 = vpop.f32.mrf.mxu1 }
 0x5de   :  { %v9572_v36 = vpop.f32.mrf.mxu0  ;;  %v9574_v0 = vpop.f32.mrf.mxu1 }
 0x5e0   :  { %v9576_v35 = vpop.f32.mrf.mxu0  ;;  %v9578_v21 = vpop.f32.mrf.mxu1 }
 0x5e2   :  { %v9580_v4 = vpop.f32.mrf.mxu0  ;;  %v9582_v2 = vpop.f32.mrf.mxu1 }
 0x5e4   :  { %v9584_v62 = vpop.f32.mrf.mxu0  ;;  %v9586_v61 = vpop.f32.mrf.mxu1 }
 0x5e5   :  { %10599 = vst [vmem:[#allocation72_spill] sm:$0xff] %v9584_v62  ;;  %10600 = vst [vmem:[#allocation76_spill] sm:$0xff] %v9586_v61 }
 0x5e6   :  { %v9588_v34 = vpop.f32.mrf.mxu0  ;;  %v9590_v24 = vpop.f32.mrf.mxu1 }
 0x5e7   :  { %10601 = vst [vmem:[#allocation32_spill] sm:$0xff] %v9588_v34  ;;  %10602 = vst [vmem:[#allocation33_spill] sm:$0xff] %v9590_v24 }
 0x5e8   :  { %v9592_v52 = vpop.f32.mrf.mxu0  ;;  %v9594_v1 = vpop.f32.mrf.mxu1 }
 0x5e9   :  { %10603 = vst [vmem:[#allocation34_spill] sm:$0xff] %v9592_v52  ;;  %10604 = vst [vmem:[#allocation35_spill] sm:$0xff] %v9594_v1 }
 0x5ea   :  { %v9596_v59 = vpop.f32.mrf.mxu0  ;;  %v9598_v23 = vpop.f32.mrf.mxu1 }
 0x5eb   :  { %10605 = vst [vmem:[#allocation36_spill] sm:$0xff] %v9596_v59  ;;  %10606 = vst [vmem:[#allocation37_spill] sm:$0xff] %v9598_v23 }
 0x5ec   :  { %v9600_v46 = vpop.f32.mrf.mxu0  ;;  %v9602_v6 = vpop.f32.mrf.mxu1 }
 0x5ed   :  { %10607 = vst [vmem:[#allocation25_spill] sm:$0xff] %v9600_v46  ;;  %10608 = vst [vmem:[#allocation26_spill] sm:$0xff] %v9602_v6 }
 0x5ee   :  { %v3797_v26 = vpop.f32.mrf.mxu0  ;;  %v3870_v56 = vpop.f32.mrf.mxu1 }
 0x5ef   :  { %v9605_v25 = vadd.f32 %v3797_v26, %v9476_v45  ;;  %v9608_v34 = vadd.f32 %v3870_v56, %v9478_v49  ;;  %v9627_v45 = vld [vmem:[%s10339_s7] sm:$0xff] }
 0x5f0   :  { %v3799_v24 = vpop.f32.mrf.mxu0  ;;  %v3872_v52 = vpop.f32.mrf.mxu1 }
 0x5f1   :  { %10609 = vst [vmem:[#allocation27_spill] sm:$0xff] %v9605_v25  ;;  %10610 = vst [vmem:[#allocation55_spill] sm:$0xff] %v9608_v34  ;;  %v9611_v1 = vadd.f32 %v3799_v24, %v9480_v44  ;;  %v9614_v59 = vadd.f32 %v3872_v52, %v9482_v32  ;;  %v10617_v44 = vld [vmem:[#allocation38_spill] sm:$0xff] }
 0x5f2   :  { %v9616_v23 = vpop.f32.mrf.mxu0  ;;  %v9618_v46 = vpop.f32.mrf.mxu1  ;;  %v10618_v32 = vsub.s32 0, %v10617_v44 }
 0x5f3   :  { %10611 = vst [vmem:[#allocation57_spill] sm:$0xff] %v9611_v1  ;;  %10612 = vst [vmem:[#allocation61_spill] sm:$0xff] %v9614_v59  ;;  %v10620_v1 = vsub.s32 1, %v10617_v44 }
 0x5f4   :  { %10613 = vst [vmem:[#allocation59_spill] sm:$0xff] %v9616_v23  ;;  %10614 = vst [vmem:[#allocation62_spill] sm:$0xff] %v9618_v46  ;;  %v9620_v6 = vpop.f32.mrf.mxu0  ;;  %v9622_v53 = vpop.f32.mrf.mxu1  ;;  %v9634_v56 = vrot.slane %v9627_v45, %v10618_v32  ;;  %v10619_v46 = vsub.s32 2, %v10617_v44 }
 0x5f5   :  { %10615 = vst [vmem:[#allocation58_spill] sm:$0xff] %v9620_v6  ;;  %10616 = vst [vmem:[#allocation56_spill] sm:$0xff] %v9622_v53  ;;  %v9644_v6 = vrot.slane %v9627_v45, %v10620_v1 }
 0x5f6   :  { %v3807_v49 = vpop.f32.mrf.mxu0  ;;  %v3880_v26 = vpop.f32.mrf.mxu1  ;;  %v9639_v34 = vrot.slane %v9627_v45, %v10619_v46 }
 0x5f7   :  { %v3808_v24 = vadd.f32 %v3807_v49, %v9492_v39  ;;  %v3881_v52 = vadd.f32 %v3880_v26, %v9494_v57  ;;  %v10621_v39 = vsub.s32 3, %v10617_v44 }
 0x5f8   :  { %v3809_v59 = vpop.f32.mrf.mxu0  ;;  %v3882_v53 = vpop.f32.mrf.mxu1 }
 0x5f9   :  { %v9649_v57 = vrot.slane %v9627_v45, %v10621_v39  ;;  %v3810_v49 = vadd.f32 %v3809_v59, %v9496_v55  ;;  %v3883_v26 = vadd.f32 %v3882_v53, %v9498_v48  ;;  %v9654_v32 = vadd.f32 %v9634_v56, %v3808_v24 }
 0x5fa   :  { %v9657_v46 = vadd.f32 %v9639_v34, %v3881_v52  ;;  %v3811_v25 = vpop.f32.mrf.mxu0  ;;  %v3884_v23 = vpop.f32.mrf.mxu1 }
 0x5fb   :  { %v3812_v1 = vadd.f32 %v3811_v25, %v9500_v58  ;;  %v3885_v61 = vadd.f32 %v3884_v23, %v9502_v13  ;;  %v9662_v62 = vadd.f32 %v9644_v6, %v3810_v49  ;;  %v9665_v39 = vadd.f32 %v9649_v57, %v3883_v26 }
 0x5fc   :  { %v3813_v59 = vpop.f32.mrf.mxu0  ;;  %v3886_v53 = vpop.f32.mrf.mxu1 }
 0x5fd   :  { %v3814_v55 = vadd.f32 %v3813_v59, %v9504_v3  ;;  %v3887_v48 = vadd.f32 %v3886_v53, %v9506_v38  ;;  %v9670_v24 = vadd.f32 %v9634_v56, %v3812_v1  ;;  %v9673_v52 = vadd.f32 %v9639_v34, %v3885_v61 }
 0x5fe   :  { %v3817_v25 = vpop.f32.mrf.mxu0  ;;  %v3890_v23 = vpop.f32.mrf.mxu1 }
 0x5ff   :  { %v3818_v58 = vadd.f32 %v3817_v25, %v9508_v8  ;;  %v3891_v13 = vadd.f32 %v3890_v23, %v9510_v31  ;;  %v9678_v49 = vadd.f32 %v9644_v6, %v3814_v55  ;;  %v9681_v26 = vadd.f32 %v9649_v57, %v3887_v48 }
 0x600   :  { %v3819_v3 = vpop.f32.mrf.mxu0  ;;  %v3892_v38 = vpop.f32.mrf.mxu1 }
 0x601   :  { %v3820_v1 = vadd.f32 %v3819_v3, %v9512_v42  ;;  %v3893_v59 = vadd.f32 %v3892_v38, %v9514_v43  ;;  %v9686_v61 = vadd.f32 %v9634_v56, %v3818_v58  ;;  %v9689_v53 = vadd.f32 %v9639_v34, %v3891_v13 }
 0x602   :  { %v3821_v8 = vpop.f32.mrf.mxu0  ;;  %v3894_v31 = vpop.f32.mrf.mxu1 }
 0x603   :  { %10622 = vst [vmem:[#allocation60_spill] sm:$0xff] %v9686_v61  ;;  %10623 = vst [vmem:[#allocation63_spill] sm:$0xff] %v9689_v53  ;;  %v3822_v55 = vadd.f32 %v3821_v8, %v9516_v63  ;;  %v3895_v25 = vadd.f32 %v3894_v31, %v9518_v47  ;;  %v9694_v48 = vadd.f32 %v9644_v6, %v3820_v1 }
 0x604   :  { %v9697_v23 = vadd.f32 %v9649_v57, %v3893_v59  ;;  %v3823_v42 = vpop.f32.mrf.mxu0  ;;  %v3896_v43 = vpop.f32.mrf.mxu1 }
 0x605   :  { %10624 = vst [vmem:[#allocation65_spill] sm:$0xff] %v9694_v48  ;;  %v3824_v58 = vadd.f32 %v3823_v42, %v9520_v60  ;;  %v3897_v3 = vadd.f32 %v3896_v43, %v9522_v40  ;;  %v9702_v13 = vadd.f32 %v9634_v56, %v3822_v55  ;;  %v9705_v38 = vadd.f32 %v9639_v34, %v3895_v25 }
 0x606   :  { %10625 = vst [vmem:[#allocation67_spill] sm:$0xff] %v9697_v23  ;;  %v3827_v63 = vpop.f32.mrf.mxu0  ;;  %v3900_v47 = vpop.f32.mrf.mxu1 }
 0x607   :  { %10626 = vst [vmem:[#allocation69_spill] sm:$0xff] %v9702_v13  ;;  %10627 = vst [vmem:[#allocation66_spill] sm:$0xff] %v9705_v38  ;;  %v3828_v1 = vadd.f32 %v3827_v63, %v9524_v28  ;;  %v3901_v8 = vadd.f32 %v3900_v47, %v9526_v29  ;;  %v9710_v59 = vadd.f32 %v9644_v6, %v3824_v58 }
 0x608   :  { %v9713_v31 = vadd.f32 %v9649_v57, %v3897_v3  ;;  %v3829_v60 = vpop.f32.mrf.mxu0  ;;  %v3902_v40 = vpop.f32.mrf.mxu1 }
 0x609   :  { %10628 = vst [vmem:[#allocation70_spill] sm:$0xff] %v9710_v59  ;;  %v3830_v55 = vadd.f32 %v3829_v60, %v9528_v16  ;;  %v3903_v42 = vadd.f32 %v3902_v40, %v9530_v15  ;;  %v9718_v25 = vadd.f32 %v9634_v56, %v3828_v1  ;;  %v9721_v43 = vadd.f32 %v9639_v34, %v3901_v8 }
 0x60a   :  { %10629 = vst [vmem:[#allocation64_spill] sm:$0xff] %v9713_v31  ;;  %v3831_v28 = vpop.f32.mrf.mxu0  ;;  %v3904_v29 = vpop.f32.mrf.mxu1  ;;  %v10634_v1 = vsub.s32 4, %v10617_v44  ;;  %v10635_v8 = vsub.s32 6, %v10617_v44 }
 0x60b   :  { %10630 = vst [vmem:[#allocation68_spill] sm:$0xff] %v9718_v25  ;;  %10631 = vst [vmem:[#allocation38_spill] sm:$0xff] %v9721_v43  ;;  %v3832_v58 = vadd.f32 %v3831_v28, %v9532_v22  ;;  %v3905_v63 = vadd.f32 %v3904_v29, %v9534_v18  ;;  %v9726_v3 = vadd.f32 %v9644_v6, %v3830_v55 }
 0x60c   :  { %v9729_v47 = vadd.f32 %v9649_v57, %v3903_v42  ;;  %v3833_v16 = vpop.f32.mrf.mxu0  ;;  %v3906_v15 = vpop.f32.mrf.mxu1  ;;  %v9734_v60 = vrot.slane %v9627_v45, %v10634_v1  ;;  %v9739_v40 = vrot.slane %v9627_v45, %v10635_v8  ;;  %v10638_v1 = vsub.s32 5, %v10617_v44 }
 0x60d   :  { %10632 = vst [vmem:[#allocation87_spill] sm:$0xff] %v9726_v3  ;;  %v3834_v22 = vadd.f32 %v3833_v16, %v9536_v41  ;;  %v3907_v18 = vadd.f32 %v3906_v15, %v9538_v10  ;;  %v9744_v55 = vadd.f32 %v9634_v56, %v3832_v58  ;;  %v9747_v42 = vadd.f32 %v9639_v34, %v3905_v63 }
 0x60e   :  { %10633 = vst [vmem:[#allocation88_spill] sm:$0xff] %v9729_v47  ;;  %v3943_v28 = vpop.f32.mrf.mxu0  ;;  %v4016_v29 = vpop.f32.mrf.mxu1  ;;  %v9752_v43 = vrot.slane %v9627_v45, %v10638_v1  ;;  %v10639_v8 = vsub.s32 7, %v10617_v44 }
 0x60f   :  { %10636 = vst [vmem:[#allocation89_spill] sm:$0xff] %v9744_v55  ;;  %10637 = vst [vmem:[#allocation90_spill] sm:$0xff] %v9747_v42  ;;  %v3944_v41 = vadd.f32 %v3943_v28, %v9540_v17  ;;  %v4017_v10 = vadd.f32 %v4016_v29, %v9542_v33  ;;  %v9762_v58 = vadd.f32 %v9644_v6, %v3834_v22 }
 0x610   :  { %v9757_v47 = vrot.slane %v9627_v45, %v10639_v8  ;;  %v9765_v63 = vadd.f32 %v9649_v57, %v3907_v18  ;;  %v3945_v16 = vpop.f32.mrf.mxu0  ;;  %v4018_v15 = vpop.f32.mrf.mxu1 }
 0x611   :  { %10640 = vst [vmem:[#allocation91_spill] sm:$0xff] %v9762_v58  ;;  %v3946_v1 = vadd.f32 %v3945_v16, %v9544_v7  ;;  %v4019_v42 = vadd.f32 %v4018_v15, %v9546_v51  ;;  %v9770_v44 = vadd.f32 %v9734_v60, %v3944_v41  ;;  %v9773_v45 = vadd.f32 %v9739_v40, %v4017_v10 }
 0x612   :  { %10641 = vst [vmem:[#allocation92_spill] sm:$0xff] %v9765_v63  ;;  %v3947_v17 = vpop.f32.mrf.mxu0  ;;  %v4020_v33 = vpop.f32.mrf.mxu1  ;;  %v10665_v63 = vld [vmem:[#allocation57_spill] sm:$0xff] }
 0x613   :  { %10642 = vst [vmem:[#allocation93_spill] sm:$0xff] %v9770_v44  ;;  %10643 = vst [vmem:[#allocation94_spill] sm:$0xff] %v9773_v45  ;;  %v3948_v22 = vadd.f32 %v3947_v17, %v9548_v30  ;;  %v4021_v28 = vadd.f32 %v4020_v33, %v9550_v14  ;;  %v9778_v18 = vadd.f32 %v9752_v43, %v3946_v1  ;;  %v10662_v45 = vld [vmem:[#allocation27_spill] sm:$0xff] }
 0x614   :  { %v9781_v29 = vadd.f32 %v9757_v47, %v4019_v42  ;;  %v3949_v7 = vpop.f32.mrf.mxu0  ;;  %v4022_v51 = vpop.f32.mrf.mxu1  ;;  %v4098_v58 = vadd.f32 %v9644_v6, %v10665_v63 }
 0x615   :  { %10644 = vst [vmem:[#allocation95_spill] sm:$0xff] %v9778_v18  ;;  %v3950_v8 = vadd.f32 %v3949_v7, %v9552_v9  ;;  %v4023_v41 = vadd.f32 %v4022_v51, %v9554_v54  ;;  %v9786_v10 = vadd.f32 %v9734_v60, %v3948_v22  ;;  %v9789_v16 = vadd.f32 %v9739_v40, %v4021_v28 }
 0x616   :  { %10645 = vst [vmem:[#allocation96_spill] sm:$0xff] %v9781_v29  ;;  %v3953_v30 = vpop.f32.mrf.mxu0  ;;  %v4026_v14 = vpop.f32.mrf.mxu1 }
 0x617   :  { %10646 = vst [vmem:[#allocation97_spill] sm:$0xff] %v9786_v10  ;;  %10647 = vst [vmem:[#allocation98_spill] sm:$0xff] %v9789_v16  ;;  %v3954_v15 = vadd.f32 %v3953_v30, %v9556_v19  ;;  %v4027_v1 = vadd.f32 %v4026_v14, %v9558_v12  ;;  %v9794_v42 = vadd.f32 %v9752_v43, %v3950_v8  ;;  %v10664_v10 = vld [vmem:[#allocation58_spill] sm:$0xff] }
 0x618   :  { %v9797_v17 = vadd.f32 %v9757_v47, %v4023_v41  ;;  %v3955_v9 = vpop.f32.mrf.mxu0  ;;  %v4028_v54 = vpop.f32.mrf.mxu1 }
 0x619   :  { %10648 = vst [vmem:[#allocation99_spill] sm:$0xff] %v9794_v42  ;;  %v3956_v33 = vadd.f32 %v3955_v9, %v9560_v27  ;;  %v4029_v22 = vadd.f32 %v4028_v54, %v9562_v11  ;;  %v9802_v28 = vadd.f32 %v9734_v60, %v3954_v15  ;;  %v9805_v7 = vadd.f32 %v9739_v40, %v4027_v1 }
 0x61a   :  { %10649 = vst [vmem:[#allocation100_spill] sm:$0xff] %v9797_v17  ;;  %v3957_v19 = vpop.f32.mrf.mxu0  ;;  %v4030_v12 = vpop.f32.mrf.mxu1 }
 0x61b   :  { %10650 = vst [vmem:[#allocation101_spill] sm:$0xff] %v9802_v28  ;;  %10651 = vst [vmem:[#allocation102_spill] sm:$0xff] %v9805_v7  ;;  %v3958_v51 = vadd.f32 %v3957_v19, %v9564_v20  ;;  %v4031_v8 = vadd.f32 %v4030_v12, %v9566_v5  ;;  %v9810_v41 = vadd.f32 %v9752_v43, %v3956_v33 }
 0x61c   :  { %v9813_v30 = vadd.f32 %v9757_v47, %v4029_v22  ;;  %v3959_v27 = vpop.f32.mrf.mxu0  ;;  %v4032_v11 = vpop.f32.mrf.mxu1 }
 0x61d   :  { %10652 = vst [vmem:[#allocation103_spill] sm:$0xff] %v9810_v41  ;;  %v3960_v14 = vadd.f32 %v3959_v27, %v9568_v50  ;;  %v4033_v15 = vadd.f32 %v4032_v11, %v9570_v37  ;;  %v9818_v1 = vadd.f32 %v9734_v60, %v3958_v51  ;;  %v9821_v9 = vadd.f32 %v9739_v40, %v4031_v8  ;;  %v10060_v41 = vld [vmem:[#allocation15 + $0xec] ss:$16 sps:$4 sm:$0xff]  }
 0x61e   :  { %10653 = vst [vmem:[#allocation104_spill] sm:$0xff] %v9813_v30  ;;  %v3963_v20 = vpop.f32.mrf.mxu0  ;;  %v4036_v5 = vpop.f32.mrf.mxu1 }
 0x61f   :  { %10654 = vst [vmem:[#allocation105_spill] sm:$0xff] %v9818_v1  ;;  %10655 = vst [vmem:[#allocation106_spill] sm:$0xff] %v9821_v9  ;;  %v3964_v54 = vadd.f32 %v3963_v20, %v9572_v36  ;;  %v4037_v33 = vadd.f32 %v4036_v5, %v9574_v0  ;;  %v9826_v22 = vadd.f32 %v9752_v43, %v3960_v14  ;;  %v10658_v5 = vld [vmem:[#allocation72_spill] sm:$0xff] }
 0x620   :  { %v9829_v19 = vadd.f32 %v9757_v47, %v4033_v15  ;;  %v3965_v50 = vpop.f32.mrf.mxu0  ;;  %v4038_v37 = vpop.f32.mrf.mxu1  ;;  %v10667_v1 = vld [vmem:[#allocation56_spill] sm:$0xff] }
 0x621   :  { %10656 = vst [vmem:[#allocation107_spill] sm:$0xff] %v9826_v22  ;;  %v3966_v12 = vadd.f32 %v3965_v50, %v9576_v35  ;;  %v4039_v51 = vadd.f32 %v4038_v37, %v9578_v21  ;;  %v9834_v8 = vadd.f32 %v9734_v60, %v3964_v54  ;;  %v9837_v27 = vadd.f32 %v9739_v40, %v4037_v33  ;;  %v10659_v50 = vld [vmem:[#allocation76_spill] sm:$0xff]  ;;  %v10666_v22 = vld [vmem:[#allocation78_spill] sm:$0xff] }
 0x622   :  { %10657 = vst [vmem:[#allocation108_spill] sm:$0xff] %v9829_v19  ;;  %v3967_v36 = vpop.f32.mrf.mxu0  ;;  %v4040_v0 = vpop.f32.mrf.mxu1 }
 0x623   :  { %v3968_v11 = vadd.f32 %v3967_v36, %v9580_v4  ;;  %v4041_v14 = vadd.f32 %v4040_v0, %v9582_v2  ;;  %v9842_v15 = vadd.f32 %v9752_v43, %v3966_v12  ;;  %v9845_v20 = vadd.f32 %v9757_v47, %v4039_v51 }
 0x624   :  { %v3969_v35 = vpop.f32.mrf.mxu0  ;;  %v4042_v21 = vpop.f32.mrf.mxu1 }
 0x625   :  { %v3970_v54 = vadd.f32 %v3969_v35, %v10658_v5  ;;  %v4043_v37 = vadd.f32 %v4042_v21, %v10659_v50  ;;  %v9850_v33 = vadd.f32 %v9734_v60, %v3968_v11  ;;  %v9853_v16 = vadd.f32 %v9739_v40, %v4041_v14  ;;  %v10660_v5 = vld [vmem:[#allocation75_spill] sm:$0xff] }
 0x626   :  { %v9855_v4 = vpop.f32.mrf.mxu0  ;;  %v9857_v2 = vpop.f32.mrf.mxu1  ;;  %v10661_v50 = vld [vmem:[#allocation59_spill] sm:$0xff] }
 0x627   :  { %v9860_v12 = vadd.f32 %v9752_v43, %v3970_v54  ;;  %v9863_v51 = vadd.f32 %v9757_v47, %v4043_v37  ;;  %v3802_v17 = vadd.f32 %v10661_v50, %v10660_v5  ;;  %v4097_v54 = vadd.f32 %v9634_v56, %v10662_v45  ;;  %v10663_v37 = vld [vmem:[#allocation74_spill] sm:$0xff] }
 0x628   :  { %v3975_v36 = vpop.f32.mrf.mxu0  ;;  %v9865_v0 = vpop.f32.mrf.mxu1  ;;  %v3804_v18 = vadd.f32 %v10664_v10, %v10663_v37  ;;  %v3877_v10 = vadd.f32 %v10667_v1, %v10666_v22  ;;  %v10668_v37 = vld [vmem:[#allocation61_spill] sm:$0xff]  ;;  %v10671_v1 = vld [vmem:[#allocation62_spill] sm:$0xff]  ;;  %10716 = vst [vmem:[#allocation74_spill] sm:$0xff] %v10060_v41 }
 0x629   :  { %v4105_v19 = vadd.f32 %v9634_v56, %v3802_v17  ;;  %v10669_v17 = vld [vmem:[#allocation55_spill] sm:$0xff] }
 0x62a   :  { %v3977_v35 = vpop.f32.mrf.mxu0  ;;  %v9867_v21 = vpop.f32.mrf.mxu1  ;;  %v4106_v30 = vadd.f32 %v9644_v6, %v3804_v18  ;;  %v4099_v6 = vadd.f32 %v9639_v34, %v10669_v17 }
 0x62c   :  { %v9869_v11 = vpop.f32.mrf.mxu0  ;;  %v9871_v14 = vpop.f32.mrf.mxu1 }
 0x62e   :  { %v4491_v29 = vpop.f32.mrf.mxu0  ;;  %v4534_v42 = vpop.f32.mrf.mxu1 }
 0x62f   :  { %v4543_v44 = vadd.f32 %v4491_v29, %v4097_v54  ;;  %v4545_v22 = vadd.f32 %v4534_v42, %v4099_v6 }
 0x630   :  { %v4493_v55 = vpop.f32.mrf.mxu0  ;;  %v4536_v3 = vpop.f32.mrf.mxu1 }
 0x631   :  { %v6579_v25 = vmul.f32 -1.442695, %v4543_v44  ;;  %v4544_v9 = vadd.f32 %v4493_v55, %v4098_v58  ;;  %v4100_v44 = vadd.f32 %v9649_v57, %v10668_v37 }
 0x632   :  { %v4495_v7 = vpop.f32.mrf.mxu0  ;;  %v4538_v45 = vpop.f32.mrf.mxu1 }
 0x633   :  { %7357 = vpow2.f32 %v6579_v25  ;;  %v6581_v5 = vmul.f32 -1.442695, %v4544_v9  ;;  %v4547_v50 = vadd.f32 %v4495_v7, %v4105_v19  ;;  %v4108_v25 = vadd.f32 %v9649_v57, %v3877_v10  ;;  %v10670_v7 = vld [vmem:[#allocation77_spill] sm:$0xff] }
 0x634   :  { %v4497_v29 = vpop.f32.mrf.mxu0  ;;  %v4540_v56 = vpop.f32.mrf.mxu1  ;;  %v4546_v58 = vadd.f32 %v4536_v3, %v4100_v44  ;;  %v3875_v9 = vadd.f32 %v10671_v1, %v10670_v7  ;;  %v10672_v44 = vld [vmem:[#allocation32_spill] sm:$0xff] }
 0x635   :  { %7359 = vpow2.f32 %v6581_v5  ;;  %v6580_v54 = vmul.f32 -1.442695, %v4547_v50  ;;  %v4548_v63 = vadd.f32 %v4497_v29, %v4106_v30  ;;  %v4550_v18 = vadd.f32 %v4540_v56, %v4108_v25  ;;  %v10673_v56 = vld [vmem:[#allocation34_spill] sm:$0xff] }
 0x636   :  { %v6583_v19 = vmul.f32 -1.442695, %v4546_v58  ;;  %v4107_v50 = vadd.f32 %v9639_v34, %v3875_v9  ;;  %v3976_v34 = vadd.f32 %v3975_v36, %v10673_v56  ;;  %v10674_v58 = vld [vmem:[#allocation36_spill] sm:$0xff] }
 0x637   :  { %7361 = vpow2.f32 %v6580_v54  ;;  %v6582_v55 = vmul.f32 -1.442695, %v4548_v63  ;;  %v6584_v30 = vmul.f32 -1.442695, %v4550_v18  ;;  %v3978_v17 = vadd.f32 %v3977_v35, %v10674_v58 }
 0x638   :  { %v4549_v57 = vadd.f32 %v4538_v45, %v4107_v50  ;;  %v4150_v9 = vadd.f32 %v9752_v43, %v3976_v34 }
 0x639   :  { %7363 = vpow2.f32 %v6582_v55  ;;  %v3974_v55 = vadd.f32 %v9855_v4, %v10672_v44 }
 0x63a   :  { %7365 = vtanh.f32 %v4545_v22 }
 0x63b   :  { %7367 = vpow2.f32 %v6583_v19  ;;  %v4149_v45 = vadd.f32 %v9734_v60, %v3974_v55  ;;  %v10675_v19 = vld [vmem:[#allocation25_spill] sm:$0xff] }
 0x63c   :  { %7369 = vpow2.f32 %v6584_v30  ;;  %v3980_v30 = vadd.f32 %v9869_v11, %v10675_v19  ;;  %v10678_v19 = vld [vmem:[#allocation26_spill] sm:$0xff] }
 0x63e   :  { %v4158_v11 = vadd.f32 %v9752_v43, %v3980_v30  ;;  %v4053_v30 = vadd.f32 %v9871_v14, %v10678_v19  ;;  %v10684_v19 = vmov 0  }
 0x640   :  { %v7358_v5 = vpop.eup %7357 }
 0x641   :  { %v4557_v29 = vadd.f32 1.0, %v7358_v5 }
 0x642   :  { %v7360_v54 = vpop.eup %7359 }
 0x643   :  { %7371 = vrcp.f32 %v4557_v29  ;;  %v4569_v3 = vadd.f32 1.0, %v7360_v54  ;;  %v4157_v54 = vadd.f32 %v9734_v60, %v3978_v17  ;;  %v10676_v17 = vld [vmem:[#allocation35_spill] sm:$0xff] }
 0x644   :  { %v7362_v10 = vpop.eup %7361 }
 0x645   :  { %7373 = vrcp.f32 %v4569_v3  ;;  %v4558_v63 = vadd.f32 1.0, %v7362_v10 }
 0x646   :  { %v7364_v37 = vpop.eup %7363  ;;  %7375 = vtanh.f32 %v4549_v57 }
 0x647   :  { %7377 = vrcp.f32 %v4558_v63  ;;  %v4570_v42 = vadd.f32 1.0, %v7364_v37  ;;  %v7366_v25 = vpop.eup %7365 }
 0x648   :  { %v7368_v6 = vpop.eup %7367 }
 0x649   :  { %7379 = vrcp.f32 %v4570_v42  ;;  %v7370_v7 = vpop.eup %7369  ;;  %v4583_v57 = vadd.f32 1.0, %v7368_v6  ;;  %v4049_v6 = vadd.f32 %v9865_v0, %v10676_v17  ;;  %v10679_v0 = vld [vmem:[#allocation37_spill] sm:$0xff] }
 0x64a   :  { %v4584_v3 = vadd.f32 1.0, %v7370_v7 }
 0x64e   :  { %v4802_v18 = vpop.f32.mrf.mxu0  ;;  %v4845_v5 = vpop.f32.mrf.mxu1 }
 0x64f   :  { %v4854_v1 = vadd.f32 %v4802_v18, %v4149_v45 }
 0x650   :  { %v7372_v22 = vpop.eup %7371  ;;  %v4804_v4 = vpop.f32.mrf.mxu0 }
 0x651   :  { %v4591_v50 = vmul.f32 %v7372_v22, %v7366_v25  ;;  %v6617_v29 = vmul.f32 -1.442695, %v4854_v1  ;;  %v4855_v36 = vadd.f32 %v4804_v4, %v4150_v9  ;;  %v4847_v56 = vpop.f32.mrf.mxu1  ;;  %v10677_v1 = vld [vmem:[#allocation33_spill] sm:$0xff] }
 0x652   :  { %v7374_v35 = vpop.eup %7373  ;;  %v4806_v10 = vpop.f32.mrf.mxu0  ;;  %v4047_v9 = vadd.f32 %v9857_v2, %v10677_v1 }
 0x653   :  { %v7376_v63 = vpop.eup %7375  ;;  %v4589_v37 = vmul.f32 0.0, %v7374_v35  ;;  %7381 = vpow2.f32 %v6617_v29  ;;  %v6619_v42 = vmul.f32 -1.442695, %v4855_v36  ;;  %v4858_v44 = vadd.f32 %v4806_v10, %v4157_v54  ;;  %v4849_v22 = vpop.f32.mrf.mxu1 }
 0x654   :  { %v7378_v55 = vpop.eup %7377  ;;  %v4808_v34 = vpop.f32.mrf.mxu0  ;;  %v4051_v29 = vadd.f32 %v9867_v21, %v10679_v0  ;;  %v4151_v2 = vadd.f32 %v9739_v40, %v4047_v9  ;;  %v4160_v35 = vadd.f32 %v9757_v47, %v4053_v30  ;;  %v10682_v9 = vld [vmem:[#allocation30_spill] sm:$0xff] }
 0x655   :  { %v9903_v58 = vadd.f32 %v4591_v50, %v4589_v37  ;;  %v4592_v25 = vmul.f32 %v7378_v55, %v7376_v63  ;;  %7383 = vpow2.f32 %v6619_v42  ;;  %v6618_v45 = vmul.f32 -1.442695, %v4858_v44  ;;  %v4851_v54 = vpop.f32.mrf.mxu1 }
 0x656   :  { %v7380_v60 = vpop.eup %7379  ;;  %7385 = vrcp.f32 %v4583_v57  ;;  %v4859_v18 = vadd.f32 %v4808_v34, %v4158_v11  ;;  %v4152_v50 = vadd.f32 %v9757_v47, %v4049_v6  ;;  %v4856_v57 = vadd.f32 %v4845_v5, %v4151_v2  ;;  %v10686_v2 = vld [vmem:[#allocation41_spill] sm:$0xff] }
 0x657   :  { %v4590_v7 = vmul.f32 0.0, %v7380_v60  ;;  %7387 = vrcp.f32 %v4584_v3  ;;  %v4861_v14 = vadd.f32 %v4851_v54, %v4160_v35  ;;  %v4159_v63 = vadd.f32 %v9739_v40, %v4051_v29  ;;  %v10685_v29 = vld [vmem:[#allocation39_spill] sm:$0xff]  ;;  %v10687_v35 = vld [vmem:[#allocation45_spill] sm:$0xff] }
 0x658   :  { %7389 = vpow2.f32 %v6618_v45  ;;  %v6620_v43 = vmul.f32 -1.442695, %v4859_v18  ;;  %v4857_v36 = vadd.f32 %v4847_v56, %v4152_v50  ;;  %v10680_v18 = vld [vmem:[#allocation28_spill] sm:$0xff] }
 0x659   :  { %7391 = vtanh.f32 %v9903_v58  ;;  %v9912_v4 = vadd.f32 %v4592_v25, %v4590_v7  ;;  %v4860_v44 = vadd.f32 %v4849_v22, %v4159_v63  ;;  %v6622_v21 = vmul.f32 -1.442695, %v4861_v14  ;;  %v10681_v7 = vld [vmem:[#allocation29_spill] sm:$0xff]  ;;  %v10683_v22 = vld [vmem:[#allocation31_spill] sm:$0xff] }
 0x65a   :  { %7393 = vpow2.f32 %v6620_v43  ;;  %v6621_v10 = vmul.f32 -1.442695, %v4857_v36 }
 0x65b   :  { %7395 = vtanh.f32 %v9912_v4 }
 0x65c   :  { %7397 = vtanh.f32 %v4856_v57  ;;  %v10688_v57 = vld [vmem:[#allocation43_spill] sm:$0xff] }
 0x660   :  { %v7382_v3 = vpop.eup %7381 }
 0x661   :  { %v4868_v37 = vadd.f32 1.0, %v7382_v3 }
 0x662   :  { %v7384_v42 = vpop.eup %7383 }
 0x663   :  { %v7386_v55 = vpop.eup %7385  ;;  %7399 = vrcp.f32 %v4868_v37  ;;  %v4880_v11 = vadd.f32 1.0, %v7384_v42  ;;  %v10689_v42 = vld [vmem:[#allocation42_spill] sm:$0xff] }
 0x664   :  { %v7388_v34 = vpop.eup %7387  ;;  %7401 = vpow2.f32 %v6621_v10 }
 0x665   :  { %v7390_v56 = vpop.eup %7389  ;;  %7403 = vrcp.f32 %v4880_v11 }
 0x666   :  { %v7392_v25 = vpop.eup %7391  ;;  %v4869_v47 = vadd.f32 1.0, %v7390_v56  ;;  %7405 = vtanh.f32 %v4860_v44  ;;  %v10690_v44 = vld [vmem:[#allocation46_spill] sm:$0xff] }
 0x667   :  { %v7394_v5 = vpop.eup %7393  ;;  %7407 = vpow2.f32 %v6622_v21  ;;  %v4597_v60 = vmul.f32 %v7392_v25, %v7386_v55  ;;  %v10691_v21 = vld [vmem:[#allocation40_spill] sm:$0xff] }
 0x668   :  { %v7396_v45 = vpop.eup %7395  ;;  %7409 = vrcp.f32 %v4869_v47  ;;  %v4881_v40 = vadd.f32 1.0, %v7394_v5  ;;  %v10693_v47 = vld [vmem:[#allocation79_spill] sm:$0xff]  ;;  %v10694_v5 = vld [vmem:[#allocation81_spill] sm:$0xff] }
 0x669   :  { %v4598_v17 = vmul.f32 %v7396_v45, %v7388_v34  ;;  %v7398_v1 = vpop.eup %7397  ;;  %v10692_v34 = vld [vmem:[#allocation44_spill] sm:$0xff]  ;;  %v10695_v45 = vld [vmem:[#allocation85_spill] sm:$0xff] }
 0x66a   :  { %7411 = vrcp.f32 %v4881_v40  ;;  %v10696_v40 = vld [vmem:[#allocation83_spill] sm:$0xff] }
 0x66b   :  { %v4599_v6 = vpack.c.bf16 %v4598_v17, %v4597_v60  ;;  %v10697_v60 = vld [vmem:[#allocation82_spill] sm:$0xff] }
 0x66c   :  { %v10698_v17 = vld [vmem:[#allocation86_spill] sm:$0xff] }
 0x66d   :  { %6770 = vst [vmem:[#allocation5] sm:$0xff] %v4599_v6   ;;  %4971 = vmatmul.mubr.bf16.vlgmr.msra.gmra.mxu0 %v4599_v6  ;;  %5014 = vmatmul.mubr.bf16.vlgmr.msra.gmra.mxu1 %v4599_v6  ;;  %v10699_v6 = vld [vmem:[#allocation80_spill] sm:$0xff] }
 0x66e   :  { %5090 = vmatpush1.bf16.msra.mxu0 %v10680_v18  ;;  %5133 = vmatpush1.bf16.msra.mxu1 %v10681_v7  ;;  %v10700_v18 = vld [vmem:[#allocation84_spill] sm:$0xff]  ;;  %v10701_v7 = vld [vmem:[#allocation47_spill] sm:$0xff] }
 0x66f   :  { %5091 = vmatprep.subr.bf16.mxu0 %v10682_v9  ;;  %5134 = vmatprep.subr.bf16.mxu1 %v10683_v22  ;;  %v10703_v9 = vld [vmem:[#allocation53_spill] sm:$0xff]  ;;  %v10704_v22 = vld [vmem:[#allocation51_spill] sm:$0xff] }
 0x670   :  { %v7400_v43 = vpop.eup %7399  ;;  %5121 = vmatprep.mubr.bf16.mxu0 %v10684_v19  ;;  %5164 = vmatprep.mubr.bf16.mxu1 %v10684_v19 }
 0x671   :  { %v7402_v30 = vpop.eup %7401  ;;  %v4902_v50 = vmul.f32 %v7400_v43, %v7398_v1  ;;  %v10702_v1 = vld [vmem:[#allocation49_spill] sm:$0xff] }
 0x672   :  { %v7404_v0 = vpop.eup %7403  ;;  %5092 = vmatpush1.bf16.msra.mxu0 %v10685_v29  ;;  %5135 = vmatpush1.bf16.msra.mxu1 %v10686_v2  ;;  %v4894_v63 = vadd.f32 1.0, %v7402_v30  ;;  %v10705_v30 = vld [vmem:[#allocation50_spill] sm:$0xff]  ;;  %v10707_v29 = vld [vmem:[#allocation48_spill] sm:$0xff] }
 0x673   :  { %v7406_v36 = vpop.eup %7405  ;;  %v4900_v54 = vmul.f32 0.0, %v7404_v0  ;;  %5093 = vmatprep.subr.bf16.mxu0 %v10687_v35  ;;  %5136 = vmatprep.subr.bf16.mxu1 %v10688_v57  ;;  %v10708_v2 = vld [vmem:[#allocation52_spill] sm:$0xff]  ;;  %v10709_v35 = vld [vmem:[#allocation71_spill] sm:$0xff]  ;;  %v10710_v57 = vld [vmem:[#allocation73_spill] sm:$0xff] }
 0x674   :  { %v7408_v14 = vpop.eup %7407  ;;  %7413 = vrcp.f32 %v4894_v63  ;;  %v9959_v63 = vld [vmem:[#allocation14 + $0xe4] ss:$16 sps:$4 sm:$0xff]  }
 0x675   :  { %v7410_v3 = vpop.eup %7409  ;;  %v9931_v10 = vadd.f32 %v4902_v50, %v4900_v54  ;;  %v4895_v11 = vadd.f32 1.0, %v7408_v14  ;;  %v10706_v50 = vld [vmem:[#allocation54_spill] sm:$0xff] }
 0x676   :  { %v4903_v37 = vmul.f32 %v7410_v3, %v7406_v36  ;;  %5094 = vmatpush1.bf16.msra.mxu0 %v10689_v42  ;;  %5137 = vmatpush1.bf16.msra.mxu1 %v10690_v44  ;;  %v9965_v44 = vld [vmem:[#allocation14 + $0xe0] ss:$16 sps:$4 sm:$0xff]  }
 0x677   :  { %v7412_v55 = vpop.eup %7411  ;;  %5095 = vmatprep.subr.bf16.mxu0 %v10691_v21  ;;  %5138 = vmatprep.subr.bf16.mxu1 %v10692_v34  ;;  %7415 = vtanh.f32 %v9931_v10  ;;  %v9974_v21 = vld [vmem:[#allocation14 + $0xcc] ss:$16 sps:$4 sm:$0xff]   ;;  %v9979_v34 = vld [vmem:[#allocation14 + $0xc0] ss:$16 sps:$4 sm:$0xff]  }
 0x678   :  { %v4901_v56 = vmul.f32 0.0, %v7412_v55  ;;  %7417 = vrcp.f32 %v4895_v11  ;;  %v9968_v55 = vld [vmem:[#allocation14 + $0xe8] ss:$16 sps:$4 sm:$0xff]   ;;  %v9971_v11 = vld [vmem:[#allocation14 + $0xc4] ss:$16 sps:$4 sm:$0xff]  }
 0x67a   :  { %v9938_v25 = vadd.f32 %v4903_v37, %v4901_v56  ;;  %5096 = vmatpush1.bf16.msra.mxu0 %v10693_v47  ;;  %5139 = vmatpush1.bf16.msra.mxu1 %v10694_v5  ;;  %v9962_v37 = vld [vmem:[#allocation14 + $0xec] ss:$16 sps:$4 sm:$0xff]   ;;  %v9982_v56 = vld [vmem:[#allocation14 + $0xc8] ss:$16 sps:$4 sm:$0xff]   ;;  %v9985_v47 = vld [vmem:[#allocation14 + $0xa4] ss:$16 sps:$4 sm:$0xff]  }
 0x67b   :  { %5097 = vmatprep.subr.bf16.mxu0 %v10695_v45  ;;  %5140 = vmatprep.subr.bf16.mxu1 %v10696_v40  ;;  %v9988_v5 = vld [vmem:[#allocation14 + $0xac] ss:$16 sps:$4 sm:$0xff]   ;;  %v9991_v45 = vld [vmem:[#allocation14 + $0xa0] ss:$16 sps:$4 sm:$0xff]   ;;  %v9994_v40 = vld [vmem:[#allocation14 + $0xa8] ss:$16 sps:$4 sm:$0xff]  }
 0x67c   :  { %7419 = vtanh.f32 %v9938_v25 }
 0x67e   :  { %5098 = vmatpush1.bf16.msra.mxu0 %v10697_v60  ;;  %5141 = vmatpush1.bf16.msra.mxu1 %v10698_v17  ;;  %v9997_v60 = vld [vmem:[#allocation14 + $0x84] ss:$16 sps:$4 sm:$0xff]   ;;  %v10000_v17 = vld [vmem:[#allocation14 + $0x8c] ss:$16 sps:$4 sm:$0xff]  }
 0x67f   :  { %5099 = vmatprep.subr.bf16.mxu0 %v10699_v6  ;;  %5142 = vmatprep.subr.bf16.mxu1 %v10700_v18  ;;  %v10003_v6 = vld [vmem:[#allocation14 + $0x80] ss:$16 sps:$4 sm:$0xff]   ;;  %v10006_v18 = vld [vmem:[#allocation14 + $0x88] ss:$16 sps:$4 sm:$0xff]  }
 0x681   :  { %v7414_v43 = vpop.eup %7413 }
 0x682   :  { %5100 = vmatpush1.bf16.msra.mxu0 %v10701_v7  ;;  %5143 = vmatpush1.bf16.msra.mxu1 %v10702_v1  ;;  %v10009_v7 = vld [vmem:[#allocation14 + $0x64] ss:$16 sps:$4 sm:$0xff]   ;;  %v10012_v1 = vld [vmem:[#allocation14 + $0x6c] ss:$16 sps:$4 sm:$0xff]  }
 0x683   :  { %5101 = vmatprep.subr.bf16.mxu0 %v10703_v9  ;;  %5144 = vmatprep.subr.bf16.mxu1 %v10704_v22  ;;  %v10015_v9 = vld [vmem:[#allocation14 + $0x60] ss:$16 sps:$4 sm:$0xff]   ;;  %v10018_v22 = vld [vmem:[#allocation14 + $0x68] ss:$16 sps:$4 sm:$0xff]  }
 0x684   :  { %v7416_v0 = vpop.eup %7415 }
 0x685   :  { %v7418_v36 = vpop.eup %7417  ;;  %v4908_v14 = vmul.f32 %v7416_v0, %v7414_v43  ;;  %v10021_v43 = vld [vmem:[#allocation14 + $0x44] ss:$16 sps:$4 sm:$0xff]   ;;  %v10030_v0 = vld [vmem:[#allocation14 + $0x48] ss:$16 sps:$4 sm:$0xff]  }
 0x686   :  { %5102 = vmatpush1.bf16.msra.mxu0 %v10705_v30  ;;  %5145 = vmatpush1.bf16.msra.mxu1 %v10706_v50  ;;  %v10024_v30 = vld [vmem:[#allocation14 + $0x4c] ss:$16 sps:$4 sm:$0xff]   ;;  %v10027_v50 = vld [vmem:[#allocation14 + $0x40] ss:$16 sps:$4 sm:$0xff]  }
 0x687   :  { %5103 = vmatprep.subr.bf16.mxu0 %v10707_v29  ;;  %5146 = vmatprep.subr.bf16.mxu1 %v10708_v2  ;;  %v10033_v29 = vld [vmem:[#allocation14 + $0x24] ss:$16 sps:$4 sm:$0xff]   ;;  %v10036_v2 = vld [vmem:[#allocation14 + $0x2c] ss:$16 sps:$4 sm:$0xff]  }
 0x689   :  { %v7420_v54 = vpop.eup %7419 }
 0x68a   :  { %5104 = vmatpush1.bf16.msra.mxu0 %v10709_v35  ;;  %5147 = vmatpush1.bf16.msra.mxu1 %v10710_v57  ;;  %v4909_v3 = vmul.f32 %v7420_v54, %v7418_v36  ;;  %v10039_v36 = vld [vmem:[#allocation14 + $0x20] ss:$16 sps:$4 sm:$0xff]   ;;  %v10042_v54 = vld [vmem:[#allocation14 + $0x28] ss:$16 sps:$4 sm:$0xff]   ;;  %v10045_v35 = vld [vmem:[#allocation14 + $0x4] ss:$16 sps:$4 sm:$0xff]  }
 0x68b   :  { %5260 = vmatprep.subr.bf16.mxu0 %v9959_v63  ;;  %5303 = vmatprep.subr.bf16.mxu1 %v9962_v37  ;;  %10711 = vst [vmem:[#allocation72_spill] sm:$0xff] %v10045_v35  ;;  %v10048_v57 = vld [vmem:[#allocation14 + $0xc] ss:$16 sps:$4 sm:$0xff]  }
 0x68c   :  { %v4910_v42 = vpack.c.bf16 %v4909_v3, %v4908_v14  ;;  %10712 = vst [vmem:[#allocation76_spill] sm:$0xff] %v10048_v57  ;;  %v10051_v14 = vld [vmem:[#allocation14] ss:$16 sps:$4 sm:$0xff]   ;;  %v10054_v3 = vld [vmem:[#allocation14 + $0x8] ss:$16 sps:$4 sm:$0xff]  }
 0x68d   :  { %10713 = vst [vmem:[#allocation75_spill] sm:$0xff] %v10051_v14  ;;  %10714 = vst [vmem:[#allocation59_spill] sm:$0xff] %v10054_v3 }
 0x68e   :  { %6775 = vst [vmem:[#allocation6 + $0x18] sm:$0xff] %v4910_v42   ;;  %5122 = vmatmul.mubr.bf16.vlgmr.msra.gmra.mxu0 %v4910_v42  ;;  %5165 = vmatmul.mubr.bf16.vlgmr.msra.gmra.mxu1 %v4910_v42  ;;  %v10057_v42 = vld [vmem:[#allocation15 + $0xe4] ss:$16 sps:$4 sm:$0xff]  }
 0x68f   :  { %5261 = vmatpush1.bf16.msra.mxu0 %v9965_v44  ;;  %5304 = vmatpush1.bf16.msra.mxu1 %v9968_v55  ;;  %10715 = vst [vmem:[#allocation27_spill] sm:$0xff] %v10057_v42 }
 0x690   :  { %5262 = vmatprep.subr.bf16.mxu0 %v9971_v11  ;;  %5305 = vmatprep.subr.bf16.mxu1 %v9974_v21 }
 0x691   :  { %5292 = vmatprep.mubr.bf16.mxu0 %v10684_v19  ;;  %5335 = vmatprep.mubr.bf16.mxu1 %v10684_v19 }
 0x693   :  { %5263 = vmatpush1.bf16.msra.mxu0 %v9979_v34  ;;  %5306 = vmatpush1.bf16.msra.mxu1 %v9982_v56 }
 0x694   :  { %5264 = vmatprep.subr.bf16.mxu0 %v9985_v47  ;;  %5307 = vmatprep.subr.bf16.mxu1 %v9988_v5 }
 0x697   :  { %5265 = vmatpush1.bf16.msra.mxu0 %v9991_v45  ;;  %5308 = vmatpush1.bf16.msra.mxu1 %v9994_v40 }
 0x698   :  { %5266 = vmatprep.subr.bf16.mxu0 %v9997_v60  ;;  %5309 = vmatprep.subr.bf16.mxu1 %v10000_v17 }
 0x69b   :  { %5267 = vmatpush1.bf16.msra.mxu0 %v10003_v6  ;;  %5310 = vmatpush1.bf16.msra.mxu1 %v10006_v18 }
 0x69c   :  { %5268 = vmatprep.subr.bf16.mxu0 %v10009_v7  ;;  %5311 = vmatprep.subr.bf16.mxu1 %v10012_v1 }
 0x69f   :  { %5269 = vmatpush1.bf16.msra.mxu0 %v10015_v9  ;;  %5312 = vmatpush1.bf16.msra.mxu1 %v10018_v22 }
 0x6a0   :  { %5270 = vmatprep.subr.bf16.mxu0 %v10021_v43  ;;  %5313 = vmatprep.subr.bf16.mxu1 %v10024_v30 }
 0x6a3   :  { %5271 = vmatpush1.bf16.msra.mxu0 %v10027_v50  ;;  %5314 = vmatpush1.bf16.msra.mxu1 %v10030_v0 }
 0x6a4   :  { %5272 = vmatprep.subr.bf16.mxu0 %v10033_v29  ;;  %5315 = vmatprep.subr.bf16.mxu1 %v10036_v2 }
 0x6a7   :  { %5273 = vmatpush1.bf16.msra.mxu0 %v10039_v36  ;;  %5316 = vmatpush1.bf16.msra.mxu1 %v10042_v54 }
 0x6a8   :  { %5274 = vmatprep.subr.bf16.mxu0 %v10045_v35  ;;  %5317 = vmatprep.subr.bf16.mxu1 %v10048_v57 }
 0x6ab   :  { %5275 = vmatpush1.bf16.msra.mxu0 %v10051_v14  ;;  %5318 = vmatpush1.bf16.msra.mxu1 %v10054_v3 }
 0x6ac   :  { %5411 = vmatprep.subr.bf16.mxu0 %v10057_v42  ;;  %5454 = vmatprep.subr.bf16.mxu1 %v10060_v41 }
 0x72d   :  { %v4972_v28 = vpop.f32.mrf.mxu0  ;;  %v5015_v53 = vpop.f32.mrf.mxu1 }
 0x72e   :  { %v5024_v38 = vadd.f32 %v4972_v28, %v9654_v32 }
 0x72f   :  { %v4974_v31 = vpop.f32.mrf.mxu0  ;;  %v5017_v61 = vpop.f32.mrf.mxu1 }
 0x730   :  { %v6627_v23 = vmul.f32 -1.442695, %v5024_v38  ;;  %v5025_v59 = vadd.f32 %v4974_v31, %v9662_v62  ;;  %v5027_v32 = vadd.f32 %v5017_v61, %v9665_v39  ;;  %v5026_v62 = vadd.f32 %v5015_v53, %v9657_v46 }
 0x731   :  { %v4976_v13 = vpop.f32.mrf.mxu0  ;;  %v5019_v41 = vpop.f32.mrf.mxu1 }
 0x732   :  { %7421 = vpow2.f32 %v6627_v23  ;;  %v6629_v48 = vmul.f32 -1.442695, %v5025_v59  ;;  %v5028_v3 = vadd.f32 %v4976_v13, %v9670_v24  ;;  %v6631_v31 = vmul.f32 -1.442695, %v5027_v32 }
 0x733   :  { %v4978_v14 = vpop.f32.mrf.mxu0  ;;  %v5021_v38 = vpop.f32.mrf.mxu1  ;;  %v5030_v24 = vadd.f32 %v5019_v41, %v9673_v52 }
 0x734   :  { %7423 = vpow2.f32 %v6629_v48  ;;  %v6628_v42 = vmul.f32 -1.442695, %v5028_v3  ;;  %v5029_v57 = vadd.f32 %v4978_v14, %v9678_v49  ;;  %v5031_v23 = vadd.f32 %v5021_v38, %v9681_v26 }
 0x736   :  { %7425 = vpow2.f32 %v6628_v42  ;;  %v6630_v35 = vmul.f32 -1.442695, %v5029_v57  ;;  %v6632_v49 = vmul.f32 -1.442695, %v5031_v23 }
 0x738   :  { %7427 = vpow2.f32 %v6630_v35 }
 0x739   :  { %7429 = vtanh.f32 %v5026_v62 }
 0x73a   :  { %7431 = vpow2.f32 %v6631_v31 }
 0x73f   :  { %v7422_v59 = vpop.eup %7421 }
 0x740   :  { %v5038_v13 = vadd.f32 1.0, %v7422_v59 }
 0x741   :  { %v7424_v48 = vpop.eup %7423 }
 0x742   :  { %7433 = vrcp.f32 %v5038_v13  ;;  %v5050_v28 = vadd.f32 1.0, %v7424_v48 }
 0x743   :  { %v7426_v57 = vpop.eup %7425  ;;  %7435 = vtanh.f32 %v5030_v24 }
 0x744   :  { %7437 = vrcp.f32 %v5050_v28  ;;  %v5039_v39 = vadd.f32 1.0, %v7426_v57 }
 0x745   :  { %v7428_v61 = vpop.eup %7427  ;;  %7439 = vpow2.f32 %v6632_v49 }
 0x746   :  { %7441 = vrcp.f32 %v5039_v39  ;;  %v5051_v46 = vadd.f32 1.0, %v7428_v61  ;;  %v7430_v26 = vpop.eup %7429 }
 0x747   :  { %v7432_v53 = vpop.eup %7431 }
 0x748   :  { %7443 = vrcp.f32 %v5051_v46  ;;  %v5064_v24 = vadd.f32 1.0, %v7432_v53 }
 0x74e   :  { %v5123_v35 = vpop.f32.mrf.mxu0  ;;  %v5166_v42 = vpop.f32.mrf.mxu1 }
 0x74f   :  { %v7434_v52 = vpop.eup %7433  ;;  %v5175_v41 = vadd.f32 %v5123_v35, %v9834_v8 }
 0x750   :  { %v7436_v14 = vpop.eup %7435  ;;  %v5072_v3 = vmul.f32 %v7434_v52, %v7430_v26  ;;  %v5125_v32 = vpop.f32.mrf.mxu0 }
 0x751   :  { %v7438_v38 = vpop.eup %7437  ;;  %v6633_v62 = vmul.f32 -1.442695, %v5175_v41  ;;  %v5176_v31 = vadd.f32 %v5125_v32, %v9842_v15  ;;  %v5168_v39 = vpop.f32.mrf.mxu1 }
 0x752   :  { %v7440_v23 = vpop.eup %7439  ;;  %v5070_v59 = vmul.f32 %v7438_v38, %v9903_v58  ;;  %v5127_v13 = vpop.f32.mrf.mxu0  ;;  %v5178_v41 = vadd.f32 %v5168_v39, %v9845_v20 }
 0x753   :  { %v7442_v48 = vpop.eup %7441  ;;  %7445 = vpow2.f32 %v6633_v62  ;;  %v6635_v49 = vmul.f32 -1.442695, %v5176_v31  ;;  %v5179_v28 = vadd.f32 %v5127_v13, %v9850_v33  ;;  %v5065_v26 = vadd.f32 1.0, %v7440_v23  ;;  %v5170_v33 = vpop.f32.mrf.mxu1 }
 0x754   :  { %v10075_v57 = vadd.f32 %v5072_v3, %v5070_v59  ;;  %v5073_v8 = vmul.f32 %v7442_v48, %v7436_v14  ;;  %v5129_v61 = vpop.f32.mrf.mxu0  ;;  %v5177_v3 = vadd.f32 %v5166_v42, %v9837_v27  ;;  %v5181_v31 = vadd.f32 %v5170_v33, %v9853_v16  ;;  %v10087_v16 = vld [vmem:[#allocation15 + $0xe0] ss:$16 sps:$4 sm:$0xff]  }
 0x755   :  { %v7444_v46 = vpop.eup %7443  ;;  %7447 = vpow2.f32 %v6635_v49  ;;  %v6634_v35 = vmul.f32 -1.442695, %v5179_v28  ;;  %v5180_v15 = vadd.f32 %v5129_v61, %v9860_v12  ;;  %v5172_v14 = vpop.f32.mrf.mxu1  ;;  %v10090_v61 = vld [vmem:[#allocation15 + $0xe8] ss:$16 sps:$4 sm:$0xff]   ;;  %v10101_v33 = vld [vmem:[#allocation15 + $0xc0] ss:$16 sps:$4 sm:$0xff]  }
 0x756   :  { %7449 = vrcp.f32 %v5064_v24  ;;  %v5071_v58 = vmul.f32 %v7444_v46, %v9912_v4  ;;  %v5182_v12 = vadd.f32 %v5172_v14, %v9863_v51  ;;  %v6637_v4 = vmul.f32 -1.442695, %v5178_v41  ;;  %v10093_v46 = vld [vmem:[#allocation15 + $0xc4] ss:$16 sps:$4 sm:$0xff]   ;;  %v10104_v41 = vld [vmem:[#allocation15 + $0xc8] ss:$16 sps:$4 sm:$0xff]  }
 0x757   :  { %7451 = vtanh.f32 %v10075_v57  ;;  %v6636_v53 = vmul.f32 -1.442695, %v5180_v15 }
 0x758   :  { %v10080_v52 = vadd.f32 %v5073_v8, %v5071_v58  ;;  %7453 = vpow2.f32 %v6634_v35  ;;  %v6638_v24 = vmul.f32 -1.442695, %v5182_v12  ;;  %v10110_v12 = vld [vmem:[#allocation15 + $0xac] ss:$16 sps:$4 sm:$0xff]  }
 0x759   :  { %7455 = vrcp.f32 %v5065_v26  ;;  %v10096_v26 = vld [vmem:[#allocation15 + $0xcc] ss:$16 sps:$4 sm:$0xff]  }
 0x75a   :  { %7457 = vtanh.f32 %v10080_v52 }
 0x75b   :  { %7459 = vpow2.f32 %v6636_v53 }
 0x75c   :  { %7461 = vtanh.f32 %v5177_v3  ;;  %v10107_v3 = vld [vmem:[#allocation15 + $0xa4] ss:$16 sps:$4 sm:$0xff]  }
 0x760   :  { %v7446_v32 = vpop.eup %7445 }
 0x761   :  { %v5189_v38 = vadd.f32 1.0, %v7446_v32 }
 0x762   :  { %v7448_v62 = vpop.eup %7447 }
 0x763   :  { %v7450_v23 = vpop.eup %7449  ;;  %7463 = vrcp.f32 %v5189_v38  ;;  %v5201_v59 = vadd.f32 1.0, %v7448_v62 }
 0x764   :  { %v7452_v13 = vpop.eup %7451  ;;  %7465 = vpow2.f32 %v6637_v4 }
 0x765   :  { %v7454_v48 = vpop.eup %7453  ;;  %7467 = vrcp.f32 %v5201_v59  ;;  %v5078_v42 = vmul.f32 %v7452_v13, %v7450_v23  ;;  %v10116_v23 = vld [vmem:[#allocation15 + $0xa0] ss:$16 sps:$4 sm:$0xff]   ;;  %v10119_v59 = vld [vmem:[#allocation15 + $0xa8] ss:$16 sps:$4 sm:$0xff]  }
 0x766   :  { %v7456_v20 = vpop.eup %7455  ;;  %v5190_v49 = vadd.f32 1.0, %v7454_v48  ;;  %7469 = vtanh.f32 %v5181_v31  ;;  %v10122_v48 = vld [vmem:[#allocation15 + $0x84] ss:$16 sps:$4 sm:$0xff]  }
 0x767   :  { %v7458_v27 = vpop.eup %7457  ;;  %7471 = vpow2.f32 %v6638_v24 }
 0x768   :  { %v7460_v51 = vpop.eup %7459  ;;  %7473 = vrcp.f32 %v5190_v49  ;;  %v5079_v28 = vmul.f32 %v7458_v27, %v7456_v20  ;;  %v10125_v20 = vld [vmem:[#allocation15 + $0x8c] ss:$16 sps:$4 sm:$0xff]  }
 0x769   :  { %v5202_v8 = vadd.f32 1.0, %v7460_v51  ;;  %v7462_v35 = vpop.eup %7461  ;;  %v10129_v51 = vld [vmem:[#allocation15 + $0x80] ss:$16 sps:$4 sm:$0xff]  }
 0x76a   :  { %v5080_v39 = vpack.c.bf16 %v5079_v28, %v5078_v42  ;;  %v10132_v42 = vld [vmem:[#allocation15 + $0x88] ss:$16 sps:$4 sm:$0xff]   ;;  %v10135_v28 = vld [vmem:[#allocation15 + $0x64] ss:$16 sps:$4 sm:$0xff]  }
 0x76b   :  { %7475 = vrcp.f32 %v5202_v8  ;;  %v10138_v8 = vld [vmem:[#allocation15 + $0x6c] ss:$16 sps:$4 sm:$0xff]  }
 0x76c   :  { %6780 = vst [vmem:[#allocation5 + $0x8] sm:$0xff] %v5080_v39   ;;  %5293 = vmatmul.mubr.bf16.vlgmr.msra.gmra.mxu0 %v5080_v39  ;;  %5336 = vmatmul.mubr.bf16.vlgmr.msra.gmra.mxu1 %v5080_v39  ;;  %v10145_v39 = vld [vmem:[#allocation15 + $0x60] ss:$16 sps:$4 sm:$0xff]  }
 0x76d   :  { %5412 = vmatpush1.bf16.msra.mxu0 %v10087_v16  ;;  %5455 = vmatpush1.bf16.msra.mxu1 %v10090_v61 }
 0x76e   :  { %5413 = vmatprep.subr.bf16.mxu0 %v10093_v46  ;;  %5456 = vmatprep.subr.bf16.mxu1 %v10096_v26 }
 0x76f   :  { %5443 = vmatprep.mubr.bf16.mxu0 %v10684_v19  ;;  %5486 = vmatprep.mubr.bf16.mxu1 %v10684_v19 }
 0x770   :  { %v7464_v15 = vpop.eup %7463 }
 0x771   :  { %v7466_v58 = vpop.eup %7465  ;;  %v5223_v53 = vmul.f32 %v7464_v15, %v7462_v35  ;;  %5414 = vmatpush1.bf16.msra.mxu0 %v10101_v33  ;;  %5457 = vmatpush1.bf16.msra.mxu1 %v10104_v41  ;;  %v10148_v35 = vld [vmem:[#allocation15 + $0x68] ss:$16 sps:$4 sm:$0xff]   ;;  %v10151_v15 = vld [vmem:[#allocation15 + $0x44] ss:$16 sps:$4 sm:$0xff]  }
 0x772   :  { %v7468_v14 = vpop.eup %7467  ;;  %5415 = vmatprep.subr.bf16.mxu0 %v10107_v3  ;;  %5458 = vmatprep.subr.bf16.mxu1 %v10110_v12  ;;  %v5215_v24 = vadd.f32 1.0, %v7466_v58  ;;  %v10154_v58 = vld [vmem:[#allocation15 + $0x4c] ss:$16 sps:$4 sm:$0xff]  }
 0x773   :  { %v7470_v32 = vpop.eup %7469  ;;  %v5221_v4 = vmul.f32 %v7468_v14, %v9931_v10  ;;  %v10160_v14 = vld [vmem:[#allocation15 + $0x48] ss:$16 sps:$4 sm:$0xff]  }
 0x774   :  { %v7472_v38 = vpop.eup %7471  ;;  %7477 = vrcp.f32 %v5215_v24  ;;  %10717 = vst [vmem:[#allocation58_spill] sm:$0xff] %v10160_v14  ;;  %v10175_v24 = vld [vmem:[#allocation15 + $0x4] ss:$16 sps:$4 sm:$0xff]  }
 0x775   :  { %v7474_v62 = vpop.eup %7473  ;;  %v10114_v31 = vadd.f32 %v5223_v53, %v5221_v4  ;;  %5416 = vmatpush1.bf16.msra.mxu0 %v10116_v23  ;;  %5459 = vmatpush1.bf16.msra.mxu1 %v10119_v59  ;;  %v5216_v49 = vadd.f32 1.0, %v7472_v38  ;;  %v10157_v53 = vld [vmem:[#allocation15 + $0x40] ss:$16 sps:$4 sm:$0xff]   ;;  %v10166_v4 = vld [vmem:[#allocation15 + $0x2c] ss:$16 sps:$4 sm:$0xff]   ;;  %10722 = vst [vmem:[#allocation55_spill] sm:$0xff] %v10175_v24 }
 0x776   :  { %v5224_v13 = vmul.f32 %v7474_v62, %v7470_v32  ;;  %5417 = vmatprep.subr.bf16.mxu0 %v10122_v48  ;;  %5460 = vmatprep.subr.bf16.mxu1 %v10125_v20  ;;  %v10163_v32 = vld [vmem:[#allocation15 + $0x24] ss:$16 sps:$4 sm:$0xff]   ;;  %10719 = vst [vmem:[#allocation78_spill] sm:$0xff] %v10166_v4  ;;  %v10169_v38 = vld [vmem:[#allocation15 + $0x20] ss:$16 sps:$4 sm:$0xff]  }
 0x777   :  { %7479 = vtanh.f32 %v10114_v31  ;;  %10718 = vst [vmem:[#allocation57_spill] sm:$0xff] %v10163_v32  ;;  %10720 = vst [vmem:[#allocation56_spill] sm:$0xff] %v10169_v38  ;;  %v10172_v62 = vld [vmem:[#allocation15 + $0x28] ss:$16 sps:$4 sm:$0xff]  }
 0x778   :  { %v7476_v10 = vpop.eup %7475  ;;  %7481 = vrcp.f32 %v5216_v49  ;;  %10721 = vst [vmem:[#allocation61_spill] sm:$0xff] %v10172_v62 }
 0x779   :  { %v5222_v27 = vmul.f32 %v7476_v10, %v9938_v25  ;;  %5418 = vmatpush1.bf16.msra.mxu0 %v10129_v51  ;;  %5461 = vmatpush1.bf16.msra.mxu1 %v10132_v42 }
 0x77a   :  { %5419 = vmatprep.subr.bf16.mxu0 %v10135_v28  ;;  %5462 = vmatprep.subr.bf16.mxu1 %v10138_v8 }
 0x77b   :  { %v10142_v25 = vadd.f32 %v5224_v13, %v5222_v27  ;;  %v10178_v13 = vld [vmem:[#allocation15 + $0xc] ss:$16 sps:$4 sm:$0xff]  }
 0x77d   :  { %7483 = vtanh.f32 %v10142_v25  ;;  %5420 = vmatpush1.bf16.msra.mxu0 %v10145_v39  ;;  %5463 = vmatpush1.bf16.msra.mxu1 %v10148_v35 }
 0x77e   :  { %5421 = vmatprep.subr.bf16.mxu0 %v10151_v15  ;;  %5464 = vmatprep.subr.bf16.mxu1 %v10154_v58 }
 0x781   :  { %5422 = vmatpush1.bf16.msra.mxu0 %v10157_v53  ;;  %5465 = vmatpush1.bf16.msra.mxu1 %v10160_v14  ;;  %v7478_v10 = vpop.eup %7477 }
 0x782   :  { %5423 = vmatprep.subr.bf16.mxu0 %v10163_v32  ;;  %5466 = vmatprep.subr.bf16.mxu1 %v10166_v4  ;;  %v10181_v4 = vld [vmem:[#allocation15] ss:$16 sps:$4 sm:$0xff]  }
 0x784   :  { %v7480_v49 = vpop.eup %7479 }
 0x785   :  { %5424 = vmatpush1.bf16.msra.mxu0 %v10169_v38  ;;  %5467 = vmatpush1.bf16.msra.mxu1 %v10172_v62  ;;  %v7482_v27 = vpop.eup %7481  ;;  %v10184_v38 = vld [vmem:[#allocation15 + $0x8] ss:$16 sps:$4 sm:$0xff]  }
 0x786   :  { %5425 = vmatprep.subr.bf16.mxu0 %v10175_v24  ;;  %5468 = vmatprep.subr.bf16.mxu1 %v10178_v13  ;;  %v5229_v24 = vmul.f32 %v7480_v49, %v7478_v10 }
 0x789   :  { %5426 = vmatpush1.bf16.msra.mxu0 %v10181_v4  ;;  %5469 = vmatpush1.bf16.msra.mxu1 %v10184_v38 }
 0x78a   :  { %v7484_v62 = vpop.eup %7483  ;;  %5582 = vmatprep.subr.bf16.mxu0 %v9959_v63  ;;  %5625 = vmatprep.subr.bf16.mxu1 %v9962_v37  ;;  %v10723_v63 = vld [vmem:[#allocation72_spill] sm:$0xff] }
 0x78b   :  { %v5230_v32 = vmul.f32 %v7484_v62, %v7482_v27  ;;  %v10724_v37 = vld [vmem:[#allocation76_spill] sm:$0xff]  ;;  %v10735_v62 = vld [vmem:[#allocation63_spill] sm:$0xff] }
 0x78d   :  { %v5231_v14 = vpack.c.bf16 %v5230_v32, %v5229_v24 }
 0x78f   :  { %6785 = vst [vmem:[#allocation6 + $0x10] sm:$0xff] %v5231_v14   ;;  %5444 = vmatmul.mubr.bf16.vlgmr.msra.gmra.mxu0 %v5231_v14  ;;  %5487 = vmatmul.mubr.bf16.vlgmr.msra.gmra.mxu1 %v5231_v14  ;;  %v10734_v14 = vld [vmem:[#allocation64_spill] sm:$0xff] }
 0x790   :  { %5583 = vmatpush1.bf16.msra.mxu0 %v9965_v44  ;;  %5626 = vmatpush1.bf16.msra.mxu1 %v9968_v55  ;;  %v10725_v44 = vld [vmem:[#allocation75_spill] sm:$0xff] }
 0x791   :  { %5584 = vmatprep.subr.bf16.mxu0 %v9971_v11  ;;  %5627 = vmatprep.subr.bf16.mxu1 %v9974_v21  ;;  %v10726_v55 = vld [vmem:[#allocation59_spill] sm:$0xff]  ;;  %v10728_v21 = vld [vmem:[#allocation74_spill] sm:$0xff] }
 0x792   :  { %5614 = vmatprep.mubr.bf16.mxu0 %v10684_v19  ;;  %5657 = vmatprep.mubr.bf16.mxu1 %v10684_v19  ;;  %v10727_v11 = vld [vmem:[#allocation27_spill] sm:$0xff] }
 0x794   :  { %5585 = vmatpush1.bf16.msra.mxu0 %v9979_v34  ;;  %5628 = vmatpush1.bf16.msra.mxu1 %v9982_v56 }
 0x795   :  { %5586 = vmatprep.subr.bf16.mxu0 %v9985_v47  ;;  %5629 = vmatprep.subr.bf16.mxu1 %v9988_v5  ;;  %v10729_v47 = vld [vmem:[#allocation60_spill] sm:$0xff] }
 0x798   :  { %5587 = vmatpush1.bf16.msra.mxu0 %v9991_v45  ;;  %5630 = vmatpush1.bf16.msra.mxu1 %v9994_v40 }
 0x799   :  { %5588 = vmatprep.subr.bf16.mxu0 %v9997_v60  ;;  %5631 = vmatprep.subr.bf16.mxu1 %v10000_v17  ;;  %v10730_v17 = vld [vmem:[#allocation65_spill] sm:$0xff] }
 0x79c   :  { %5589 = vmatpush1.bf16.msra.mxu0 %v10003_v6  ;;  %5632 = vmatpush1.bf16.msra.mxu1 %v10006_v18 }
 0x79d   :  { %5590 = vmatprep.subr.bf16.mxu0 %v10009_v7  ;;  %5633 = vmatprep.subr.bf16.mxu1 %v10012_v1  ;;  %v10731_v1 = vld [vmem:[#allocation69_spill] sm:$0xff] }
 0x7a0   :  { %5591 = vmatpush1.bf16.msra.mxu0 %v10015_v9  ;;  %5634 = vmatpush1.bf16.msra.mxu1 %v10018_v22 }
 0x7a1   :  { %5592 = vmatprep.subr.bf16.mxu0 %v10021_v43  ;;  %5635 = vmatprep.subr.bf16.mxu1 %v10024_v30 }
 0x7a4   :  { %5593 = vmatpush1.bf16.msra.mxu0 %v10027_v50  ;;  %5636 = vmatpush1.bf16.msra.mxu1 %v10030_v0  ;;  %v10732_v50 = vld [vmem:[#allocation70_spill] sm:$0xff] }
 0x7a5   :  { %5594 = vmatprep.subr.bf16.mxu0 %v10033_v29  ;;  %5637 = vmatprep.subr.bf16.mxu1 %v10036_v2 }
 0x7a8   :  { %5595 = vmatpush1.bf16.msra.mxu0 %v10039_v36  ;;  %5638 = vmatpush1.bf16.msra.mxu1 %v10042_v54  ;;  %v10733_v36 = vld [vmem:[#allocation67_spill] sm:$0xff] }
 0x7a9   :  { %5596 = vmatprep.subr.bf16.mxu0 %v10723_v63  ;;  %5639 = vmatprep.subr.bf16.mxu1 %v10724_v37 }
 0x7ac   :  { %5597 = vmatpush1.bf16.msra.mxu0 %v10725_v44  ;;  %5640 = vmatpush1.bf16.msra.mxu1 %v10726_v55  ;;  %v10736_v44 = vld [vmem:[#allocation66_spill] sm:$0xff] }
 0x7ad   :  { %5733 = vmatprep.subr.bf16.mxu0 %v10727_v11  ;;  %5776 = vmatprep.subr.bf16.mxu1 %v10728_v21 }
 0x82c   :  { %v5294_v34 = vpop.f32.mrf.mxu0  ;;  %v5337_v56 = vpop.f32.mrf.mxu1 }
 0x82d   :  { %v5346_v5 = vadd.f32 %v5294_v34, %v10729_v47  ;;  %v5348_v24 = vadd.f32 %v5337_v56, %v10735_v62 }
 0x82e   :  { %v5296_v45 = vpop.f32.mrf.mxu0  ;;  %v5339_v40 = vpop.f32.mrf.mxu1 }
 0x82f   :  { %v6643_v60 = vmul.f32 -1.442695, %v5346_v5  ;;  %v5347_v6 = vadd.f32 %v5296_v45, %v10730_v17  ;;  %v5349_v54 = vadd.f32 %v5339_v40, %v10733_v36  ;;  %v10738_v36 = vld [vmem:[#allocation103_spill] sm:$0xff] }
 0x830   :  { %v5298_v18 = vpop.f32.mrf.mxu0  ;;  %v5341_v22 = vpop.f32.mrf.mxu1 }
 0x831   :  { %7485 = vpow2.f32 %v6643_v60  ;;  %v6645_v7 = vmul.f32 -1.442695, %v5347_v6  ;;  %v5350_v9 = vadd.f32 %v5298_v18, %v10731_v1  ;;  %v6647_v10 = vmul.f32 -1.442695, %v5349_v54  ;;  %v10737_v1 = vld [vmem:[#allocation101_spill] sm:$0xff] }
 0x832   :  { %v5300_v43 = vpop.f32.mrf.mxu0  ;;  %v5343_v2 = vpop.f32.mrf.mxu1  ;;  %v5352_v55 = vadd.f32 %v5341_v22, %v10736_v44 }
 0x833   :  { %7487 = vpow2.f32 %v6645_v7  ;;  %v6644_v30 = vmul.f32 -1.442695, %v5350_v9  ;;  %v5351_v0 = vadd.f32 %v5300_v43, %v10732_v50  ;;  %v5353_v32 = vadd.f32 %v5343_v2, %v10734_v14 }
 0x835   :  { %7489 = vpow2.f32 %v6644_v30  ;;  %v6646_v29 = vmul.f32 -1.442695, %v5351_v0  ;;  %v6648_v49 = vmul.f32 -1.442695, %v5353_v32 }
 0x837   :  { %7491 = vpow2.f32 %v6646_v29 }
 0x838   :  { %7493 = vtanh.f32 %v5348_v24 }
 0x839   :  { %7495 = vpow2.f32 %v6647_v10 }
 0x83a   :  { %7497 = vpow2.f32 %v6648_v49 }
 0x83e   :  { %v7486_v27 = vpop.eup %7485 }
 0x83f   :  { %v5360_v63 = vadd.f32 1.0, %v7486_v27  ;;  %v10739_v27 = vld [vmem:[#allocation105_spill] sm:$0xff] }
 0x840   :  { %v7488_v37 = vpop.eup %7487 }
 0x841   :  { %7499 = vrcp.f32 %v5360_v63  ;;  %v5372_v11 = vadd.f32 1.0, %v7488_v37 }
 0x842   :  { %v7490_v21 = vpop.eup %7489 }
 0x843   :  { %7501 = vrcp.f32 %v5372_v11  ;;  %v5361_v34 = vadd.f32 1.0, %v7490_v21 }
 0x844   :  { %v7492_v47 = vpop.eup %7491  ;;  %7503 = vtanh.f32 %v5352_v55  ;;  %v10740_v55 = vld [vmem:[#allocation107_spill] sm:$0xff] }
 0x845   :  { %7505 = vrcp.f32 %v5361_v34  ;;  %v5373_v5 = vadd.f32 1.0, %v7492_v47  ;;  %v7494_v56 = vpop.eup %7493 }
 0x846   :  { %v7496_v45 = vpop.eup %7495 }
 0x847   :  { %7507 = vrcp.f32 %v5373_v5  ;;  %v7498_v40 = vpop.eup %7497  ;;  %v5386_v6 = vadd.f32 1.0, %v7496_v45  ;;  %v10741_v5 = vld [vmem:[#allocation104_spill] sm:$0xff] }
 0x848   :  { %v5387_v50 = vadd.f32 1.0, %v7498_v40 }
 0x849   :  { %7509 = vrcp.f32 %v5386_v6 }
 0x84e   :  { %v7500_v60 = vpop.eup %7499 }
 0x84f   :  { %v5394_v17 = vmul.f32 %v7500_v60, %v7494_v56  ;;  %v5445_v18 = vpop.f32.mrf.mxu0  ;;  %v5488_v22 = vpop.f32.mrf.mxu1 }
 0x850   :  { %v7502_v7 = vpop.eup %7501  ;;  %v5497_v9 = vadd.f32 %v5445_v18, %v10737_v1  ;;  %v10744_v1 = vld [vmem:[#allocation106_spill] sm:$0xff] }
 0x851   :  { %v7504_v43 = vpop.eup %7503  ;;  %v5392_v30 = vmul.f32 %v7502_v7, %v10075_v57  ;;  %v5447_v0 = vpop.f32.mrf.mxu0 }
 0x852   :  { %v7506_v29 = vpop.eup %7505  ;;  %v6649_v2 = vmul.f32 -1.442695, %v5497_v9  ;;  %v5498_v54 = vadd.f32 %v5447_v0, %v10738_v36  ;;  %v5490_v49 = vpop.f32.mrf.mxu1 }
 0x853   :  { %v10234_v14 = vadd.f32 %v5394_v17, %v5392_v30  ;;  %v5395_v32 = vmul.f32 %v7506_v29, %v7504_v43  ;;  %v5449_v62 = vpop.f32.mrf.mxu0  ;;  %v5500_v56 = vadd.f32 %v5490_v49, %v10741_v5  ;;  %v10743_v17 = vld [vmem:[#allocation108_spill] sm:$0xff]  ;;  %v7091_v5 = vld [vmem:[#allocation17 + $0x8] sm:$0xff]  }
 0x854   :  { %v7508_v24 = vpop.eup %7507  ;;  %7511 = vpow2.f32 %v6649_v2  ;;  %v6651_v10 = vmul.f32 -1.442695, %v5498_v54  ;;  %v5501_v63 = vadd.f32 %v5449_v62, %v10739_v27  ;;  %v5492_v34 = vpop.f32.mrf.mxu1 }
 0x855   :  { %v5393_v37 = vmul.f32 %v7508_v24, %v10080_v52  ;;  %7513 = vrcp.f32 %v5387_v50  ;;  %v5451_v57 = vpop.f32.mrf.mxu0  ;;  %v10742_v52 = vld [vmem:[#allocation102_spill] sm:$0xff]  ;;  %v6653_v60 = vmul.f32 -1.442695, %v5500_v56  ;;  %v5503_v9 = vadd.f32 %v5492_v34, %v10744_v1  ;;  %v7089_v34 = vld [vmem:[#allocation17 + $0x18] sm:$0xff]   ;;  %v7092_v56 = vld [vmem:[#allocation17] sm:$0xff]  }
 0x856   :  { %7515 = vpow2.f32 %v6651_v10  ;;  %v6650_v44 = vmul.f32 -1.442695, %v5501_v63  ;;  %v5502_v11 = vadd.f32 %v5451_v57, %v10740_v55  ;;  %v5494_v45 = vpop.f32.mrf.mxu1  ;;  %v5499_v40 = vadd.f32 %v5488_v22, %v10742_v52  ;;  %v7510_v18 = vpop.eup %7509  ;;  %v7085_v55 = vld [vmem:[#allocation17 + $0x38] sm:$0xff]   ;;  %v7094_v52 = vld [vmem:[#allocation18 + $0x30] sm:$0xff]  }
 0x857   :  { %7517 = vtanh.f32 %v10234_v14  ;;  %v10240_v21 = vadd.f32 %v5395_v32, %v5393_v37  ;;  %v5504_v6 = vadd.f32 %v5494_v45, %v10743_v17  ;;  %v7093_v45 = vld [vmem:[#allocation18 + $0x38] sm:$0xff]  }
 0x858   :  { %7519 = vpow2.f32 %v6650_v44  ;;  %v6652_v47 = vmul.f32 -1.442695, %v5502_v11  ;;  %v7926_v11 = vmov 0.0   ;;  %v7097_v17 = vld [vmem:[#allocation18 + $0x18] sm:$0xff]  }
 0x859   :  { %7521 = vtanh.f32 %v10240_v21  ;;  %v6654_v0 = vmul.f32 -1.442695, %v5504_v6  ;;  %v7098_v6 = vld [vmem:[#allocation18 + $0x10] sm:$0xff]  }
 0x85a   :  { %7523 = vpow2.f32 %v6652_v47  ;;  %v7090_v47 = vld [vmem:[#allocation17 + $0x10] sm:$0xff]  }
 0x85b   :  { %7525 = vtanh.f32 %v5499_v40  ;;  %v7095_v40 = vld [vmem:[#allocation18 + $0x28] sm:$0xff]  }
 0x85c   :  { %7527 = vpow2.f32 %v6653_v60  ;;  %v7096_v60 = vld [vmem:[#allocation18 + $0x20] sm:$0xff]  }
 0x861   :  { %v7512_v7 = vpop.eup %7511 }
 0x862   :  { %v7514_v43 = vpop.eup %7513  ;;  %v5511_v30 = vadd.f32 1.0, %v7512_v7  ;;  %v7100_v7 = vld [vmem:[#allocation18] sm:$0xff]  }
 0x863   :  { %v7516_v50 = vpop.eup %7515 }
 0x864   :  { %v7518_v29 = vpop.eup %7517  ;;  %7529 = vrcp.f32 %v5511_v30  ;;  %v5523_v2 = vadd.f32 1.0, %v7516_v50 }
 0x865   :  { %v7520_v36 = vpop.eup %7519  ;;  %7531 = vtanh.f32 %v5503_v9  ;;  %v5400_v32 = vmul.f32 %v7518_v29, %v7510_v18  ;;  %v7099_v18 = vld [vmem:[#allocation18 + $0x8] sm:$0xff]   ;;  %v10752_v29 = vld [vmem:[#allocation87_spill] sm:$0xff] }
 0x866   :  { %v7522_v54 = vpop.eup %7521  ;;  %7533 = vrcp.f32 %v5523_v2  ;;  %v5512_v22 = vadd.f32 1.0, %v7520_v36 }
 0x867   :  { %7535 = vpow2.f32 %v6654_v0  ;;  %v5401_v62 = vmul.f32 %v7522_v54, %v7514_v43  ;;  %v7524_v24 = vpop.eup %7523  ;;  %v10751_v43 = vld [vmem:[#allocation68_spill] sm:$0xff] }
 0x868   :  { %7537 = vrcp.f32 %v5512_v22  ;;  %v5524_v10 = vadd.f32 1.0, %v7524_v24  ;;  %v7526_v27 = vpop.eup %7525 }
 0x869   :  { %v5402_v49 = vpack.c.bf16 %v5401_v62, %v5400_v32  ;;  %v7528_v63 = vpop.eup %7527  ;;  %v10753_v32 = vld [vmem:[#allocation89_spill] sm:$0xff] }
 0x86a   :  { %7539 = vrcp.f32 %v5524_v10 }
 0x86b   :  { %6790 = vst [vmem:[#allocation5 + $0x10] sm:$0xff] %v5402_v49   ;;  %5615 = vmatmul.mubr.bf16.vlgmr.msra.gmra.mxu0 %v5402_v49  ;;  %5658 = vmatmul.mubr.bf16.vlgmr.msra.gmra.mxu1 %v5402_v49 }
 0x86c   :  { %5734 = vmatpush1.bf16.msra.mxu0 %v10087_v16  ;;  %5777 = vmatpush1.bf16.msra.mxu1 %v10090_v61 }
 0x86d   :  { %5735 = vmatprep.subr.bf16.mxu0 %v10093_v46  ;;  %5778 = vmatprep.subr.bf16.mxu1 %v10096_v26 }
 0x86e   :  { %5765 = vmatprep.mubr.bf16.mxu0 %v10684_v19  ;;  %5808 = vmatprep.mubr.bf16.mxu1 %v10684_v19 }
 0x870   :  { %5736 = vmatpush1.bf16.msra.mxu0 %v10101_v33  ;;  %5779 = vmatpush1.bf16.msra.mxu1 %v10104_v41  ;;  %v5537_v41 = vadd.f32 1.0, %v7528_v63 }
 0x871   :  { %v7530_v37 = vpop.eup %7529  ;;  %5737 = vmatprep.subr.bf16.mxu0 %v10107_v3  ;;  %5780 = vmatprep.subr.bf16.mxu1 %v10110_v12 }
 0x872   :  { %v7532_v16 = vpop.eup %7531  ;;  %v5545_v61 = vmul.f32 %v7530_v37, %v7526_v27  ;;  %7541 = vrcp.f32 %v5537_v41  ;;  %v10754_v27 = vld [vmem:[#allocation91_spill] sm:$0xff] }
 0x873   :  { %v7534_v46 = vpop.eup %7533 }
 0x874   :  { %v7536_v57 = vpop.eup %7535  ;;  %v5543_v26 = vmul.f32 %v7534_v46, %v10114_v31  ;;  %5738 = vmatpush1.bf16.msra.mxu0 %v10116_v23  ;;  %5781 = vmatpush1.bf16.msra.mxu1 %v10119_v59  ;;  %v10745_v59 = vld [vmem:[#allocation58_spill] sm:$0xff] }
 0x875   :  { %v7538_v19 = vpop.eup %7537  ;;  %5739 = vmatprep.subr.bf16.mxu0 %v10122_v48  ;;  %5782 = vmatprep.subr.bf16.mxu1 %v10125_v20  ;;  %v5538_v44 = vadd.f32 1.0, %v7536_v57  ;;  %v10746_v48 = vld [vmem:[#allocation57_spill] sm:$0xff]  ;;  %v10747_v20 = vld [vmem:[#allocation78_spill] sm:$0xff]  ;;  %v10756_v57 = vld [vmem:[#allocation92_spill] sm:$0xff] }
 0x876   :  { %v10262_v33 = vadd.f32 %v5545_v61, %v5543_v26  ;;  %v5546_v3 = vmul.f32 %v7538_v19, %v7532_v16  ;;  %v10755_v61 = vld [vmem:[#allocation88_spill] sm:$0xff]  ;;  %v10757_v19 = vld [vmem:[#allocation38_spill] sm:$0xff] }
 0x877   :  { %v7540_v12 = vpop.eup %7539 }
 0x878   :  { %5740 = vmatpush1.bf16.msra.mxu0 %v10129_v51  ;;  %5783 = vmatpush1.bf16.msra.mxu1 %v10132_v42  ;;  %v5544_v31 = vmul.f32 %v7540_v12, %v10142_v25  ;;  %7543 = vtanh.f32 %v10262_v33  ;;  %v10748_v51 = vld [vmem:[#allocation56_spill] sm:$0xff]  ;;  %v10749_v42 = vld [vmem:[#allocation61_spill] sm:$0xff] }
 0x879   :  { %5741 = vmatprep.subr.bf16.mxu0 %v10135_v28  ;;  %5784 = vmatprep.subr.bf16.mxu1 %v10138_v8  ;;  %7545 = vrcp.f32 %v5538_v44  ;;  %v10750_v28 = vld [vmem:[#allocation55_spill] sm:$0xff] }
 0x87a   :  { %v10270_v23 = vadd.f32 %v5546_v3, %v5544_v31 }
 0x87c   :  { %5742 = vmatpush1.bf16.msra.mxu0 %v10145_v39  ;;  %5785 = vmatpush1.bf16.msra.mxu1 %v10148_v35  ;;  %7547 = vtanh.f32 %v10270_v23 }
 0x87d   :  { %5743 = vmatprep.subr.bf16.mxu0 %v10151_v15  ;;  %5786 = vmatprep.subr.bf16.mxu1 %v10154_v58 }
 0x87f   :  { %v7542_v8 = vpop.eup %7541 }
 0x880   :  { %5744 = vmatpush1.bf16.msra.mxu0 %v10157_v53  ;;  %5787 = vmatpush1.bf16.msra.mxu1 %v10745_v59 }
 0x881   :  { %5745 = vmatprep.subr.bf16.mxu0 %v10746_v48  ;;  %5788 = vmatprep.subr.bf16.mxu1 %v10747_v20  ;;  %v10758_v48 = vld [vmem:[#allocation90_spill] sm:$0xff] }
 0x884   :  { %5746 = vmatpush1.bf16.msra.mxu0 %v10748_v51  ;;  %5789 = vmatpush1.bf16.msra.mxu1 %v10749_v42 }
 0x885   :  { %5747 = vmatprep.subr.bf16.mxu0 %v10750_v28  ;;  %5790 = vmatprep.subr.bf16.mxu1 %v10178_v13  ;;  %v7544_v25 = vpop.eup %7543  ;;  %v7086_v13 = vld [vmem:[#allocation17 + $0x30] sm:$0xff]  }
 0x886   :  { %v7546_v39 = vpop.eup %7545  ;;  %v5551_v15 = vmul.f32 %v7544_v25, %v7542_v8 }
 0x888   :  { %5748 = vmatpush1.bf16.msra.mxu0 %v10181_v4  ;;  %5791 = vmatpush1.bf16.msra.mxu1 %v10184_v38  ;;  %v7087_v4 = vld [vmem:[#allocation17 + $0x28] sm:$0xff]   ;;  %v7088_v38 = vld [vmem:[#allocation17 + $0x20] sm:$0xff]  }
 0x889   :  { %v7548_v35 = vpop.eup %7547  ;;  %6844 = vmatprep.subr.bf16.mxu1 %v7926_v11  ;;  %6824 = vmatprep.subr.bf16.mxu0 %v7926_v11 }
 0x88a   :  { %v5552_v58 = vmul.f32 %v7548_v35, %v7546_v39 }
 0x88c   :  { %v5553_v53 = vpack.c.bf16 %v5552_v58, %v5551_v15 }
 0x88e   :  { %6795 = vst [vmem:[#allocation6 + $0x8] sm:$0xff] %v5553_v53   ;;  %5766 = vmatmul.mubr.bf16.vlgmr.msra.gmra.mxu0 %v5553_v53  ;;  %5809 = vmatmul.mubr.bf16.vlgmr.msra.gmra.mxu1 %v5553_v53 }
 0x88f   :  { %6845 = vmatpush3.bf16.msra.mxu1 %v7085_v55  ;;  %6860 = vmatprep.mubr.msk.bf16.mxu1 %vm7927_vm0, %v7926_v11 }
 0x890   :  { %6846 = vmatprep.subr.bf16.mxu1 %v7926_v11  ;;  %6840 = vmatprep.mubr.msk.bf16.mxu0 %vm7927_vm0, %v7926_v11 }
 0x891   :  { %6825 = vmatpush3.bf16.msra.mxu0 %v7093_v45 }
 0x892   :  { %6826 = vmatprep.subr.bf16.mxu0 %v7926_v11 }
 0x893   :  { %6847 = vmatpush3.bf16.msra.mxu1 %v7086_v13 }
 0x894   :  { %6848 = vmatprep.subr.bf16.mxu1 %v7926_v11 }
 0x895   :  { %6827 = vmatpush3.bf16.msra.mxu0 %v7094_v52 }
 0x896   :  { %6828 = vmatprep.subr.bf16.mxu0 %v7926_v11 }
 0x897   :  { %6849 = vmatpush3.bf16.msra.mxu1 %v7087_v4 }
 0x898   :  { %6850 = vmatprep.subr.bf16.mxu1 %v7926_v11 }
 0x899   :  { %6829 = vmatpush3.bf16.msra.mxu0 %v7095_v40 }
 0x89a   :  { %6830 = vmatprep.subr.bf16.mxu0 %v7926_v11 }
 0x89b   :  { %6851 = vmatpush3.bf16.msra.mxu1 %v7088_v38 }
 0x89c   :  { %6852 = vmatprep.subr.bf16.mxu1 %v7926_v11 }
 0x89d   :  { %6831 = vmatpush3.bf16.msra.mxu0 %v7096_v60 }
 0x89e   :  { %6832 = vmatprep.subr.bf16.mxu0 %v7926_v11 }
 0x89f   :  { %6853 = vmatpush3.bf16.msra.mxu1 %v7089_v34  ;;  %v10759_v34 = vld [vmem:[#allocation93_spill] sm:$0xff] }
 0x8a0   :  { %6854 = vmatprep.subr.bf16.mxu1 %v7926_v11 }
 0x8a1   :  { %6833 = vmatpush3.bf16.msra.mxu0 %v7097_v17 }
 0x8a2   :  { %6834 = vmatprep.subr.bf16.mxu0 %v7926_v11 }
 0x8a3   :  { %6855 = vmatpush3.bf16.msra.mxu1 %v7090_v47 }
 0x8a4   :  { %6856 = vmatprep.subr.bf16.mxu1 %v7926_v11 }
 0x8a5   :  { %6835 = vmatpush3.bf16.msra.mxu0 %v7098_v6 }
 0x8a6   :  { %6836 = vmatprep.subr.bf16.mxu0 %v7926_v11 }
 0x8a7   :  { %6857 = vmatpush3.bf16.msra.mxu1 %v7091_v5 }
 0x8a8   :  { %6858 = vmatprep.subr.bf16.mxu1 %v7926_v11 }
 0x8a9   :  { %6837 = vmatpush3.bf16.msra.mxu0 %v7099_v18  ;;  %v10760_v18 = vld [vmem:[#allocation95_spill] sm:$0xff] }
 0x8aa   :  { %6838 = vmatprep.subr.bf16.mxu0 %v7926_v11 }
 0x8ab   :  { %6859 = vmatpush3.bf16.msra.mxu1 %v7092_v56 }
 0x8ad   :  { %6839 = vmatpush3.bf16.msra.mxu0 %v7100_v7 }
 0x92b   :  { %v5616_v1 = vpop.f32.mrf.mxu0  ;;  %v5659_v9 = vpop.f32.mrf.mxu1 }
 0x92c   :  { %v5668_v30 = vadd.f32 %v5616_v1, %v10751_v43  ;;  %v5670_v41 = vadd.f32 %v5659_v9, %v10757_v19  ;;  %v10761_v43 = vld [vmem:[#allocation97_spill] sm:$0xff] }
 0x92d   :  { %v5618_v50 = vpop.f32.mrf.mxu0  ;;  %v5661_v36 = vpop.f32.mrf.mxu1 }
 0x92e   :  { %v6659_v0 = vmul.f32 -1.442695, %v5668_v30  ;;  %v5669_v2 = vadd.f32 %v5618_v50, %v10752_v29  ;;  %v5671_v46 = vadd.f32 %v5661_v36, %v10755_v61  ;;  %v10762_v36 = vld [vmem:[#allocation99_spill] sm:$0xff] }
 0x92f   :  { %v5620_v54 = vpop.f32.mrf.mxu0  ;;  %v5663_v49 = vpop.f32.mrf.mxu1 }
 0x930   :  { %7549 = vpow2.f32 %v6659_v0  ;;  %v6661_v22 = vmul.f32 -1.442695, %v5669_v2  ;;  %v5672_v62 = vadd.f32 %v5620_v54, %v10753_v32  ;;  %v6663_v3 = vmul.f32 -1.442695, %v5671_v46 }
 0x931   :  { %v5622_v24 = vpop.f32.mrf.mxu0  ;;  %v5665_v16 = vpop.f32.mrf.mxu1  ;;  %v5674_v20 = vadd.f32 %v5663_v49, %v10758_v48 }
 0x932   :  { %7551 = vpow2.f32 %v6661_v22  ;;  %v6660_v10 = vmul.f32 -1.442695, %v5672_v62  ;;  %v5673_v63 = vadd.f32 %v5622_v24, %v10754_v27  ;;  %v5675_v26 = vadd.f32 %v5665_v16, %v10756_v57  ;;  %v10763_v62 = vld [vmem:[#allocation96_spill] sm:$0xff] }
 0x934   :  { %7553 = vpow2.f32 %v6660_v10  ;;  %v6662_v37 = vmul.f32 -1.442695, %v5673_v63  ;;  %v6664_v44 = vmul.f32 -1.442695, %v5675_v26  ;;  %v10764_v10 = vld [vmem:[#allocation94_spill] sm:$0xff] }
 0x936   :  { %7555 = vpow2.f32 %v6662_v37  ;;  %v10765_v37 = vld [vmem:[#allocation100_spill] sm:$0xff] }
 0x937   :  { %7557 = vtanh.f32 %v5670_v41 }
 0x938   :  { %7559 = vpow2.f32 %v6663_v3 }
 0x93d   :  { %v7550_v12 = vpop.eup %7549 }
 0x93e   :  { %v5682_v31 = vadd.f32 1.0, %v7550_v12 }
 0x93f   :  { %v7552_v59 = vpop.eup %7551 }
 0x940   :  { %7561 = vrcp.f32 %v5682_v31  ;;  %v5694_v51 = vadd.f32 1.0, %v7552_v59  ;;  %v10766_v31 = vld [vmem:[#allocation98_spill] sm:$0xff] }
 0x941   :  { %v7554_v42 = vpop.eup %7553  ;;  %7563 = vpow2.f32 %v6664_v44 }
 0x942   :  { %7565 = vrcp.f32 %v5694_v51  ;;  %v5683_v28 = vadd.f32 1.0, %v7554_v42 }
 0x943   :  { %v7556_v8 = vpop.eup %7555  ;;  %7567 = vtanh.f32 %v5674_v20 }
 0x944   :  { %7569 = vrcp.f32 %v5683_v28  ;;  %v5695_v25 = vadd.f32 1.0, %v7556_v8  ;;  %v7558_v39 = vpop.eup %7557 }
 0x945   :  { %v7560_v35 = vpop.eup %7559 }
 0x946   :  { %7571 = vrcp.f32 %v5695_v25  ;;  %v5708_v11 = vadd.f32 1.0, %v7560_v35  ;;  %v5899_v25 = vld [vmem:[#allocation5 + $0x10] sm:$0xf]  ;;  %v5896_v35 = vld [vmem:[#allocation5 + $0x4] sm:$0xf] }
 0x948   :  { %7573 = vrcp.f32 %v5708_v11 }
 0x94d   :  { %v7562_v15 = vpop.eup %7561 }
 0x94e   :  { %v7564_v58 = vpop.eup %7563  ;;  %v5716_v53 = vmul.f32 %v7562_v15, %v7558_v39  ;;  %v5767_v13 = vpop.f32.mrf.mxu0  ;;  %v5895_v39 = vld [vmem:[#allocation5] sm:$0xf]  ;;  %v5900_v15 = vld [vmem:[#allocation5 + $0x14] sm:$0xf] }
 0x94f   :  { %v7566_v55 = vpop.eup %7565  ;;  %v5819_v47 = vadd.f32 %v5767_v13, %v10759_v34  ;;  %v5810_v56 = vpop.f32.mrf.mxu1  ;;  %v5709_v60 = vadd.f32 1.0, %v7564_v58  ;;  %v5897_v58 = vld [vmem:[#allocation5 + $0x8] sm:$0xf]  ;;  %v5906_v13 = vsel %vm5903_vm1, %v5895_v39, 4286644096 }
 0x950   :  { %v7568_v4 = vpop.eup %7567  ;;  %v5714_v38 = vmul.f32 %v7566_v55, %v10234_v14  ;;  %v5769_v45 = vpop.f32.mrf.mxu0  ;;  %v5821_v49 = vadd.f32 %v5810_v56, %v10764_v10  ;;  %v5912_v55 = vsel %vm5903_vm1, %v5899_v25, 4286644096  ;;  %v5909_v56 = vsel %vm5903_vm1, %v5897_v58, 4286644096 }
 0x951   :  { %v7570_v5 = vpop.eup %7569  ;;  %v6665_v17 = vmul.f32 -1.442695, %v5819_v47  ;;  %v5820_v7 = vadd.f32 %v5769_v45, %v10760_v18  ;;  %v5812_v50 = vpop.f32.mrf.mxu1 }
 0x952   :  { %v5718_v52 = vadd.f32 %v5716_v53, %v5714_v38  ;;  %v5717_v40 = vmul.f32 %v7570_v5, %v7568_v4  ;;  %v5771_v1 = vpop.f32.mrf.mxu0  ;;  %v5822_v24 = vadd.f32 %v5812_v50, %v10763_v62  ;;  %v5898_v53 = vld [vmem:[#allocation5 + $0xc] sm:$0xf]  ;;  %v5921_v4 = vsel %vm5903_vm1, %v5896_v35, 4286644096 }
 0x953   :  { %v7572_v6 = vpop.eup %7571  ;;  %v5823_v30 = vadd.f32 %v5771_v1, %v10761_v43  ;;  %v6667_v14 = vmul.f32 -1.442695, %v5820_v7  ;;  %v5814_v32 = vpop.f32.mrf.mxu1  ;;  %v5927_v38 = vsel %vm5903_vm1, %v5900_v15, 4286644096 }
 0x954   :  { %7575 = vtanh.f32 %v5718_v52  ;;  %v5715_v9 = vmul.f32 %v7572_v6, %v10240_v21  ;;  %v5773_v0 = vpop.f32.mrf.mxu0  ;;  %v6669_v63 = vmul.f32 -1.442695, %v5822_v24  ;;  %v5825_v59 = vadd.f32 %v5814_v32, %v10766_v31 }
 0x955   :  { %7577 = vpow2.f32 %v6665_v17  ;;  %v6666_v2 = vmul.f32 -1.442695, %v5823_v30  ;;  %v5824_v54 = vadd.f32 %v5773_v0, %v10762_v36  ;;  %v5816_v21 = vpop.f32.mrf.mxu1  ;;  %v7574_v27 = vpop.eup %7573  ;;  %v5914_v52 = vmax.bf16 %v5912_v55, %v5906_v13 }
 0x956   :  { %v5719_v29 = vadd.f32 %v5717_v40, %v5715_v9  ;;  %7579 = vrcp.f32 %v5709_v60  ;;  %v5826_v16 = vadd.f32 %v5816_v21, %v10765_v37  ;;  %v5924_v60 = vsel %vm5903_vm1, %v5898_v53, 4286644096 }
 0x957   :  { %7581 = vpow2.f32 %v6667_v14  ;;  %v6668_v22 = vmul.f32 -1.442695, %v5824_v54  ;;  %v5929_v7 = vmax.bf16 %v5927_v38, %v5921_v4  ;;  %v6693_v38 = vld [vmem:[%s10344_s12] ss:$0 sm:$0xff] }
 0x958   :  { %7583 = vtanh.f32 %v5719_v29  ;;  %v6670_v3 = vmul.f32 -1.442695, %v5826_v16 }
 0x959   :  { %7585 = vpow2.f32 %v6666_v2 }
 0x95a   :  { %7587 = vpow2.f32 %v6668_v22 }
 0x95b   :  { %7589 = vtanh.f32 %v5821_v49 }
 0x95c   :  { %7591 = vpow2.f32 %v6669_v63 }
 0x961   :  { %v7576_v61 = vpop.eup %7575 }
 0x962   :  { %v7578_v46 = vpop.eup %7577  ;;  %v5722_v57 = vmul.f32 %v7576_v61, %v7574_v27  ;;  %v5941_v61 = vld [vmem:[#allocation6 + $0x18] sm:$0xf] }
 0x963   :  { %v7580_v26 = vpop.eup %7579  ;;  %v5833_v19 = vadd.f32 1.0, %v7578_v46  ;;  %v5937_v46 = vld [vmem:[#allocation6 + $0x8] sm:$0xf] }
 0x964   :  { %v7582_v41 = vpop.eup %7581 }
 0x965   :  { %v7584_v12 = vpop.eup %7583  ;;  %7593 = vrcp.f32 %v5833_v19  ;;  %v5845_v44 = vadd.f32 1.0, %v7582_v41  ;;  %v5939_v19 = vld [vmem:[#allocation6 + $0x10] sm:$0xf]  ;;  %v5940_v41 = vld [vmem:[#allocation6 + $0x14] sm:$0xf] }
 0x966   :  { %v5723_v48 = vmul.f32 %v7584_v12, %v7580_v26  ;;  %v7586_v20 = vpop.eup %7585  ;;  %v5942_v26 = vld [vmem:[#allocation6 + $0x1c] sm:$0xf] }
 0x967   :  { %7595 = vrcp.f32 %v5845_v44  ;;  %v7588_v51 = vpop.eup %7587  ;;  %v5834_v28 = vadd.f32 1.0, %v7586_v20  ;;  %v5969_v44 = vsel %vm5903_vm1, %v5942_v26, 4286644096 }
 0x968   :  { %v6799_v42 = vpack.c.bf16 %v5723_v48, %v5722_v57  ;;  %7597 = vpow2.f32 %v6670_v3  ;;  %v5846_v8 = vadd.f32 1.0, %v7588_v51  ;;  %v7590_v11 = vpop.eup %7589  ;;  %v5938_v57 = vld [vmem:[#allocation6 + $0xc] sm:$0xf]  ;;  %v5947_v3 = vsel %vm5903_vm1, %v5937_v46, 4286644096 }
 0x969   :  { %7599 = vtanh.f32 %v5825_v59  ;;  %v7592_v34 = vpop.eup %7591  ;;  %v5962_v12 = vsel %vm5903_vm1, %v5938_v57, 4286644096  ;;  %v5950_v48 = vsel %vm5903_vm1, %v5939_v19, 4286644096 }
 0x96a   :  { %6800 = vst [vmem:[#allocation5 + $0x18] sm:$0xff] %v6799_v42   ;;  %7601 = vrcp.f32 %v5834_v28  ;;  %v5859_v43 = vadd.f32 1.0, %v7592_v34  ;;  %v5965_v42 = vsel %vm5903_vm1, %v5940_v41, 4286644096  ;;  %v5971_v39 = vmax.bf16 %v5969_v44, %v5962_v12 }
 0x96b   :  { %7603 = vrcp.f32 %v5846_v8 }
 0x96c   :  { %7605 = vrcp.f32 %v5859_v43 }
 0x971   :  { %v5901_v47 = vld [vmem:[#allocation5 + $0x18] sm:$0xf]  ;;  %v5902_v5 = vld [vmem:[#allocation5 + $0x1c] sm:$0xf] }
 0x972   :  { %v7594_v45 = vpop.eup %7593  ;;  %v5916_v40 = vsel %vm5903_vm1, %v5901_v47, 4286644096  ;;  %v5931_v17 = vsel %vm5903_vm1, %v5902_v5, 4286644096 }
 0x973   :  { %v5867_v6 = vmul.f32 %v7594_v45, %v7590_v11  ;;  %v5918_v18 = vmax.bf16 %v5916_v40, %v5909_v56  ;;  %v5933_v1 = vmax.bf16 %v5931_v17, %v5924_v60 }
 0x974   :  { %v7596_v9 = vpop.eup %7595 }
 0x975   :  { %v7598_v30 = vpop.eup %7597  ;;  %v5865_v14 = vmul.f32 %v7596_v9, %v10262_v33  ;;  %v5919_v50 = vmax.bf16 %v5918_v18, %v5914_v52  ;;  %v5934_v0 = vmax.bf16 %v5933_v1, %v5929_v7 }
 0x976   :  { %v7600_v29 = vpop.eup %7599  ;;  %v5860_v62 = vadd.f32 1.0, %v7598_v30 }
 0x977   :  { %v7602_v2 = vpop.eup %7601  ;;  %v5869_v36 = vadd.f32 %v5867_v6, %v5865_v14  ;;  %v6684_v54 = vcombine.low %v5919_v50, %v5934_v0 }
 0x978   :  { %v7604_v22 = vpop.eup %7603  ;;  %v5868_v32 = vmul.f32 %v7602_v2, %v7600_v29 }
 0x979   :  { %7607 = vtanh.f32 %v5869_v36  ;;  %v5866_v24 = vmul.f32 %v7604_v22, %v10270_v23  ;;  %6861 = vmatmul.mubr.bf16.vlgmr.msra.gmra.mxu1 %v6684_v54  ;;  %v7606_v10 = vpop.eup %7605  ;;  %v5954_v23 = vsel %vm5903_vm1, %v5941_v61, 4286644096 }
 0x97a   :  { %7609 = vrcp.f32 %v5860_v62  ;;  %v5956_v8 = vmax.bf16 %v5954_v23, %v5947_v3 }
 0x97b   :  { %v5870_v21 = vadd.f32 %v5868_v32, %v5866_v24 }
 0x97d   :  { %7611 = vtanh.f32 %v5870_v21 }
 0x986   :  { %v7608_v49 = vpop.eup %7607 }
 0x987   :  { %v5873_v33 = vmul.f32 %v7608_v49, %v7606_v10  ;;  %v7610_v27 = vpop.eup %7609 }
 0x98a   :  { %v7612_v63 = vpop.eup %7611 }
 0x98b   :  { %v5874_v37 = vmul.f32 %v7612_v63, %v7610_v27 }
 0x98d   :  { %v6804_v16 = vpack.c.bf16 %v5874_v37, %v5873_v33 }
 0x98f   :  { %6805 = vst [vmem:[#allocation6] sm:$0xff] %v6804_v16  }
 0x996   :  { %v5935_v31 = vld [vmem:[#allocation6] sm:$0xf]  ;;  %v5936_v59 = vld [vmem:[#allocation6 + $0x4] sm:$0xf] }
 0x997   :  { %v5944_v20 = vsel %vm5903_vm1, %v5935_v31, 4286644096  ;;  %v5959_v51 = vsel %vm5903_vm1, %v5936_v59, 4286644096 }
 0x998   :  { %v5952_v28 = vmax.bf16 %v5950_v48, %v5944_v20  ;;  %v5967_v25 = vmax.bf16 %v5965_v42, %v5959_v51 }
 0x99a   :  { %v5957_v35 = vmax.bf16 %v5956_v8, %v5952_v28  ;;  %v5972_v15 = vmax.bf16 %v5971_v39, %v5967_v25 }
 0x99c   :  { %v6675_v58 = vcombine.low %v5957_v35, %v5972_v15 }
 0x99e   :  { %6841 = vmatmul.mubr.bf16.vlgmr.msra.gmra.mxu0 %v6675_v58 }
 0xa39   :  { %v6188_v53 = vpop.f32.mrf.mxu1 }
 0xa3b   :  { %v6862_v55 = vpop.f32.mrf.mxu1 }
 0xa3d   :  { %v6191_v11 = vpop.f32.mrf.mxu1 }
 0xa3f   :  { %v6863_v13 = vpop.f32.mrf.mxu1 }
 0xa5e   :  { %v6093_v4 = vpop.f32.mrf.mxu0 }
 0xa5f   :  { %v6189_v34 = vadd.f32 %v6188_v53, %v6093_v4 }
 0xa60   :  { %v6842_v47 = vpop.f32.mrf.mxu0 }
 0xa61   :  { %v6202_v5 = vadd.f32 %v6693_v38, %v6189_v34 }
 0xa62   :  { %v6096_v56 = vpop.f32.mrf.mxu0 }
 0xa63   :  { %6204 = vst [vmem:[%s10345_s13] sm:$0xff] %v6202_v5  ;;  %v6192_v45 = vadd.f32 %v6191_v11, %v6096_v56 }
 0xa64   :  { %v6843_v52 = vpop.f32.mrf.mxu0 }
 0xa65   :  { %v6203_v40 = vadd.f32 %v6693_v38, %v6192_v45 }
 0xa67   :  { %6205 = vst [vmem:[%s10345_s13 + $0x8] sm:$0xff] %v6203_v40 }
 0xa68   :  { %6210 = vsyncpa [#allocation8], 1 }
 0xa69   :  { %6211 = vsyncpa [#allocation10], 1 }
 0xa6a   :  { %6212 = vsyncpa [#allocation13], 1 }
 0xa6b   :  { %6213 = vsyncpa [#allocation16], 1 }
 0xa6c   :  { %6214 = vsyncpa [#allocation19], 1 }

</bundles_post_ra>
